<compile_context>
chip_gen: v7x
topology: tpu7x:2x2x1
jax: 0.10.0
libtpu: 0.0.40
codegen_flags: <defaults>
</compile_context>

<pallas_src>
import functools

import numpy as np

import jax
import jax.numpy as jnp
from jax.experimental import pallas as pl
from jax.experimental.pallas import tpu as pltpu


# Geometry of the reference PyTorch module (28x28, single-channel input).
_IN_HW = 28        # input spatial size
_K = 5             # conv kernel size
_C1_HW = 24        # conv1 output spatial (28 - 5 + 1)
_P1_HW = 12        # pool1 output spatial
_C2_HW = 8         # conv2 output spatial (12 - 5 + 1)
_P2_HW = 4         # pool2 output spatial
_TAPS = _K * _K    # 25 conv taps
_LANE = 128        # padded channel / feature width (TPU lane count)
_KPAD = 32         # conv1 contraction dim, padded 25 -> 32 (sublane multiple)
_NROW = 8          # padded batch rows for the FC stage (sublane tile)
_NUM_CLASSES = 10


# ------------------------------ Pallas kernel ------------------------------ #

def _lenet5_fused_kernel(patches1_ref, w1_ref, b1_ref,
                         w2_hbm_ref, b2_ref, p2m_ref,
                         wfc1_hbm_ref, bfc1_ref,
                         wfc2_ref, bfc2_ref,
                         wfc3_ref, bfc3_ref,
                         out_ref,
                         p1_scratch, w2_vmem, wfc1_vmem, dma_sems,
                         *, n_batch):
    f32 = jnp.float32
    n = n_batch
    rb1 = _P1_HW * _P1_HW * n     # pooled1 rows, ordered (h1, w1, n)
    wrow = _P1_HW * n             # rows per h1 line of pooled1
    orow = _C2_HW * n             # rows per h2 line of conv2 output
    rb2 = _C2_HW * _C2_HW * n     # conv2 output rows, ordered (h2, w2, n)

    # Prefetch the late-used weights (conv2, fc1) so their HBM->VMEM DMAs
    # overlap with the conv1 + pool1 compute below.
    w2_cp = pltpu.make_async_copy(w2_hbm_ref, w2_vmem, dma_sems.at[0])
    wfc1_cp = pltpu.make_async_copy(wfc1_hbm_ref, wfc1_vmem, dma_sems.at[1])
    w2_cp.start()
    wfc1_cp.start()

    # conv1 (im2col matmul) + bias + ReLU; pool1 is the sum of the 4 (dy, dx)
    # row blocks (the 1/4 avg-pool scale is folded into the conv2 weights).
    w1 = w1_ref[...]
    b1 = b1_ref[...]
    psum = jnp.zeros((rb1, _LANE), f32)
    for blk in range(4):
        h = jnp.dot(patches1_ref[pl.ds(blk * rb1, rb1), :], w1,
                    preferred_element_type=f32)
        psum = psum + jnp.maximum(h + b1, 0.0)
    p1_scratch[...] = psum                     # rows (h1, w1, n), lanes = c1

    # conv2: 25-tap accumulation.  Each tap's input window is 8 static row
    # slices of the pooled1 scratch (rows (h2+ki, w2+kj, n)), so the "gather"
    # is plain vld work instead of a 3200x288x128 one-hot matmul.
    w2_cp.wait()
    acc = jnp.zeros((rb2, _LANE), f32)
    for ki in range(_K):
        for kj in range(_K):
            win = jnp.concatenate(
                [p1_scratch[pl.ds((h2 + ki) * wrow + kj * n, orow), :]
                 for h2 in range(_C2_HW)], axis=0)            # (rb2, 128)
            w_tap = w2_vmem[ki * _K + kj].astype(f32)         # (128, 128)
            acc = acc + jnp.dot(win, w_tap, preferred_element_type=f32)
    h2a = jnp.maximum(acc + b2_ref[...], 0.0)                 # (rb2, 128)

    # pool2 + expansion to rows (s, n_pad8): one small constant 0/1 matmul
    # (the 1/4 avg-pool scale is folded into the fc1 weights).
    p2e = jnp.dot(p2m_ref[...], h2a, preferred_element_type=f32)  # (128, 128)

    # fc1 as a 16-chunk accumulation over the spatial positions s.
    wfc1_cp.wait()
    acc1 = jnp.zeros((_NROW, _LANE), f32)
    for s in range(_P2_HW * _P2_HW):
        acc1 = acc1 + jnp.dot(p2e[_NROW * s:_NROW * (s + 1)],
                              wfc1_vmem[s].astype(f32),
                              preferred_element_type=f32)
    x1 = jnp.maximum(acc1 + bfc1_ref[...], 0.0)               # (8, 128)

    x2 = jnp.maximum(
        jnp.dot(x1, wfc2_ref[...], preferred_element_type=f32) + bfc2_ref[...],
        0.0)                                                  # (8, 128)
    out = jnp.dot(x2, wfc3_ref[...], preferred_element_type=f32) + bfc3_ref[...]
    out_ref[...] = out.astype(out_ref.dtype)                  # (8, 128) dense


# --------------------- constant (geometry-only) matrix ---------------------- #

def _pool2_expand_matrix(n_batch):
    """(16*8, 64*N) 0/1 matrix: row (s*8 + n) sums the 4 conv2-output rows
    ((2ph+dy), (2pw+dx), n) of pooling window s = ph*4 + pw (scale folded
    into wfc1).  Also expands the batch rows to the 8-aligned FC layout."""
    orow = _C2_HW * n_batch
    rb2 = _C2_HW * _C2_HW * n_batch
    a = np.zeros((_P2_HW * _P2_HW * _NROW, rb2), np.float32)
    for ph in range(_P2_HW):
        for pw in range(_P2_HW):
            s = ph * _P2_HW + pw
            for nn in range(n_batch):
                for dy in range(2):
                    for dx in range(2):
                        src = ((2 * ph + dy) * orow
                               + (2 * pw + dx) * n_batch + nn)
                        a[s * _NROW + nn, src] = 1.0
    return a


# ------------------------- one-time parameter packing ----------------------- #

def pack_params(params, n_batch):
    """Pre-pad / pre-transpose all weights into lane-dense, MXU-friendly
    layouts (folding the two 1/4 avg-pool scales) and build the small pool2
    matrix.  Call once, outside jit."""
    assert 1 <= n_batch <= _NROW, "FC-stage row padding assumes batch <= 8"
    c1 = params["conv1_w"].shape[0]
    c2 = params["conv2_w"].shape[0]
    f1 = params["fc1_w"].shape[0]
    f2 = params["fc2_w"].shape[0]
    f3 = params["fc3_w"].shape[0]
    assert params["fc1_w"].shape[1] == c2 * _P2_HW * _P2_HW

    def pad_bias(b):
        return jnp.zeros((1, _LANE), jnp.float32).at[0, :b.shape[0]].set(b)

    # conv1: (C1, 1, 5, 5) -> (32, 128); rows = tap (ki*5+kj), cols = c1.
    w1 = params["conv1_w"].reshape(c1, _TAPS).T
    w1p = jnp.zeros((_KPAD, _LANE), jnp.float32).at[:_TAPS, :c1].set(w1)

    # conv2: (C2, C1, 5, 5) -> (25, 128, 128) = [tap, c1, c2]; pool1's 1/4 is
    # folded in; stored bf16 (exact halving of its DMA, f32 accumulation).
    w2 = jnp.transpose(params["conv2_w"].reshape(c2, c1, _TAPS), (2, 1, 0))
    w2p = (jnp.zeros((_TAPS, _LANE, _LANE), jnp.float32)
           .at[:, :c1, :c2].set(0.25 * w2)).astype(jnp.bfloat16)

    # fc1: (F1, C2*16) -> (16, 128, 128) = [s, c2, f1], matching the kernel's
    # (s, n) pooled2 row layout (PyTorch flatten order is c2*16 + s); pool2's
    # 1/4 is folded in; stored bf16.
    fw1 = jnp.transpose(params["fc1_w"].reshape(f1, c2, _P2_HW * _P2_HW),
                        (2, 1, 0))
    wfc1 = (jnp.zeros((_P2_HW * _P2_HW, _LANE, _LANE), jnp.float32)
            .at[:, :c2, :f1].set(0.25 * fw1)).astype(jnp.bfloat16)

    wfc2 = jnp.zeros((_LANE, _LANE), jnp.float32).at[:f1, :f2].set(
        params["fc2_w"].T)
    wfc3 = jnp.zeros((_LANE, _LANE), jnp.float32).at[:f2, :f3].set(
        params["fc3_w"].T)

    return {
        "w1": w1p, "b1": pad_bias(params["conv1_b"]),
        "w2": w2p, "b2": pad_bias(params["conv2_b"]),
        "p2m": jnp.asarray(_pool2_expand_matrix(n_batch)),
        "wfc1": wfc1, "b_fc1": pad_bias(params["fc1_b"]),
        "wfc2": wfc2, "b_fc2": pad_bias(params["fc2_b"]),
        "wfc3": wfc3, "b_fc3": pad_bias(params["fc3_b"]),
    }


# --------------------------------- JAX glue --------------------------------- #

def _build_patches1(x):
    """im2col of the 28x28 input with rows ordered (dy, dx, h1, w1, n) so:
      * pool1 is a sum of 4 contiguous row blocks, and
      * each conv2 tap window is 8 static (8*N)-row slices of pooled1."""
    n = x.shape[0]
    xs = x[:, 0].astype(jnp.float32)                        # (N, 28, 28)
    taps = [xs[:, ki:ki + _C1_HW, kj:kj + _C1_HW]
            for ki in range(_K) for kj in range(_K)]
    p = jnp.stack(taps, axis=-1)                            # (N, 24, 24, 25)
    p = p.reshape(n, _P1_HW, 2, _P1_HW, 2, _TAPS)           # (n,h1,dy,w1,dx,k)
    p = p.transpose(2, 4, 1, 3, 0, 5)                       # (dy,dx,h1,w1,n,k)
    p = p.reshape(4 * _P1_HW * _P1_HW * n, _TAPS)
    return jnp.pad(p, ((0, 0), (0, _KPAD - _TAPS)))         # (4*144*N, 32)


def pruned_lenet5_forward(x, packed):
    """PrunedLeNet5 forward: input prep (im2col of x) + ONE fused Pallas call."""
    n = x.shape[0]
    rb1 = _P1_HW * _P1_HW * n
    rb2 = _C2_HW * _C2_HW * n
    patches1 = _build_patches1(x)

    vmem = pl.BlockSpec(memory_space=pltpu.MemorySpace.VMEM)
    hbm = pl.BlockSpec(memory_space=pl.ANY)      # manually DMA'd inside kernel
    in_specs = [vmem, vmem, vmem,                # patches1, w1, b1
                hbm, vmem, vmem,                 # w2 (async copy), b2, p2m
                hbm, vmem,                       # wfc1 (async copy), b_fc1
                vmem, vmem, vmem, vmem]          # wfc2, b_fc2, wfc3, b_fc3

    inputs = (patches1,
              packed["w1"], packed["b1"],
              packed["w2"], packed["b2"], packed["p2m"],
              packed["wfc1"], packed["b_fc1"],
              packed["wfc2"], packed["b_fc2"],
              packed["wfc3"], packed["b_fc3"])

    macs = (4 * rb1 * _KPAD * _LANE                           # conv1
            + _TAPS * rb2 * _LANE * _LANE                     # conv2
            + _P2_HW * _P2_HW * _NROW * rb2 * _LANE           # pool2 matmul
            + (_P2_HW * _P2_HW + 2) * _NROW * _LANE * _LANE)  # fc1..fc3
    bytes_accessed = int(
        sum(int(np.prod(a.shape)) * a.dtype.itemsize for a in inputs)
        + _NROW * _LANE * 4)

    kernel = functools.partial(_lenet5_fused_kernel, n_batch=n)
    out = pl.pallas_call(
        kernel,
        out_shape=jax.ShapeDtypeStruct((_NROW, _LANE), jnp.float32),
        in_specs=in_specs,
        out_specs=pl.BlockSpec(memory_space=pltpu.MemorySpace.VMEM),
        scratch_shapes=[
            pltpu.VMEM((rb1, _LANE), jnp.float32),                    # pooled1
            pltpu.VMEM((_TAPS, _LANE, _LANE), jnp.bfloat16),          # conv2 w
            pltpu.VMEM((_P2_HW * _P2_HW, _LANE, _LANE), jnp.bfloat16),  # fc1 w
            pltpu.SemaphoreType.DMA((2,)),
        ],
        compiler_params=pltpu.CompilerParams(
            vmem_limit_bytes=16 * 1024 * 1024),
        cost_estimate=pl.CostEstimate(flops=2 * macs, transcendentals=0,
                                      bytes_accessed=bytes_accessed),
    )(*inputs)
    return out[:n, :_NUM_CLASSES]


# --------------------------- reference + test setup -------------------------- #

def init_params(key, conv1_out=6, conv2_out=16, fc1_out=120, fc2_out=84):
    ks = jax.random.split(key, 10)
    scale = 0.1
    return {
        "conv1_w": scale * jax.random.normal(ks[0], (conv1_out, 1, 5, 5), jnp.float32),
        "conv1_b": scale * jax.random.normal(ks[1], (conv1_out,), jnp.float32),
        "conv2_w": scale * jax.random.normal(ks[2], (conv2_out, conv1_out, 5, 5), jnp.float32),
        "conv2_b": scale * jax.random.normal(ks[3], (conv2_out,), jnp.float32),
        "fc1_w": scale * jax.random.normal(ks[4], (fc1_out, conv2_out * 4 * 4), jnp.float32),
        "fc1_b": scale * jax.random.normal(ks[5], (fc1_out,), jnp.float32),
        "fc2_w": scale * jax.random.normal(ks[6], (fc2_out, fc1_out), jnp.float32),
        "fc2_b": scale * jax.random.normal(ks[7], (fc2_out,), jnp.float32),
        "fc3_w": scale * jax.random.normal(ks[8], (10, fc2_out), jnp.float32),
        "fc3_b": scale * jax.random.normal(ks[9], (10,), jnp.float32),
    }


def _reference_forward(x, params):
    """Pure-JAX re-statement of the PyTorch module (for the self-check)."""
    def avg_pool(y):
        n, c, h, w = y.shape
        return y.reshape(n, c, h // 2, 2, w // 2, 2).mean(axis=(3, 5))

    dn = ("NCHW", "OIHW", "NCHW")
    hi = jax.lax.Precision.HIGHEST
    y = jax.lax.conv_general_dilated(x, params["conv1_w"], (1, 1), "VALID",
                                     dimension_numbers=dn, precision=hi)
    y = avg_pool(jax.nn.relu(y + params["conv1_b"][None, :, None, None]))
    y = jax.lax.conv_general_dilated(y, params["conv2_w"], (1, 1), "VALID",
                                     dimension_numbers=dn, precision=hi)
    y = avg_pool(jax.nn.relu(y + params["conv2_b"][None, :, None, None]))
    y = y.reshape(y.shape[0], -1)
    y = jax.nn.relu(y @ params["fc1_w"].T + params["fc1_b"])
    y = jax.nn.relu(y @ params["fc2_w"].T + params["fc2_b"])
    return y @ params["fc3_w"].T + params["fc3_b"]


if __name__ == "__main__":
    key = jax.random.PRNGKey(0)
    k_x, k_p = jax.random.split(key)
    # LeNet-5 geometry requires a 28x28 single-channel input (flatten -> 16*4*4).
    batch = 2
    x = jax.random.normal(k_x, (batch, 1, _IN_HW, _IN_HW), jnp.float32)
    params = init_params(k_p)

    packed = pack_params(params, batch)            # once, outside the jitted fwd
    fwd = jax.jit(pruned_lenet5_forward)
    out = fwd(x, packed)
    jax.block_until_ready(out)
    assert out.shape == (batch, _NUM_CLASSES) and out.dtype == jnp.float32

    # Numerical self-check against a pure-JAX reference of the PyTorch module.
    # (Tolerance tightened vs. v1; conv2/fc1 weights are stored in bf16.)
    with jax.default_matmul_precision("highest"):
        ref = _reference_forward(x, params)
    err = float(jnp.max(jnp.abs(out - ref)))
    assert err < 1e-2, f"mismatch vs reference: max abs err = {err}"
    print("KERNEL_OK")
</pallas_src>

<mosaic_0001>
module attributes {stable_mosaic.version = 11 : i64} {
  func.func @_lenet5_fused_kernel(%arg0: memref<1152x32xf32, #tpu.memory_space<vmem>>, %arg1: memref<32x128xf32, #tpu.memory_space<vmem>>, %arg2: memref<1x128xf32, #tpu.memory_space<vmem>>, %arg3: memref<25x128x128xbf16, #tpu.memory_space<any>>, %arg4: memref<1x128xf32, #tpu.memory_space<vmem>>, %arg5: memref<128x128xf32, #tpu.memory_space<vmem>>, %arg6: memref<16x128x128xbf16, #tpu.memory_space<any>>, %arg7: memref<1x128xf32, #tpu.memory_space<vmem>>, %arg8: memref<128x128xf32, #tpu.memory_space<vmem>>, %arg9: memref<1x128xf32, #tpu.memory_space<vmem>>, %arg10: memref<128x128xf32, #tpu.memory_space<vmem>>, %arg11: memref<1x128xf32, #tpu.memory_space<vmem>>, %arg12: memref<8x128xf32, #tpu.memory_space<vmem>>, %arg13: memref<288x128xf32, #tpu.memory_space<vmem>>, %arg14: memref<25x128x128xbf16, #tpu.memory_space<vmem>>, %arg15: memref<16x128x128xbf16, #tpu.memory_space<vmem>>, %arg16: memref<2x!tpu.dma_semaphore, #tpu.memory_space<semaphore_mem>>) attributes {dimension_semantics = [], scalar_prefetch = 0 : i64, scratch_operands = 4 : i64, tpu.core_type = #tpu.core_type<tc>} {
    %c0_i32 = arith.constant 0 : i32
    %0 = tpu.memref_slice %arg16[%c0_i32] : memref<2x!tpu.dma_semaphore, #tpu.memory_space<semaphore_mem>> -> memref<1x!tpu.dma_semaphore, #tpu.memory_space<semaphore_mem>>
    %1 = tpu.memref_squeeze %0 : memref<1x!tpu.dma_semaphore, #tpu.memory_space<semaphore_mem>> -> memref<!tpu.dma_semaphore, #tpu.memory_space<semaphore_mem>>
    tpu.enqueue_dma source(%arg3 : memref<25x128x128xbf16, #tpu.memory_space<any>>) target(%arg14 : memref<25x128x128xbf16, #tpu.memory_space<vmem>>) target_semaphore(%1 : memref<!tpu.dma_semaphore, #tpu.memory_space<semaphore_mem>>)
    %c1_i32 = arith.constant 1 : i32
    %2 = tpu.memref_slice %arg16[%c1_i32] : memref<2x!tpu.dma_semaphore, #tpu.memory_space<semaphore_mem>> -> memref<1x!tpu.dma_semaphore, #tpu.memory_space<semaphore_mem>>
    %3 = tpu.memref_squeeze %2 : memref<1x!tpu.dma_semaphore, #tpu.memory_space<semaphore_mem>> -> memref<!tpu.dma_semaphore, #tpu.memory_space<semaphore_mem>>
    tpu.enqueue_dma source(%arg6 : memref<16x128x128xbf16, #tpu.memory_space<any>>) target(%arg15 : memref<16x128x128xbf16, #tpu.memory_space<vmem>>) target_semaphore(%3 : memref<!tpu.dma_semaphore, #tpu.memory_space<semaphore_mem>>)
    %c0 = arith.constant 0 : index
    %c0_0 = arith.constant 0 : index
    %4 = vector.load %arg1[%c0, %c0_0] : memref<32x128xf32, #tpu.memory_space<vmem>>, vector<32x128xf32>
    %c0_1 = arith.constant 0 : index
    %c0_2 = arith.constant 0 : index
    %5 = vector.load %arg2[%c0_1, %c0_2] : memref<1x128xf32, #tpu.memory_space<vmem>>, vector<1x128xf32>
    %cst = arith.constant 0.000000e+00 : f32
    %6 = vector.broadcast %cst : f32 to vector<288x128xf32>
    %c0_3 = arith.constant 0 : index
    %c0_4 = arith.constant 0 : index
    %7 = vector.load %arg0[%c0_3, %c0_4] : memref<1152x32xf32, #tpu.memory_space<vmem>>, vector<288x32xf32>
    %cst_5 = arith.constant dense<0.000000e+00> : vector<288x128xf32>
    %8 = tpu.matmul %7, %4, %cst_5 {dimension_numbers = #tpu.dot_dimension_numbers<[1], [0], [0], [1], [0, 0, 1, 1], [], []>} : vector<288x32xf32>, vector<32x128xf32>, vector<288x128xf32> -> vector<288x128xf32>
    %9 = vector.broadcast %5 : vector<1x128xf32> to vector<288x128xf32>
    %10 = arith.addf %8, %9 : vector<288x128xf32>
    %cst_6 = arith.constant 0.000000e+00 : f32
    %11 = vector.broadcast %cst_6 : f32 to vector<288x128xf32>
    %12 = arith.maximumf %10, %11 : vector<288x128xf32>
    %13 = arith.addf %6, %12 : vector<288x128xf32>
    %c288 = arith.constant 288 : index
    %c0_7 = arith.constant 0 : index
    %14 = vector.load %arg0[%c288, %c0_7] : memref<1152x32xf32, #tpu.memory_space<vmem>>, vector<288x32xf32>
    %cst_8 = arith.constant dense<0.000000e+00> : vector<288x128xf32>
    %15 = tpu.matmul %14, %4, %cst_8 {dimension_numbers = #tpu.dot_dimension_numbers<[1], [0], [0], [1], [0, 0, 1, 1], [], []>} : vector<288x32xf32>, vector<32x128xf32>, vector<288x128xf32> -> vector<288x128xf32>
    %16 = vector.broadcast %5 : vector<1x128xf32> to vector<288x128xf32>
    %17 = arith.addf %15, %16 : vector<288x128xf32>
    %cst_9 = arith.constant 0.000000e+00 : f32
    %18 = vector.broadcast %cst_9 : f32 to vector<288x128xf32>
    %19 = arith.maximumf %17, %18 : vector<288x128xf32>
    %20 = arith.addf %13, %19 : vector<288x128xf32>
    %c576 = arith.constant 576 : index
    %c0_10 = arith.constant 0 : index
    %21 = vector.load %arg0[%c576, %c0_10] : memref<1152x32xf32, #tpu.memory_space<vmem>>, vector<288x32xf32>
    %cst_11 = arith.constant dense<0.000000e+00> : vector<288x128xf32>
    %22 = tpu.matmul %21, %4, %cst_11 {dimension_numbers = #tpu.dot_dimension_numbers<[1], [0], [0], [1], [0, 0, 1, 1], [], []>} : vector<288x32xf32>, vector<32x128xf32>, vector<288x128xf32> -> vector<288x128xf32>
    %23 = vector.broadcast %5 : vector<1x128xf32> to vector<288x128xf32>
    %24 = arith.addf %22, %23 : vector<288x128xf32>
    %cst_12 = arith.constant 0.000000e+00 : f32
    %25 = vector.broadcast %cst_12 : f32 to vector<288x128xf32>
    %26 = arith.maximumf %24, %25 : vector<288x128xf32>
    %27 = arith.addf %20, %26 : vector<288x128xf32>
    %c864 = arith.constant 864 : index
    %c0_13 = arith.constant 0 : index
    %28 = vector.load %arg0[%c864, %c0_13] : memref<1152x32xf32, #tpu.memory_space<vmem>>, vector<288x32xf32>
    %cst_14 = arith.constant dense<0.000000e+00> : vector<288x128xf32>
    %29 = tpu.matmul %28, %4, %cst_14 {dimension_numbers = #tpu.dot_dimension_numbers<[1], [0], [0], [1], [0, 0, 1, 1], [], []>} : vector<288x32xf32>, vector<32x128xf32>, vector<288x128xf32> -> vector<288x128xf32>
    %30 = vector.broadcast %5 : vector<1x128xf32> to vector<288x128xf32>
    %31 = arith.addf %29, %30 : vector<288x128xf32>
    %cst_15 = arith.constant 0.000000e+00 : f32
    %32 = vector.broadcast %cst_15 : f32 to vector<288x128xf32>
    %33 = arith.maximumf %31, %32 : vector<288x128xf32>
    %34 = arith.addf %27, %33 : vector<288x128xf32>
    %c0_16 = arith.constant 0 : index
    %c0_17 = arith.constant 0 : index
    %35 = vector.load %arg13[%c0_16, %c0_17] : memref<288x128xf32, #tpu.memory_space<vmem>>, vector<288x128xf32>
    tpu.vector_store %arg13[%c0_16, %c0_17], %34 {strides = array<i32>} : memref<288x128xf32, #tpu.memory_space<vmem>>, vector<288x128xf32>,
    %c0_i32_18 = arith.constant 0 : i32
    %36 = tpu.memref_slice %arg16[%c0_i32_18] : memref<2x!tpu.dma_semaphore, #tpu.memory_space<semaphore_mem>> -> memref<1x!tpu.dma_semaphore, #tpu.memory_space<semaphore_mem>>
    %37 = tpu.memref_squeeze %36 : memref<1x!tpu.dma_semaphore, #tpu.memory_space<semaphore_mem>> -> memref<!tpu.dma_semaphore, #tpu.memory_space<semaphore_mem>>
    tpu.wait_dma2 semaphore(%37 : memref<!tpu.dma_semaphore, #tpu.memory_space<semaphore_mem>>) src(%arg3 : memref<25x128x128xbf16, #tpu.memory_space<any>>) dst(%arg14 : memref<25x128x128xbf16, #tpu.memory_space<vmem>>)
    %cst_19 = arith.constant 0.000000e+00 : f32
    %38 = vector.broadcast %cst_19 : f32 to vector<128x128xf32>
    %c0_20 = arith.constant 0 : index
    %c0_21 = arith.constant 0 : index
    %39 = vector.load %arg13[%c0_20, %c0_21] : memref<288x128xf32, #tpu.memory_space<vmem>>, vector<16x128xf32>
    %c24 = arith.constant 24 : index
    %c0_22 = arith.constant 0 : index
    %40 = vector.load %arg13[%c24, %c0_22] : memref<288x128xf32, #tpu.memory_space<vmem>>, vector<16x128xf32>
    %c48 = arith.constant 48 : index
    %c0_23 = arith.constant 0 : index
    %41 = vector.load %arg13[%c48, %c0_23] : memref<288x128xf32, #tpu.memory_space<vmem>>, vector<16x128xf32>
    %c72 = arith.constant 72 : index
    %c0_24 = arith.constant 0 : index
    %42 = vector.load %arg13[%c72, %c0_24] : memref<288x128xf32, #tpu.memory_space<vmem>>, vector<16x128xf32>
    %c96 = arith.constant 96 : index
    %c0_25 = arith.constant 0 : index
    %43 = vector.load %arg13[%c96, %c0_25] : memref<288x128xf32, #tpu.memory_space<vmem>>, vector<16x128xf32>
    %c120 = arith.constant 120 : index
    %c0_26 = arith.constant 0 : index
    %44 = vector.load %arg13[%c120, %c0_26] : memref<288x128xf32, #tpu.memory_space<vmem>>, vector<16x128xf32>
    %c144 = arith.constant 144 : index
    %c0_27 = arith.constant 0 : index
    %45 = vector.load %arg13[%c144, %c0_27] : memref<288x128xf32, #tpu.memory_space<vmem>>, vector<16x128xf32>
    %c168 = arith.constant 168 : index
    %c0_28 = arith.constant 0 : index
    %46 = vector.load %arg13[%c168, %c0_28] : memref<288x128xf32, #tpu.memory_space<vmem>>, vector<16x128xf32>
    %47 = tpu.concatenate %39, %40, %41, %42, %43, %44, %45, %46 in 0 : vector<16x128xf32>, vector<16x128xf32>, vector<16x128xf32>, vector<16x128xf32>, vector<16x128xf32>, vector<16x128xf32>, vector<16x128xf32>, vector<16x128xf32> -> vector<128x128xf32>
    %c0_29 = arith.constant 0 : index
    %c0_30 = arith.constant 0 : index
    %c0_31 = arith.constant 0 : index
    %48 = vector.load %arg14[%c0_29, %c0_30, %c0_31] : memref<25x128x128xbf16, #tpu.memory_space<vmem>>, vector<1x128x128xbf16>
    %49 = vector.shape_cast %48 : vector<1x128x128xbf16> to vector<128x128xbf16>
    %50 = arith.extf %49 : vector<128x128xbf16> to vector<128x128xf32>
    %cst_32 = arith.constant dense<0.000000e+00> : vector<128x128xf32>
    %51 = tpu.matmul %47, %50, %cst_32 {dimension_numbers = #tpu.dot_dimension_numbers<[1], [0], [0], [1], [0, 0, 1, 1], [], []>} : vector<128x128xf32>, vector<128x128xf32>, vector<128x128xf32> -> vector<128x128xf32>
    %52 = arith.addf %38, %51 : vector<128x128xf32>
    %c2 = arith.constant 2 : index
    %c0_33 = arith.constant 0 : index
    %53 = vector.load %arg13[%c2, %c0_33] : memref<288x128xf32, #tpu.memory_space<vmem>>, vector<16x128xf32>
    %c26 = arith.constant 26 : index
    %c0_34 = arith.constant 0 : index
    %54 = vector.load %arg13[%c26, %c0_34] : memref<288x128xf32, #tpu.memory_space<vmem>>, vector<16x128xf32>
    %c50 = arith.constant 50 : index
    %c0_35 = arith.constant 0 : index
    %55 = vector.load %arg13[%c50, %c0_35] : memref<288x128xf32, #tpu.memory_space<vmem>>, vector<16x128xf32>
    %c74 = arith.constant 74 : index
    %c0_36 = arith.constant 0 : index
    %56 = vector.load %arg13[%c74, %c0_36] : memref<288x128xf32, #tpu.memory_space<vmem>>, vector<16x128xf32>
    %c98 = arith.constant 98 : index
    %c0_37 = arith.constant 0 : index
    %57 = vector.load %arg13[%c98, %c0_37] : memref<288x128xf32, #tpu.memory_space<vmem>>, vector<16x128xf32>
    %c122 = arith.constant 122 : index
    %c0_38 = arith.constant 0 : index
    %58 = vector.load %arg13[%c122, %c0_38] : memref<288x128xf32, #tpu.memory_space<vmem>>, vector<16x128xf32>
    %c146 = arith.constant 146 : index
    %c0_39 = arith.constant 0 : index
    %59 = vector.load %arg13[%c146, %c0_39] : memref<288x128xf32, #tpu.memory_space<vmem>>, vector<16x128xf32>
    %c170 = arith.constant 170 : index
    %c0_40 = arith.constant 0 : index
    %60 = vector.load %arg13[%c170, %c0_40] : memref<288x128xf32, #tpu.memory_space<vmem>>, vector<16x128xf32>
    %61 = tpu.concatenate %53, %54, %55, %56, %57, %58, %59, %60 in 0 : vector<16x128xf32>, vector<16x128xf32>, vector<16x128xf32>, vector<16x128xf32>, vector<16x128xf32>, vector<16x128xf32>, vector<16x128xf32>, vector<16x128xf32> -> vector<128x128xf32>
    %c1 = arith.constant 1 : index
    %c0_41 = arith.constant 0 : index
    %c0_42 = arith.constant 0 : index
    %62 = vector.load %arg14[%c1, %c0_41, %c0_42] : memref<25x128x128xbf16, #tpu.memory_space<vmem>>, vector<1x128x128xbf16>
    %63 = vector.shape_cast %62 : vector<1x128x128xbf16> to vector<128x128xbf16>
    %64 = arith.extf %63 : vector<128x128xbf16> to vector<128x128xf32>
    %cst_43 = arith.constant dense<0.000000e+00> : vector<128x128xf32>
    %65 = tpu.matmul %61, %64, %cst_43 {dimension_numbers = #tpu.dot_dimension_numbers<[1], [0], [0], [1], [0, 0, 1, 1], [], []>} : vector<128x128xf32>, vector<128x128xf32>, vector<128x128xf32> -> vector<128x128xf32>
    %66 = arith.addf %52, %65 : vector<128x128xf32>
    %c4 = arith.constant 4 : index
    %c0_44 = arith.constant 0 : index
    %67 = vector.load %arg13[%c4, %c0_44] : memref<288x128xf32, #tpu.memory_space<vmem>>, vector<16x128xf32>
    %c28 = arith.constant 28 : index
    %c0_45 = arith.constant 0 : index
    %68 = vector.load %arg13[%c28, %c0_45] : memref<288x128xf32, #tpu.memory_space<vmem>>, vector<16x128xf32>
    %c52 = arith.constant 52 : index
    %c0_46 = arith.constant 0 : index
    %69 = vector.load %arg13[%c52, %c0_46] : memref<288x128xf32, #tpu.memory_space<vmem>>, vector<16x128xf32>
    %c76 = arith.constant 76 : index
    %c0_47 = arith.constant 0 : index
    %70 = vector.load %arg13[%c76, %c0_47] : memref<288x128xf32, #tpu.memory_space<vmem>>, vector<16x128xf32>
    %c100 = arith.constant 100 : index
    %c0_48 = arith.constant 0 : index
    %71 = vector.load %arg13[%c100, %c0_48] : memref<288x128xf32, #tpu.memory_space<vmem>>, vector<16x128xf32>
    %c124 = arith.constant 124 : index
    %c0_49 = arith.constant 0 : index
    %72 = vector.load %arg13[%c124, %c0_49] : memref<288x128xf32, #tpu.memory_space<vmem>>, vector<16x128xf32>
    %c148 = arith.constant 148 : index
    %c0_50 = arith.constant 0 : index
    %73 = vector.load %arg13[%c148, %c0_50] : memref<288x128xf32, #tpu.memory_space<vmem>>, vector<16x128xf32>
    %c172 = arith.constant 172 : index
    %c0_51 = arith.constant 0 : index
    %74 = vector.load %arg13[%c172, %c0_51] : memref<288x128xf32, #tpu.memory_space<vmem>>, vector<16x128xf32>
    %75 = tpu.concatenate %67, %68, %69, %70, %71, %72, %73, %74 in 0 : vector<16x128xf32>, vector<16x128xf32>, vector<16x128xf32>, vector<16x128xf32>, vector<16x128xf32>, vector<16x128xf32>, vector<16x128xf32>, vector<16x128xf32> -> vector<128x128xf32>
    %c2_52 = arith.constant 2 : index
    %c0_53 = arith.constant 0 : index
    %c0_54 = arith.constant 0 : index
    %76 = vector.load %arg14[%c2_52, %c0_53, %c0_54] : memref<25x128x128xbf16, #tpu.memory_space<vmem>>, vector<1x128x128xbf16>
    %77 = vector.shape_cast %76 : vector<1x128x128xbf16> to vector<128x128xbf16>
    %78 = arith.extf %77 : vector<128x128xbf16> to vector<128x128xf32>
    %cst_55 = arith.constant dense<0.000000e+00> : vector<128x128xf32>
    %79 = tpu.matmul %75, %78, %cst_55 {dimension_numbers = #tpu.dot_dimension_numbers<[1], [0], [0], [1], [0, 0, 1, 1], [], []>} : vector<128x128xf32>, vector<128x128xf32>, vector<128x128xf32> -> vector<128x128xf32>
    %80 = arith.addf %66, %79 : vector<128x128xf32>
    %c6 = arith.constant 6 : index
    %c0_56 = arith.constant 0 : index
    %81 = vector.load %arg13[%c6, %c0_56] : memref<288x128xf32, #tpu.memory_space<vmem>>, vector<16x128xf32>
    %c30 = arith.constant 30 : index
    %c0_57 = arith.constant 0 : index
    %82 = vector.load %arg13[%c30, %c0_57] : memref<288x128xf32, #tpu.memory_space<vmem>>, vector<16x128xf32>
    %c54 = arith.constant 54 : index
    %c0_58 = arith.constant 0 : index
    %83 = vector.load %arg13[%c54, %c0_58] : memref<288x128xf32, #tpu.memory_space<vmem>>, vector<16x128xf32>
    %c78 = arith.constant 78 : index
    %c0_59 = arith.constant 0 : index
    %84 = vector.load %arg13[%c78, %c0_59] : memref<288x128xf32, #tpu.memory_space<vmem>>, vector<16x128xf32>
    %c102 = arith.constant 102 : index
    %c0_60 = arith.constant 0 : index
    %85 = vector.load %arg13[%c102, %c0_60] : memref<288x128xf32, #tpu.memory_space<vmem>>, vector<16x128xf32>
    %c126 = arith.constant 126 : index
    %c0_61 = arith.constant 0 : index
    %86 = vector.load %arg13[%c126, %c0_61] : memref<288x128xf32, #tpu.memory_space<vmem>>, vector<16x128xf32>
    %c150 = arith.constant 150 : index
    %c0_62 = arith.constant 0 : index
    %87 = vector.load %arg13[%c150, %c0_62] : memref<288x128xf32, #tpu.memory_space<vmem>>, vector<16x128xf32>
    %c174 = arith.constant 174 : index
    %c0_63 = arith.constant 0 : index
    %88 = vector.load %arg13[%c174, %c0_63] : memref<288x128xf32, #tpu.memory_space<vmem>>, vector<16x128xf32>
    %89 = tpu.concatenate %81, %82, %83, %84, %85, %86, %87, %88 in 0 : vector<16x128xf32>, vector<16x128xf32>, vector<16x128xf32>, vector<16x128xf32>, vector<16x128xf32>, vector<16x128xf32>, vector<16x128xf32>, vector<16x128xf32> -> vector<128x128xf32>
    %c3 = arith.constant 3 : index
    %c0_64 = arith.constant 0 : index
    %c0_65 = arith.constant 0 : index
    %90 = vector.load %arg14[%c3, %c0_64, %c0_65] : memref<25x128x128xbf16, #tpu.memory_space<vmem>>, vector<1x128x128xbf16>
    %91 = vector.shape_cast %90 : vector<1x128x128xbf16> to vector<128x128xbf16>
    %92 = arith.extf %91 : vector<128x128xbf16> to vector<128x128xf32>
    %cst_66 = arith.constant dense<0.000000e+00> : vector<128x128xf32>
    %93 = tpu.matmul %89, %92, %cst_66 {dimension_numbers = #tpu.dot_dimension_numbers<[1], [0], [0], [1], [0, 0, 1, 1], [], []>} : vector<128x128xf32>, vector<128x128xf32>, vector<128x128xf32> -> vector<128x128xf32>
    %94 = arith.addf %80, %93 : vector<128x128xf32>
    %c8 = arith.constant 8 : index
    %c0_67 = arith.constant 0 : index
    %95 = vector.load %arg13[%c8, %c0_67] : memref<288x128xf32, #tpu.memory_space<vmem>>, vector<16x128xf32>
    %c32 = arith.constant 32 : index
    %c0_68 = arith.constant 0 : index
    %96 = vector.load %arg13[%c32, %c0_68] : memref<288x128xf32, #tpu.memory_space<vmem>>, vector<16x128xf32>
    %c56 = arith.constant 56 : index
    %c0_69 = arith.constant 0 : index
    %97 = vector.load %arg13[%c56, %c0_69] : memref<288x128xf32, #tpu.memory_space<vmem>>, vector<16x128xf32>
    %c80 = arith.constant 80 : index
    %c0_70 = arith.constant 0 : index
    %98 = vector.load %arg13[%c80, %c0_70] : memref<288x128xf32, #tpu.memory_space<vmem>>, vector<16x128xf32>
    %c104 = arith.constant 104 : index
    %c0_71 = arith.constant 0 : index
    %99 = vector.load %arg13[%c104, %c0_71] : memref<288x128xf32, #tpu.memory_space<vmem>>, vector<16x128xf32>
    %c128 = arith.constant 128 : index
    %c0_72 = arith.constant 0 : index
    %100 = vector.load %arg13[%c128, %c0_72] : memref<288x128xf32, #tpu.memory_space<vmem>>, vector<16x128xf32>
    %c152 = arith.constant 152 : index
    %c0_73 = arith.constant 0 : index
    %101 = vector.load %arg13[%c152, %c0_73] : memref<288x128xf32, #tpu.memory_space<vmem>>, vector<16x128xf32>
    %c176 = arith.constant 176 : index
    %c0_74 = arith.constant 0 : index
    %102 = vector.load %arg13[%c176, %c0_74] : memref<288x128xf32, #tpu.memory_space<vmem>>, vector<16x128xf32>
    %103 = tpu.concatenate %95, %96, %97, %98, %99, %100, %101, %102 in 0 : vector<16x128xf32>, vector<16x128xf32>, vector<16x128xf32>, vector<16x128xf32>, vector<16x128xf32>, vector<16x128xf32>, vector<16x128xf32>, vector<16x128xf32> -> vector<128x128xf32>
    %c4_75 = arith.constant 4 : index
    %c0_76 = arith.constant 0 : index
    %c0_77 = arith.constant 0 : index
    %104 = vector.load %arg14[%c4_75, %c0_76, %c0_77] : memref<25x128x128xbf16, #tpu.memory_space<vmem>>, vector<1x128x128xbf16>
    %105 = vector.shape_cast %104 : vector<1x128x128xbf16> to vector<128x128xbf16>
    %106 = arith.extf %105 : vector<128x128xbf16> to vector<128x128xf32>
    %cst_78 = arith.constant dense<0.000000e+00> : vector<128x128xf32>
    %107 = tpu.matmul %103, %106, %cst_78 {dimension_numbers = #tpu.dot_dimension_numbers<[1], [0], [0], [1], [0, 0, 1, 1], [], []>} : vector<128x128xf32>, vector<128x128xf32>, vector<128x128xf32> -> vector<128x128xf32>
    %108 = arith.addf %94, %107 : vector<128x128xf32>
    %c24_79 = arith.constant 24 : index
    %c0_80 = arith.constant 0 : index
    %109 = vector.load %arg13[%c24_79, %c0_80] : memref<288x128xf32, #tpu.memory_space<vmem>>, vector<16x128xf32>
    %c48_81 = arith.constant 48 : index
    %c0_82 = arith.constant 0 : index
    %110 = vector.load %arg13[%c48_81, %c0_82] : memref<288x128xf32, #tpu.memory_space<vmem>>, vector<16x128xf32>
    %c72_83 = arith.constant 72 : index
    %c0_84 = arith.constant 0 : index
    %111 = vector.load %arg13[%c72_83, %c0_84] : memref<288x128xf32, #tpu.memory_space<vmem>>, vector<16x128xf32>
    %c96_85 = arith.constant 96 : index
    %c0_86 = arith.constant 0 : index
    %112 = vector.load %arg13[%c96_85, %c0_86] : memref<288x128xf32, #tpu.memory_space<vmem>>, vector<16x128xf32>
    %c120_87 = arith.constant 120 : index
    %c0_88 = arith.constant 0 : index
    %113 = vector.load %arg13[%c120_87, %c0_88] : memref<288x128xf32, #tpu.memory_space<vmem>>, vector<16x128xf32>
    %c144_89 = arith.constant 144 : index
    %c0_90 = arith.constant 0 : index
    %114 = vector.load %arg13[%c144_89, %c0_90] : memref<288x128xf32, #tpu.memory_space<vmem>>, vector<16x128xf32>
    %c168_91 = arith.constant 168 : index
    %c0_92 = arith.constant 0 : index
    %115 = vector.load %arg13[%c168_91, %c0_92] : memref<288x128xf32, #tpu.memory_space<vmem>>, vector<16x128xf32>
    %c192 = arith.constant 192 : index
    %c0_93 = arith.constant 0 : index
    %116 = vector.load %arg13[%c192, %c0_93] : memref<288x128xf32, #tpu.memory_space<vmem>>, vector<16x128xf32>
    %117 = tpu.concatenate %109, %110, %111, %112, %113, %114, %115, %116 in 0 : vector<16x128xf32>, vector<16x128xf32>, vector<16x128xf32>, vector<16x128xf32>, vector<16x128xf32>, vector<16x128xf32>, vector<16x128xf32>, vector<16x128xf32> -> vector<128x128xf32>
    %c5 = arith.constant 5 : index
    %c0_94 = arith.constant 0 : index
    %c0_95 = arith.constant 0 : index
    %118 = vector.load %arg14[%c5, %c0_94, %c0_95] : memref<25x128x128xbf16, #tpu.memory_space<vmem>>, vector<1x128x128xbf16>
    %119 = vector.shape_cast %118 : vector<1x128x128xbf16> to vector<128x128xbf16>
    %120 = arith.extf %119 : vector<128x128xbf16> to vector<128x128xf32>
    %cst_96 = arith.constant dense<0.000000e+00> : vector<128x128xf32>
    %121 = tpu.matmul %117, %120, %cst_96 {dimension_numbers = #tpu.dot_dimension_numbers<[1], [0], [0], [1], [0, 0, 1, 1], [], []>} : vector<128x128xf32>, vector<128x128xf32>, vector<128x128xf32> -> vector<128x128xf32>
    %122 = arith.addf %108, %121 : vector<128x128xf32>
    %c26_97 = arith.constant 26 : index
    %c0_98 = arith.constant 0 : index
    %123 = vector.load %arg13[%c26_97, %c0_98] : memref<288x128xf32, #tpu.memory_space<vmem>>, vector<16x128xf32>
    %c50_99 = arith.constant 50 : index
    %c0_100 = arith.constant 0 : index
    %124 = vector.load %arg13[%c50_99, %c0_100] : memref<288x128xf32, #tpu.memory_space<vmem>>, vector<16x128xf32>
    %c74_101 = arith.constant 74 : index
    %c0_102 = arith.constant 0 : index
    %125 = vector.load %arg13[%c74_101, %c0_102] : memref<288x128xf32, #tpu.memory_space<vmem>>, vector<16x128xf32>
    %c98_103 = arith.constant 98 : index
    %c0_104 = arith.constant 0 : index
    %126 = vector.load %arg13[%c98_103, %c0_104] : memref<288x128xf32, #tpu.memory_space<vmem>>, vector<16x128xf32>
    %c122_105 = arith.constant 122 : index
    %c0_106 = arith.constant 0 : index
    %127 = vector.load %arg13[%c122_105, %c0_106] : memref<288x128xf32, #tpu.memory_space<vmem>>, vector<16x128xf32>
    %c146_107 = arith.constant 146 : index
    %c0_108 = arith.constant 0 : index
    %128 = vector.load %arg13[%c146_107, %c0_108] : memref<288x128xf32, #tpu.memory_space<vmem>>, vector<16x128xf32>
    %c170_109 = arith.constant 170 : index
    %c0_110 = arith.constant 0 : index
    %129 = vector.load %arg13[%c170_109, %c0_110] : memref<288x128xf32, #tpu.memory_space<vmem>>, vector<16x128xf32>
    %c194 = arith.constant 194 : index
    %c0_111 = arith.constant 0 : index
    %130 = vector.load %arg13[%c194, %c0_111] : memref<288x128xf32, #tpu.memory_space<vmem>>, vector<16x128xf32>
    %131 = tpu.concatenate %123, %124, %125, %126, %127, %128, %129, %130 in 0 : vector<16x128xf32>, vector<16x128xf32>, vector<16x128xf32>, vector<16x128xf32>, vector<16x128xf32>, vector<16x128xf32>, vector<16x128xf32>, vector<16x128xf32> -> vector<128x128xf32>
    %c6_112 = arith.constant 6 : index
    %c0_113 = arith.constant 0 : index
    %c0_114 = arith.constant 0 : index
    %132 = vector.load %arg14[%c6_112, %c0_113, %c0_114] : memref<25x128x128xbf16, #tpu.memory_space<vmem>>, vector<1x128x128xbf16>
    %133 = vector.shape_cast %132 : vector<1x128x128xbf16> to vector<128x128xbf16>
    %134 = arith.extf %133 : vector<128x128xbf16> to vector<128x128xf32>
    %cst_115 = arith.constant dense<0.000000e+00> : vector<128x128xf32>
    %135 = tpu.matmul %131, %134, %cst_115 {dimension_numbers = #tpu.dot_dimension_numbers<[1], [0], [0], [1], [0, 0, 1, 1], [], []>} : vector<128x128xf32>, vector<128x128xf32>, vector<128x128xf32> -> vector<128x128xf32>
    %136 = arith.addf %122, %135 : vector<128x128xf32>
    %c28_116 = arith.constant 28 : index
    %c0_117 = arith.constant 0 : index
    %137 = vector.load %arg13[%c28_116, %c0_117] : memref<288x128xf32, #tpu.memory_space<vmem>>, vector<16x128xf32>
    %c52_118 = arith.constant 52 : index
    %c0_119 = arith.constant 0 : index
    %138 = vector.load %arg13[%c52_118, %c0_119] : memref<288x128xf32, #tpu.memory_space<vmem>>, vector<16x128xf32>
    %c76_120 = arith.constant 76 : index
    %c0_121 = arith.constant 0 : index
    %139 = vector.load %arg13[%c76_120, %c0_121] : memref<288x128xf32, #tpu.memory_space<vmem>>, vector<16x128xf32>
    %c100_122 = arith.constant 100 : index
    %c0_123 = arith.constant 0 : index
    %140 = vector.load %arg13[%c100_122, %c0_123] : memref<288x128xf32, #tpu.memory_space<vmem>>, vector<16x128xf32>
    %c124_124 = arith.constant 124 : index
    %c0_125 = arith.constant 0 : index
    %141 = vector.load %arg13[%c124_124, %c0_125] : memref<288x128xf32, #tpu.memory_space<vmem>>, vector<16x128xf32>
    %c148_126 = arith.constant 148 : index
    %c0_127 = arith.constant 0 : index
    %142 = vector.load %arg13[%c148_126, %c0_127] : memref<288x128xf32, #tpu.memory_space<vmem>>, vector<16x128xf32>
    %c172_128 = arith.constant 172 : index
    %c0_129 = arith.constant 0 : index
    %143 = vector.load %arg13[%c172_128, %c0_129] : memref<288x128xf32, #tpu.memory_space<vmem>>, vector<16x128xf32>
    %c196 = arith.constant 196 : index
    %c0_130 = arith.constant 0 : index
    %144 = vector.load %arg13[%c196, %c0_130] : memref<288x128xf32, #tpu.memory_space<vmem>>, vector<16x128xf32>
    %145 = tpu.concatenate %137, %138, %139, %140, %141, %142, %143, %144 in 0 : vector<16x128xf32>, vector<16x128xf32>, vector<16x128xf32>, vector<16x128xf32>, vector<16x128xf32>, vector<16x128xf32>, vector<16x128xf32>, vector<16x128xf32> -> vector<128x128xf32>
    %c7 = arith.constant 7 : index
    %c0_131 = arith.constant 0 : index
    %c0_132 = arith.constant 0 : index
    %146 = vector.load %arg14[%c7, %c0_131, %c0_132] : memref<25x128x128xbf16, #tpu.memory_space<vmem>>, vector<1x128x128xbf16>
    %147 = vector.shape_cast %146 : vector<1x128x128xbf16> to vector<128x128xbf16>
    %148 = arith.extf %147 : vector<128x128xbf16> to vector<128x128xf32>
    %cst_133 = arith.constant dense<0.000000e+00> : vector<128x128xf32>
    %149 = tpu.matmul %145, %148, %cst_133 {dimension_numbers = #tpu.dot_dimension_numbers<[1], [0], [0], [1], [0, 0, 1, 1], [], []>} : vector<128x128xf32>, vector<128x128xf32>, vector<128x128xf32> -> vector<128x128xf32>
    %150 = arith.addf %136, %149 : vector<128x128xf32>
    %c30_134 = arith.constant 30 : index
    %c0_135 = arith.constant 0 : index
    %151 = vector.load %arg13[%c30_134, %c0_135] : memref<288x128xf32, #tpu.memory_space<vmem>>, vector<16x128xf32>
    %c54_136 = arith.constant 54 : index
    %c0_137 = arith.constant 0 : index
    %152 = vector.load %arg13[%c54_136, %c0_137] : memref<288x128xf32, #tpu.memory_space<vmem>>, vector<16x128xf32>
    %c78_138 = arith.constant 78 : index
    %c0_139 = arith.constant 0 : index
    %153 = vector.load %arg13[%c78_138, %c0_139] : memref<288x128xf32, #tpu.memory_space<vmem>>, vector<16x128xf32>
    %c102_140 = arith.constant 102 : index
    %c0_141 = arith.constant 0 : index
    %154 = vector.load %arg13[%c102_140, %c0_141] : memref<288x128xf32, #tpu.memory_space<vmem>>, vector<16x128xf32>
    %c126_142 = arith.constant 126 : index
    %c0_143 = arith.constant 0 : index
    %155 = vector.load %arg13[%c126_142, %c0_143] : memref<288x128xf32, #tpu.memory_space<vmem>>, vector<16x128xf32>
    %c150_144 = arith.constant 150 : index
    %c0_145 = arith.constant 0 : index
    %156 = vector.load %arg13[%c150_144, %c0_145] : memref<288x128xf32, #tpu.memory_space<vmem>>, vector<16x128xf32>
    %c174_146 = arith.constant 174 : index
    %c0_147 = arith.constant 0 : index
    %157 = vector.load %arg13[%c174_146, %c0_147] : memref<288x128xf32, #tpu.memory_space<vmem>>, vector<16x128xf32>
    %c198 = arith.constant 198 : index
    %c0_148 = arith.constant 0 : index
    %158 = vector.load %arg13[%c198, %c0_148] : memref<288x128xf32, #tpu.memory_space<vmem>>, vector<16x128xf32>
    %159 = tpu.concatenate %151, %152, %153, %154, %155, %156, %157, %158 in 0 : vector<16x128xf32>, vector<16x128xf32>, vector<16x128xf32>, vector<16x128xf32>, vector<16x128xf32>, vector<16x128xf32>, vector<16x128xf32>, vector<16x128xf32> -> vector<128x128xf32>
    %c8_149 = arith.constant 8 : index
    %c0_150 = arith.constant 0 : index
    %c0_151 = arith.constant 0 : index
    %160 = vector.load %arg14[%c8_149, %c0_150, %c0_151] : memref<25x128x128xbf16, #tpu.memory_space<vmem>>, vector<1x128x128xbf16>
    %161 = vector.shape_cast %160 : vector<1x128x128xbf16> to vector<128x128xbf16>
    %162 = arith.extf %161 : vector<128x128xbf16> to vector<128x128xf32>
    %cst_152 = arith.constant dense<0.000000e+00> : vector<128x128xf32>
    %163 = tpu.matmul %159, %162, %cst_152 {dimension_numbers = #tpu.dot_dimension_numbers<[1], [0], [0], [1], [0, 0, 1, 1], [], []>} : vector<128x128xf32>, vector<128x128xf32>, vector<128x128xf32> -> vector<128x128xf32>
    %164 = arith.addf %150, %163 : vector<128x128xf32>
    %c32_153 = arith.constant 32 : index
    %c0_154 = arith.constant 0 : index
    %165 = vector.load %arg13[%c32_153, %c0_154] : memref<288x128xf32, #tpu.memory_space<vmem>>, vector<16x128xf32>
    %c56_155 = arith.constant 56 : index
    %c0_156 = arith.constant 0 : index
    %166 = vector.load %arg13[%c56_155, %c0_156] : memref<288x128xf32, #tpu.memory_space<vmem>>, vector<16x128xf32>
    %c80_157 = arith.constant 80 : index
    %c0_158 = arith.constant 0 : index
    %167 = vector.load %arg13[%c80_157, %c0_158] : memref<288x128xf32, #tpu.memory_space<vmem>>, vector<16x128xf32>
    %c104_159 = arith.constant 104 : index
    %c0_160 = arith.constant 0 : index
    %168 = vector.load %arg13[%c104_159, %c0_160] : memref<288x128xf32, #tpu.memory_space<vmem>>, vector<16x128xf32>
    %c128_161 = arith.constant 128 : index
    %c0_162 = arith.constant 0 : index
    %169 = vector.load %arg13[%c128_161, %c0_162] : memref<288x128xf32, #tpu.memory_space<vmem>>, vector<16x128xf32>
    %c152_163 = arith.constant 152 : index
    %c0_164 = arith.constant 0 : index
    %170 = vector.load %arg13[%c152_163, %c0_164] : memref<288x128xf32, #tpu.memory_space<vmem>>, vector<16x128xf32>
    %c176_165 = arith.constant 176 : index
    %c0_166 = arith.constant 0 : index
    %171 = vector.load %arg13[%c176_165, %c0_166] : memref<288x128xf32, #tpu.memory_space<vmem>>, vector<16x128xf32>
    %c200 = arith.constant 200 : index
    %c0_167 = arith.constant 0 : index
    %172 = vector.load %arg13[%c200, %c0_167] : memref<288x128xf32, #tpu.memory_space<vmem>>, vector<16x128xf32>
    %173 = tpu.concatenate %165, %166, %167, %168, %169, %170, %171, %172 in 0 : vector<16x128xf32>, vector<16x128xf32>, vector<16x128xf32>, vector<16x128xf32>, vector<16x128xf32>, vector<16x128xf32>, vector<16x128xf32>, vector<16x128xf32> -> vector<128x128xf32>
    %c9 = arith.constant 9 : index
    %c0_168 = arith.constant 0 : index
    %c0_169 = arith.constant 0 : index
    %174 = vector.load %arg14[%c9, %c0_168, %c0_169] : memref<25x128x128xbf16, #tpu.memory_space<vmem>>, vector<1x128x128xbf16>
    %175 = vector.shape_cast %174 : vector<1x128x128xbf16> to vector<128x128xbf16>
    %176 = arith.extf %175 : vector<128x128xbf16> to vector<128x128xf32>
    %cst_170 = arith.constant dense<0.000000e+00> : vector<128x128xf32>
    %177 = tpu.matmul %173, %176, %cst_170 {dimension_numbers = #tpu.dot_dimension_numbers<[1], [0], [0], [1], [0, 0, 1, 1], [], []>} : vector<128x128xf32>, vector<128x128xf32>, vector<128x128xf32> -> vector<128x128xf32>
    %178 = arith.addf %164, %177 : vector<128x128xf32>
    %c48_171 = arith.constant 48 : index
    %c0_172 = arith.constant 0 : index
    %179 = vector.load %arg13[%c48_171, %c0_172] : memref<288x128xf32, #tpu.memory_space<vmem>>, vector<16x128xf32>
    %c72_173 = arith.constant 72 : index
    %c0_174 = arith.constant 0 : index
    %180 = vector.load %arg13[%c72_173, %c0_174] : memref<288x128xf32, #tpu.memory_space<vmem>>, vector<16x128xf32>
    %c96_175 = arith.constant 96 : index
    %c0_176 = arith.constant 0 : index
    %181 = vector.load %arg13[%c96_175, %c0_176] : memref<288x128xf32, #tpu.memory_space<vmem>>, vector<16x128xf32>
    %c120_177 = arith.constant 120 : index
    %c0_178 = arith.constant 0 : index
    %182 = vector.load %arg13[%c120_177, %c0_178] : memref<288x128xf32, #tpu.memory_space<vmem>>, vector<16x128xf32>
    %c144_179 = arith.constant 144 : index
    %c0_180 = arith.constant 0 : index
    %183 = vector.load %arg13[%c144_179, %c0_180] : memref<288x128xf32, #tpu.memory_space<vmem>>, vector<16x128xf32>
    %c168_181 = arith.constant 168 : index
    %c0_182 = arith.constant 0 : index
    %184 = vector.load %arg13[%c168_181, %c0_182] : memref<288x128xf32, #tpu.memory_space<vmem>>, vector<16x128xf32>
    %c192_183 = arith.constant 192 : index
    %c0_184 = arith.constant 0 : index
    %185 = vector.load %arg13[%c192_183, %c0_184] : memref<288x128xf32, #tpu.memory_space<vmem>>, vector<16x128xf32>
    %c216 = arith.constant 216 : index
    %c0_185 = arith.constant 0 : index
    %186 = vector.load %arg13[%c216, %c0_185] : memref<288x128xf32, #tpu.memory_space<vmem>>, vector<16x128xf32>
    %187 = tpu.concatenate %179, %180, %181, %182, %183, %184, %185, %186 in 0 : vector<16x128xf32>, vector<16x128xf32>, vector<16x128xf32>, vector<16x128xf32>, vector<16x128xf32>, vector<16x128xf32>, vector<16x128xf32>, vector<16x128xf32> -> vector<128x128xf32>
    %c10 = arith.constant 10 : index
    %c0_186 = arith.constant 0 : index
    %c0_187 = arith.constant 0 : index
    %188 = vector.load %arg14[%c10, %c0_186, %c0_187] : memref<25x128x128xbf16, #tpu.memory_space<vmem>>, vector<1x128x128xbf16>
    %189 = vector.shape_cast %188 : vector<1x128x128xbf16> to vector<128x128xbf16>
    %190 = arith.extf %189 : vector<128x128xbf16> to vector<128x128xf32>
    %cst_188 = arith.constant dense<0.000000e+00> : vector<128x128xf32>
    %191 = tpu.matmul %187, %190, %cst_188 {dimension_numbers = #tpu.dot_dimension_numbers<[1], [0], [0], [1], [0, 0, 1, 1], [], []>} : vector<128x128xf32>, vector<128x128xf32>, vector<128x128xf32> -> vector<128x128xf32>
    %192 = arith.addf %178, %191 : vector<128x128xf32>
    %c50_189 = arith.constant 50 : index
    %c0_190 = arith.constant 0 : index
    %193 = vector.load %arg13[%c50_189, %c0_190] : memref<288x128xf32, #tpu.memory_space<vmem>>, vector<16x128xf32>
    %c74_191 = arith.constant 74 : index
    %c0_192 = arith.constant 0 : index
    %194 = vector.load %arg13[%c74_191, %c0_192] : memref<288x128xf32, #tpu.memory_space<vmem>>, vector<16x128xf32>
    %c98_193 = arith.constant 98 : index
    %c0_194 = arith.constant 0 : index
    %195 = vector.load %arg13[%c98_193, %c0_194] : memref<288x128xf32, #tpu.memory_space<vmem>>, vector<16x128xf32>
    %c122_195 = arith.constant 122 : index
    %c0_196 = arith.constant 0 : index
    %196 = vector.load %arg13[%c122_195, %c0_196] : memref<288x128xf32, #tpu.memory_space<vmem>>, vector<16x128xf32>
    %c146_197 = arith.constant 146 : index
    %c0_198 = arith.constant 0 : index
    %197 = vector.load %arg13[%c146_197, %c0_198] : memref<288x128xf32, #tpu.memory_space<vmem>>, vector<16x128xf32>
    %c170_199 = arith.constant 170 : index
    %c0_200 = arith.constant 0 : index
    %198 = vector.load %arg13[%c170_199, %c0_200] : memref<288x128xf32, #tpu.memory_space<vmem>>, vector<16x128xf32>
    %c194_201 = arith.constant 194 : index
    %c0_202 = arith.constant 0 : index
    %199 = vector.load %arg13[%c194_201, %c0_202] : memref<288x128xf32, #tpu.memory_space<vmem>>, vector<16x128xf32>
    %c218 = arith.constant 218 : index
    %c0_203 = arith.constant 0 : index
    %200 = vector.load %arg13[%c218, %c0_203] : memref<288x128xf32, #tpu.memory_space<vmem>>, vector<16x128xf32>
    %201 = tpu.concatenate %193, %194, %195, %196, %197, %198, %199, %200 in 0 : vector<16x128xf32>, vector<16x128xf32>, vector<16x128xf32>, vector<16x128xf32>, vector<16x128xf32>, vector<16x128xf32>, vector<16x128xf32>, vector<16x128xf32> -> vector<128x128xf32>
    %c11 = arith.constant 11 : index
    %c0_204 = arith.constant 0 : index
    %c0_205 = arith.constant 0 : index
    %202 = vector.load %arg14[%c11, %c0_204, %c0_205] : memref<25x128x128xbf16, #tpu.memory_space<vmem>>, vector<1x128x128xbf16>
    %203 = vector.shape_cast %202 : vector<1x128x128xbf16> to vector<128x128xbf16>
    %204 = arith.extf %203 : vector<128x128xbf16> to vector<128x128xf32>
    %cst_206 = arith.constant dense<0.000000e+00> : vector<128x128xf32>
    %205 = tpu.matmul %201, %204, %cst_206 {dimension_numbers = #tpu.dot_dimension_numbers<[1], [0], [0], [1], [0, 0, 1, 1], [], []>} : vector<128x128xf32>, vector<128x128xf32>, vector<128x128xf32> -> vector<128x128xf32>
    %206 = arith.addf %192, %205 : vector<128x128xf32>
    %c52_207 = arith.constant 52 : index
    %c0_208 = arith.constant 0 : index
    %207 = vector.load %arg13[%c52_207, %c0_208] : memref<288x128xf32, #tpu.memory_space<vmem>>, vector<16x128xf32>
    %c76_209 = arith.constant 76 : index
    %c0_210 = arith.constant 0 : index
    %208 = vector.load %arg13[%c76_209, %c0_210] : memref<288x128xf32, #tpu.memory_space<vmem>>, vector<16x128xf32>
    %c100_211 = arith.constant 100 : index
    %c0_212 = arith.constant 0 : index
    %209 = vector.load %arg13[%c100_211, %c0_212] : memref<288x128xf32, #tpu.memory_space<vmem>>, vector<16x128xf32>
    %c124_213 = arith.constant 124 : index
    %c0_214 = arith.constant 0 : index
    %210 = vector.load %arg13[%c124_213, %c0_214] : memref<288x128xf32, #tpu.memory_space<vmem>>, vector<16x128xf32>
    %c148_215 = arith.constant 148 : index
    %c0_216 = arith.constant 0 : index
    %211 = vector.load %arg13[%c148_215, %c0_216] : memref<288x128xf32, #tpu.memory_space<vmem>>, vector<16x128xf32>
    %c172_217 = arith.constant 172 : index
    %c0_218 = arith.constant 0 : index
    %212 = vector.load %arg13[%c172_217, %c0_218] : memref<288x128xf32, #tpu.memory_space<vmem>>, vector<16x128xf32>
    %c196_219 = arith.constant 196 : index
    %c0_220 = arith.constant 0 : index
    %213 = vector.load %arg13[%c196_219, %c0_220] : memref<288x128xf32, #tpu.memory_space<vmem>>, vector<16x128xf32>
    %c220 = arith.constant 220 : index
    %c0_221 = arith.constant 0 : index
    %214 = vector.load %arg13[%c220, %c0_221] : memref<288x128xf32, #tpu.memory_space<vmem>>, vector<16x128xf32>
    %215 = tpu.concatenate %207, %208, %209, %210, %211, %212, %213, %214 in 0 : vector<16x128xf32>, vector<16x128xf32>, vector<16x128xf32>, vector<16x128xf32>, vector<16x128xf32>, vector<16x128xf32>, vector<16x128xf32>, vector<16x128xf32> -> vector<128x128xf32>
    %c12 = arith.constant 12 : index
    %c0_222 = arith.constant 0 : index
    %c0_223 = arith.constant 0 : index
    %216 = vector.load %arg14[%c12, %c0_222, %c0_223] : memref<25x128x128xbf16, #tpu.memory_space<vmem>>, vector<1x128x128xbf16>
    %217 = vector.shape_cast %216 : vector<1x128x128xbf16> to vector<128x128xbf16>
    %218 = arith.extf %217 : vector<128x128xbf16> to vector<128x128xf32>
    %cst_224 = arith.constant dense<0.000000e+00> : vector<128x128xf32>
    %219 = tpu.matmul %215, %218, %cst_224 {dimension_numbers = #tpu.dot_dimension_numbers<[1], [0], [0], [1], [0, 0, 1, 1], [], []>} : vector<128x128xf32>, vector<128x128xf32>, vector<128x128xf32> -> vector<128x128xf32>
    %220 = arith.addf %206, %219 : vector<128x128xf32>
    %c54_225 = arith.constant 54 : index
    %c0_226 = arith.constant 0 : index
    %221 = vector.load %arg13[%c54_225, %c0_226] : memref<288x128xf32, #tpu.memory_space<vmem>>, vector<16x128xf32>
    %c78_227 = arith.constant 78 : index
    %c0_228 = arith.constant 0 : index
    %222 = vector.load %arg13[%c78_227, %c0_228] : memref<288x128xf32, #tpu.memory_space<vmem>>, vector<16x128xf32>
    %c102_229 = arith.constant 102 : index
    %c0_230 = arith.constant 0 : index
    %223 = vector.load %arg13[%c102_229, %c0_230] : memref<288x128xf32, #tpu.memory_space<vmem>>, vector<16x128xf32>
    %c126_231 = arith.constant 126 : index
    %c0_232 = arith.constant 0 : index
    %224 = vector.load %arg13[%c126_231, %c0_232] : memref<288x128xf32, #tpu.memory_space<vmem>>, vector<16x128xf32>
    %c150_233 = arith.constant 150 : index
    %c0_234 = arith.constant 0 : index
    %225 = vector.load %arg13[%c150_233, %c0_234] : memref<288x128xf32, #tpu.memory_space<vmem>>, vector<16x128xf32>
    %c174_235 = arith.constant 174 : index
    %c0_236 = arith.constant 0 : index
    %226 = vector.load %arg13[%c174_235, %c0_236] : memref<288x128xf32, #tpu.memory_space<vmem>>, vector<16x128xf32>
    %c198_237 = arith.constant 198 : index
    %c0_238 = arith.constant 0 : index
    %227 = vector.load %arg13[%c198_237, %c0_238] : memref<288x128xf32, #tpu.memory_space<vmem>>, vector<16x128xf32>
    %c222 = arith.constant 222 : index
    %c0_239 = arith.constant 0 : index
    %228 = vector.load %arg13[%c222, %c0_239] : memref<288x128xf32, #tpu.memory_space<vmem>>, vector<16x128xf32>
    %229 = tpu.concatenate %221, %222, %223, %224, %225, %226, %227, %228 in 0 : vector<16x128xf32>, vector<16x128xf32>, vector<16x128xf32>, vector<16x128xf32>, vector<16x128xf32>, vector<16x128xf32>, vector<16x128xf32>, vector<16x128xf32> -> vector<128x128xf32>
    %c13 = arith.constant 13 : index
    %c0_240 = arith.constant 0 : index
    %c0_241 = arith.constant 0 : index
    %230 = vector.load %arg14[%c13, %c0_240, %c0_241] : memref<25x128x128xbf16, #tpu.memory_space<vmem>>, vector<1x128x128xbf16>
    %231 = vector.shape_cast %230 : vector<1x128x128xbf16> to vector<128x128xbf16>
    %232 = arith.extf %231 : vector<128x128xbf16> to vector<128x128xf32>
    %cst_242 = arith.constant dense<0.000000e+00> : vector<128x128xf32>
    %233 = tpu.matmul %229, %232, %cst_242 {dimension_numbers = #tpu.dot_dimension_numbers<[1], [0], [0], [1], [0, 0, 1, 1], [], []>} : vector<128x128xf32>, vector<128x128xf32>, vector<128x128xf32> -> vector<128x128xf32>
    %234 = arith.addf %220, %233 : vector<128x128xf32>
    %c56_243 = arith.constant 56 : index
    %c0_244 = arith.constant 0 : index
    %235 = vector.load %arg13[%c56_243, %c0_244] : memref<288x128xf32, #tpu.memory_space<vmem>>, vector<16x128xf32>
    %c80_245 = arith.constant 80 : index
    %c0_246 = arith.constant 0 : index
    %236 = vector.load %arg13[%c80_245, %c0_246] : memref<288x128xf32, #tpu.memory_space<vmem>>, vector<16x128xf32>
    %c104_247 = arith.constant 104 : index
    %c0_248 = arith.constant 0 : index
    %237 = vector.load %arg13[%c104_247, %c0_248] : memref<288x128xf32, #tpu.memory_space<vmem>>, vector<16x128xf32>
    %c128_249 = arith.constant 128 : index
    %c0_250 = arith.constant 0 : index
    %238 = vector.load %arg13[%c128_249, %c0_250] : memref<288x128xf32, #tpu.memory_space<vmem>>, vector<16x128xf32>
    %c152_251 = arith.constant 152 : index
    %c0_252 = arith.constant 0 : index
    %239 = vector.load %arg13[%c152_251, %c0_252] : memref<288x128xf32, #tpu.memory_space<vmem>>, vector<16x128xf32>
    %c176_253 = arith.constant 176 : index
    %c0_254 = arith.constant 0 : index
    %240 = vector.load %arg13[%c176_253, %c0_254] : memref<288x128xf32, #tpu.memory_space<vmem>>, vector<16x128xf32>
    %c200_255 = arith.constant 200 : index
    %c0_256 = arith.constant 0 : index
    %241 = vector.load %arg13[%c200_255, %c0_256] : memref<288x128xf32, #tpu.memory_space<vmem>>, vector<16x128xf32>
    %c224 = arith.constant 224 : index
    %c0_257 = arith.constant 0 : index
    %242 = vector.load %arg13[%c224, %c0_257] : memref<288x128xf32, #tpu.memory_space<vmem>>, vector<16x128xf32>
    %243 = tpu.concatenate %235, %236, %237, %238, %239, %240, %241, %242 in 0 : vector<16x128xf32>, vector<16x128xf32>, vector<16x128xf32>, vector<16x128xf32>, vector<16x128xf32>, vector<16x128xf32>, vector<16x128xf32>, vector<16x128xf32> -> vector<128x128xf32>
    %c14 = arith.constant 14 : index
    %c0_258 = arith.constant 0 : index
    %c0_259 = arith.constant 0 : index
    %244 = vector.load %arg14[%c14, %c0_258, %c0_259] : memref<25x128x128xbf16, #tpu.memory_space<vmem>>, vector<1x128x128xbf16>
    %245 = vector.shape_cast %244 : vector<1x128x128xbf16> to vector<128x128xbf16>
    %246 = arith.extf %245 : vector<128x128xbf16> to vector<128x128xf32>
    %cst_260 = arith.constant dense<0.000000e+00> : vector<128x128xf32>
    %247 = tpu.matmul %243, %246, %cst_260 {dimension_numbers = #tpu.dot_dimension_numbers<[1], [0], [0], [1], [0, 0, 1, 1], [], []>} : vector<128x128xf32>, vector<128x128xf32>, vector<128x128xf32> -> vector<128x128xf32>
    %248 = arith.addf %234, %247 : vector<128x128xf32>
    %c72_261 = arith.constant 72 : index
    %c0_262 = arith.constant 0 : index
    %249 = vector.load %arg13[%c72_261, %c0_262] : memref<288x128xf32, #tpu.memory_space<vmem>>, vector<16x128xf32>
    %c96_263 = arith.constant 96 : index
    %c0_264 = arith.constant 0 : index
    %250 = vector.load %arg13[%c96_263, %c0_264] : memref<288x128xf32, #tpu.memory_space<vmem>>, vector<16x128xf32>
    %c120_265 = arith.constant 120 : index
    %c0_266 = arith.constant 0 : index
    %251 = vector.load %arg13[%c120_265, %c0_266] : memref<288x128xf32, #tpu.memory_space<vmem>>, vector<16x128xf32>
    %c144_267 = arith.constant 144 : index
    %c0_268 = arith.constant 0 : index
    %252 = vector.load %arg13[%c144_267, %c0_268] : memref<288x128xf32, #tpu.memory_space<vmem>>, vector<16x128xf32>
    %c168_269 = arith.constant 168 : index
    %c0_270 = arith.constant 0 : index
    %253 = vector.load %arg13[%c168_269, %c0_270] : memref<288x128xf32, #tpu.memory_space<vmem>>, vector<16x128xf32>
    %c192_271 = arith.constant 192 : index
    %c0_272 = arith.constant 0 : index
    %254 = vector.load %arg13[%c192_271, %c0_272] : memref<288x128xf32, #tpu.memory_space<vmem>>, vector<16x128xf32>
    %c216_273 = arith.constant 216 : index
    %c0_274 = arith.constant 0 : index
    %255 = vector.load %arg13[%c216_273, %c0_274] : memref<288x128xf32, #tpu.memory_space<vmem>>, vector<16x128xf32>
    %c240 = arith.constant 240 : index
    %c0_275 = arith.constant 0 : index
    %256 = vector.load %arg13[%c240, %c0_275] : memref<288x128xf32, #tpu.memory_space<vmem>>, vector<16x128xf32>
    %257 = tpu.concatenate %249, %250, %251, %252, %253, %254, %255, %256 in 0 : vector<16x128xf32>, vector<16x128xf32>, vector<16x128xf32>, vector<16x128xf32>, vector<16x128xf32>, vector<16x128xf32>, vector<16x128xf32>, vector<16x128xf32> -> vector<128x128xf32>
    %c15 = arith.constant 15 : index
    %c0_276 = arith.constant 0 : index
    %c0_277 = arith.constant 0 : index
    %258 = vector.load %arg14[%c15, %c0_276, %c0_277] : memref<25x128x128xbf16, #tpu.memory_space<vmem>>, vector<1x128x128xbf16>
    %259 = vector.shape_cast %258 : vector<1x128x128xbf16> to vector<128x128xbf16>
    %260 = arith.extf %259 : vector<128x128xbf16> to vector<128x128xf32>
    %cst_278 = arith.constant dense<0.000000e+00> : vector<128x128xf32>
    %261 = tpu.matmul %257, %260, %cst_278 {dimension_numbers = #tpu.dot_dimension_numbers<[1], [0], [0], [1], [0, 0, 1, 1], [], []>} : vector<128x128xf32>, vector<128x128xf32>, vector<128x128xf32> -> vector<128x128xf32>
    %262 = arith.addf %248, %261 : vector<128x128xf32>
    %c74_279 = arith.constant 74 : index
    %c0_280 = arith.constant 0 : index
    %263 = vector.load %arg13[%c74_279, %c0_280] : memref<288x128xf32, #tpu.memory_space<vmem>>, vector<16x128xf32>
    %c98_281 = arith.constant 98 : index
    %c0_282 = arith.constant 0 : index
    %264 = vector.load %arg13[%c98_281, %c0_282] : memref<288x128xf32, #tpu.memory_space<vmem>>, vector<16x128xf32>
    %c122_283 = arith.constant 122 : index
    %c0_284 = arith.constant 0 : index
    %265 = vector.load %arg13[%c122_283, %c0_284] : memref<288x128xf32, #tpu.memory_space<vmem>>, vector<16x128xf32>
    %c146_285 = arith.constant 146 : index
    %c0_286 = arith.constant 0 : index
    %266 = vector.load %arg13[%c146_285, %c0_286] : memref<288x128xf32, #tpu.memory_space<vmem>>, vector<16x128xf32>
    %c170_287 = arith.constant 170 : index
    %c0_288 = arith.constant 0 : index
    %267 = vector.load %arg13[%c170_287, %c0_288] : memref<288x128xf32, #tpu.memory_space<vmem>>, vector<16x128xf32>
    %c194_289 = arith.constant 194 : index
    %c0_290 = arith.constant 0 : index
    %268 = vector.load %arg13[%c194_289, %c0_290] : memref<288x128xf32, #tpu.memory_space<vmem>>, vector<16x128xf32>
    %c218_291 = arith.constant 218 : index
    %c0_292 = arith.constant 0 : index
    %269 = vector.load %arg13[%c218_291, %c0_292] : memref<288x128xf32, #tpu.memory_space<vmem>>, vector<16x128xf32>
    %c242 = arith.constant 242 : index
    %c0_293 = arith.constant 0 : index
    %270 = vector.load %arg13[%c242, %c0_293] : memref<288x128xf32, #tpu.memory_space<vmem>>, vector<16x128xf32>
    %271 = tpu.concatenate %263, %264, %265, %266, %267, %268, %269, %270 in 0 : vector<16x128xf32>, vector<16x128xf32>, vector<16x128xf32>, vector<16x128xf32>, vector<16x128xf32>, vector<16x128xf32>, vector<16x128xf32>, vector<16x128xf32> -> vector<128x128xf32>
    %c16 = arith.constant 16 : index
    %c0_294 = arith.constant 0 : index
    %c0_295 = arith.constant 0 : index
    %272 = vector.load %arg14[%c16, %c0_294, %c0_295] : memref<25x128x128xbf16, #tpu.memory_space<vmem>>, vector<1x128x128xbf16>
    %273 = vector.shape_cast %272 : vector<1x128x128xbf16> to vector<128x128xbf16>
    %274 = arith.extf %273 : vector<128x128xbf16> to vector<128x128xf32>
    %cst_296 = arith.constant dense<0.000000e+00> : vector<128x128xf32>
    %275 = tpu.matmul %271, %274, %cst_296 {dimension_numbers = #tpu.dot_dimension_numbers<[1], [0], [0], [1], [0, 0, 1, 1], [], []>} : vector<128x128xf32>, vector<128x128xf32>, vector<128x128xf32> -> vector<128x128xf32>
    %276 = arith.addf %262, %275 : vector<128x128xf32>
    %c76_297 = arith.constant 76 : index
    %c0_298 = arith.constant 0 : index
    %277 = vector.load %arg13[%c76_297, %c0_298] : memref<288x128xf32, #tpu.memory_space<vmem>>, vector<16x128xf32>
    %c100_299 = arith.constant 100 : index
    %c0_300 = arith.constant 0 : index
    %278 = vector.load %arg13[%c100_299, %c0_300] : memref<288x128xf32, #tpu.memory_space<vmem>>, vector<16x128xf32>
    %c124_301 = arith.constant 124 : index
    %c0_302 = arith.constant 0 : index
    %279 = vector.load %arg13[%c124_301, %c0_302] : memref<288x128xf32, #tpu.memory_space<vmem>>, vector<16x128xf32>
    %c148_303 = arith.constant 148 : index
    %c0_304 = arith.constant 0 : index
    %280 = vector.load %arg13[%c148_303, %c0_304] : memref<288x128xf32, #tpu.memory_space<vmem>>, vector<16x128xf32>
    %c172_305 = arith.constant 172 : index
    %c0_306 = arith.constant 0 : index
    %281 = vector.load %arg13[%c172_305, %c0_306] : memref<288x128xf32, #tpu.memory_space<vmem>>, vector<16x128xf32>
    %c196_307 = arith.constant 196 : index
    %c0_308 = arith.constant 0 : index
    %282 = vector.load %arg13[%c196_307, %c0_308] : memref<288x128xf32, #tpu.memory_space<vmem>>, vector<16x128xf32>
    %c220_309 = arith.constant 220 : index
    %c0_310 = arith.constant 0 : index
    %283 = vector.load %arg13[%c220_309, %c0_310] : memref<288x128xf32, #tpu.memory_space<vmem>>, vector<16x128xf32>
    %c244 = arith.constant 244 : index
    %c0_311 = arith.constant 0 : index
    %284 = vector.load %arg13[%c244, %c0_311] : memref<288x128xf32, #tpu.memory_space<vmem>>, vector<16x128xf32>
    %285 = tpu.concatenate %277, %278, %279, %280, %281, %282, %283, %284 in 0 : vector<16x128xf32>, vector<16x128xf32>, vector<16x128xf32>, vector<16x128xf32>, vector<16x128xf32>, vector<16x128xf32>, vector<16x128xf32>, vector<16x128xf32> -> vector<128x128xf32>
    %c17 = arith.constant 17 : index
    %c0_312 = arith.constant 0 : index
    %c0_313 = arith.constant 0 : index
    %286 = vector.load %arg14[%c17, %c0_312, %c0_313] : memref<25x128x128xbf16, #tpu.memory_space<vmem>>, vector<1x128x128xbf16>
    %287 = vector.shape_cast %286 : vector<1x128x128xbf16> to vector<128x128xbf16>
    %288 = arith.extf %287 : vector<128x128xbf16> to vector<128x128xf32>
    %cst_314 = arith.constant dense<0.000000e+00> : vector<128x128xf32>
    %289 = tpu.matmul %285, %288, %cst_314 {dimension_numbers = #tpu.dot_dimension_numbers<[1], [0], [0], [1], [0, 0, 1, 1], [], []>} : vector<128x128xf32>, vector<128x128xf32>, vector<128x128xf32> -> vector<128x128xf32>
    %290 = arith.addf %276, %289 : vector<128x128xf32>
    %c78_315 = arith.constant 78 : index
    %c0_316 = arith.constant 0 : index
    %291 = vector.load %arg13[%c78_315, %c0_316] : memref<288x128xf32, #tpu.memory_space<vmem>>, vector<16x128xf32>
    %c102_317 = arith.constant 102 : index
    %c0_318 = arith.constant 0 : index
    %292 = vector.load %arg13[%c102_317, %c0_318] : memref<288x128xf32, #tpu.memory_space<vmem>>, vector<16x128xf32>
    %c126_319 = arith.constant 126 : index
    %c0_320 = arith.constant 0 : index
    %293 = vector.load %arg13[%c126_319, %c0_320] : memref<288x128xf32, #tpu.memory_space<vmem>>, vector<16x128xf32>
    %c150_321 = arith.constant 150 : index
    %c0_322 = arith.constant 0 : index
    %294 = vector.load %arg13[%c150_321, %c0_322] : memref<288x128xf32, #tpu.memory_space<vmem>>, vector<16x128xf32>
    %c174_323 = arith.constant 174 : index
    %c0_324 = arith.constant 0 : index
    %295 = vector.load %arg13[%c174_323, %c0_324] : memref<288x128xf32, #tpu.memory_space<vmem>>, vector<16x128xf32>
    %c198_325 = arith.constant 198 : index
    %c0_326 = arith.constant 0 : index
    %296 = vector.load %arg13[%c198_325, %c0_326] : memref<288x128xf32, #tpu.memory_space<vmem>>, vector<16x128xf32>
    %c222_327 = arith.constant 222 : index
    %c0_328 = arith.constant 0 : index
    %297 = vector.load %arg13[%c222_327, %c0_328] : memref<288x128xf32, #tpu.memory_space<vmem>>, vector<16x128xf32>
    %c246 = arith.constant 246 : index
    %c0_329 = arith.constant 0 : index
    %298 = vector.load %arg13[%c246, %c0_329] : memref<288x128xf32, #tpu.memory_space<vmem>>, vector<16x128xf32>
    %299 = tpu.concatenate %291, %292, %293, %294, %295, %296, %297, %298 in 0 : vector<16x128xf32>, vector<16x128xf32>, vector<16x128xf32>, vector<16x128xf32>, vector<16x128xf32>, vector<16x128xf32>, vector<16x128xf32>, vector<16x128xf32> -> vector<128x128xf32>
    %c18 = arith.constant 18 : index
    %c0_330 = arith.constant 0 : index
    %c0_331 = arith.constant 0 : index
    %300 = vector.load %arg14[%c18, %c0_330, %c0_331] : memref<25x128x128xbf16, #tpu.memory_space<vmem>>, vector<1x128x128xbf16>
    %301 = vector.shape_cast %300 : vector<1x128x128xbf16> to vector<128x128xbf16>
    %302 = arith.extf %301 : vector<128x128xbf16> to vector<128x128xf32>
    %cst_332 = arith.constant dense<0.000000e+00> : vector<128x128xf32>
    %303 = tpu.matmul %299, %302, %cst_332 {dimension_numbers = #tpu.dot_dimension_numbers<[1], [0], [0], [1], [0, 0, 1, 1], [], []>} : vector<128x128xf32>, vector<128x128xf32>, vector<128x128xf32> -> vector<128x128xf32>
    %304 = arith.addf %290, %303 : vector<128x128xf32>
    %c80_333 = arith.constant 80 : index
    %c0_334 = arith.constant 0 : index
    %305 = vector.load %arg13[%c80_333, %c0_334] : memref<288x128xf32, #tpu.memory_space<vmem>>, vector<16x128xf32>
    %c104_335 = arith.constant 104 : index
    %c0_336 = arith.constant 0 : index
    %306 = vector.load %arg13[%c104_335, %c0_336] : memref<288x128xf32, #tpu.memory_space<vmem>>, vector<16x128xf32>
    %c128_337 = arith.constant 128 : index
    %c0_338 = arith.constant 0 : index
    %307 = vector.load %arg13[%c128_337, %c0_338] : memref<288x128xf32, #tpu.memory_space<vmem>>, vector<16x128xf32>
    %c152_339 = arith.constant 152 : index
    %c0_340 = arith.constant 0 : index
    %308 = vector.load %arg13[%c152_339, %c0_340] : memref<288x128xf32, #tpu.memory_space<vmem>>, vector<16x128xf32>
    %c176_341 = arith.constant 176 : index
    %c0_342 = arith.constant 0 : index
    %309 = vector.load %arg13[%c176_341, %c0_342] : memref<288x128xf32, #tpu.memory_space<vmem>>, vector<16x128xf32>
    %c200_343 = arith.constant 200 : index
    %c0_344 = arith.constant 0 : index
    %310 = vector.load %arg13[%c200_343, %c0_344] : memref<288x128xf32, #tpu.memory_space<vmem>>, vector<16x128xf32>
    %c224_345 = arith.constant 224 : index
    %c0_346 = arith.constant 0 : index
    %311 = vector.load %arg13[%c224_345, %c0_346] : memref<288x128xf32, #tpu.memory_space<vmem>>, vector<16x128xf32>
    %c248 = arith.constant 248 : index
    %c0_347 = arith.constant 0 : index
    %312 = vector.load %arg13[%c248, %c0_347] : memref<288x128xf32, #tpu.memory_space<vmem>>, vector<16x128xf32>
    %313 = tpu.concatenate %305, %306, %307, %308, %309, %310, %311, %312 in 0 : vector<16x128xf32>, vector<16x128xf32>, vector<16x128xf32>, vector<16x128xf32>, vector<16x128xf32>, vector<16x128xf32>, vector<16x128xf32>, vector<16x128xf32> -> vector<128x128xf32>
    %c19 = arith.constant 19 : index
    %c0_348 = arith.constant 0 : index
    %c0_349 = arith.constant 0 : index
    %314 = vector.load %arg14[%c19, %c0_348, %c0_349] : memref<25x128x128xbf16, #tpu.memory_space<vmem>>, vector<1x128x128xbf16>
    %315 = vector.shape_cast %314 : vector<1x128x128xbf16> to vector<128x128xbf16>
    %316 = arith.extf %315 : vector<128x128xbf16> to vector<128x128xf32>
    %cst_350 = arith.constant dense<0.000000e+00> : vector<128x128xf32>
    %317 = tpu.matmul %313, %316, %cst_350 {dimension_numbers = #tpu.dot_dimension_numbers<[1], [0], [0], [1], [0, 0, 1, 1], [], []>} : vector<128x128xf32>, vector<128x128xf32>, vector<128x128xf32> -> vector<128x128xf32>
    %318 = arith.addf %304, %317 : vector<128x128xf32>
    %c96_351 = arith.constant 96 : index
    %c0_352 = arith.constant 0 : index
    %319 = vector.load %arg13[%c96_351, %c0_352] : memref<288x128xf32, #tpu.memory_space<vmem>>, vector<16x128xf32>
    %c120_353 = arith.constant 120 : index
    %c0_354 = arith.constant 0 : index
    %320 = vector.load %arg13[%c120_353, %c0_354] : memref<288x128xf32, #tpu.memory_space<vmem>>, vector<16x128xf32>
    %c144_355 = arith.constant 144 : index
    %c0_356 = arith.constant 0 : index
    %321 = vector.load %arg13[%c144_355, %c0_356] : memref<288x128xf32, #tpu.memory_space<vmem>>, vector<16x128xf32>
    %c168_357 = arith.constant 168 : index
    %c0_358 = arith.constant 0 : index
    %322 = vector.load %arg13[%c168_357, %c0_358] : memref<288x128xf32, #tpu.memory_space<vmem>>, vector<16x128xf32>
    %c192_359 = arith.constant 192 : index
    %c0_360 = arith.constant 0 : index
    %323 = vector.load %arg13[%c192_359, %c0_360] : memref<288x128xf32, #tpu.memory_space<vmem>>, vector<16x128xf32>
    %c216_361 = arith.constant 216 : index
    %c0_362 = arith.constant 0 : index
    %324 = vector.load %arg13[%c216_361, %c0_362] : memref<288x128xf32, #tpu.memory_space<vmem>>, vector<16x128xf32>
    %c240_363 = arith.constant 240 : index
    %c0_364 = arith.constant 0 : index
    %325 = vector.load %arg13[%c240_363, %c0_364] : memref<288x128xf32, #tpu.memory_space<vmem>>, vector<16x128xf32>
    %c264 = arith.constant 264 : index
    %c0_365 = arith.constant 0 : index
    %326 = vector.load %arg13[%c264, %c0_365] : memref<288x128xf32, #tpu.memory_space<vmem>>, vector<16x128xf32>
    %327 = tpu.concatenate %319, %320, %321, %322, %323, %324, %325, %326 in 0 : vector<16x128xf32>, vector<16x128xf32>, vector<16x128xf32>, vector<16x128xf32>, vector<16x128xf32>, vector<16x128xf32>, vector<16x128xf32>, vector<16x128xf32> -> vector<128x128xf32>
    %c20 = arith.constant 20 : index
    %c0_366 = arith.constant 0 : index
    %c0_367 = arith.constant 0 : index
    %328 = vector.load %arg14[%c20, %c0_366, %c0_367] : memref<25x128x128xbf16, #tpu.memory_space<vmem>>, vector<1x128x128xbf16>
    %329 = vector.shape_cast %328 : vector<1x128x128xbf16> to vector<128x128xbf16>
    %330 = arith.extf %329 : vector<128x128xbf16> to vector<128x128xf32>
    %cst_368 = arith.constant dense<0.000000e+00> : vector<128x128xf32>
    %331 = tpu.matmul %327, %330, %cst_368 {dimension_numbers = #tpu.dot_dimension_numbers<[1], [0], [0], [1], [0, 0, 1, 1], [], []>} : vector<128x128xf32>, vector<128x128xf32>, vector<128x128xf32> -> vector<128x128xf32>
    %332 = arith.addf %318, %331 : vector<128x128xf32>
    %c98_369 = arith.constant 98 : index
    %c0_370 = arith.constant 0 : index
    %333 = vector.load %arg13[%c98_369, %c0_370] : memref<288x128xf32, #tpu.memory_space<vmem>>, vector<16x128xf32>
    %c122_371 = arith.constant 122 : index
    %c0_372 = arith.constant 0 : index
    %334 = vector.load %arg13[%c122_371, %c0_372] : memref<288x128xf32, #tpu.memory_space<vmem>>, vector<16x128xf32>
    %c146_373 = arith.constant 146 : index
    %c0_374 = arith.constant 0 : index
    %335 = vector.load %arg13[%c146_373, %c0_374] : memref<288x128xf32, #tpu.memory_space<vmem>>, vector<16x128xf32>
    %c170_375 = arith.constant 170 : index
    %c0_376 = arith.constant 0 : index
    %336 = vector.load %arg13[%c170_375, %c0_376] : memref<288x128xf32, #tpu.memory_space<vmem>>, vector<16x128xf32>
    %c194_377 = arith.constant 194 : index
    %c0_378 = arith.constant 0 : index
    %337 = vector.load %arg13[%c194_377, %c0_378] : memref<288x128xf32, #tpu.memory_space<vmem>>, vector<16x128xf32>
    %c218_379 = arith.constant 218 : index
    %c0_380 = arith.constant 0 : index
    %338 = vector.load %arg13[%c218_379, %c0_380] : memref<288x128xf32, #tpu.memory_space<vmem>>, vector<16x128xf32>
    %c242_381 = arith.constant 242 : index
    %c0_382 = arith.constant 0 : index
    %339 = vector.load %arg13[%c242_381, %c0_382] : memref<288x128xf32, #tpu.memory_space<vmem>>, vector<16x128xf32>
    %c266 = arith.constant 266 : index
    %c0_383 = arith.constant 0 : index
    %340 = vector.load %arg13[%c266, %c0_383] : memref<288x128xf32, #tpu.memory_space<vmem>>, vector<16x128xf32>
    %341 = tpu.concatenate %333, %334, %335, %336, %337, %338, %339, %340 in 0 : vector<16x128xf32>, vector<16x128xf32>, vector<16x128xf32>, vector<16x128xf32>, vector<16x128xf32>, vector<16x128xf32>, vector<16x128xf32>, vector<16x128xf32> -> vector<128x128xf32>
    %c21 = arith.constant 21 : index
    %c0_384 = arith.constant 0 : index
    %c0_385 = arith.constant 0 : index
    %342 = vector.load %arg14[%c21, %c0_384, %c0_385] : memref<25x128x128xbf16, #tpu.memory_space<vmem>>, vector<1x128x128xbf16>
    %343 = vector.shape_cast %342 : vector<1x128x128xbf16> to vector<128x128xbf16>
    %344 = arith.extf %343 : vector<128x128xbf16> to vector<128x128xf32>
    %cst_386 = arith.constant dense<0.000000e+00> : vector<128x128xf32>
    %345 = tpu.matmul %341, %344, %cst_386 {dimension_numbers = #tpu.dot_dimension_numbers<[1], [0], [0], [1], [0, 0, 1, 1], [], []>} : vector<128x128xf32>, vector<128x128xf32>, vector<128x128xf32> -> vector<128x128xf32>
    %346 = arith.addf %332, %345 : vector<128x128xf32>
    %c100_387 = arith.constant 100 : index
    %c0_388 = arith.constant 0 : index
    %347 = vector.load %arg13[%c100_387, %c0_388] : memref<288x128xf32, #tpu.memory_space<vmem>>, vector<16x128xf32>
    %c124_389 = arith.constant 124 : index
    %c0_390 = arith.constant 0 : index
    %348 = vector.load %arg13[%c124_389, %c0_390] : memref<288x128xf32, #tpu.memory_space<vmem>>, vector<16x128xf32>
    %c148_391 = arith.constant 148 : index
    %c0_392 = arith.constant 0 : index
    %349 = vector.load %arg13[%c148_391, %c0_392] : memref<288x128xf32, #tpu.memory_space<vmem>>, vector<16x128xf32>
    %c172_393 = arith.constant 172 : index
    %c0_394 = arith.constant 0 : index
    %350 = vector.load %arg13[%c172_393, %c0_394] : memref<288x128xf32, #tpu.memory_space<vmem>>, vector<16x128xf32>
    %c196_395 = arith.constant 196 : index
    %c0_396 = arith.constant 0 : index
    %351 = vector.load %arg13[%c196_395, %c0_396] : memref<288x128xf32, #tpu.memory_space<vmem>>, vector<16x128xf32>
    %c220_397 = arith.constant 220 : index
    %c0_398 = arith.constant 0 : index
    %352 = vector.load %arg13[%c220_397, %c0_398] : memref<288x128xf32, #tpu.memory_space<vmem>>, vector<16x128xf32>
    %c244_399 = arith.constant 244 : index
    %c0_400 = arith.constant 0 : index
    %353 = vector.load %arg13[%c244_399, %c0_400] : memref<288x128xf32, #tpu.memory_space<vmem>>, vector<16x128xf32>
    %c268 = arith.constant 268 : index
    %c0_401 = arith.constant 0 : index
    %354 = vector.load %arg13[%c268, %c0_401] : memref<288x128xf32, #tpu.memory_space<vmem>>, vector<16x128xf32>
    %355 = tpu.concatenate %347, %348, %349, %350, %351, %352, %353, %354 in 0 : vector<16x128xf32>, vector<16x128xf32>, vector<16x128xf32>, vector<16x128xf32>, vector<16x128xf32>, vector<16x128xf32>, vector<16x128xf32>, vector<16x128xf32> -> vector<128x128xf32>
    %c22 = arith.constant 22 : index
    %c0_402 = arith.constant 0 : index
    %c0_403 = arith.constant 0 : index
    %356 = vector.load %arg14[%c22, %c0_402, %c0_403] : memref<25x128x128xbf16, #tpu.memory_space<vmem>>, vector<1x128x128xbf16>
    %357 = vector.shape_cast %356 : vector<1x128x128xbf16> to vector<128x128xbf16>
    %358 = arith.extf %357 : vector<128x128xbf16> to vector<128x128xf32>
    %cst_404 = arith.constant dense<0.000000e+00> : vector<128x128xf32>
    %359 = tpu.matmul %355, %358, %cst_404 {dimension_numbers = #tpu.dot_dimension_numbers<[1], [0], [0], [1], [0, 0, 1, 1], [], []>} : vector<128x128xf32>, vector<128x128xf32>, vector<128x128xf32> -> vector<128x128xf32>
    %360 = arith.addf %346, %359 : vector<128x128xf32>
    %c102_405 = arith.constant 102 : index
    %c0_406 = arith.constant 0 : index
    %361 = vector.load %arg13[%c102_405, %c0_406] : memref<288x128xf32, #tpu.memory_space<vmem>>, vector<16x128xf32>
    %c126_407 = arith.constant 126 : index
    %c0_408 = arith.constant 0 : index
    %362 = vector.load %arg13[%c126_407, %c0_408] : memref<288x128xf32, #tpu.memory_space<vmem>>, vector<16x128xf32>
    %c150_409 = arith.constant 150 : index
    %c0_410 = arith.constant 0 : index
    %363 = vector.load %arg13[%c150_409, %c0_410] : memref<288x128xf32, #tpu.memory_space<vmem>>, vector<16x128xf32>
    %c174_411 = arith.constant 174 : index
    %c0_412 = arith.constant 0 : index
    %364 = vector.load %arg13[%c174_411, %c0_412] : memref<288x128xf32, #tpu.memory_space<vmem>>, vector<16x128xf32>
    %c198_413 = arith.constant 198 : index
    %c0_414 = arith.constant 0 : index
    %365 = vector.load %arg13[%c198_413, %c0_414] : memref<288x128xf32, #tpu.memory_space<vmem>>, vector<16x128xf32>
    %c222_415 = arith.constant 222 : index
    %c0_416 = arith.constant 0 : index
    %366 = vector.load %arg13[%c222_415, %c0_416] : memref<288x128xf32, #tpu.memory_space<vmem>>, vector<16x128xf32>
    %c246_417 = arith.constant 246 : index
    %c0_418 = arith.constant 0 : index
    %367 = vector.load %arg13[%c246_417, %c0_418] : memref<288x128xf32, #tpu.memory_space<vmem>>, vector<16x128xf32>
    %c270 = arith.constant 270 : index
    %c0_419 = arith.constant 0 : index
    %368 = vector.load %arg13[%c270, %c0_419] : memref<288x128xf32, #tpu.memory_space<vmem>>, vector<16x128xf32>
    %369 = tpu.concatenate %361, %362, %363, %364, %365, %366, %367, %368 in 0 : vector<16x128xf32>, vector<16x128xf32>, vector<16x128xf32>, vector<16x128xf32>, vector<16x128xf32>, vector<16x128xf32>, vector<16x128xf32>, vector<16x128xf32> -> vector<128x128xf32>
    %c23 = arith.constant 23 : index
    %c0_420 = arith.constant 0 : index
    %c0_421 = arith.constant 0 : index
    %370 = vector.load %arg14[%c23, %c0_420, %c0_421] : memref<25x128x128xbf16, #tpu.memory_space<vmem>>, vector<1x128x128xbf16>
    %371 = vector.shape_cast %370 : vector<1x128x128xbf16> to vector<128x128xbf16>
    %372 = arith.extf %371 : vector<128x128xbf16> to vector<128x128xf32>
    %cst_422 = arith.constant dense<0.000000e+00> : vector<128x128xf32>
    %373 = tpu.matmul %369, %372, %cst_422 {dimension_numbers = #tpu.dot_dimension_numbers<[1], [0], [0], [1], [0, 0, 1, 1], [], []>} : vector<128x128xf32>, vector<128x128xf32>, vector<128x128xf32> -> vector<128x128xf32>
    %374 = arith.addf %360, %373 : vector<128x128xf32>
    %c104_423 = arith.constant 104 : index
    %c0_424 = arith.constant 0 : index
    %375 = vector.load %arg13[%c104_423, %c0_424] : memref<288x128xf32, #tpu.memory_space<vmem>>, vector<16x128xf32>
    %c128_425 = arith.constant 128 : index
    %c0_426 = arith.constant 0 : index
    %376 = vector.load %arg13[%c128_425, %c0_426] : memref<288x128xf32, #tpu.memory_space<vmem>>, vector<16x128xf32>
    %c152_427 = arith.constant 152 : index
    %c0_428 = arith.constant 0 : index
    %377 = vector.load %arg13[%c152_427, %c0_428] : memref<288x128xf32, #tpu.memory_space<vmem>>, vector<16x128xf32>
    %c176_429 = arith.constant 176 : index
    %c0_430 = arith.constant 0 : index
    %378 = vector.load %arg13[%c176_429, %c0_430] : memref<288x128xf32, #tpu.memory_space<vmem>>, vector<16x128xf32>
    %c200_431 = arith.constant 200 : index
    %c0_432 = arith.constant 0 : index
    %379 = vector.load %arg13[%c200_431, %c0_432] : memref<288x128xf32, #tpu.memory_space<vmem>>, vector<16x128xf32>
    %c224_433 = arith.constant 224 : index
    %c0_434 = arith.constant 0 : index
    %380 = vector.load %arg13[%c224_433, %c0_434] : memref<288x128xf32, #tpu.memory_space<vmem>>, vector<16x128xf32>
    %c248_435 = arith.constant 248 : index
    %c0_436 = arith.constant 0 : index
    %381 = vector.load %arg13[%c248_435, %c0_436] : memref<288x128xf32, #tpu.memory_space<vmem>>, vector<16x128xf32>
    %c272 = arith.constant 272 : index
    %c0_437 = arith.constant 0 : index
    %382 = vector.load %arg13[%c272, %c0_437] : memref<288x128xf32, #tpu.memory_space<vmem>>, vector<16x128xf32>
    %383 = tpu.concatenate %375, %376, %377, %378, %379, %380, %381, %382 in 0 : vector<16x128xf32>, vector<16x128xf32>, vector<16x128xf32>, vector<16x128xf32>, vector<16x128xf32>, vector<16x128xf32>, vector<16x128xf32>, vector<16x128xf32> -> vector<128x128xf32>
    %c24_438 = arith.constant 24 : index
    %c0_439 = arith.constant 0 : index
    %c0_440 = arith.constant 0 : index
    %384 = vector.load %arg14[%c24_438, %c0_439, %c0_440] : memref<25x128x128xbf16, #tpu.memory_space<vmem>>, vector<1x128x128xbf16>
    %385 = vector.shape_cast %384 : vector<1x128x128xbf16> to vector<128x128xbf16>
    %386 = arith.extf %385 : vector<128x128xbf16> to vector<128x128xf32>
    %cst_441 = arith.constant dense<0.000000e+00> : vector<128x128xf32>
    %387 = tpu.matmul %383, %386, %cst_441 {dimension_numbers = #tpu.dot_dimension_numbers<[1], [0], [0], [1], [0, 0, 1, 1], [], []>} : vector<128x128xf32>, vector<128x128xf32>, vector<128x128xf32> -> vector<128x128xf32>
    %388 = arith.addf %374, %387 : vector<128x128xf32>
    %c0_442 = arith.constant 0 : index
    %c0_443 = arith.constant 0 : index
    %389 = vector.load %arg4[%c0_442, %c0_443] : memref<1x128xf32, #tpu.memory_space<vmem>>, vector<1x128xf32>
    %390 = vector.broadcast %389 : vector<1x128xf32> to vector<128x128xf32>
    %391 = arith.addf %388, %390 : vector<128x128xf32>
    %cst_444 = arith.constant 0.000000e+00 : f32
    %392 = vector.broadcast %cst_444 : f32 to vector<128x128xf32>
    %393 = arith.maximumf %391, %392 : vector<128x128xf32>
    %c0_445 = arith.constant 0 : index
    %c0_446 = arith.constant 0 : index
    %394 = vector.load %arg5[%c0_445, %c0_446] : memref<128x128xf32, #tpu.memory_space<vmem>>, vector<128x128xf32>
    %cst_447 = arith.constant dense<0.000000e+00> : vector<128x128xf32>
    %395 = tpu.matmul %394, %393, %cst_447 {dimension_numbers = #tpu.dot_dimension_numbers<[1], [0], [0], [1], [0, 0, 1, 1], [], []>} : vector<128x128xf32>, vector<128x128xf32>, vector<128x128xf32> -> vector<128x128xf32>
    %c1_i32_448 = arith.constant 1 : i32
    %396 = tpu.memref_slice %arg16[%c1_i32_448] : memref<2x!tpu.dma_semaphore, #tpu.memory_space<semaphore_mem>> -> memref<1x!tpu.dma_semaphore, #tpu.memory_space<semaphore_mem>>
    %397 = tpu.memref_squeeze %396 : memref<1x!tpu.dma_semaphore, #tpu.memory_space<semaphore_mem>> -> memref<!tpu.dma_semaphore, #tpu.memory_space<semaphore_mem>>
    tpu.wait_dma2 semaphore(%397 : memref<!tpu.dma_semaphore, #tpu.memory_space<semaphore_mem>>) src(%arg6 : memref<16x128x128xbf16, #tpu.memory_space<any>>) dst(%arg15 : memref<16x128x128xbf16, #tpu.memory_space<vmem>>)
    %cst_449 = arith.constant 0.000000e+00 : f32
    %398 = vector.broadcast %cst_449 : f32 to vector<8x128xf32>
    %399 = vector.extract_strided_slice %395 {offsets = [0, 0], sizes = [8, 128], strides = [1, 1]} : vector<128x128xf32> to vector<8x128xf32>
    %c0_450 = arith.constant 0 : index
    %c0_451 = arith.constant 0 : index
    %c0_452 = arith.constant 0 : index
    %400 = vector.load %arg15[%c0_450, %c0_451, %c0_452] : memref<16x128x128xbf16, #tpu.memory_space<vmem>>, vector<1x128x128xbf16>
    %401 = vector.shape_cast %400 : vector<1x128x128xbf16> to vector<128x128xbf16>
    %402 = arith.extf %401 : vector<128x128xbf16> to vector<128x128xf32>
    %cst_453 = arith.constant dense<0.000000e+00> : vector<8x128xf32>
    %403 = tpu.matmul %399, %402, %cst_453 {dimension_numbers = #tpu.dot_dimension_numbers<[1], [0], [0], [1], [0, 0, 1, 1], [], []>} : vector<8x128xf32>, vector<128x128xf32>, vector<8x128xf32> -> vector<8x128xf32>
    %404 = arith.addf %398, %403 : vector<8x128xf32>
    %405 = vector.extract_strided_slice %395 {offsets = [8, 0], sizes = [8, 128], strides = [1, 1]} : vector<128x128xf32> to vector<8x128xf32>
    %c1_454 = arith.constant 1 : index
    %c0_455 = arith.constant 0 : index
    %c0_456 = arith.constant 0 : index
    %406 = vector.load %arg15[%c1_454, %c0_455, %c0_456] : memref<16x128x128xbf16, #tpu.memory_space<vmem>>, vector<1x128x128xbf16>
    %407 = vector.shape_cast %406 : vector<1x128x128xbf16> to vector<128x128xbf16>
    %408 = arith.extf %407 : vector<128x128xbf16> to vector<128x128xf32>
    %cst_457 = arith.constant dense<0.000000e+00> : vector<8x128xf32>
    %409 = tpu.matmul %405, %408, %cst_457 {dimension_numbers = #tpu.dot_dimension_numbers<[1], [0], [0], [1], [0, 0, 1, 1], [], []>} : vector<8x128xf32>, vector<128x128xf32>, vector<8x128xf32> -> vector<8x128xf32>
    %410 = arith.addf %404, %409 : vector<8x128xf32>
    %411 = vector.extract_strided_slice %395 {offsets = [16, 0], sizes = [8, 128], strides = [1, 1]} : vector<128x128xf32> to vector<8x128xf32>
    %c2_458 = arith.constant 2 : index
    %c0_459 = arith.constant 0 : index
    %c0_460 = arith.constant 0 : index
    %412 = vector.load %arg15[%c2_458, %c0_459, %c0_460] : memref<16x128x128xbf16, #tpu.memory_space<vmem>>, vector<1x128x128xbf16>
    %413 = vector.shape_cast %412 : vector<1x128x128xbf16> to vector<128x128xbf16>
    %414 = arith.extf %413 : vector<128x128xbf16> to vector<128x128xf32>
    %cst_461 = arith.constant dense<0.000000e+00> : vector<8x128xf32>
    %415 = tpu.matmul %411, %414, %cst_461 {dimension_numbers = #tpu.dot_dimension_numbers<[1], [0], [0], [1], [0, 0, 1, 1], [], []>} : vector<8x128xf32>, vector<128x128xf32>, vector<8x128xf32> -> vector<8x128xf32>
    %416 = arith.addf %410, %415 : vector<8x128xf32>
    %417 = vector.extract_strided_slice %395 {offsets = [24, 0], sizes = [8, 128], strides = [1, 1]} : vector<128x128xf32> to vector<8x128xf32>
    %c3_462 = arith.constant 3 : index
    %c0_463 = arith.constant 0 : index
    %c0_464 = arith.constant 0 : index
    %418 = vector.load %arg15[%c3_462, %c0_463, %c0_464] : memref<16x128x128xbf16, #tpu.memory_space<vmem>>, vector<1x128x128xbf16>
    %419 = vector.shape_cast %418 : vector<1x128x128xbf16> to vector<128x128xbf16>
    %420 = arith.extf %419 : vector<128x128xbf16> to vector<128x128xf32>
    %cst_465 = arith.constant dense<0.000000e+00> : vector<8x128xf32>
    %421 = tpu.matmul %417, %420, %cst_465 {dimension_numbers = #tpu.dot_dimension_numbers<[1], [0], [0], [1], [0, 0, 1, 1], [], []>} : vector<8x128xf32>, vector<128x128xf32>, vector<8x128xf32> -> vector<8x128xf32>
    %422 = arith.addf %416, %421 : vector<8x128xf32>
    %423 = vector.extract_strided_slice %395 {offsets = [32, 0], sizes = [8, 128], strides = [1, 1]} : vector<128x128xf32> to vector<8x128xf32>
    %c4_466 = arith.constant 4 : index
    %c0_467 = arith.constant 0 : index
    %c0_468 = arith.constant 0 : index
    %424 = vector.load %arg15[%c4_466, %c0_467, %c0_468] : memref<16x128x128xbf16, #tpu.memory_space<vmem>>, vector<1x128x128xbf16>
    %425 = vector.shape_cast %424 : vector<1x128x128xbf16> to vector<128x128xbf16>
    %426 = arith.extf %425 : vector<128x128xbf16> to vector<128x128xf32>
    %cst_469 = arith.constant dense<0.000000e+00> : vector<8x128xf32>
    %427 = tpu.matmul %423, %426, %cst_469 {dimension_numbers = #tpu.dot_dimension_numbers<[1], [0], [0], [1], [0, 0, 1, 1], [], []>} : vector<8x128xf32>, vector<128x128xf32>, vector<8x128xf32> -> vector<8x128xf32>
    %428 = arith.addf %422, %427 : vector<8x128xf32>
    %429 = vector.extract_strided_slice %395 {offsets = [40, 0], sizes = [8, 128], strides = [1, 1]} : vector<128x128xf32> to vector<8x128xf32>
    %c5_470 = arith.constant 5 : index
    %c0_471 = arith.constant 0 : index
    %c0_472 = arith.constant 0 : index
    %430 = vector.load %arg15[%c5_470, %c0_471, %c0_472] : memref<16x128x128xbf16, #tpu.memory_space<vmem>>, vector<1x128x128xbf16>
    %431 = vector.shape_cast %430 : vector<1x128x128xbf16> to vector<128x128xbf16>
    %432 = arith.extf %431 : vector<128x128xbf16> to vector<128x128xf32>
    %cst_473 = arith.constant dense<0.000000e+00> : vector<8x128xf32>
    %433 = tpu.matmul %429, %432, %cst_473 {dimension_numbers = #tpu.dot_dimension_numbers<[1], [0], [0], [1], [0, 0, 1, 1], [], []>} : vector<8x128xf32>, vector<128x128xf32>, vector<8x128xf32> -> vector<8x128xf32>
    %434 = arith.addf %428, %433 : vector<8x128xf32>
    %435 = vector.extract_strided_slice %395 {offsets = [48, 0], sizes = [8, 128], strides = [1, 1]} : vector<128x128xf32> to vector<8x128xf32>
    %c6_474 = arith.constant 6 : index
    %c0_475 = arith.constant 0 : index
    %c0_476 = arith.constant 0 : index
    %436 = vector.load %arg15[%c6_474, %c0_475, %c0_476] : memref<16x128x128xbf16, #tpu.memory_space<vmem>>, vector<1x128x128xbf16>
    %437 = vector.shape_cast %436 : vector<1x128x128xbf16> to vector<128x128xbf16>
    %438 = arith.extf %437 : vector<128x128xbf16> to vector<128x128xf32>
    %cst_477 = arith.constant dense<0.000000e+00> : vector<8x128xf32>
    %439 = tpu.matmul %435, %438, %cst_477 {dimension_numbers = #tpu.dot_dimension_numbers<[1], [0], [0], [1], [0, 0, 1, 1], [], []>} : vector<8x128xf32>, vector<128x128xf32>, vector<8x128xf32> -> vector<8x128xf32>
    %440 = arith.addf %434, %439 : vector<8x128xf32>
    %441 = vector.extract_strided_slice %395 {offsets = [56, 0], sizes = [8, 128], strides = [1, 1]} : vector<128x128xf32> to vector<8x128xf32>
    %c7_478 = arith.constant 7 : index
    %c0_479 = arith.constant 0 : index
    %c0_480 = arith.constant 0 : index
    %442 = vector.load %arg15[%c7_478, %c0_479, %c0_480] : memref<16x128x128xbf16, #tpu.memory_space<vmem>>, vector<1x128x128xbf16>
    %443 = vector.shape_cast %442 : vector<1x128x128xbf16> to vector<128x128xbf16>
    %444 = arith.extf %443 : vector<128x128xbf16> to vector<128x128xf32>
    %cst_481 = arith.constant dense<0.000000e+00> : vector<8x128xf32>
    %445 = tpu.matmul %441, %444, %cst_481 {dimension_numbers = #tpu.dot_dimension_numbers<[1], [0], [0], [1], [0, 0, 1, 1], [], []>} : vector<8x128xf32>, vector<128x128xf32>, vector<8x128xf32> -> vector<8x128xf32>
    %446 = arith.addf %440, %445 : vector<8x128xf32>
    %447 = vector.extract_strided_slice %395 {offsets = [64, 0], sizes = [8, 128], strides = [1, 1]} : vector<128x128xf32> to vector<8x128xf32>
    %c8_482 = arith.constant 8 : index
    %c0_483 = arith.constant 0 : index
    %c0_484 = arith.constant 0 : index
    %448 = vector.load %arg15[%c8_482, %c0_483, %c0_484] : memref<16x128x128xbf16, #tpu.memory_space<vmem>>, vector<1x128x128xbf16>
    %449 = vector.shape_cast %448 : vector<1x128x128xbf16> to vector<128x128xbf16>
    %450 = arith.extf %449 : vector<128x128xbf16> to vector<128x128xf32>
    %cst_485 = arith.constant dense<0.000000e+00> : vector<8x128xf32>
    %451 = tpu.matmul %447, %450, %cst_485 {dimension_numbers = #tpu.dot_dimension_numbers<[1], [0], [0], [1], [0, 0, 1, 1], [], []>} : vector<8x128xf32>, vector<128x128xf32>, vector<8x128xf32> -> vector<8x128xf32>
    %452 = arith.addf %446, %451 : vector<8x128xf32>
    %453 = vector.extract_strided_slice %395 {offsets = [72, 0], sizes = [8, 128], strides = [1, 1]} : vector<128x128xf32> to vector<8x128xf32>
    %c9_486 = arith.constant 9 : index
    %c0_487 = arith.constant 0 : index
    %c0_488 = arith.constant 0 : index
    %454 = vector.load %arg15[%c9_486, %c0_487, %c0_488] : memref<16x128x128xbf16, #tpu.memory_space<vmem>>, vector<1x128x128xbf16>
    %455 = vector.shape_cast %454 : vector<1x128x128xbf16> to vector<128x128xbf16>
    %456 = arith.extf %455 : vector<128x128xbf16> to vector<128x128xf32>
    %cst_489 = arith.constant dense<0.000000e+00> : vector<8x128xf32>
    %457 = tpu.matmul %453, %456, %cst_489 {dimension_numbers = #tpu.dot_dimension_numbers<[1], [0], [0], [1], [0, 0, 1, 1], [], []>} : vector<8x128xf32>, vector<128x128xf32>, vector<8x128xf32> -> vector<8x128xf32>
    %458 = arith.addf %452, %457 : vector<8x128xf32>
    %459 = vector.extract_strided_slice %395 {offsets = [80, 0], sizes = [8, 128], strides = [1, 1]} : vector<128x128xf32> to vector<8x128xf32>
    %c10_490 = arith.constant 10 : index
    %c0_491 = arith.constant 0 : index
    %c0_492 = arith.constant 0 : index
    %460 = vector.load %arg15[%c10_490, %c0_491, %c0_492] : memref<16x128x128xbf16, #tpu.memory_space<vmem>>, vector<1x128x128xbf16>
    %461 = vector.shape_cast %460 : vector<1x128x128xbf16> to vector<128x128xbf16>
    %462 = arith.extf %461 : vector<128x128xbf16> to vector<128x128xf32>
    %cst_493 = arith.constant dense<0.000000e+00> : vector<8x128xf32>
    %463 = tpu.matmul %459, %462, %cst_493 {dimension_numbers = #tpu.dot_dimension_numbers<[1], [0], [0], [1], [0, 0, 1, 1], [], []>} : vector<8x128xf32>, vector<128x128xf32>, vector<8x128xf32> -> vector<8x128xf32>
    %464 = arith.addf %458, %463 : vector<8x128xf32>
    %465 = vector.extract_strided_slice %395 {offsets = [88, 0], sizes = [8, 128], strides = [1, 1]} : vector<128x128xf32> to vector<8x128xf32>
    %c11_494 = arith.constant 11 : index
    %c0_495 = arith.constant 0 : index
    %c0_496 = arith.constant 0 : index
    %466 = vector.load %arg15[%c11_494, %c0_495, %c0_496] : memref<16x128x128xbf16, #tpu.memory_space<vmem>>, vector<1x128x128xbf16>
    %467 = vector.shape_cast %466 : vector<1x128x128xbf16> to vector<128x128xbf16>
    %468 = arith.extf %467 : vector<128x128xbf16> to vector<128x128xf32>
    %cst_497 = arith.constant dense<0.000000e+00> : vector<8x128xf32>
    %469 = tpu.matmul %465, %468, %cst_497 {dimension_numbers = #tpu.dot_dimension_numbers<[1], [0], [0], [1], [0, 0, 1, 1], [], []>} : vector<8x128xf32>, vector<128x128xf32>, vector<8x128xf32> -> vector<8x128xf32>
    %470 = arith.addf %464, %469 : vector<8x128xf32>
    %471 = vector.extract_strided_slice %395 {offsets = [96, 0], sizes = [8, 128], strides = [1, 1]} : vector<128x128xf32> to vector<8x128xf32>
    %c12_498 = arith.constant 12 : index
    %c0_499 = arith.constant 0 : index
    %c0_500 = arith.constant 0 : index
    %472 = vector.load %arg15[%c12_498, %c0_499, %c0_500] : memref<16x128x128xbf16, #tpu.memory_space<vmem>>, vector<1x128x128xbf16>
    %473 = vector.shape_cast %472 : vector<1x128x128xbf16> to vector<128x128xbf16>
    %474 = arith.extf %473 : vector<128x128xbf16> to vector<128x128xf32>
    %cst_501 = arith.constant dense<0.000000e+00> : vector<8x128xf32>
    %475 = tpu.matmul %471, %474, %cst_501 {dimension_numbers = #tpu.dot_dimension_numbers<[1], [0], [0], [1], [0, 0, 1, 1], [], []>} : vector<8x128xf32>, vector<128x128xf32>, vector<8x128xf32> -> vector<8x128xf32>
    %476 = arith.addf %470, %475 : vector<8x128xf32>
    %477 = vector.extract_strided_slice %395 {offsets = [104, 0], sizes = [8, 128], strides = [1, 1]} : vector<128x128xf32> to vector<8x128xf32>
    %c13_502 = arith.constant 13 : index
    %c0_503 = arith.constant 0 : index
    %c0_504 = arith.constant 0 : index
    %478 = vector.load %arg15[%c13_502, %c0_503, %c0_504] : memref<16x128x128xbf16, #tpu.memory_space<vmem>>, vector<1x128x128xbf16>
    %479 = vector.shape_cast %478 : vector<1x128x128xbf16> to vector<128x128xbf16>
    %480 = arith.extf %479 : vector<128x128xbf16> to vector<128x128xf32>
    %cst_505 = arith.constant dense<0.000000e+00> : vector<8x128xf32>
    %481 = tpu.matmul %477, %480, %cst_505 {dimension_numbers = #tpu.dot_dimension_numbers<[1], [0], [0], [1], [0, 0, 1, 1], [], []>} : vector<8x128xf32>, vector<128x128xf32>, vector<8x128xf32> -> vector<8x128xf32>
    %482 = arith.addf %476, %481 : vector<8x128xf32>
    %483 = vector.extract_strided_slice %395 {offsets = [112, 0], sizes = [8, 128], strides = [1, 1]} : vector<128x128xf32> to vector<8x128xf32>
    %c14_506 = arith.constant 14 : index
    %c0_507 = arith.constant 0 : index
    %c0_508 = arith.constant 0 : index
    %484 = vector.load %arg15[%c14_506, %c0_507, %c0_508] : memref<16x128x128xbf16, #tpu.memory_space<vmem>>, vector<1x128x128xbf16>
    %485 = vector.shape_cast %484 : vector<1x128x128xbf16> to vector<128x128xbf16>
    %486 = arith.extf %485 : vector<128x128xbf16> to vector<128x128xf32>
    %cst_509 = arith.constant dense<0.000000e+00> : vector<8x128xf32>
    %487 = tpu.matmul %483, %486, %cst_509 {dimension_numbers = #tpu.dot_dimension_numbers<[1], [0], [0], [1], [0, 0, 1, 1], [], []>} : vector<8x128xf32>, vector<128x128xf32>, vector<8x128xf32> -> vector<8x128xf32>
    %488 = arith.addf %482, %487 : vector<8x128xf32>
    %489 = vector.extract_strided_slice %395 {offsets = [120, 0], sizes = [8, 128], strides = [1, 1]} : vector<128x128xf32> to vector<8x128xf32>
    %c15_510 = arith.constant 15 : index
    %c0_511 = arith.constant 0 : index
    %c0_512 = arith.constant 0 : index
    %490 = vector.load %arg15[%c15_510, %c0_511, %c0_512] : memref<16x128x128xbf16, #tpu.memory_space<vmem>>, vector<1x128x128xbf16>
    %491 = vector.shape_cast %490 : vector<1x128x128xbf16> to vector<128x128xbf16>
    %492 = arith.extf %491 : vector<128x128xbf16> to vector<128x128xf32>
    %cst_513 = arith.constant dense<0.000000e+00> : vector<8x128xf32>
    %493 = tpu.matmul %489, %492, %cst_513 {dimension_numbers = #tpu.dot_dimension_numbers<[1], [0], [0], [1], [0, 0, 1, 1], [], []>} : vector<8x128xf32>, vector<128x128xf32>, vector<8x128xf32> -> vector<8x128xf32>
    %494 = arith.addf %488, %493 : vector<8x128xf32>
    %c0_514 = arith.constant 0 : index
    %c0_515 = arith.constant 0 : index
    %495 = vector.load %arg7[%c0_514, %c0_515] : memref<1x128xf32, #tpu.memory_space<vmem>>, vector<1x128xf32>
    %496 = vector.broadcast %495 : vector<1x128xf32> to vector<8x128xf32>
    %497 = arith.addf %494, %496 : vector<8x128xf32>
    %cst_516 = arith.constant 0.000000e+00 : f32
    %498 = vector.broadcast %cst_516 : f32 to vector<8x128xf32>
    %499 = arith.maximumf %497, %498 : vector<8x128xf32>
    %c0_517 = arith.constant 0 : index
    %c0_518 = arith.constant 0 : index
    %500 = vector.load %arg8[%c0_517, %c0_518] : memref<128x128xf32, #tpu.memory_space<vmem>>, vector<128x128xf32>
    %cst_519 = arith.constant dense<0.000000e+00> : vector<8x128xf32>
    %501 = tpu.matmul %499, %500, %cst_519 {dimension_numbers = #tpu.dot_dimension_numbers<[1], [0], [0], [1], [0, 0, 1, 1], [], []>} : vector<8x128xf32>, vector<128x128xf32>, vector<8x128xf32> -> vector<8x128xf32>
    %c0_520 = arith.constant 0 : index
    %c0_521 = arith.constant 0 : index
    %502 = vector.load %arg9[%c0_520, %c0_521] : memref<1x128xf32, #tpu.memory_space<vmem>>, vector<1x128xf32>
    %503 = vector.broadcast %502 : vector<1x128xf32> to vector<8x128xf32>
    %504 = arith.addf %501, %503 : vector<8x128xf32>
    %cst_522 = arith.constant 0.000000e+00 : f32
    %505 = vector.broadcast %cst_522 : f32 to vector<8x128xf32>
    %506 = arith.maximumf %504, %505 : vector<8x128xf32>
    %c0_523 = arith.constant 0 : index
    %c0_524 = arith.constant 0 : index
    %507 = vector.load %arg10[%c0_523, %c0_524] : memref<128x128xf32, #tpu.memory_space<vmem>>, vector<128x128xf32>
    %cst_525 = arith.constant dense<0.000000e+00> : vector<8x128xf32>
    %508 = tpu.matmul %506, %507, %cst_525 {dimension_numbers = #tpu.dot_dimension_numbers<[1], [0], [0], [1], [0, 0, 1, 1], [], []>} : vector<8x128xf32>, vector<128x128xf32>, vector<8x128xf32> -> vector<8x128xf32>
    %c0_526 = arith.constant 0 : index
    %c0_527 = arith.constant 0 : index
    %509 = vector.load %arg11[%c0_526, %c0_527] : memref<1x128xf32, #tpu.memory_space<vmem>>, vector<1x128xf32>
    %510 = vector.broadcast %509 : vector<1x128xf32> to vector<8x128xf32>
    %511 = arith.addf %508, %510 : vector<8x128xf32>
    %c0_528 = arith.constant 0 : index
    %c0_529 = arith.constant 0 : index
    %512 = vector.load %arg12[%c0_528, %c0_529] : memref<8x128xf32, #tpu.memory_space<vmem>>, vector<8x128xf32>
    tpu.vector_store %arg12[%c0_528, %c0_529], %511 {strides = array<i32>} : memref<8x128xf32, #tpu.memory_space<vmem>>, vector<8x128xf32>,
    return
  }
}

</mosaic_0001>

<bundles_post_ra>
// kernel: pruned_lenet5_forward.1
= control target key start
LH: loop header
LB: loop body
LE: loop exit
PB: predicated region body
PF: predicated region fallthrough
CT: control target
= control target key end

     0   :  { %s19200_s0 = inlined_call_operand.vmem [shape: f32[1152,32], index: 0, kind: input, shape index: {}]   ;;  %s19201_s1 = inlined_call_operand.vmem [shape: f32[32,128], index: 1, kind: input, shape index: {}]   ;;  %s19202_s2 = inlined_call_operand.vmem [shape: f32[1,128], index: 2, kind: input, shape index: {}]   ;;  %s19203_s3 = inlined_call_operand.vmem [shape: bf16[25,128,128], index: 3, kind: input, shape index: {}]   ;;  %s19204_s4 = inlined_call_operand.vmem [shape: f32[1,128], index: 4, kind: input, shape index: {}]   ;;  %s19205_s5 = inlined_call_operand.vmem [shape: f32[128,128], index: 5, kind: input, shape index: {}]   ;;  %s19206_s6 = inlined_call_operand.vmem [shape: bf16[16,128,128], index: 6, kind: input, shape index: {}]   ;;  %s19207_s7 = inlined_call_operand.vmem [shape: f32[1,128], index: 7, kind: input, shape index: {}]   ;;  %s19208_s8 = inlined_call_operand.vmem [shape: f32[128,128], index: 8, kind: input, shape index: {}]   ;;  %s19209_s9 = inlined_call_operand.vmem [shape: f32[1,128], index: 9, kind: input, shape index: {}]   ;;  %s19210_s10 = inlined_call_operand.vmem [shape: f32[128,128], index: 10, kind: input, shape index: {}]   ;;  %s19211_s11 = inlined_call_operand.vmem [shape: f32[1,128], index: 11, kind: input, shape index: {}]   ;;  %s19212_s12 = inlined_call_operand.vmem [shape: f32[8,128], index: 12, kind: output, shape index: {}]  }
   0x1   :  { %v14965_v0 = vld [vmem:[%s19203_s3] sm:$0xff]  ;;  %v14970_v1 = vld [vmem:[%s19203_s3 + $0x8] sm:$0xff]  ;;  %v14975_v2 = vld [vmem:[%s19203_s3 + $0x10] sm:$0xff] }
   0x2   :  { %19428 = vst [vmem:[#allocation10_spill] sm:$0xff] %v14965_v0  ;;  %19429 = vst [vmem:[#allocation11_spill] sm:$0xff] %v14970_v1  ;;  %v14980_v3 = vld [vmem:[%s19203_s3 + $0x18] sm:$0xff]  ;;  %v14985_v4 = vld [vmem:[%s19203_s3 + $0x20] sm:$0xff] }
   0x3   :  { %19430 = vst [vmem:[#allocation12_spill] sm:$0xff] %v14975_v2  ;;  %19431 = vst [vmem:[#allocation13_spill] sm:$0xff] %v14980_v3  ;;  %v14990_v5 = vld [vmem:[%s19203_s3 + $0x28] sm:$0xff]  ;;  %v14995_v6 = vld [vmem:[%s19203_s3 + $0x30] sm:$0xff] }
   0x4   :  { %19432 = vst [vmem:[#allocation14_spill] sm:$0xff] %v14985_v4  ;;  %19433 = vst [vmem:[#allocation15_spill] sm:$0xff] %v14990_v5  ;;  %v15000_v7 = vld [vmem:[%s19203_s3 + $0x38] sm:$0xff]  ;;  %v15005_v8 = vld [vmem:[%s19203_s3 + $0x40] sm:$0xff] }
   0x5   :  { %19434 = vst [vmem:[#allocation16_spill] sm:$0xff] %v14995_v6  ;;  %19435 = vst [vmem:[#allocation17_spill] sm:$0xff] %v15000_v7  ;;  %v15010_v9 = vld [vmem:[%s19203_s3 + $0x48] sm:$0xff]  ;;  %v15015_v10 = vld [vmem:[%s19203_s3 + $0x50] sm:$0xff] }
   0x6   :  { %19436 = vst [vmem:[#allocation18_spill] sm:$0xff] %v15005_v8  ;;  %19437 = vst [vmem:[#allocation19_spill] sm:$0xff] %v15010_v9  ;;  %v15020_v11 = vld [vmem:[%s19203_s3 + $0x58] sm:$0xff]  ;;  %v15025_v12 = vld [vmem:[%s19203_s3 + $0x60] sm:$0xff] }
   0x7   :  { %19438 = vst [vmem:[#allocation20_spill] sm:$0xff] %v15015_v10  ;;  %19439 = vst [vmem:[#allocation21_spill] sm:$0xff] %v15020_v11  ;;  %v15030_v13 = vld [vmem:[%s19203_s3 + $0x68] sm:$0xff]  ;;  %v15035_v14 = vld [vmem:[%s19203_s3 + $0x70] sm:$0xff] }
   0x8   :  { %19440 = vst [vmem:[#allocation22_spill] sm:$0xff] %v15025_v12  ;;  %19441 = vst [vmem:[#allocation23_spill] sm:$0xff] %v15030_v13  ;;  %v15040_v15 = vld [vmem:[%s19203_s3 + $0x78] sm:$0xff]  ;;  %v15045_v16 = vld [vmem:[%s19203_s3 + $0x80] sm:$0xff] }
   0x9   :  { %19442 = vst [vmem:[#allocation24_spill] sm:$0xff] %v15035_v14  ;;  %19443 = vst [vmem:[#allocation25_spill] sm:$0xff] %v15040_v15  ;;  %v15050_v17 = vld [vmem:[%s19203_s3 + $0x88] sm:$0xff]  ;;  %v15055_v18 = vld [vmem:[%s19203_s3 + $0x90] sm:$0xff] }
   0xa   :  { %19444 = vst [vmem:[#allocation26_spill] sm:$0xff] %v15045_v16  ;;  %19445 = vst [vmem:[#allocation27_spill] sm:$0xff] %v15050_v17  ;;  %v15060_v19 = vld [vmem:[%s19203_s3 + $0x98] sm:$0xff]  ;;  %v15065_v20 = vld [vmem:[%s19203_s3 + $0xa0] sm:$0xff] }
   0xb   :  { %19446 = vst [vmem:[#allocation28_spill] sm:$0xff] %v15055_v18  ;;  %19447 = vst [vmem:[#allocation29_spill] sm:$0xff] %v15060_v19  ;;  %v15070_v21 = vld [vmem:[%s19203_s3 + $0xa8] sm:$0xff]  ;;  %v15075_v22 = vld [vmem:[%s19203_s3 + $0xb0] sm:$0xff] }
   0xc   :  { %19448 = vst [vmem:[#allocation30_spill] sm:$0xff] %v15065_v20  ;;  %19449 = vst [vmem:[#allocation31_spill] sm:$0xff] %v15070_v21  ;;  %v15080_v23 = vld [vmem:[%s19203_s3 + $0xb8] sm:$0xff]  ;;  %v15085_v24 = vld [vmem:[%s19203_s3 + $0xc0] sm:$0xff] }
   0xd   :  { %19450 = vst [vmem:[#allocation32_spill] sm:$0xff] %v15075_v22  ;;  %19451 = vst [vmem:[#allocation33_spill] sm:$0xff] %v15080_v23  ;;  %v15090_v25 = vld [vmem:[%s19203_s3 + $0xc8] sm:$0xff]  ;;  %v15095_v26 = vld [vmem:[%s19203_s3 + $0xd0] sm:$0xff] }
   0xe   :  { %19452 = vst [vmem:[#allocation34_spill] sm:$0xff] %v15085_v24  ;;  %19453 = vst [vmem:[#allocation35_spill] sm:$0xff] %v15090_v25  ;;  %v15100_v27 = vld [vmem:[%s19203_s3 + $0xd8] sm:$0xff]  ;;  %v15105_v28 = vld [vmem:[%s19203_s3 + $0xe0] sm:$0xff] }
   0xf   :  { %19454 = vst [vmem:[#allocation36_spill] sm:$0xff] %v15095_v26  ;;  %19455 = vst [vmem:[#allocation37_spill] sm:$0xff] %v15100_v27  ;;  %v15110_v29 = vld [vmem:[%s19203_s3 + $0xe8] sm:$0xff]  ;;  %v15115_v30 = vld [vmem:[%s19203_s3 + $0xf0] sm:$0xff] }
  0x10   :  { %19456 = vst [vmem:[#allocation38_spill] sm:$0xff] %v15105_v28  ;;  %19457 = vst [vmem:[#allocation39_spill] sm:$0xff] %v15110_v29  ;;  %v15120_v31 = vld [vmem:[%s19203_s3 + $0xf8] sm:$0xff]  ;;  %v15125_v32 = vld [vmem:[%s19203_s3 + $0x100] sm:$0xff] }
  0x11   :  { %19458 = vst [vmem:[#allocation40_spill] sm:$0xff] %v15115_v30  ;;  %19459 = vst [vmem:[#allocation41_spill] sm:$0xff] %v15120_v31  ;;  %v15130_v33 = vld [vmem:[%s19203_s3 + $0x108] sm:$0xff]  ;;  %v15135_v34 = vld [vmem:[%s19203_s3 + $0x110] sm:$0xff] }
  0x12   :  { %19460 = vst [vmem:[#allocation42_spill] sm:$0xff] %v15125_v32  ;;  %19461 = vst [vmem:[#allocation43_spill] sm:$0xff] %v15130_v33  ;;  %v15140_v35 = vld [vmem:[%s19203_s3 + $0x118] sm:$0xff]  ;;  %v15145_v36 = vld [vmem:[%s19203_s3 + $0x120] sm:$0xff] }
  0x13   :  { %19462 = vst [vmem:[#allocation44_spill] sm:$0xff] %v15135_v34  ;;  %19463 = vst [vmem:[#allocation45_spill] sm:$0xff] %v15140_v35  ;;  %v15150_v37 = vld [vmem:[%s19203_s3 + $0x128] sm:$0xff]  ;;  %v15155_v38 = vld [vmem:[%s19203_s3 + $0x130] sm:$0xff] }
  0x14   :  { %19464 = vst [vmem:[#allocation46_spill] sm:$0xff] %v15145_v36  ;;  %19465 = vst [vmem:[#allocation47_spill] sm:$0xff] %v15150_v37  ;;  %v15160_v39 = vld [vmem:[%s19203_s3 + $0x138] sm:$0xff]  ;;  %v15165_v40 = vld [vmem:[%s19203_s3 + $0x140] sm:$0xff] }
  0x15   :  { %19466 = vst [vmem:[#allocation48_spill] sm:$0xff] %v15155_v38  ;;  %19467 = vst [vmem:[#allocation49_spill] sm:$0xff] %v15160_v39  ;;  %v15170_v41 = vld [vmem:[%s19203_s3 + $0x148] sm:$0xff]  ;;  %v15175_v42 = vld [vmem:[%s19203_s3 + $0x150] sm:$0xff] }
  0x16   :  { %19468 = vst [vmem:[#allocation50_spill] sm:$0xff] %v15165_v40  ;;  %19469 = vst [vmem:[#allocation51_spill] sm:$0xff] %v15170_v41  ;;  %v15180_v43 = vld [vmem:[%s19203_s3 + $0x158] sm:$0xff]  ;;  %v15185_v44 = vld [vmem:[%s19203_s3 + $0x160] sm:$0xff] }
  0x17   :  { %19470 = vst [vmem:[#allocation52_spill] sm:$0xff] %v15175_v42  ;;  %19471 = vst [vmem:[#allocation53_spill] sm:$0xff] %v15180_v43  ;;  %v15190_v45 = vld [vmem:[%s19203_s3 + $0x168] sm:$0xff]  ;;  %v15195_v46 = vld [vmem:[%s19203_s3 + $0x170] sm:$0xff] }
  0x18   :  { %19472 = vst [vmem:[#allocation54_spill] sm:$0xff] %v15185_v44  ;;  %19473 = vst [vmem:[#allocation55_spill] sm:$0xff] %v15190_v45  ;;  %v15200_v47 = vld [vmem:[%s19203_s3 + $0x178] sm:$0xff]  ;;  %v15205_v48 = vld [vmem:[%s19203_s3 + $0x180] sm:$0xff] }
  0x19   :  { %19474 = vst [vmem:[#allocation56_spill] sm:$0xff] %v15195_v46  ;;  %19475 = vst [vmem:[#allocation57_spill] sm:$0xff] %v15200_v47  ;;  %v15210_v49 = vld [vmem:[%s19203_s3 + $0x188] sm:$0xff]  ;;  %v15215_v50 = vld [vmem:[%s19203_s3 + $0x190] sm:$0xff] }
  0x1a   :  { %19476 = vst [vmem:[#allocation58_spill] sm:$0xff] %v15205_v48  ;;  %19477 = vst [vmem:[#allocation59_spill] sm:$0xff] %v15210_v49  ;;  %v15220_v51 = vld [vmem:[%s19203_s3 + $0x198] sm:$0xff]  ;;  %v15225_v52 = vld [vmem:[%s19203_s3 + $0x1a0] sm:$0xff] }
  0x1b   :  { %19478 = vst [vmem:[#allocation60_spill] sm:$0xff] %v15215_v50  ;;  %19479 = vst [vmem:[#allocation61_spill] sm:$0xff] %v15220_v51  ;;  %v15230_v53 = vld [vmem:[%s19203_s3 + $0x1a8] sm:$0xff]  ;;  %v15235_v54 = vld [vmem:[%s19203_s3 + $0x1b0] sm:$0xff] }
  0x1c   :  { %19480 = vst [vmem:[#allocation62_spill] sm:$0xff] %v15225_v52  ;;  %19481 = vst [vmem:[#allocation63_spill] sm:$0xff] %v15230_v53  ;;  %v15240_v55 = vld [vmem:[%s19203_s3 + $0x1b8] sm:$0xff]  ;;  %v15245_v56 = vld [vmem:[%s19203_s3 + $0x1c0] sm:$0xff] }
  0x1d   :  { %19482 = vst [vmem:[#allocation64_spill] sm:$0xff] %v15235_v54  ;;  %19483 = vst [vmem:[#allocation65_spill] sm:$0xff] %v15240_v55  ;;  %v15250_v57 = vld [vmem:[%s19203_s3 + $0x1c8] sm:$0xff]  ;;  %v15255_v58 = vld [vmem:[%s19203_s3 + $0x1d0] sm:$0xff] }
  0x1e   :  { %19484 = vst [vmem:[#allocation66_spill] sm:$0xff] %v15245_v56  ;;  %19485 = vst [vmem:[#allocation67_spill] sm:$0xff] %v15250_v57  ;;  %v15260_v59 = vld [vmem:[%s19203_s3 + $0x1d8] sm:$0xff]  ;;  %v15265_v60 = vld [vmem:[%s19203_s3 + $0x1e0] sm:$0xff] }
  0x1f   :  { %19486 = vst [vmem:[#allocation68_spill] sm:$0xff] %v15255_v58  ;;  %19487 = vst [vmem:[#allocation69_spill] sm:$0xff] %v15260_v59  ;;  %v15270_v61 = vld [vmem:[%s19203_s3 + $0x1e8] sm:$0xff]  ;;  %v15275_v62 = vld [vmem:[%s19203_s3 + $0x1f0] sm:$0xff] }
  0x20   :  { %19488 = vst [vmem:[#allocation70_spill] sm:$0xff] %v15265_v60  ;;  %19489 = vst [vmem:[#allocation71_spill] sm:$0xff] %v15270_v61  ;;  %v15280_v63 = vld [vmem:[%s19203_s3 + $0x1f8] sm:$0xff]  ;;  %v15285_v59 = vld [vmem:[%s19203_s3 + $0x200] sm:$0xff] }
  0x21   :  { %19490 = vst [vmem:[#allocation72_spill] sm:$0xff] %v15275_v62  ;;  %19491 = vst [vmem:[#allocation73_spill] sm:$0xff] %v15280_v63  ;;  %v15290_v60 = vld [vmem:[%s19203_s3 + $0x208] sm:$0xff]  ;;  %v15295_v61 = vld [vmem:[%s19203_s3 + $0x210] sm:$0xff] }
  0x22   :  { %19492 = vst [vmem:[#allocation74_spill] sm:$0xff] %v15285_v59  ;;  %19493 = vst [vmem:[#allocation75_spill] sm:$0xff] %v15290_v60  ;;  %v15300_v62 = vld [vmem:[%s19203_s3 + $0x218] sm:$0xff]  ;;  %v15305_v63 = vld [vmem:[%s19203_s3 + $0x220] sm:$0xff] }
  0x23   :  { %19494 = vst [vmem:[#allocation76_spill] sm:$0xff] %v15295_v61  ;;  %19495 = vst [vmem:[#allocation77_spill] sm:$0xff] %v15300_v62  ;;  %v15310_v59 = vld [vmem:[%s19203_s3 + $0x228] sm:$0xff]  ;;  %v15315_v60 = vld [vmem:[%s19203_s3 + $0x230] sm:$0xff] }
  0x24   :  { %19496 = vst [vmem:[#allocation78_spill] sm:$0xff] %v15305_v63  ;;  %19497 = vst [vmem:[#allocation79_spill] sm:$0xff] %v15310_v59  ;;  %v15320_v61 = vld [vmem:[%s19203_s3 + $0x238] sm:$0xff]  ;;  %v15325_v62 = vld [vmem:[%s19203_s3 + $0x240] sm:$0xff] }
  0x25   :  { %19498 = vst [vmem:[#allocation80_spill] sm:$0xff] %v15315_v60  ;;  %19499 = vst [vmem:[#allocation81_spill] sm:$0xff] %v15320_v61  ;;  %v15330_v63 = vld [vmem:[%s19203_s3 + $0x248] sm:$0xff]  ;;  %v15335_v59 = vld [vmem:[%s19203_s3 + $0x250] sm:$0xff] }
  0x26   :  { %19500 = vst [vmem:[#allocation82_spill] sm:$0xff] %v15325_v62  ;;  %19501 = vst [vmem:[#allocation83_spill] sm:$0xff] %v15330_v63  ;;  %v15340_v60 = vld [vmem:[%s19203_s3 + $0x258] sm:$0xff]  ;;  %v15345_v61 = vld [vmem:[%s19203_s3 + $0x260] sm:$0xff] }
  0x27   :  { %19502 = vst [vmem:[#allocation84_spill] sm:$0xff] %v15335_v59  ;;  %19503 = vst [vmem:[#allocation85_spill] sm:$0xff] %v15340_v60  ;;  %v15350_v62 = vld [vmem:[%s19203_s3 + $0x268] sm:$0xff]  ;;  %v15355_v63 = vld [vmem:[%s19203_s3 + $0x270] sm:$0xff] }
  0x28   :  { %19504 = vst [vmem:[#allocation86_spill] sm:$0xff] %v15345_v61  ;;  %19505 = vst [vmem:[#allocation87_spill] sm:$0xff] %v15350_v62  ;;  %v15360_v59 = vld [vmem:[%s19203_s3 + $0x278] sm:$0xff]  ;;  %v15365_v60 = vld [vmem:[%s19203_s3 + $0x280] sm:$0xff] }
  0x29   :  { %19506 = vst [vmem:[#allocation88_spill] sm:$0xff] %v15355_v63  ;;  %19507 = vst [vmem:[#allocation89_spill] sm:$0xff] %v15360_v59  ;;  %v15370_v61 = vld [vmem:[%s19203_s3 + $0x288] sm:$0xff]  ;;  %v15375_v62 = vld [vmem:[%s19203_s3 + $0x290] sm:$0xff] }
  0x2a   :  { %19508 = vst [vmem:[#allocation90_spill] sm:$0xff] %v15365_v60  ;;  %19509 = vst [vmem:[#allocation91_spill] sm:$0xff] %v15370_v61  ;;  %v15380_v63 = vld [vmem:[%s19203_s3 + $0x298] sm:$0xff]  ;;  %v15385_v59 = vld [vmem:[%s19203_s3 + $0x2a0] sm:$0xff] }
  0x2b   :  { %19510 = vst [vmem:[#allocation92_spill] sm:$0xff] %v15375_v62  ;;  %19511 = vst [vmem:[#allocation93_spill] sm:$0xff] %v15380_v63  ;;  %v15390_v60 = vld [vmem:[%s19203_s3 + $0x2a8] sm:$0xff]  ;;  %v15395_v61 = vld [vmem:[%s19203_s3 + $0x2b0] sm:$0xff] }
  0x2c   :  { %19512 = vst [vmem:[#allocation94_spill] sm:$0xff] %v15385_v59  ;;  %19513 = vst [vmem:[#allocation95_spill] sm:$0xff] %v15390_v60  ;;  %v15400_v62 = vld [vmem:[%s19203_s3 + $0x2b8] sm:$0xff]  ;;  %v15405_v63 = vld [vmem:[%s19203_s3 + $0x2c0] sm:$0xff] }
  0x2d   :  { %19514 = vst [vmem:[#allocation96_spill] sm:$0xff] %v15395_v61  ;;  %19515 = vst [vmem:[#allocation97_spill] sm:$0xff] %v15400_v62  ;;  %v15410_v59 = vld [vmem:[%s19203_s3 + $0x2c8] sm:$0xff]  ;;  %v15415_v60 = vld [vmem:[%s19203_s3 + $0x2d0] sm:$0xff] }
  0x2e   :  { %19516 = vst [vmem:[#allocation98_spill] sm:$0xff] %v15405_v63  ;;  %19517 = vst [vmem:[#allocation99_spill] sm:$0xff] %v15410_v59  ;;  %v15420_v61 = vld [vmem:[%s19203_s3 + $0x2d8] sm:$0xff]  ;;  %v15425_v62 = vld [vmem:[%s19203_s3 + $0x2e0] sm:$0xff] }
  0x2f   :  { %19518 = vst [vmem:[#allocation100_spill] sm:$0xff] %v15415_v60  ;;  %19519 = vst [vmem:[#allocation101_spill] sm:$0xff] %v15420_v61  ;;  %v15430_v63 = vld [vmem:[%s19203_s3 + $0x2e8] sm:$0xff]  ;;  %v15435_v59 = vld [vmem:[%s19203_s3 + $0x2f0] sm:$0xff] }
  0x30   :  { %19520 = vst [vmem:[#allocation102_spill] sm:$0xff] %v15425_v62  ;;  %19521 = vst [vmem:[#allocation103_spill] sm:$0xff] %v15430_v63  ;;  %v15440_v60 = vld [vmem:[%s19203_s3 + $0x2f8] sm:$0xff]  ;;  %v15445_v61 = vld [vmem:[%s19203_s3 + $0x300] sm:$0xff] }
  0x31   :  { %19522 = vst [vmem:[#allocation104_spill] sm:$0xff] %v15435_v59  ;;  %19523 = vst [vmem:[#allocation105_spill] sm:$0xff] %v15440_v60  ;;  %v15450_v62 = vld [vmem:[%s19203_s3 + $0x308] sm:$0xff]  ;;  %v15455_v63 = vld [vmem:[%s19203_s3 + $0x310] sm:$0xff] }
  0x32   :  { %19524 = vst [vmem:[#allocation106_spill] sm:$0xff] %v15445_v61  ;;  %19525 = vst [vmem:[#allocation107_spill] sm:$0xff] %v15450_v62  ;;  %v15460_v59 = vld [vmem:[%s19203_s3 + $0x318] sm:$0xff]  ;;  %v15465_v60 = vld [vmem:[%s19203_s3 + $0x320] sm:$0xff] }
  0x33   :  { %19526 = vst [vmem:[#allocation108_spill] sm:$0xff] %v15455_v63  ;;  %19527 = vst [vmem:[#allocation109_spill] sm:$0xff] %v15460_v59  ;;  %v15470_v61 = vld [vmem:[%s19203_s3 + $0x328] sm:$0xff]  ;;  %v15475_v62 = vld [vmem:[%s19203_s3 + $0x330] sm:$0xff] }
  0x34   :  { %19528 = vst [vmem:[#allocation110_spill] sm:$0xff] %v15465_v60  ;;  %19529 = vst [vmem:[#allocation111_spill] sm:$0xff] %v15470_v61  ;;  %v15480_v63 = vld [vmem:[%s19203_s3 + $0x338] sm:$0xff]  ;;  %v15485_v59 = vld [vmem:[%s19203_s3 + $0x340] sm:$0xff] }
  0x35   :  { %19530 = vst [vmem:[#allocation112_spill] sm:$0xff] %v15475_v62  ;;  %19531 = vst [vmem:[#allocation113_spill] sm:$0xff] %v15480_v63  ;;  %v15490_v60 = vld [vmem:[%s19203_s3 + $0x348] sm:$0xff]  ;;  %v15495_v61 = vld [vmem:[%s19203_s3 + $0x350] sm:$0xff] }
  0x36   :  { %19532 = vst [vmem:[#allocation114_spill] sm:$0xff] %v15485_v59  ;;  %19533 = vst [vmem:[#allocation115_spill] sm:$0xff] %v15490_v60  ;;  %v15500_v62 = vld [vmem:[%s19203_s3 + $0x358] sm:$0xff]  ;;  %v15505_v63 = vld [vmem:[%s19203_s3 + $0x360] sm:$0xff] }
  0x37   :  { %19534 = vst [vmem:[#allocation116_spill] sm:$0xff] %v15495_v61  ;;  %19535 = vst [vmem:[#allocation117_spill] sm:$0xff] %v15500_v62  ;;  %v15510_v59 = vld [vmem:[%s19203_s3 + $0x368] sm:$0xff]  ;;  %v15515_v60 = vld [vmem:[%s19203_s3 + $0x370] sm:$0xff] }
  0x38   :  { %19536 = vst [vmem:[#allocation118_spill] sm:$0xff] %v15505_v63  ;;  %19537 = vst [vmem:[#allocation119_spill] sm:$0xff] %v15510_v59  ;;  %v15520_v61 = vld [vmem:[%s19203_s3 + $0x378] sm:$0xff]  ;;  %v15525_v62 = vld [vmem:[%s19203_s3 + $0x380] sm:$0xff] }
  0x39   :  { %19538 = vst [vmem:[#allocation120_spill] sm:$0xff] %v15515_v60  ;;  %19539 = vst [vmem:[#allocation121_spill] sm:$0xff] %v15520_v61  ;;  %v15530_v63 = vld [vmem:[%s19203_s3 + $0x388] sm:$0xff]  ;;  %v15535_v59 = vld [vmem:[%s19203_s3 + $0x390] sm:$0xff] }
  0x3a   :  { %19540 = vst [vmem:[#allocation122_spill] sm:$0xff] %v15525_v62  ;;  %19541 = vst [vmem:[#allocation123_spill] sm:$0xff] %v15530_v63  ;;  %v15540_v60 = vld [vmem:[%s19203_s3 + $0x398] sm:$0xff]  ;;  %v15545_v61 = vld [vmem:[%s19203_s3 + $0x3a0] sm:$0xff] }
  0x3b   :  { %19542 = vst [vmem:[#allocation124_spill] sm:$0xff] %v15535_v59  ;;  %19543 = vst [vmem:[#allocation125_spill] sm:$0xff] %v15540_v60  ;;  %v15550_v62 = vld [vmem:[%s19203_s3 + $0x3a8] sm:$0xff]  ;;  %v15555_v63 = vld [vmem:[%s19203_s3 + $0x3b0] sm:$0xff] }
  0x3c   :  { %19544 = vst [vmem:[#allocation126_spill] sm:$0xff] %v15545_v61  ;;  %19545 = vst [vmem:[#allocation127_spill] sm:$0xff] %v15550_v62  ;;  %v15560_v59 = vld [vmem:[%s19203_s3 + $0x3b8] sm:$0xff]  ;;  %v15565_v60 = vld [vmem:[%s19203_s3 + $0x3c0] sm:$0xff] }
  0x3d   :  { %19546 = vst [vmem:[#allocation128_spill] sm:$0xff] %v15555_v63  ;;  %19547 = vst [vmem:[#allocation129_spill] sm:$0xff] %v15560_v59  ;;  %v15570_v61 = vld [vmem:[%s19203_s3 + $0x3c8] sm:$0xff]  ;;  %v15575_v62 = vld [vmem:[%s19203_s3 + $0x3d0] sm:$0xff] }
  0x3e   :  { %19548 = vst [vmem:[#allocation130_spill] sm:$0xff] %v15565_v60  ;;  %19549 = vst [vmem:[#allocation131_spill] sm:$0xff] %v15570_v61  ;;  %v15580_v63 = vld [vmem:[%s19203_s3 + $0x3d8] sm:$0xff]  ;;  %v15585_v59 = vld [vmem:[%s19203_s3 + $0x3e0] sm:$0xff] }
  0x3f   :  { %19550 = vst [vmem:[#allocation132_spill] sm:$0xff] %v15575_v62  ;;  %19551 = vst [vmem:[#allocation133_spill] sm:$0xff] %v15580_v63  ;;  %v15590_v60 = vld [vmem:[%s19203_s3 + $0x3e8] sm:$0xff]  ;;  %v15595_v61 = vld [vmem:[%s19203_s3 + $0x3f0] sm:$0xff] }
  0x40   :  { %19552 = vst [vmem:[#allocation134_spill] sm:$0xff] %v15585_v59  ;;  %19553 = vst [vmem:[#allocation135_spill] sm:$0xff] %v15590_v60  ;;  %v15600_v62 = vld [vmem:[%s19203_s3 + $0x3f8] sm:$0xff]  ;;  %v15605_v63 = vld [vmem:[%s19203_s3 + $0x400] sm:$0xff] }
  0x41   :  { %19554 = vst [vmem:[#allocation136_spill] sm:$0xff] %v15595_v61  ;;  %19555 = vst [vmem:[#allocation137_spill] sm:$0xff] %v15600_v62  ;;  %v15610_v59 = vld [vmem:[%s19203_s3 + $0x408] sm:$0xff]  ;;  %v15615_v60 = vld [vmem:[%s19203_s3 + $0x410] sm:$0xff] }
  0x42   :  { %19556 = vst [vmem:[#allocation138_spill] sm:$0xff] %v15605_v63  ;;  %19557 = vst [vmem:[#allocation139_spill] sm:$0xff] %v15610_v59  ;;  %v15620_v61 = vld [vmem:[%s19203_s3 + $0x418] sm:$0xff]  ;;  %v15625_v62 = vld [vmem:[%s19203_s3 + $0x420] sm:$0xff] }
  0x43   :  { %19558 = vst [vmem:[#allocation140_spill] sm:$0xff] %v15615_v60  ;;  %19559 = vst [vmem:[#allocation141_spill] sm:$0xff] %v15620_v61  ;;  %v15630_v63 = vld [vmem:[%s19203_s3 + $0x428] sm:$0xff]  ;;  %v15635_v59 = vld [vmem:[%s19203_s3 + $0x430] sm:$0xff] }
  0x44   :  { %19560 = vst [vmem:[#allocation142_spill] sm:$0xff] %v15625_v62  ;;  %19561 = vst [vmem:[#allocation143_spill] sm:$0xff] %v15630_v63  ;;  %v15640_v60 = vld [vmem:[%s19203_s3 + $0x438] sm:$0xff]  ;;  %v15645_v61 = vld [vmem:[%s19203_s3 + $0x440] sm:$0xff] }
  0x45   :  { %19562 = vst [vmem:[#allocation144_spill] sm:$0xff] %v15635_v59  ;;  %19563 = vst [vmem:[#allocation145_spill] sm:$0xff] %v15640_v60  ;;  %v15650_v62 = vld [vmem:[%s19203_s3 + $0x448] sm:$0xff]  ;;  %v15655_v63 = vld [vmem:[%s19203_s3 + $0x450] sm:$0xff] }
  0x46   :  { %19564 = vst [vmem:[#allocation146_spill] sm:$0xff] %v15645_v61  ;;  %19565 = vst [vmem:[#allocation147_spill] sm:$0xff] %v15650_v62  ;;  %v15660_v59 = vld [vmem:[%s19203_s3 + $0x458] sm:$0xff]  ;;  %v15665_v60 = vld [vmem:[%s19203_s3 + $0x460] sm:$0xff] }
  0x47   :  { %19566 = vst [vmem:[#allocation148_spill] sm:$0xff] %v15655_v63  ;;  %19567 = vst [vmem:[#allocation149_spill] sm:$0xff] %v15660_v59  ;;  %v15670_v61 = vld [vmem:[%s19203_s3 + $0x468] sm:$0xff]  ;;  %v15675_v62 = vld [vmem:[%s19203_s3 + $0x470] sm:$0xff] }
  0x48   :  { %19568 = vst [vmem:[#allocation150_spill] sm:$0xff] %v15665_v60  ;;  %19569 = vst [vmem:[#allocation151_spill] sm:$0xff] %v15670_v61  ;;  %v15680_v63 = vld [vmem:[%s19203_s3 + $0x478] sm:$0xff]  ;;  %v15685_v59 = vld [vmem:[%s19203_s3 + $0x480] sm:$0xff] }
  0x49   :  { %19570 = vst [vmem:[#allocation152_spill] sm:$0xff] %v15675_v62  ;;  %19571 = vst [vmem:[#allocation153_spill] sm:$0xff] %v15680_v63  ;;  %v15690_v60 = vld [vmem:[%s19203_s3 + $0x488] sm:$0xff]  ;;  %v15695_v61 = vld [vmem:[%s19203_s3 + $0x490] sm:$0xff] }
  0x4a   :  { %19572 = vst [vmem:[#allocation154_spill] sm:$0xff] %v15685_v59  ;;  %19573 = vst [vmem:[#allocation155_spill] sm:$0xff] %v15690_v60  ;;  %v15700_v62 = vld [vmem:[%s19203_s3 + $0x498] sm:$0xff]  ;;  %v15705_v63 = vld [vmem:[%s19203_s3 + $0x4a0] sm:$0xff] }
  0x4b   :  { %19574 = vst [vmem:[#allocation156_spill] sm:$0xff] %v15695_v61  ;;  %19575 = vst [vmem:[#allocation157_spill] sm:$0xff] %v15700_v62  ;;  %v15710_v59 = vld [vmem:[%s19203_s3 + $0x4a8] sm:$0xff]  ;;  %v15715_v60 = vld [vmem:[%s19203_s3 + $0x4b0] sm:$0xff] }
  0x4c   :  { %19576 = vst [vmem:[#allocation158_spill] sm:$0xff] %v15705_v63  ;;  %19577 = vst [vmem:[#allocation159_spill] sm:$0xff] %v15710_v59  ;;  %v15720_v61 = vld [vmem:[%s19203_s3 + $0x4b8] sm:$0xff]  ;;  %v15725_v62 = vld [vmem:[%s19203_s3 + $0x4c0] sm:$0xff] }
  0x4d   :  { %19578 = vst [vmem:[#allocation160_spill] sm:$0xff] %v15715_v60  ;;  %19579 = vst [vmem:[#allocation161_spill] sm:$0xff] %v15720_v61  ;;  %v15730_v63 = vld [vmem:[%s19203_s3 + $0x4c8] sm:$0xff]  ;;  %v15735_v59 = vld [vmem:[%s19203_s3 + $0x4d0] sm:$0xff] }
  0x4e   :  { %19580 = vst [vmem:[#allocation162_spill] sm:$0xff] %v15725_v62  ;;  %19581 = vst [vmem:[#allocation163_spill] sm:$0xff] %v15730_v63  ;;  %v15740_v60 = vld [vmem:[%s19203_s3 + $0x4d8] sm:$0xff]  ;;  %v15745_v61 = vld [vmem:[%s19203_s3 + $0x4e0] sm:$0xff] }
  0x4f   :  { %19582 = vst [vmem:[#allocation164_spill] sm:$0xff] %v15735_v59  ;;  %19583 = vst [vmem:[#allocation165_spill] sm:$0xff] %v15740_v60  ;;  %v15750_v62 = vld [vmem:[%s19203_s3 + $0x4e8] sm:$0xff]  ;;  %v15755_v63 = vld [vmem:[%s19203_s3 + $0x4f0] sm:$0xff] }
  0x50   :  { %19584 = vst [vmem:[#allocation166_spill] sm:$0xff] %v15745_v61  ;;  %19585 = vst [vmem:[#allocation167_spill] sm:$0xff] %v15750_v62  ;;  %v15760_v59 = vld [vmem:[%s19203_s3 + $0x4f8] sm:$0xff]  ;;  %v15765_v60 = vld [vmem:[%s19203_s3 + $0x500] sm:$0xff] }
  0x51   :  { %19586 = vst [vmem:[#allocation168_spill] sm:$0xff] %v15755_v63  ;;  %19587 = vst [vmem:[#allocation169_spill] sm:$0xff] %v15760_v59  ;;  %v15770_v61 = vld [vmem:[%s19203_s3 + $0x508] sm:$0xff]  ;;  %v15775_v62 = vld [vmem:[%s19203_s3 + $0x510] sm:$0xff] }
  0x52   :  { %19588 = vst [vmem:[#allocation170_spill] sm:$0xff] %v15765_v60  ;;  %19589 = vst [vmem:[#allocation171_spill] sm:$0xff] %v15770_v61  ;;  %v15780_v63 = vld [vmem:[%s19203_s3 + $0x518] sm:$0xff]  ;;  %v15785_v59 = vld [vmem:[%s19203_s3 + $0x520] sm:$0xff] }
  0x53   :  { %19590 = vst [vmem:[#allocation172_spill] sm:$0xff] %v15775_v62  ;;  %19591 = vst [vmem:[#allocation173_spill] sm:$0xff] %v15780_v63  ;;  %v15790_v60 = vld [vmem:[%s19203_s3 + $0x528] sm:$0xff]  ;;  %v15795_v61 = vld [vmem:[%s19203_s3 + $0x530] sm:$0xff] }
  0x54   :  { %19592 = vst [vmem:[#allocation174_spill] sm:$0xff] %v15785_v59  ;;  %19593 = vst [vmem:[#allocation175_spill] sm:$0xff] %v15790_v60  ;;  %v15800_v62 = vld [vmem:[%s19203_s3 + $0x538] sm:$0xff]  ;;  %v15805_v63 = vld [vmem:[%s19203_s3 + $0x540] sm:$0xff] }
  0x55   :  { %19594 = vst [vmem:[#allocation176_spill] sm:$0xff] %v15795_v61  ;;  %19595 = vst [vmem:[#allocation177_spill] sm:$0xff] %v15800_v62  ;;  %v15810_v59 = vld [vmem:[%s19203_s3 + $0x548] sm:$0xff]  ;;  %v15815_v60 = vld [vmem:[%s19203_s3 + $0x550] sm:$0xff] }
  0x56   :  { %19596 = vst [vmem:[#allocation178_spill] sm:$0xff] %v15805_v63  ;;  %19597 = vst [vmem:[#allocation179_spill] sm:$0xff] %v15810_v59  ;;  %v15820_v61 = vld [vmem:[%s19203_s3 + $0x558] sm:$0xff]  ;;  %v15825_v62 = vld [vmem:[%s19203_s3 + $0x560] sm:$0xff] }
  0x57   :  { %19598 = vst [vmem:[#allocation180_spill] sm:$0xff] %v15815_v60  ;;  %19599 = vst [vmem:[#allocation181_spill] sm:$0xff] %v15820_v61  ;;  %v15830_v63 = vld [vmem:[%s19203_s3 + $0x568] sm:$0xff]  ;;  %v15835_v59 = vld [vmem:[%s19203_s3 + $0x570] sm:$0xff] }
  0x58   :  { %19600 = vst [vmem:[#allocation182_spill] sm:$0xff] %v15825_v62  ;;  %19601 = vst [vmem:[#allocation183_spill] sm:$0xff] %v15830_v63  ;;  %v15840_v60 = vld [vmem:[%s19203_s3 + $0x578] sm:$0xff]  ;;  %v15845_v61 = vld [vmem:[%s19203_s3 + $0x580] sm:$0xff] }
  0x59   :  { %19602 = vst [vmem:[#allocation184_spill] sm:$0xff] %v15835_v59  ;;  %19603 = vst [vmem:[#allocation185_spill] sm:$0xff] %v15840_v60  ;;  %v15850_v62 = vld [vmem:[%s19203_s3 + $0x588] sm:$0xff]  ;;  %v15855_v63 = vld [vmem:[%s19203_s3 + $0x590] sm:$0xff] }
  0x5a   :  { %19604 = vst [vmem:[#allocation186_spill] sm:$0xff] %v15845_v61  ;;  %19605 = vst [vmem:[#allocation187_spill] sm:$0xff] %v15850_v62  ;;  %v15860_v59 = vld [vmem:[%s19203_s3 + $0x598] sm:$0xff]  ;;  %v15865_v60 = vld [vmem:[%s19203_s3 + $0x5a0] sm:$0xff] }
  0x5b   :  { %19606 = vst [vmem:[#allocation188_spill] sm:$0xff] %v15855_v63  ;;  %19607 = vst [vmem:[#allocation189_spill] sm:$0xff] %v15860_v59  ;;  %v15870_v61 = vld [vmem:[%s19203_s3 + $0x5a8] sm:$0xff]  ;;  %v15875_v62 = vld [vmem:[%s19203_s3 + $0x5b0] sm:$0xff] }
  0x5c   :  { %19608 = vst [vmem:[#allocation190_spill] sm:$0xff] %v15865_v60  ;;  %19609 = vst [vmem:[#allocation191_spill] sm:$0xff] %v15870_v61  ;;  %v15880_v63 = vld [vmem:[%s19203_s3 + $0x5b8] sm:$0xff]  ;;  %v15885_v59 = vld [vmem:[%s19203_s3 + $0x5c0] sm:$0xff] }
  0x5d   :  { %19610 = vst [vmem:[#allocation192_spill] sm:$0xff] %v15875_v62  ;;  %19611 = vst [vmem:[#allocation193_spill] sm:$0xff] %v15880_v63  ;;  %v15890_v60 = vld [vmem:[%s19203_s3 + $0x5c8] sm:$0xff]  ;;  %v15895_v61 = vld [vmem:[%s19203_s3 + $0x5d0] sm:$0xff] }
  0x5e   :  { %19612 = vst [vmem:[#allocation194_spill] sm:$0xff] %v15885_v59  ;;  %19613 = vst [vmem:[#allocation195_spill] sm:$0xff] %v15890_v60  ;;  %v15900_v62 = vld [vmem:[%s19203_s3 + $0x5d8] sm:$0xff]  ;;  %v15905_v63 = vld [vmem:[%s19203_s3 + $0x5e0] sm:$0xff] }
  0x5f   :  { %19614 = vst [vmem:[#allocation196_spill] sm:$0xff] %v15895_v61  ;;  %19615 = vst [vmem:[#allocation197_spill] sm:$0xff] %v15900_v62  ;;  %v15910_v59 = vld [vmem:[%s19203_s3 + $0x5e8] sm:$0xff]  ;;  %v15915_v60 = vld [vmem:[%s19203_s3 + $0x5f0] sm:$0xff] }
  0x60   :  { %19616 = vst [vmem:[#allocation198_spill] sm:$0xff] %v15905_v63  ;;  %19617 = vst [vmem:[#allocation199_spill] sm:$0xff] %v15910_v59  ;;  %v15920_v61 = vld [vmem:[%s19203_s3 + $0x5f8] sm:$0xff]  ;;  %v15925_v62 = vld [vmem:[%s19203_s3 + $0x600] sm:$0xff] }
  0x61   :  { %19618 = vst [vmem:[#allocation200_spill] sm:$0xff] %v15915_v60  ;;  %19619 = vst [vmem:[#allocation201_spill] sm:$0xff] %v15920_v61  ;;  %v15930_v63 = vld [vmem:[%s19203_s3 + $0x608] sm:$0xff]  ;;  %v15935_v59 = vld [vmem:[%s19203_s3 + $0x610] sm:$0xff] }
  0x62   :  { %19620 = vst [vmem:[#allocation202_spill] sm:$0xff] %v15925_v62  ;;  %19621 = vst [vmem:[#allocation203_spill] sm:$0xff] %v15930_v63  ;;  %v15940_v60 = vld [vmem:[%s19203_s3 + $0x618] sm:$0xff]  ;;  %v15945_v61 = vld [vmem:[%s19203_s3 + $0x620] sm:$0xff] }
  0x63   :  { %19622 = vst [vmem:[#allocation204_spill] sm:$0xff] %v15935_v59  ;;  %19623 = vst [vmem:[#allocation205_spill] sm:$0xff] %v15940_v60  ;;  %v15950_v62 = vld [vmem:[%s19203_s3 + $0x628] sm:$0xff]  ;;  %v15955_v63 = vld [vmem:[%s19203_s3 + $0x630] sm:$0xff] }
  0x64   :  { %19624 = vst [vmem:[#allocation206_spill] sm:$0xff] %v15945_v61  ;;  %19625 = vst [vmem:[#allocation207_spill] sm:$0xff] %v15950_v62  ;;  %v15960_v59 = vld [vmem:[%s19203_s3 + $0x638] sm:$0xff] }
  0x65   :  { %19626 = vst [vmem:[#allocation208_spill] sm:$0xff] %v15955_v63  ;;  %19627 = vst [vmem:[#allocation209_spill] sm:$0xff] %v15960_v59 }
  0x66   :  { %476 = vsyncadd [#allocation5], 25600  ;;  %v15965_v61 = vld [vmem:[%s19206_s6] sm:$0xff]  ;;  %v15970_v62 = vld [vmem:[%s19206_s6 + $0x8] sm:$0xff] }
  0x67   :  { %19628 = vst [vmem:[#allocation210_spill] sm:$0xff] %v15965_v61  ;;  %19629 = vst [vmem:[#allocation211_spill] sm:$0xff] %v15970_v62  ;;  %v15975_v63 = vld [vmem:[%s19206_s6 + $0x10] sm:$0xff]  ;;  %v15980_v59 = vld [vmem:[%s19206_s6 + $0x18] sm:$0xff] }
  0x68   :  { %19630 = vst [vmem:[#allocation212_spill] sm:$0xff] %v15975_v63  ;;  %19631 = vst [vmem:[#allocation213_spill] sm:$0xff] %v15980_v59  ;;  %v15985_v60 = vld [vmem:[%s19206_s6 + $0x20] sm:$0xff]  ;;  %v15990_v61 = vld [vmem:[%s19206_s6 + $0x28] sm:$0xff] }
  0x69   :  { %19632 = vst [vmem:[#allocation214_spill] sm:$0xff] %v15985_v60  ;;  %19633 = vst [vmem:[#allocation215_spill] sm:$0xff] %v15990_v61  ;;  %v15995_v62 = vld [vmem:[%s19206_s6 + $0x30] sm:$0xff]  ;;  %v16000_v63 = vld [vmem:[%s19206_s6 + $0x38] sm:$0xff] }
  0x6a   :  { %19634 = vst [vmem:[#allocation216_spill] sm:$0xff] %v15995_v62  ;;  %19635 = vst [vmem:[#allocation217_spill] sm:$0xff] %v16000_v63  ;;  %v16005_v59 = vld [vmem:[%s19206_s6 + $0x40] sm:$0xff]  ;;  %v16010_v60 = vld [vmem:[%s19206_s6 + $0x48] sm:$0xff] }
  0x6b   :  { %19636 = vst [vmem:[#allocation218_spill] sm:$0xff] %v16005_v59  ;;  %19637 = vst [vmem:[#allocation219_spill] sm:$0xff] %v16010_v60  ;;  %v16015_v61 = vld [vmem:[%s19206_s6 + $0x50] sm:$0xff]  ;;  %v16020_v62 = vld [vmem:[%s19206_s6 + $0x58] sm:$0xff] }
  0x6c   :  { %19638 = vst [vmem:[#allocation220_spill] sm:$0xff] %v16015_v61  ;;  %19639 = vst [vmem:[#allocation221_spill] sm:$0xff] %v16020_v62  ;;  %v16025_v63 = vld [vmem:[%s19206_s6 + $0x60] sm:$0xff]  ;;  %v16030_v59 = vld [vmem:[%s19206_s6 + $0x68] sm:$0xff] }
  0x6d   :  { %19640 = vst [vmem:[#allocation222_spill] sm:$0xff] %v16025_v63  ;;  %19641 = vst [vmem:[#allocation223_spill] sm:$0xff] %v16030_v59  ;;  %v16035_v60 = vld [vmem:[%s19206_s6 + $0x70] sm:$0xff]  ;;  %v16040_v61 = vld [vmem:[%s19206_s6 + $0x78] sm:$0xff] }
  0x6e   :  { %19642 = vst [vmem:[#allocation224_spill] sm:$0xff] %v16035_v60  ;;  %19643 = vst [vmem:[#allocation225_spill] sm:$0xff] %v16040_v61  ;;  %v16045_v62 = vld [vmem:[%s19206_s6 + $0x80] sm:$0xff]  ;;  %v16050_v63 = vld [vmem:[%s19206_s6 + $0x88] sm:$0xff] }
  0x6f   :  { %19644 = vst [vmem:[#allocation226_spill] sm:$0xff] %v16045_v62  ;;  %19645 = vst [vmem:[#allocation227_spill] sm:$0xff] %v16050_v63  ;;  %v16055_v59 = vld [vmem:[%s19206_s6 + $0x90] sm:$0xff]  ;;  %v16060_v60 = vld [vmem:[%s19206_s6 + $0x98] sm:$0xff] }
  0x70   :  { %19646 = vst [vmem:[#allocation228_spill] sm:$0xff] %v16055_v59  ;;  %19647 = vst [vmem:[#allocation229_spill] sm:$0xff] %v16060_v60  ;;  %v16065_v61 = vld [vmem:[%s19206_s6 + $0xa0] sm:$0xff]  ;;  %v16070_v62 = vld [vmem:[%s19206_s6 + $0xa8] sm:$0xff] }
  0x71   :  { %19648 = vst [vmem:[#allocation230_spill] sm:$0xff] %v16065_v61  ;;  %19649 = vst [vmem:[#allocation231_spill] sm:$0xff] %v16070_v62  ;;  %v16075_v63 = vld [vmem:[%s19206_s6 + $0xb0] sm:$0xff]  ;;  %v16080_v59 = vld [vmem:[%s19206_s6 + $0xb8] sm:$0xff] }
  0x72   :  { %19650 = vst [vmem:[#allocation232_spill] sm:$0xff] %v16075_v63  ;;  %19651 = vst [vmem:[#allocation233_spill] sm:$0xff] %v16080_v59  ;;  %v16085_v60 = vld [vmem:[%s19206_s6 + $0xc0] sm:$0xff]  ;;  %v16090_v61 = vld [vmem:[%s19206_s6 + $0xc8] sm:$0xff] }
  0x73   :  { %19652 = vst [vmem:[#allocation234_spill] sm:$0xff] %v16085_v60  ;;  %19653 = vst [vmem:[#allocation235_spill] sm:$0xff] %v16090_v61  ;;  %v16095_v62 = vld [vmem:[%s19206_s6 + $0xd0] sm:$0xff]  ;;  %v16100_v63 = vld [vmem:[%s19206_s6 + $0xd8] sm:$0xff] }
  0x74   :  { %19654 = vst [vmem:[#allocation236_spill] sm:$0xff] %v16095_v62  ;;  %19655 = vst [vmem:[#allocation237_spill] sm:$0xff] %v16100_v63  ;;  %v16105_v59 = vld [vmem:[%s19206_s6 + $0xe0] sm:$0xff]  ;;  %v16110_v60 = vld [vmem:[%s19206_s6 + $0xe8] sm:$0xff] }
  0x75   :  { %19656 = vst [vmem:[#allocation238_spill] sm:$0xff] %v16105_v59  ;;  %19657 = vst [vmem:[#allocation239_spill] sm:$0xff] %v16110_v60  ;;  %v16115_v61 = vld [vmem:[%s19206_s6 + $0xf0] sm:$0xff]  ;;  %v16120_v62 = vld [vmem:[%s19206_s6 + $0xf8] sm:$0xff] }
  0x76   :  { %19658 = vst [vmem:[#allocation240_spill] sm:$0xff] %v16115_v61  ;;  %19659 = vst [vmem:[#allocation241_spill] sm:$0xff] %v16120_v62  ;;  %v16125_v63 = vld [vmem:[%s19206_s6 + $0x100] sm:$0xff]  ;;  %v16130_v59 = vld [vmem:[%s19206_s6 + $0x108] sm:$0xff] }
  0x77   :  { %19660 = vst [vmem:[#allocation242_spill] sm:$0xff] %v16125_v63  ;;  %19661 = vst [vmem:[#allocation243_spill] sm:$0xff] %v16130_v59  ;;  %v16135_v60 = vld [vmem:[%s19206_s6 + $0x110] sm:$0xff]  ;;  %v16140_v61 = vld [vmem:[%s19206_s6 + $0x118] sm:$0xff] }
  0x78   :  { %19662 = vst [vmem:[#allocation244_spill] sm:$0xff] %v16135_v60  ;;  %19663 = vst [vmem:[#allocation245_spill] sm:$0xff] %v16140_v61  ;;  %v16145_v62 = vld [vmem:[%s19206_s6 + $0x120] sm:$0xff]  ;;  %v16150_v63 = vld [vmem:[%s19206_s6 + $0x128] sm:$0xff] }
  0x79   :  { %19664 = vst [vmem:[#allocation246_spill] sm:$0xff] %v16145_v62  ;;  %19665 = vst [vmem:[#allocation247_spill] sm:$0xff] %v16150_v63  ;;  %v16155_v59 = vld [vmem:[%s19206_s6 + $0x130] sm:$0xff]  ;;  %v16160_v60 = vld [vmem:[%s19206_s6 + $0x138] sm:$0xff] }
  0x7a   :  { %19666 = vst [vmem:[#allocation248_spill] sm:$0xff] %v16155_v59  ;;  %19667 = vst [vmem:[#allocation249_spill] sm:$0xff] %v16160_v60  ;;  %v16165_v61 = vld [vmem:[%s19206_s6 + $0x140] sm:$0xff]  ;;  %v16170_v62 = vld [vmem:[%s19206_s6 + $0x148] sm:$0xff] }
  0x7b   :  { %19668 = vst [vmem:[#allocation250_spill] sm:$0xff] %v16165_v61  ;;  %19669 = vst [vmem:[#allocation251_spill] sm:$0xff] %v16170_v62  ;;  %v16175_v63 = vld [vmem:[%s19206_s6 + $0x150] sm:$0xff]  ;;  %v16180_v59 = vld [vmem:[%s19206_s6 + $0x158] sm:$0xff] }
  0x7c   :  { %19670 = vst [vmem:[#allocation252_spill] sm:$0xff] %v16175_v63  ;;  %19671 = vst [vmem:[#allocation253_spill] sm:$0xff] %v16180_v59  ;;  %v16185_v60 = vld [vmem:[%s19206_s6 + $0x160] sm:$0xff]  ;;  %v16190_v61 = vld [vmem:[%s19206_s6 + $0x168] sm:$0xff] }
  0x7d   :  { %19672 = vst [vmem:[#allocation254_spill] sm:$0xff] %v16185_v60  ;;  %19673 = vst [vmem:[#allocation255_spill] sm:$0xff] %v16190_v61  ;;  %v16195_v62 = vld [vmem:[%s19206_s6 + $0x170] sm:$0xff]  ;;  %v16200_v63 = vld [vmem:[%s19206_s6 + $0x178] sm:$0xff] }
  0x7e   :  { %19674 = vst [vmem:[#allocation256_spill] sm:$0xff] %v16195_v62  ;;  %19675 = vst [vmem:[#allocation257_spill] sm:$0xff] %v16200_v63  ;;  %v16205_v59 = vld [vmem:[%s19206_s6 + $0x180] sm:$0xff]  ;;  %v16210_v60 = vld [vmem:[%s19206_s6 + $0x188] sm:$0xff] }
  0x7f   :  { %19676 = vst [vmem:[#allocation258_spill] sm:$0xff] %v16205_v59  ;;  %19677 = vst [vmem:[#allocation259_spill] sm:$0xff] %v16210_v60  ;;  %v16215_v61 = vld [vmem:[%s19206_s6 + $0x190] sm:$0xff]  ;;  %v16220_v62 = vld [vmem:[%s19206_s6 + $0x198] sm:$0xff] }
  0x80   :  { %19678 = vst [vmem:[#allocation260_spill] sm:$0xff] %v16215_v61  ;;  %19679 = vst [vmem:[#allocation261_spill] sm:$0xff] %v16220_v62  ;;  %v16225_v63 = vld [vmem:[%s19206_s6 + $0x1a0] sm:$0xff]  ;;  %v16230_v59 = vld [vmem:[%s19206_s6 + $0x1a8] sm:$0xff] }
  0x81   :  { %19680 = vst [vmem:[#allocation262_spill] sm:$0xff] %v16225_v63  ;;  %19681 = vst [vmem:[#allocation263_spill] sm:$0xff] %v16230_v59  ;;  %v16235_v60 = vld [vmem:[%s19206_s6 + $0x1b0] sm:$0xff]  ;;  %v16240_v61 = vld [vmem:[%s19206_s6 + $0x1b8] sm:$0xff] }
  0x82   :  { %19682 = vst [vmem:[#allocation264_spill] sm:$0xff] %v16235_v60  ;;  %19683 = vst [vmem:[#allocation265_spill] sm:$0xff] %v16240_v61  ;;  %v16245_v62 = vld [vmem:[%s19206_s6 + $0x1c0] sm:$0xff]  ;;  %v16250_v63 = vld [vmem:[%s19206_s6 + $0x1c8] sm:$0xff] }
  0x83   :  { %19684 = vst [vmem:[#allocation266_spill] sm:$0xff] %v16245_v62  ;;  %19685 = vst [vmem:[#allocation267_spill] sm:$0xff] %v16250_v63  ;;  %v16255_v59 = vld [vmem:[%s19206_s6 + $0x1d0] sm:$0xff]  ;;  %v16260_v60 = vld [vmem:[%s19206_s6 + $0x1d8] sm:$0xff] }
  0x84   :  { %19686 = vst [vmem:[#allocation268_spill] sm:$0xff] %v16255_v59  ;;  %19687 = vst [vmem:[#allocation269_spill] sm:$0xff] %v16260_v60  ;;  %v16265_v61 = vld [vmem:[%s19206_s6 + $0x1e0] sm:$0xff]  ;;  %v16270_v62 = vld [vmem:[%s19206_s6 + $0x1e8] sm:$0xff] }
  0x85   :  { %19688 = vst [vmem:[#allocation270_spill] sm:$0xff] %v16265_v61  ;;  %19689 = vst [vmem:[#allocation271_spill] sm:$0xff] %v16270_v62  ;;  %v16275_v63 = vld [vmem:[%s19206_s6 + $0x1f0] sm:$0xff]  ;;  %v16280_v59 = vld [vmem:[%s19206_s6 + $0x1f8] sm:$0xff] }
  0x86   :  { %19690 = vst [vmem:[#allocation272_spill] sm:$0xff] %v16275_v63  ;;  %19691 = vst [vmem:[#allocation273_spill] sm:$0xff] %v16280_v59  ;;  %v16285_v60 = vld [vmem:[%s19206_s6 + $0x200] sm:$0xff]  ;;  %v16290_v61 = vld [vmem:[%s19206_s6 + $0x208] sm:$0xff] }
  0x87   :  { %19692 = vst [vmem:[#allocation274_spill] sm:$0xff] %v16285_v60  ;;  %19693 = vst [vmem:[#allocation275_spill] sm:$0xff] %v16290_v61  ;;  %v16295_v62 = vld [vmem:[%s19206_s6 + $0x210] sm:$0xff]  ;;  %v16300_v63 = vld [vmem:[%s19206_s6 + $0x218] sm:$0xff] }
  0x88   :  { %19694 = vst [vmem:[#allocation276_spill] sm:$0xff] %v16295_v62  ;;  %19695 = vst [vmem:[#allocation277_spill] sm:$0xff] %v16300_v63  ;;  %v16305_v59 = vld [vmem:[%s19206_s6 + $0x220] sm:$0xff]  ;;  %v16310_v60 = vld [vmem:[%s19206_s6 + $0x228] sm:$0xff] }
  0x89   :  { %19696 = vst [vmem:[#allocation278_spill] sm:$0xff] %v16305_v59  ;;  %19697 = vst [vmem:[#allocation279_spill] sm:$0xff] %v16310_v60  ;;  %v16315_v61 = vld [vmem:[%s19206_s6 + $0x230] sm:$0xff]  ;;  %v16320_v62 = vld [vmem:[%s19206_s6 + $0x238] sm:$0xff] }
  0x8a   :  { %19698 = vst [vmem:[#allocation280_spill] sm:$0xff] %v16315_v61  ;;  %19699 = vst [vmem:[#allocation281_spill] sm:$0xff] %v16320_v62  ;;  %v16325_v63 = vld [vmem:[%s19206_s6 + $0x240] sm:$0xff]  ;;  %v16330_v59 = vld [vmem:[%s19206_s6 + $0x248] sm:$0xff] }
  0x8b   :  { %19700 = vst [vmem:[#allocation282_spill] sm:$0xff] %v16325_v63  ;;  %19701 = vst [vmem:[#allocation283_spill] sm:$0xff] %v16330_v59  ;;  %v16335_v60 = vld [vmem:[%s19206_s6 + $0x250] sm:$0xff]  ;;  %v16340_v61 = vld [vmem:[%s19206_s6 + $0x258] sm:$0xff] }
  0x8c   :  { %19702 = vst [vmem:[#allocation284_spill] sm:$0xff] %v16335_v60  ;;  %19703 = vst [vmem:[#allocation285_spill] sm:$0xff] %v16340_v61  ;;  %v16345_v62 = vld [vmem:[%s19206_s6 + $0x260] sm:$0xff]  ;;  %v16350_v63 = vld [vmem:[%s19206_s6 + $0x268] sm:$0xff] }
  0x8d   :  { %19704 = vst [vmem:[#allocation286_spill] sm:$0xff] %v16345_v62  ;;  %19705 = vst [vmem:[#allocation287_spill] sm:$0xff] %v16350_v63  ;;  %v16355_v59 = vld [vmem:[%s19206_s6 + $0x270] sm:$0xff]  ;;  %v16360_v60 = vld [vmem:[%s19206_s6 + $0x278] sm:$0xff] }
  0x8e   :  { %19706 = vst [vmem:[#allocation288_spill] sm:$0xff] %v16355_v59  ;;  %19707 = vst [vmem:[#allocation289_spill] sm:$0xff] %v16360_v60  ;;  %v16365_v61 = vld [vmem:[%s19206_s6 + $0x280] sm:$0xff]  ;;  %v16370_v62 = vld [vmem:[%s19206_s6 + $0x288] sm:$0xff] }
  0x8f   :  { %19708 = vst [vmem:[#allocation290_spill] sm:$0xff] %v16365_v61  ;;  %19709 = vst [vmem:[#allocation291_spill] sm:$0xff] %v16370_v62  ;;  %v16375_v63 = vld [vmem:[%s19206_s6 + $0x290] sm:$0xff]  ;;  %v16380_v59 = vld [vmem:[%s19206_s6 + $0x298] sm:$0xff] }
  0x90   :  { %19710 = vst [vmem:[#allocation292_spill] sm:$0xff] %v16375_v63  ;;  %19711 = vst [vmem:[#allocation293_spill] sm:$0xff] %v16380_v59  ;;  %v16385_v60 = vld [vmem:[%s19206_s6 + $0x2a0] sm:$0xff]  ;;  %v16390_v61 = vld [vmem:[%s19206_s6 + $0x2a8] sm:$0xff] }
  0x91   :  { %19712 = vst [vmem:[#allocation294_spill] sm:$0xff] %v16385_v60  ;;  %19713 = vst [vmem:[#allocation295_spill] sm:$0xff] %v16390_v61  ;;  %v16395_v62 = vld [vmem:[%s19206_s6 + $0x2b0] sm:$0xff]  ;;  %v16400_v63 = vld [vmem:[%s19206_s6 + $0x2b8] sm:$0xff] }
  0x92   :  { %19714 = vst [vmem:[#allocation296_spill] sm:$0xff] %v16395_v62  ;;  %19715 = vst [vmem:[#allocation297_spill] sm:$0xff] %v16400_v63  ;;  %v16405_v59 = vld [vmem:[%s19206_s6 + $0x2c0] sm:$0xff]  ;;  %v16410_v60 = vld [vmem:[%s19206_s6 + $0x2c8] sm:$0xff] }
  0x93   :  { %19716 = vst [vmem:[#allocation298_spill] sm:$0xff] %v16405_v59  ;;  %19717 = vst [vmem:[#allocation299_spill] sm:$0xff] %v16410_v60  ;;  %v16415_v61 = vld [vmem:[%s19206_s6 + $0x2d0] sm:$0xff]  ;;  %v16420_v62 = vld [vmem:[%s19206_s6 + $0x2d8] sm:$0xff] }
  0x94   :  { %19718 = vst [vmem:[#allocation300_spill] sm:$0xff] %v16415_v61  ;;  %19719 = vst [vmem:[#allocation301_spill] sm:$0xff] %v16420_v62  ;;  %v16425_v63 = vld [vmem:[%s19206_s6 + $0x2e0] sm:$0xff]  ;;  %v16430_v59 = vld [vmem:[%s19206_s6 + $0x2e8] sm:$0xff] }
  0x95   :  { %19720 = vst [vmem:[#allocation302_spill] sm:$0xff] %v16425_v63  ;;  %19721 = vst [vmem:[#allocation303_spill] sm:$0xff] %v16430_v59  ;;  %v16435_v60 = vld [vmem:[%s19206_s6 + $0x2f0] sm:$0xff]  ;;  %v16440_v61 = vld [vmem:[%s19206_s6 + $0x2f8] sm:$0xff] }
  0x96   :  { %19722 = vst [vmem:[#allocation304_spill] sm:$0xff] %v16435_v60  ;;  %19723 = vst [vmem:[#allocation305_spill] sm:$0xff] %v16440_v61  ;;  %v16445_v62 = vld [vmem:[%s19206_s6 + $0x300] sm:$0xff]  ;;  %v16450_v63 = vld [vmem:[%s19206_s6 + $0x308] sm:$0xff] }
  0x97   :  { %19724 = vst [vmem:[#allocation306_spill] sm:$0xff] %v16445_v62  ;;  %19725 = vst [vmem:[#allocation307_spill] sm:$0xff] %v16450_v63  ;;  %v16455_v59 = vld [vmem:[%s19206_s6 + $0x310] sm:$0xff]  ;;  %v16460_v60 = vld [vmem:[%s19206_s6 + $0x318] sm:$0xff] }
  0x98   :  { %19726 = vst [vmem:[#allocation308_spill] sm:$0xff] %v16455_v59  ;;  %19727 = vst [vmem:[#allocation309_spill] sm:$0xff] %v16460_v60  ;;  %v16465_v61 = vld [vmem:[%s19206_s6 + $0x320] sm:$0xff]  ;;  %v16470_v62 = vld [vmem:[%s19206_s6 + $0x328] sm:$0xff] }
  0x99   :  { %19728 = vst [vmem:[#allocation310_spill] sm:$0xff] %v16465_v61  ;;  %19729 = vst [vmem:[#allocation311_spill] sm:$0xff] %v16470_v62  ;;  %v16475_v63 = vld [vmem:[%s19206_s6 + $0x330] sm:$0xff]  ;;  %v16480_v59 = vld [vmem:[%s19206_s6 + $0x338] sm:$0xff] }
  0x9a   :  { %19730 = vst [vmem:[#allocation312_spill] sm:$0xff] %v16475_v63  ;;  %19731 = vst [vmem:[#allocation313_spill] sm:$0xff] %v16480_v59  ;;  %v16485_v60 = vld [vmem:[%s19206_s6 + $0x340] sm:$0xff]  ;;  %v16490_v61 = vld [vmem:[%s19206_s6 + $0x348] sm:$0xff] }
  0x9b   :  { %19732 = vst [vmem:[#allocation314_spill] sm:$0xff] %v16485_v60  ;;  %19733 = vst [vmem:[#allocation315_spill] sm:$0xff] %v16490_v61  ;;  %v16495_v62 = vld [vmem:[%s19206_s6 + $0x350] sm:$0xff]  ;;  %v16500_v63 = vld [vmem:[%s19206_s6 + $0x358] sm:$0xff] }
  0x9c   :  { %19734 = vst [vmem:[#allocation316_spill] sm:$0xff] %v16495_v62  ;;  %19735 = vst [vmem:[#allocation317_spill] sm:$0xff] %v16500_v63  ;;  %v16505_v59 = vld [vmem:[%s19206_s6 + $0x360] sm:$0xff]  ;;  %v16510_v60 = vld [vmem:[%s19206_s6 + $0x368] sm:$0xff] }
  0x9d   :  { %19736 = vst [vmem:[#allocation318_spill] sm:$0xff] %v16505_v59  ;;  %19737 = vst [vmem:[#allocation319_spill] sm:$0xff] %v16510_v60  ;;  %v16515_v61 = vld [vmem:[%s19206_s6 + $0x370] sm:$0xff]  ;;  %v16520_v62 = vld [vmem:[%s19206_s6 + $0x378] sm:$0xff] }
  0x9e   :  { %19738 = vst [vmem:[#allocation320_spill] sm:$0xff] %v16515_v61  ;;  %19739 = vst [vmem:[#allocation321_spill] sm:$0xff] %v16520_v62  ;;  %v16525_v63 = vld [vmem:[%s19206_s6 + $0x380] sm:$0xff]  ;;  %v16530_v59 = vld [vmem:[%s19206_s6 + $0x388] sm:$0xff] }
  0x9f   :  { %19740 = vst [vmem:[#allocation322_spill] sm:$0xff] %v16525_v63  ;;  %19741 = vst [vmem:[#allocation323_spill] sm:$0xff] %v16530_v59  ;;  %v16535_v60 = vld [vmem:[%s19206_s6 + $0x390] sm:$0xff]  ;;  %v16540_v61 = vld [vmem:[%s19206_s6 + $0x398] sm:$0xff] }
  0xa0   :  { %19742 = vst [vmem:[#allocation324_spill] sm:$0xff] %v16535_v60  ;;  %19743 = vst [vmem:[#allocation325_spill] sm:$0xff] %v16540_v61  ;;  %v16545_v62 = vld [vmem:[%s19206_s6 + $0x3a0] sm:$0xff]  ;;  %v16550_v63 = vld [vmem:[%s19206_s6 + $0x3a8] sm:$0xff] }
  0xa1   :  { %19744 = vst [vmem:[#allocation326_spill] sm:$0xff] %v16545_v62  ;;  %19745 = vst [vmem:[#allocation327_spill] sm:$0xff] %v16550_v63  ;;  %v16555_v59 = vld [vmem:[%s19206_s6 + $0x3b0] sm:$0xff]  ;;  %v16560_v60 = vld [vmem:[%s19206_s6 + $0x3b8] sm:$0xff] }
  0xa2   :  { %19746 = vst [vmem:[#allocation328_spill] sm:$0xff] %v16555_v59  ;;  %19747 = vst [vmem:[#allocation329_spill] sm:$0xff] %v16560_v60  ;;  %v16565_v61 = vld [vmem:[%s19206_s6 + $0x3c0] sm:$0xff]  ;;  %v16570_v62 = vld [vmem:[%s19206_s6 + $0x3c8] sm:$0xff] }
  0xa3   :  { %19748 = vst [vmem:[#allocation330_spill] sm:$0xff] %v16565_v61  ;;  %19749 = vst [vmem:[#allocation331_spill] sm:$0xff] %v16570_v62  ;;  %v16575_v63 = vld [vmem:[%s19206_s6 + $0x3d0] sm:$0xff]  ;;  %v16580_v59 = vld [vmem:[%s19206_s6 + $0x3d8] sm:$0xff] }
  0xa4   :  { %19750 = vst [vmem:[#allocation332_spill] sm:$0xff] %v16575_v63  ;;  %19751 = vst [vmem:[#allocation333_spill] sm:$0xff] %v16580_v59  ;;  %v16585_v60 = vld [vmem:[%s19206_s6 + $0x3e0] sm:$0xff]  ;;  %v16590_v61 = vld [vmem:[%s19206_s6 + $0x3e8] sm:$0xff] }
  0xa5   :  { %19752 = vst [vmem:[#allocation334_spill] sm:$0xff] %v16585_v60  ;;  %19753 = vst [vmem:[#allocation335_spill] sm:$0xff] %v16590_v61  ;;  %v16595_v62 = vld [vmem:[%s19206_s6 + $0x3f0] sm:$0xff]  ;;  %v16600_v63 = vld [vmem:[%s19206_s6 + $0x3f8] sm:$0xff] }
  0xa6   :  { %19754 = vst [vmem:[#allocation336_spill] sm:$0xff] %v16595_v62  ;;  %19755 = vst [vmem:[#allocation337_spill] sm:$0xff] %v16600_v63 }
  0xa7   :  { %773 = vsyncadd [#allocation5 + $0x1], 16384  ;;  %v774_v60 = vld [vmem:[%s19201_s1] sm:$0xff]  ;;  %v775_v59 = vld [vmem:[%s19201_s1 + $0x8] sm:$0xff]  ;;  %vm821_vm0 = vcmask 261120  }
  0xa8   :  { %v16608_v61 = vpack.c.bf16 %v775_v59, %v774_v60  ;;  %v776_v62 = vld [vmem:[%s19201_s1 + $0x10] sm:$0xff]  ;;  %v777_v63 = vld [vmem:[%s19201_s1 + $0x18] sm:$0xff]  ;;  %v779_v58 = vld [vmem:[%s19200_s0] sm:$0xff] }
  0xa9   :  { %v16619_v57 = vpack.c.bf16 %v777_v63, %v776_v62  ;;  %10833 = vmatprep.mubr.msk.f32.mxu1 %vm821_vm0, %v779_v58  ;;  %v780_v59 = vld [vmem:[%s19200_s0 + $0x8] sm:$0xff]  ;;  %v781_v58 = vld [vmem:[%s19200_s0 + $0x10] sm:$0xff]  ;;  %v782_v60 = vld [vmem:[%s19200_s0 + $0x18] sm:$0xff] }
  0xaa   :  { %13160 = vmatprep.subr.bf16.mxu1 %v16608_v61  ;;  %13176 = vmatprep.subr.bf16.mxu0 %v16608_v61  ;;  %v783_v62 = vld [vmem:[%s19200_s0 + $0x20] sm:$0xff]  ;;  %v784_v56 = vld [vmem:[%s19200_s0 + $0x28] sm:$0xff]  ;;  %v785_v55 = vld [vmem:[%s19200_s0 + $0x30] sm:$0xff] }
  0xab   :  { %13162 = vmatpush3.bf16.msra.mxu1 %v16608_v61  ;;  %13178 = vmatpush3.bf16.msra.mxu0 %v16608_v61  ;;  %v1708_v63 = vld [vmem:[%s19200_s0 + $0x240] sm:$0xff]  ;;  %v2191_v51 = vld [vmem:[%s19200_s0 + $0x410] sm:$0xff] }
  0xac   :  { %13164 = vmatprep.subr.bf16.mxu1 %v16619_v57  ;;  %13180 = vmatprep.subr.bf16.mxu0 %v16619_v57  ;;  %v2193_v47 = vld [vmem:[%s19200_s0 + $0x420] sm:$0xff]  ;;  %v2195_v43 = vld [vmem:[%s19200_s0 + $0x430] sm:$0xff] }
  0xad   :  { %10957 = vmatprep.mubr.msk.f32.mxu0 %vm821_vm0, %v1708_v63  ;;  %v786_v63 = vld [vmem:[%s19200_s0 + $0x38] sm:$0xff]  ;;  %v2197_v39 = vld [vmem:[%s19200_s0 + $0x440] sm:$0xff]  ;;  %v2199_v35 = vld [vmem:[%s19200_s0 + $0x450] sm:$0xff] }
  0xae   :  { %v2201_v31 = vld [vmem:[%s19200_s0 + $0x460] sm:$0xff]  ;;  %v2203_v27 = vld [vmem:[%s19200_s0 + $0x470] sm:$0xff] }
  0xaf   :  { %13166 = vmatpush3.bf16.msra.mxu1 %v16619_v57  ;;  %13182 = vmatpush3.bf16.msra.mxu0 %v16619_v57  ;;  %v17317_v5 = vld [vmem:[%s19202_s2] ss:$0 sm:$0xff] }
  0xb0   :  { %13168 = vmatprep.subr.bf16.mxu1 %v16608_v61 }
  0xb2   :  { %10834 = vmatmul.mubr.msk.f32.vlgmr.msra.gmra.mrb[0].mxu1 %vm821_vm0, %v780_v59  ;;  %v1709_v59 = vld [vmem:[%s19200_s0 + $0x248] sm:$0xff] }
  0xb3   :  { %13170 = vmatpush3.bf16.msra.mxu1 %v16608_v61  ;;  %10836 = vmatprep.mubr.msk.f32.mxu1 %vm821_vm0, %v781_v58  ;;  %v1710_v58 = vld [vmem:[%s19200_s0 + $0x250] sm:$0xff] }
  0xb4   :  { %13172 = vmatprep.subr.bf16.mxu1 %v16619_v57  ;;  %10958 = vmatmul.mubr.msk.f32.vlgmr.msra.gmra.mrb[0].mxu0 %vm821_vm0, %v1709_v59  ;;  %v787_v59 = vld [vmem:[%s19200_s0 + $0x40] sm:$0xff] }
  0xb5   :  { %10960 = vmatprep.mubr.msk.f32.mxu0 %vm821_vm0, %v1710_v58  ;;  %v788_v58 = vld [vmem:[%s19200_s0 + $0x48] sm:$0xff] }
  0xb6   :  { %10837 = vmatmul.mubr.msk.f32.gmra.mrb[2].mxu1 %vm821_vm0, %v782_v60  ;;  %v1711_v60 = vld [vmem:[%s19200_s0 + $0x258] sm:$0xff] }
  0xb7   :  { %10839 = vmatprep.mubr.msk.f32.mxu1 %vm821_vm0, %v783_v62  ;;  %13174 = vmatpush3.bf16.msra.mxu1 %v16619_v57  ;;  %v1712_v62 = vld [vmem:[%s19200_s0 + $0x260] sm:$0xff] }
  0xb8   :  { %14455 = vmatprep.subr.bf16.mxu1 %v16608_v61  ;;  %10961 = vmatmul.mubr.msk.f32.gmra.mrb[2].mxu0 %vm821_vm0, %v1711_v60  ;;  %v789_v60 = vld [vmem:[%s19200_s0 + $0x50] sm:$0xff] }
  0xb9   :  { %10963 = vmatprep.mubr.msk.f32.mxu0 %vm821_vm0, %v1712_v62  ;;  %v1715_v62 = vld [vmem:[%s19200_s0 + $0x278] sm:$0xff] }
  0xba   :  { %10840 = vmatmul.mubr.msk.f32.gmra.mrb[4].mxu1 %vm821_vm0, %v784_v56  ;;  %v1713_v56 = vld [vmem:[%s19200_s0 + $0x268] sm:$0xff] }
  0xbb   :  { %10842 = vmatprep.mubr.msk.f32.mxu1 %vm821_vm0, %v785_v55  ;;  %v1714_v55 = vld [vmem:[%s19200_s0 + $0x270] sm:$0xff] }
  0xbc   :  { %10964 = vmatmul.mubr.msk.f32.gmra.mrb[4].mxu0 %vm821_vm0, %v1713_v56  ;;  %v791_v56 = vld [vmem:[%s19200_s0 + $0x60] sm:$0xff] }
  0xbd   :  { %10966 = vmatprep.mubr.msk.f32.mxu0 %vm821_vm0, %v1714_v55  ;;  %v1717_v55 = vld [vmem:[%s19200_s0 + $0x288] sm:$0xff] }
  0xbe   :  { %10843 = vmatmul.mubr.msk.f32.gmra.mrb[6].mxu1 %vm821_vm0, %v786_v63  ;;  %v1716_v63 = vld [vmem:[%s19200_s0 + $0x280] sm:$0xff] }
  0xbf   :  { %10845 = vmatprep.mubr.msk.f32.mxu1 %vm821_vm0, %v787_v59  ;;  %v790_v59 = vld [vmem:[%s19200_s0 + $0x58] sm:$0xff] }
  0xc0   :  { %10967 = vmatmul.mubr.msk.f32.gmra.mrb[6].mxu0 %vm821_vm0, %v1715_v62  ;;  %v793_v62 = vld [vmem:[%s19200_s0 + $0x70] sm:$0xff] }
  0xc1   :  { %10969 = vmatprep.mubr.msk.f32.mxu0 %vm821_vm0, %v1716_v63  ;;  %v1719_v63 = vld [vmem:[%s19200_s0 + $0x298] sm:$0xff] }
  0xc2   :  { %10846 = vmatmul.mubr.msk.f32.gmra.mrb[8].mxu1 %vm821_vm0, %v788_v58  ;;  %v1718_v58 = vld [vmem:[%s19200_s0 + $0x290] sm:$0xff] }
  0xc3   :  { %10848 = vmatprep.mubr.msk.f32.mxu1 %vm821_vm0, %v789_v60  ;;  %v792_v60 = vld [vmem:[%s19200_s0 + $0x68] sm:$0xff] }
  0xc4   :  { %10970 = vmatmul.mubr.msk.f32.gmra.mrb[8].mxu0 %vm821_vm0, %v1717_v55  ;;  %v795_v55 = vld [vmem:[%s19200_s0 + $0x80] sm:$0xff] }
  0xc5   :  { %10972 = vmatprep.mubr.msk.f32.mxu0 %vm821_vm0, %v1718_v58  ;;  %v1721_v58 = vld [vmem:[%s19200_s0 + $0x2a8] sm:$0xff] }
  0xc6   :  { %10849 = vmatmul.mubr.msk.f32.gmra.mrb[10].mxu1 %vm821_vm0, %v790_v59  ;;  %v1720_v59 = vld [vmem:[%s19200_s0 + $0x2a0] sm:$0xff] }
  0xc7   :  { %10851 = vmatprep.mubr.msk.f32.mxu1 %vm821_vm0, %v791_v56  ;;  %v794_v56 = vld [vmem:[%s19200_s0 + $0x78] sm:$0xff] }
  0xc8   :  { %10973 = vmatmul.mubr.msk.f32.gmra.mrb[10].mxu0 %vm821_vm0, %v1719_v63  ;;  %v797_v63 = vld [vmem:[%s19200_s0 + $0x90] sm:$0xff] }
  0xc9   :  { %10975 = vmatprep.mubr.msk.f32.mxu0 %vm821_vm0, %v1720_v59  ;;  %v1723_v59 = vld [vmem:[%s19200_s0 + $0x2b8] sm:$0xff] }
  0xca   :  { %10852 = vmatmul.mubr.msk.f32.gmra.mrb[12].mxu1 %vm821_vm0, %v792_v60  ;;  %v1722_v60 = vld [vmem:[%s19200_s0 + $0x2b0] sm:$0xff] }
  0xcb   :  { %10854 = vmatprep.mubr.msk.f32.mxu1 %vm821_vm0, %v793_v62  ;;  %v796_v62 = vld [vmem:[%s19200_s0 + $0x88] sm:$0xff] }
  0xcc   :  { %10976 = vmatmul.mubr.msk.f32.gmra.mrb[12].mxu0 %vm821_vm0, %v1721_v58  ;;  %v800_v58 = vld [vmem:[%s19200_s0 + $0xa8] sm:$0xff] }
  0xcd   :  { %10978 = vmatprep.mubr.msk.f32.mxu0 %vm821_vm0, %v1722_v60  ;;  %v801_v60 = vld [vmem:[%s19200_s0 + $0xb0] sm:$0xff] }
  0xce   :  { %10855 = vmatmul.mubr.msk.f32.gmra.mrb[14].mxu1 %vm821_vm0, %v794_v56  ;;  %v798_v56 = vld [vmem:[%s19200_s0 + $0x98] sm:$0xff] }
  0xcf   :  { %10857 = vmatprep.mubr.msk.f32.mxu1 %vm821_vm0, %v795_v55  ;;  %v799_v55 = vld [vmem:[%s19200_s0 + $0xa0] sm:$0xff] }
  0xd0   :  { %10979 = vmatmul.mubr.msk.f32.gmra.mrb[14].mxu0 %vm821_vm0, %v1723_v59  ;;  %v804_v59 = vld [vmem:[%s19200_s0 + $0xc8] sm:$0xff] }
  0xd2   :  { %10858 = vmatmul.mubr.msk.f32.gmra.mrb[16].mxu1 %vm821_vm0, %v796_v62  ;;  %v802_v62 = vld [vmem:[%s19200_s0 + $0xb8] sm:$0xff] }
  0xd3   :  { %10860 = vmatprep.mubr.msk.f32.mxu1 %vm821_vm0, %v797_v63  ;;  %v803_v63 = vld [vmem:[%s19200_s0 + $0xc0] sm:$0xff] }
  0xd6   :  { %10861 = vmatmul.mubr.msk.f32.gmra.mrb[18].mxu1 %vm821_vm0, %v798_v56  ;;  %v805_v56 = vld [vmem:[%s19200_s0 + $0xd0] sm:$0xff] }
  0xd7   :  { %10863 = vmatprep.mubr.msk.f32.mxu1 %vm821_vm0, %v799_v55  ;;  %v806_v55 = vld [vmem:[%s19200_s0 + $0xd8] sm:$0xff] }
  0xda   :  { %10864 = vmatmul.mubr.msk.f32.gmra.mrb[20].mxu1 %vm821_vm0, %v800_v58  ;;  %v807_v58 = vld [vmem:[%s19200_s0 + $0xe0] sm:$0xff] }
  0xdb   :  { %10866 = vmatprep.mubr.msk.f32.mxu1 %vm821_vm0, %v801_v60  ;;  %v808_v60 = vld [vmem:[%s19200_s0 + $0xe8] sm:$0xff] }
  0xde   :  { %10867 = vmatmul.mubr.msk.f32.gmra.mrb[22].mxu1 %vm821_vm0, %v802_v62  ;;  %v809_v62 = vld [vmem:[%s19200_s0 + $0xf0] sm:$0xff] }
  0xdf   :  { %10869 = vmatprep.mubr.msk.f32.mxu1 %vm821_vm0, %v803_v63  ;;  %v810_v63 = vld [vmem:[%s19200_s0 + $0xf8] sm:$0xff] }
  0xe2   :  { %10870 = vmatmul.mubr.msk.f32.gmra.mrb[24].mxu1 %vm821_vm0, %v804_v59  ;;  %v811_v59 = vld [vmem:[%s19200_s0 + $0x100] sm:$0xff] }
  0xe3   :  { %10872 = vmatprep.mubr.msk.f32.mxu1 %vm821_vm0, %v805_v56  ;;  %v812_v56 = vld [vmem:[%s19200_s0 + $0x108] sm:$0xff] }
  0xe6   :  { %10873 = vmatmul.mubr.msk.f32.gmra.mrb[26].mxu1 %vm821_vm0, %v806_v55  ;;  %v813_v55 = vld [vmem:[%s19200_s0 + $0x110] sm:$0xff] }
  0xe7   :  { %10875 = vmatprep.mubr.msk.f32.mxu1 %vm821_vm0, %v807_v58  ;;  %v814_v58 = vld [vmem:[%s19200_s0 + $0x118] sm:$0xff] }
  0xea   :  { %10876 = vmatmul.mubr.msk.f32.gmra.mrb[28].mxu1 %vm821_vm0, %v808_v60  ;;  %v1247_v60 = vld [vmem:[%s19200_s0 + $0x120] sm:$0xff] }
  0xeb   :  { %10878 = vmatprep.mubr.msk.f32.mxu1 %vm821_vm0, %v809_v62  ;;  %v1248_v62 = vld [vmem:[%s19200_s0 + $0x128] sm:$0xff] }
  0xee   :  { %10879 = vmatmul.mubr.msk.f32.gmra.mrb[30].mxu1 %vm821_vm0, %v810_v63  ;;  %v1249_v63 = vld [vmem:[%s19200_s0 + $0x130] sm:$0xff] }
  0xef   :  { %10881 = vmatprep.mubr.msk.f32.mxu1 %vm821_vm0, %v811_v59  ;;  %v1250_v59 = vld [vmem:[%s19200_s0 + $0x138] sm:$0xff] }
  0xf2   :  { %10882 = vmatmul.mubr.msk.f32.gmra.mrb[32].mxu1 %vm821_vm0, %v812_v56  ;;  %v1251_v56 = vld [vmem:[%s19200_s0 + $0x140] sm:$0xff] }
  0xf3   :  { %10884 = vmatprep.mubr.msk.f32.mxu1 %vm821_vm0, %v813_v55  ;;  %v1252_v55 = vld [vmem:[%s19200_s0 + $0x148] sm:$0xff] }
  0xf6   :  { %10885 = vmatmul.mubr.msk.f32.gmra.mrb[34].mxu1 %vm821_vm0, %v814_v58  ;;  %v1253_v58 = vld [vmem:[%s19200_s0 + $0x150] sm:$0xff] }
  0xf7   :  { %10895 = vmatprep.mubr.msk.f32.mxu1 %vm821_vm0, %v1247_v60  ;;  %v1254_v60 = vld [vmem:[%s19200_s0 + $0x158] sm:$0xff] }
  0xfa   :  { %10896 = vmatmul.mubr.msk.f32.vlgmr.msra.gmra.mrb[36].mxu1 %vm821_vm0, %v1248_v62  ;;  %v1255_v62 = vld [vmem:[%s19200_s0 + $0x160] sm:$0xff] }
  0xfb   :  { %14457 = vmatpush3.bf16.msra.mxu1 %v16608_v61  ;;  %10898 = vmatprep.mubr.msk.f32.mxu1 %vm821_vm0, %v1249_v63  ;;  %v1256_v63 = vld [vmem:[%s19200_s0 + $0x168] sm:$0xff] }
  0xfc   :  { %14456 = vmatprep.subr.bf16.mxu1 %v16619_v57 }
  0xfe   :  { %10899 = vmatmul.mubr.msk.f32.gmra.mrb[38].mxu1 %vm821_vm0, %v1250_v59  ;;  %v1257_v59 = vld [vmem:[%s19200_s0 + $0x170] sm:$0xff] }
  0xff   :  { %10901 = vmatprep.mubr.msk.f32.mxu1 %vm821_vm0, %v1251_v56  ;;  %14458 = vmatpush3.bf16.msra.mxu1 %v16619_v57  ;;  %v1258_v56 = vld [vmem:[%s19200_s0 + $0x178] sm:$0xff] }
 0x100   :  { %13184 = vmatprep.subr.bf16.mxu1 %v16608_v61 }
 0x102   :  { %10902 = vmatmul.mubr.msk.f32.gmra.mrb[40].mxu1 %vm821_vm0, %v1252_v55  ;;  %v1259_v55 = vld [vmem:[%s19200_s0 + $0x180] sm:$0xff] }
 0x103   :  { %10904 = vmatprep.mubr.msk.f32.mxu1 %vm821_vm0, %v1253_v58  ;;  %v1260_v58 = vld [vmem:[%s19200_s0 + $0x188] sm:$0xff] }
 0x106   :  { %10905 = vmatmul.mubr.msk.f32.gmra.mrb[42].mxu1 %vm821_vm0, %v1254_v60  ;;  %v1261_v60 = vld [vmem:[%s19200_s0 + $0x190] sm:$0xff] }
 0x107   :  { %10907 = vmatprep.mubr.msk.f32.mxu1 %vm821_vm0, %v1255_v62  ;;  %v1262_v62 = vld [vmem:[%s19200_s0 + $0x198] sm:$0xff] }
 0x10a   :  { %10908 = vmatmul.mubr.msk.f32.gmra.mrb[44].mxu1 %vm821_vm0, %v1256_v63  ;;  %v1263_v63 = vld [vmem:[%s19200_s0 + $0x1a0] sm:$0xff] }
 0x10b   :  { %10910 = vmatprep.mubr.msk.f32.mxu1 %vm821_vm0, %v1257_v59  ;;  %v1264_v59 = vld [vmem:[%s19200_s0 + $0x1a8] sm:$0xff] }
 0x10e   :  { %10911 = vmatmul.mubr.msk.f32.gmra.mrb[46].mxu1 %vm821_vm0, %v1258_v56  ;;  %v1265_v56 = vld [vmem:[%s19200_s0 + $0x1b0] sm:$0xff] }
 0x10f   :  { %10913 = vmatprep.mubr.msk.f32.mxu1 %vm821_vm0, %v1259_v55  ;;  %v1266_v55 = vld [vmem:[%s19200_s0 + $0x1b8] sm:$0xff] }
 0x112   :  { %10914 = vmatmul.mubr.msk.f32.gmra.mrb[48].mxu1 %vm821_vm0, %v1260_v58  ;;  %v1267_v58 = vld [vmem:[%s19200_s0 + $0x1c0] sm:$0xff] }
 0x113   :  { %10916 = vmatprep.mubr.msk.f32.mxu1 %vm821_vm0, %v1261_v60  ;;  %v1268_v60 = vld [vmem:[%s19200_s0 + $0x1c8] sm:$0xff] }
 0x116   :  { %10917 = vmatmul.mubr.msk.f32.gmra.mrb[50].mxu1 %vm821_vm0, %v1262_v62  ;;  %v1269_v62 = vld [vmem:[%s19200_s0 + $0x1d0] sm:$0xff] }
 0x117   :  { %10919 = vmatprep.mubr.msk.f32.mxu1 %vm821_vm0, %v1263_v63  ;;  %v1270_v63 = vld [vmem:[%s19200_s0 + $0x1d8] sm:$0xff] }
 0x11a   :  { %10920 = vmatmul.mubr.msk.f32.gmra.mrb[52].mxu1 %vm821_vm0, %v1264_v59  ;;  %v1271_v59 = vld [vmem:[%s19200_s0 + $0x1e0] sm:$0xff] }
 0x11b   :  { %10922 = vmatprep.mubr.msk.f32.mxu1 %vm821_vm0, %v1265_v56  ;;  %v1272_v56 = vld [vmem:[%s19200_s0 + $0x1e8] sm:$0xff] }
 0x11e   :  { %10923 = vmatmul.mubr.msk.f32.gmra.mrb[54].mxu1 %vm821_vm0, %v1266_v55  ;;  %v1273_v55 = vld [vmem:[%s19200_s0 + $0x1f0] sm:$0xff] }
 0x11f   :  { %10925 = vmatprep.mubr.msk.f32.mxu1 %vm821_vm0, %v1267_v58  ;;  %v1274_v58 = vld [vmem:[%s19200_s0 + $0x1f8] sm:$0xff] }
 0x122   :  { %10926 = vmatmul.mubr.msk.f32.gmra.mrb[56].mxu1 %vm821_vm0, %v1268_v60  ;;  %v1275_v60 = vld [vmem:[%s19200_s0 + $0x200] sm:$0xff] }
 0x123   :  { %10928 = vmatprep.mubr.msk.f32.mxu1 %vm821_vm0, %v1269_v62  ;;  %v1276_v62 = vld [vmem:[%s19200_s0 + $0x208] sm:$0xff] }
 0x126   :  { %10929 = vmatmul.mubr.msk.f32.gmra.mrb[58].mxu1 %vm821_vm0, %v1270_v63  ;;  %v1277_v63 = vld [vmem:[%s19200_s0 + $0x210] sm:$0xff] }
 0x127   :  { %10931 = vmatprep.mubr.msk.f32.mxu1 %vm821_vm0, %v1271_v59  ;;  %v1278_v59 = vld [vmem:[%s19200_s0 + $0x218] sm:$0xff] }
 0x12a   :  { %10932 = vmatmul.mubr.msk.f32.gmra.mrb[60].mxu1 %vm821_vm0, %v1272_v56  ;;  %v1279_v56 = vld [vmem:[%s19200_s0 + $0x220] sm:$0xff] }
 0x12b   :  { %10934 = vmatprep.mubr.msk.f32.mxu1 %vm821_vm0, %v1273_v55  ;;  %v1280_v55 = vld [vmem:[%s19200_s0 + $0x228] sm:$0xff] }
 0x12e   :  { %10935 = vmatmul.mubr.msk.f32.gmra.mrb[62].mxu1 %vm821_vm0, %v1274_v58  ;;  %v1281_v58 = vld [vmem:[%s19200_s0 + $0x230] sm:$0xff] }
 0x12f   :  { %10937 = vmatprep.mubr.msk.f32.mxu1 %vm821_vm0, %v1275_v60  ;;  %v1282_v60 = vld [vmem:[%s19200_s0 + $0x238] sm:$0xff] }
 0x132   :  { %10938 = vmatmul.mubr.msk.f32.gmra.mrb[64].mxu1 %vm821_vm0, %v1276_v62  ;;  %v1724_v62 = vld [vmem:[%s19200_s0 + $0x2c0] sm:$0xff] }
 0x133   :  { %10940 = vmatprep.mubr.msk.f32.mxu1 %vm821_vm0, %v1277_v63  ;;  %v1725_v63 = vld [vmem:[%s19200_s0 + $0x2c8] sm:$0xff] }
 0x136   :  { %10941 = vmatmul.mubr.msk.f32.gmra.mrb[66].mxu1 %vm821_vm0, %v1278_v59  ;;  %v1726_v59 = vld [vmem:[%s19200_s0 + $0x2d0] sm:$0xff] }
 0x137   :  { %10943 = vmatprep.mubr.msk.f32.mxu1 %vm821_vm0, %v1279_v56  ;;  %v1727_v56 = vld [vmem:[%s19200_s0 + $0x2d8] sm:$0xff] }
 0x13a   :  { %10944 = vmatmul.mubr.msk.f32.gmra.mrb[68].mxu1 %vm821_vm0, %v1280_v55  ;;  %v1728_v55 = vld [vmem:[%s19200_s0 + $0x2e0] sm:$0xff] }
 0x13b   :  { %10946 = vmatprep.mubr.msk.f32.mxu1 %vm821_vm0, %v1281_v58  ;;  %v1730_v58 = vld [vmem:[%s19200_s0 + $0x2f0] sm:$0xff] }
 0x13e   :  { %10947 = vmatmul.mubr.msk.f32.gmra.mrb[70].mxu1 %vm821_vm0, %v1282_v60  ;;  %v1731_v60 = vld [vmem:[%s19200_s0 + $0x2f8] sm:$0xff] }
 0x13f   :  { %10981 = vmatprep.mubr.msk.f32.mxu1 %vm821_vm0, %v1724_v62  ;;  %v1732_v62 = vld [vmem:[%s19200_s0 + $0x300] sm:$0xff] }
 0x142   :  { %10982 = vmatmul.mubr.msk.f32.vlgmr.msra.gmra.mrb[72].mxu1 %vm821_vm0, %v1725_v63  ;;  %v1734_v63 = vld [vmem:[%s19200_s0 + $0x310] sm:$0xff] }
 0x143   :  { %13186 = vmatpush3.bf16.msra.mxu1 %v16608_v61  ;;  %10984 = vmatprep.mubr.msk.f32.mxu1 %vm821_vm0, %v1726_v59  ;;  %v1729_v61 = vld [vmem:[%s19200_s0 + $0x2e8] sm:$0xff]  ;;  %v1735_v59 = vld [vmem:[%s19200_s0 + $0x318] sm:$0xff] }
 0x144   :  { %13188 = vmatprep.subr.bf16.mxu1 %v16619_v57 }
 0x146   :  { %10985 = vmatmul.mubr.msk.f32.gmra.mrb[74].mxu1 %vm821_vm0, %v1727_v56  ;;  %v1736_v56 = vld [vmem:[%s19200_s0 + $0x320] sm:$0xff] }
 0x147   :  { %10987 = vmatprep.mubr.msk.f32.mxu1 %vm821_vm0, %v1728_v55  ;;  %13190 = vmatpush3.bf16.msra.mxu1 %v16619_v57  ;;  %v1733_v57 = vld [vmem:[%s19200_s0 + $0x308] sm:$0xff] }
 0x148   :  { %v1737_v55 = vld [vmem:[%s19200_s0 + $0x328] sm:$0xff] }
 0x14a   :  { %10988 = vmatmul.mubr.msk.f32.gmra.mrb[76].mxu1 %vm821_vm0, %v1729_v61  ;;  %v1738_v61 = vld [vmem:[%s19200_s0 + $0x330] sm:$0xff] }
 0x14b   :  { %10990 = vmatprep.mubr.msk.f32.mxu1 %vm821_vm0, %v1730_v58  ;;  %v1739_v58 = vld [vmem:[%s19200_s0 + $0x338] sm:$0xff] }
 0x14e   :  { %10991 = vmatmul.mubr.msk.f32.gmra.mrb[78].mxu1 %vm821_vm0, %v1731_v60  ;;  %v1740_v60 = vld [vmem:[%s19200_s0 + $0x340] sm:$0xff] }
 0x14f   :  { %10993 = vmatprep.mubr.msk.f32.mxu1 %vm821_vm0, %v1732_v62  ;;  %v1741_v62 = vld [vmem:[%s19200_s0 + $0x348] sm:$0xff] }
 0x152   :  { %10994 = vmatmul.mubr.msk.f32.gmra.mrb[80].mxu1 %vm821_vm0, %v1733_v57  ;;  %v1742_v57 = vld [vmem:[%s19200_s0 + $0x350] sm:$0xff] }
 0x153   :  { %10996 = vmatprep.mubr.msk.f32.mxu1 %vm821_vm0, %v1734_v63  ;;  %v1743_v63 = vld [vmem:[%s19200_s0 + $0x358] sm:$0xff] }
 0x156   :  { %10997 = vmatmul.mubr.msk.f32.gmra.mrb[82].mxu1 %vm821_vm0, %v1735_v59  ;;  %v2169_v59 = vld [vmem:[%s19200_s0 + $0x360] sm:$0xff] }
 0x157   :  { %10999 = vmatprep.mubr.msk.f32.mxu1 %vm821_vm0, %v1736_v56  ;;  %v2170_v56 = vld [vmem:[%s19200_s0 + $0x368] sm:$0xff] }
 0x15a   :  { %11000 = vmatmul.mubr.msk.f32.gmra.mrb[84].mxu1 %vm821_vm0, %v1737_v55  ;;  %v2171_v55 = vld [vmem:[%s19200_s0 + $0x370] sm:$0xff] }
 0x15b   :  { %11002 = vmatprep.mubr.msk.f32.mxu1 %vm821_vm0, %v1738_v61  ;;  %v2172_v61 = vld [vmem:[%s19200_s0 + $0x378] sm:$0xff] }
 0x15e   :  { %11003 = vmatmul.mubr.msk.f32.gmra.mrb[86].mxu1 %vm821_vm0, %v1739_v58  ;;  %v2173_v58 = vld [vmem:[%s19200_s0 + $0x380] sm:$0xff] }
 0x15f   :  { %11005 = vmatprep.mubr.msk.f32.mxu1 %vm821_vm0, %v1740_v60  ;;  %v2174_v60 = vld [vmem:[%s19200_s0 + $0x388] sm:$0xff] }
 0x162   :  { %11006 = vmatmul.mubr.msk.f32.gmra.mrb[88].mxu1 %vm821_vm0, %v1741_v62  ;;  %v2175_v62 = vld [vmem:[%s19200_s0 + $0x390] sm:$0xff] }
 0x163   :  { %11008 = vmatprep.mubr.msk.f32.mxu1 %vm821_vm0, %v1742_v57  ;;  %v2176_v57 = vld [vmem:[%s19200_s0 + $0x398] sm:$0xff] }
 0x166   :  { %11009 = vmatmul.mubr.msk.f32.gmra.mrb[90].mxu1 %vm821_vm0, %v1743_v63  ;;  %v2177_v63 = vld [vmem:[%s19200_s0 + $0x3a0] sm:$0xff] }
 0x167   :  { %11019 = vmatprep.mubr.msk.f32.mxu1 %vm821_vm0, %v2169_v59  ;;  %v2178_v59 = vld [vmem:[%s19200_s0 + $0x3a8] sm:$0xff] }
 0x16a   :  { %11020 = vmatmul.mubr.msk.f32.vlgmr.msra.gmra.mrb[92].mxu1 %vm821_vm0, %v2170_v56  ;;  %v2179_v56 = vld [vmem:[%s19200_s0 + $0x3b0] sm:$0xff] }
 0x16b   :  { %11022 = vmatprep.mubr.msk.f32.mxu1 %vm821_vm0, %v2171_v55  ;;  %v2180_v55 = vld [vmem:[%s19200_s0 + $0x3b8] sm:$0xff] }
 0x16e   :  { %11023 = vmatmul.mubr.msk.f32.gmra.mrb[94].mxu1 %vm821_vm0, %v2172_v61  ;;  %v2181_v61 = vld [vmem:[%s19200_s0 + $0x3c0] sm:$0xff] }
 0x16f   :  { %11025 = vmatprep.mubr.msk.f32.mxu1 %vm821_vm0, %v2173_v58  ;;  %v2182_v58 = vld [vmem:[%s19200_s0 + $0x3c8] sm:$0xff] }
 0x172   :  { %11026 = vmatmul.mubr.msk.f32.gmra.mrb[96].mxu1 %vm821_vm0, %v2174_v60  ;;  %v2183_v60 = vld [vmem:[%s19200_s0 + $0x3d0] sm:$0xff] }
 0x173   :  { %11028 = vmatprep.mubr.msk.f32.mxu1 %vm821_vm0, %v2175_v62  ;;  %v2184_v62 = vld [vmem:[%s19200_s0 + $0x3d8] sm:$0xff] }
 0x176   :  { %11029 = vmatmul.mubr.msk.f32.gmra.mrb[98].mxu1 %vm821_vm0, %v2176_v57  ;;  %v2185_v57 = vld [vmem:[%s19200_s0 + $0x3e0] sm:$0xff] }
 0x177   :  { %11031 = vmatprep.mubr.msk.f32.mxu1 %vm821_vm0, %v2177_v63 }
 0x17a   :  { %11032 = vmatmul.mubr.msk.f32.gmra.mrb[100].mxu1 %vm821_vm0, %v2178_v59 }
 0x17b   :  { %11034 = vmatprep.mubr.msk.f32.mxu1 %vm821_vm0, %v2179_v56  ;;  %v2186_v56 = vld [vmem:[%s19200_s0 + $0x3e8] sm:$0xff] }
 0x17e   :  { %11035 = vmatmul.mubr.msk.f32.gmra.mrb[102].mxu1 %vm821_vm0, %v2180_v55  ;;  %v2187_v55 = vld [vmem:[%s19200_s0 + $0x3f0] sm:$0xff] }
 0x17f   :  { %11037 = vmatprep.mubr.msk.f32.mxu1 %vm821_vm0, %v2181_v61 }
 0x182   :  { %11038 = vmatmul.mubr.msk.f32.gmra.mrb[104].mxu1 %vm821_vm0, %v2182_v58 }
 0x183   :  { %11040 = vmatprep.mubr.msk.f32.mxu1 %vm821_vm0, %v2183_v60  ;;  %v2188_v60 = vld [vmem:[%s19200_s0 + $0x3f8] sm:$0xff] }
 0x185   :  { %v17136_v63 = vpop.f32.mrb[0].mxu1 }
 0x186   :  { %v17138_v59 = vpop.f32.mrb[1].mxu1  ;;  %11041 = vmatmul.mubr.msk.f32.gmra.mrb[106].mxu1 %vm821_vm0, %v2184_v62  ;;  %v1002_v2 = vadd.f32 %v17136_v63, %v17317_v5 }
 0x187   :  { %11043 = vmatprep.mubr.msk.f32.mxu1 %vm821_vm0, %v2185_v57  ;;  %v17157_v62 = vpop.f32.mrb[0].mxu0  ;;  %v2189_v57 = vld [vmem:[%s19200_s0 + $0x400] sm:$0xff]  ;;  %v997_v0 = vadd.f32 %v17317_v5, %v17138_v59 }
 0x188   :  { %v17162_v54 = vpop.f32.mrb[1].mxu0  ;;  %v1924_v1 = vadd.f32 %v17157_v62, %v17317_v5  ;;  %v1176_v9 = vmax.f32 %v1002_v2, 0.0 }
 0x189   :  { %v17148_v61 = vpop.f32.mrb[2].mxu1  ;;  %v1919_v14 = vadd.f32 %v17317_v5, %v17162_v54 }
 0x18a   :  { %v17150_v58 = vpop.f32.mrb[3].mxu1  ;;  %11044 = vmatmul.mubr.msk.f32.gmra.mrb[108].mxu1 %vm821_vm0, %v2186_v56  ;;  %v2190_v56 = vld [vmem:[%s19200_s0 + $0x408] sm:$0xff]  ;;  %v1012_v11 = vadd.f32 %v17148_v61, %v17317_v5  ;;  %v2098_v8 = vmax.f32 %v1924_v1, 0.0 }
 0x18b   :  { %11046 = vmatprep.mubr.msk.f32.mxu1 %vm821_vm0, %v2187_v55  ;;  %v17173_v55 = vpop.f32.mrb[2].mxu0  ;;  %v1007_v10 = vadd.f32 %v17317_v5, %v17150_v58  ;;  %v2097_v54 = vmax.f32 %v1919_v14, 0.0 }
 0x18c   :  { %v17178_v50 = vpop.f32.mrb[3].mxu0  ;;  %v1934_v59 = vadd.f32 %v17173_v55, %v17317_v5 }
 0x18d   :  { %v17164_v53 = vpop.f32.mrb[4].mxu1 }
 0x18e   :  { %v17166_v52 = vpop.f32.mrb[5].mxu1  ;;  %11047 = vmatmul.mubr.msk.f32.gmra.mrb[110].mxu1 %vm821_vm0, %v2188_v60  ;;  %v2192_v60 = vld [vmem:[%s19200_s0 + $0x418] sm:$0xff]  ;;  %v1022_v61 = vadd.f32 %v17164_v53, %v17317_v5 }
 0x18f   :  { %11049 = vmatprep.mubr.msk.f32.mxu1 %vm821_vm0, %v2189_v57  ;;  %v17189_v57 = vpop.f32.mrb[4].mxu0  ;;  %v1017_v58 = vadd.f32 %v17317_v5, %v17166_v52 }
 0x190   :  { %v17194_v46 = vpop.f32.mrb[5].mxu0 }
 0x191   :  { %v17180_v49 = vpop.f32.mrb[6].mxu1 }
 0x192   :  { %v17182_v48 = vpop.f32.mrb[7].mxu1  ;;  %11050 = vmatmul.mubr.msk.f32.gmra.mrb[112].mxu1 %vm821_vm0, %v2190_v56 }
 0x193   :  { %11052 = vmatprep.mubr.msk.f32.mxu1 %vm821_vm0, %v2191_v51  ;;  %v2194_v51 = vld [vmem:[%s19200_s0 + $0x428] sm:$0xff]  ;;  %v17205_v56 = vpop.f32.mrb[6].mxu0 }
 0x194   :  { %v17210_v42 = vpop.f32.mrb[7].mxu0 }
 0x195   :  { %v17196_v45 = vpop.f32.mrb[8].mxu1 }
 0x196   :  { %v17198_v44 = vpop.f32.mrb[9].mxu1  ;;  %11053 = vmatmul.mubr.msk.f32.gmra.mrb[114].mxu1 %vm821_vm0, %v2192_v60 }
 0x197   :  { %11055 = vmatprep.mubr.msk.f32.mxu1 %vm821_vm0, %v2193_v47  ;;  %v2196_v47 = vld [vmem:[%s19200_s0 + $0x438] sm:$0xff]  ;;  %v17221_v60 = vpop.f32.mrb[8].mxu0 }
 0x198   :  { %v17226_v38 = vpop.f32.mrb[9].mxu0 }
 0x199   :  { %v17212_v41 = vpop.f32.mrb[10].mxu1 }
 0x19a   :  { %v17214_v40 = vpop.f32.mrb[11].mxu1  ;;  %11056 = vmatmul.mubr.msk.f32.gmra.mrb[116].mxu1 %vm821_vm0, %v2194_v51 }
 0x19b   :  { %11058 = vmatprep.mubr.msk.f32.mxu1 %vm821_vm0, %v2195_v43  ;;  %v2198_v43 = vld [vmem:[%s19200_s0 + $0x448] sm:$0xff]  ;;  %v17237_v51 = vpop.f32.mrb[10].mxu0 }
 0x19c   :  { %v17242_v34 = vpop.f32.mrb[11].mxu0 }
 0x19d   :  { %v17228_v37 = vpop.f32.mrb[12].mxu1 }
 0x19e   :  { %v17230_v36 = vpop.f32.mrb[13].mxu1  ;;  %11059 = vmatmul.mubr.msk.f32.gmra.mrb[118].mxu1 %vm821_vm0, %v2196_v47 }
 0x19f   :  { %11061 = vmatprep.mubr.msk.f32.mxu1 %vm821_vm0, %v2197_v39  ;;  %v2200_v39 = vld [vmem:[%s19200_s0 + $0x458] sm:$0xff]  ;;  %v17253_v47 = vpop.f32.mrb[12].mxu0 }
 0x1a0   :  { %v17258_v30 = vpop.f32.mrb[13].mxu0 }
 0x1a1   :  { %v17244_v33 = vpop.f32.mrb[14].mxu1 }
 0x1a2   :  { %v17246_v32 = vpop.f32.mrb[15].mxu1  ;;  %11062 = vmatmul.mubr.msk.f32.gmra.mrb[120].mxu1 %vm821_vm0, %v2198_v43 }
 0x1a3   :  { %11064 = vmatprep.mubr.msk.f32.mxu1 %vm821_vm0, %v2199_v35  ;;  %v2202_v35 = vld [vmem:[%s19200_s0 + $0x468] sm:$0xff]  ;;  %v17269_v43 = vpop.f32.mrb[14].mxu0 }
 0x1a4   :  { %v17274_v26 = vpop.f32.mrb[15].mxu0 }
 0x1a5   :  { %v17260_v29 = vpop.f32.mrb[16].mxu1 }
 0x1a6   :  { %v17262_v28 = vpop.f32.mrb[17].mxu1  ;;  %11065 = vmatmul.mubr.msk.f32.gmra.mrb[122].mxu1 %vm821_vm0, %v2200_v39 }
 0x1a7   :  { %11067 = vmatprep.mubr.msk.f32.mxu1 %vm821_vm0, %v2201_v31  ;;  %v2204_v31 = vld [vmem:[%s19200_s0 + $0x478] sm:$0xff] }
 0x1a9   :  { %v17276_v25 = vpop.f32.mrb[18].mxu1 }
 0x1aa   :  { %v17278_v24 = vpop.f32.mrb[19].mxu1  ;;  %11068 = vmatmul.mubr.msk.f32.gmra.mrb[124].mxu1 %vm821_vm0, %v2202_v35 }
 0x1ab   :  { %11070 = vmatprep.mubr.msk.f32.mxu1 %vm821_vm0, %v2203_v27 }
 0x1ad   :  { %v17285_v39 = vpop.f32.mrb[20].mxu1 }
 0x1ae   :  { %v17287_v23 = vpop.f32.mrb[21].mxu1  ;;  %11071 = vmatmul.mubr.msk.f32.gmra.mrb[126].mxu1 %vm821_vm0, %v2204_v31 }
 0x1b1   :  { %v17290_v22 = vpop.f32.mrb[22].mxu1 }
 0x1b2   :  { %v17292_v21 = vpop.f32.mrb[23].mxu1 }
 0x1b5   :  { %v17294_v20 = vpop.f32.mrb[24].mxu1 }
 0x1b6   :  { %v17296_v19 = vpop.f32.mrb[25].mxu1 }
 0x1b9   :  { %v17298_v35 = vpop.f32.mrb[26].mxu1 }
 0x1ba   :  { %v17300_v27 = vpop.f32.mrb[27].mxu1 }
 0x1bd   :  { %v17302_v18 = vpop.f32.mrb[28].mxu1 }
 0x1be   :  { %v17304_v17 = vpop.f32.mrb[29].mxu1 }
 0x1c1   :  { %v17306_v16 = vpop.f32.mrb[30].mxu1 }
 0x1c2   :  { %19756 = vst [vmem:[#allocation338_spill] sm:$0xff] %v17306_v16  ;;  %v17308_v7 = vpop.f32.mrb[31].mxu1 }
 0x1c3   :  { %19757 = vst [vmem:[#allocation339_spill] sm:$0xff] %v17308_v7  ;;  %v2100_v7 = vmax.f32 %v1934_v59, 0.0 }
 0x1c5   :  { %v17310_v31 = vpop.f32.mrb[32].mxu1 }
 0x1c6   :  { %19758 = vst [vmem:[#allocation340_spill] sm:$0xff] %v17310_v31  ;;  %v17312_v6 = vpop.f32.mrb[33].mxu1  ;;  %v1177_v31 = vmax.f32 %v1007_v10, 0.0  ;;  %v1179_v10 = vmax.f32 %v1017_v58, 0.0 }
 0x1c7   :  { %19759 = vst [vmem:[#allocation341_spill] sm:$0xff] %v17312_v6 }
 0x1c9   :  { %v17319_v4 = vpop.f32.mrb[34].mxu1 }
 0x1ca   :  { %19760 = vst [vmem:[#allocation342_spill] sm:$0xff] %v17319_v4  ;;  %v17321_v3 = vpop.f32.mrb[35].mxu1 }
 0x1cb   :  { %19761 = vst [vmem:[#allocation343_spill] sm:$0xff] %v17321_v3  ;;  %v1175_v3 = vmax.f32 %v997_v0, 0.0 }
 0x1cd   :  { %v10897_v15 = vpop.f32.mrb[36].mxu1 }
 0x1ce   :  { %v1463_v13 = vadd.f32 %v10897_v15, %v17317_v5  ;;  %v1457_v12 = vpop.f32.mrb[37].mxu1  ;;  %v1929_v15 = vadd.f32 %v17317_v5, %v17178_v50  ;;  %v1944_v50 = vadd.f32 %v17189_v57, %v17317_v5  ;;  %v1027_v57 = vadd.f32 %v17317_v5, %v17182_v48 }
 0x1cf   :  { %v1458_v63 = vadd.f32 %v17317_v5, %v1457_v12 }
 0x1d0   :  { %v1637_v62 = vmax.f32 %v1463_v13, 0.0  ;;  %v1178_v13 = vmax.f32 %v1012_v11, 0.0  ;;  %v2099_v52 = vmax.f32 %v1929_v15, 0.0  ;;  %v1180_v11 = vmax.f32 %v1022_v61, 0.0 }
 0x1d1   :  { %v1636_v4 = vmax.f32 %v1458_v63, 0.0  ;;  %v10900_v6 = vpop.f32.mrb[38].mxu1 }
 0x1d2   :  { %v1673_v12 = vadd.f32 %v1637_v62, %v1176_v9  ;;  %v1473_v2 = vadd.f32 %v10900_v6, %v17317_v5  ;;  %v1467_v1 = vpop.f32.mrb[39].mxu1  ;;  %v1939_v6 = vadd.f32 %v17317_v5, %v17194_v46  ;;  %v1032_v62 = vadd.f32 %v17180_v49, %v17317_v5 }
 0x1d3   :  { %v1672_v55 = vadd.f32 %v1636_v4, %v1175_v3  ;;  %v1468_v0 = vadd.f32 %v17317_v5, %v1467_v1  ;;  %v1954_v46 = vadd.f32 %v17205_v56, %v17317_v5  ;;  %v1949_v49 = vadd.f32 %v17317_v5, %v17210_v42 }
 0x1d4   :  { %v17347_v14 = vadd.f32 %v2098_v8, %v1673_v12  ;;  %v1639_v63 = vmax.f32 %v1473_v2, 0.0  ;;  %v2102_v2 = vmax.f32 %v1944_v50, 0.0  ;;  %v2101_v1 = vmax.f32 %v1939_v6, 0.0 }
 0x1d5   :  { %v17351_v53 = vadd.f32 %v2097_v54, %v1672_v55  ;;  %v1638_v16 = vmax.f32 %v1468_v0, 0.0  ;;  %v10903_v9 = vpop.f32.mrb[40].mxu1  ;;  %v1182_v0 = vmax.f32 %v1032_v62, 0.0  ;;  %v1181_v56 = vmax.f32 %v1027_v57, 0.0 }
 0x1d6   :  { %v1675_v3 = vadd.f32 %v1639_v63, %v1178_v13  ;;  %v1483_v4 = vadd.f32 %v10903_v9, %v17317_v5  ;;  %v1477_v8 = vpop.f32.mrb[41].mxu1  ;;  %v2104_v6 = vmax.f32 %v1954_v46, 0.0  ;;  %v1964_v42 = vadd.f32 %v17221_v60, %v17317_v5 }
 0x1d7   :  { %v1674_v59 = vadd.f32 %v1638_v16, %v1177_v31  ;;  %v1478_v54 = vadd.f32 %v17317_v5, %v1477_v8  ;;  %v1042_v16 = vadd.f32 %v17196_v45, %v17317_v5  ;;  %v1047_v60 = vadd.f32 %v17317_v5, %v17214_v40 }
 0x1d8   :  { %v17361_v15 = vadd.f32 %v2100_v7, %v1675_v3  ;;  %v1641_v12 = vmax.f32 %v1483_v4, 0.0  ;;  %v1037_v7 = vadd.f32 %v17317_v5, %v17198_v44  ;;  %v2103_v44 = vmax.f32 %v1949_v49, 0.0 }
 0x1d9   :  { %v17365_v61 = vadd.f32 %v2099_v52, %v1674_v59  ;;  %v1640_v58 = vmax.f32 %v1478_v54, 0.0  ;;  %v10906_v13 = vpop.f32.mrb[42].mxu1  ;;  %v1959_v4 = vadd.f32 %v17317_v5, %v17226_v38  ;;  %v1184_v8 = vmax.f32 %v1042_v16, 0.0 }
 0x1da   :  { %v1677_v48 = vadd.f32 %v1641_v12, %v1180_v11  ;;  %v1493_v31 = vadd.f32 %v10906_v13, %v17317_v5  ;;  %v1487_v55 = vpop.f32.mrb[43].mxu1  ;;  %v1183_v62 = vmax.f32 %v1037_v7, 0.0  ;;  %v1052_v54 = vadd.f32 %v17212_v41, %v17317_v5 }
 0x1db   :  { %v1676_v63 = vadd.f32 %v1640_v58, %v1179_v10  ;;  %v1488_v50 = vadd.f32 %v17317_v5, %v1487_v55  ;;  %v1974_v38 = vadd.f32 %v17237_v51, %v17317_v5  ;;  %v2105_v16 = vmax.f32 %v1959_v4, 0.0 }
 0x1dc   :  { %v17375_v52 = vadd.f32 %v2102_v2, %v1677_v48  ;;  %v1643_v9 = vmax.f32 %v1493_v31, 0.0  ;;  %v1969_v41 = vadd.f32 %v17317_v5, %v17242_v34  ;;  %v1062_v40 = vadd.f32 %v17228_v37, %v17317_v5 }
 0x1dd   :  { %v17379_v45 = vadd.f32 %v2101_v1, %v1676_v63  ;;  %v1642_v3 = vmax.f32 %v1488_v50, 0.0  ;;  %v10909_v11 = vpop.f32.mrb[44].mxu1  ;;  %v2106_v1 = vmax.f32 %v1964_v42, 0.0  ;;  %v1057_v48 = vadd.f32 %v17317_v5, %v17230_v36 }
 0x1de   :  { %v1679_v10 = vadd.f32 %v1643_v9, %v1182_v0  ;;  %v1503_v57 = vadd.f32 %v10909_v11, %v17317_v5  ;;  %v1497_v59 = vpop.f32.mrb[45].mxu1  ;;  %v1185_v51 = vmax.f32 %v1047_v60, 0.0  ;;  %v2108_v42 = vmax.f32 %v1974_v38, 0.0 }
 0x1df   :  { %v1678_v12 = vadd.f32 %v1642_v3, %v1181_v56  ;;  %v1498_v2 = vadd.f32 %v17317_v5, %v1497_v59  ;;  %v1186_v56 = vmax.f32 %v1052_v54, 0.0  ;;  %v1984_v34 = vadd.f32 %v17253_v47, %v17317_v5 }
 0x1e0   :  { %v17389_v46 = vadd.f32 %v2104_v6, %v1679_v10  ;;  %v1645_v58 = vmax.f32 %v1503_v57, 0.0  ;;  %v2107_v36 = vmax.f32 %v1969_v41, 0.0  ;;  %v1979_v11 = vadd.f32 %v17317_v5, %v17258_v30 }
 0x1e1   :  { %v17393_v13 = vadd.f32 %v2103_v44, %v1678_v12  ;;  %v1644_v49 = vmax.f32 %v1498_v2, 0.0  ;;  %v10912_v7 = vpop.f32.mrb[46].mxu1  ;;  %v1188_v4 = vmax.f32 %v1062_v40, 0.0  ;;  %v1072_v59 = vadd.f32 %v17244_v33, %v17317_v5 }
 0x1e2   :  { %v1681_v31 = vadd.f32 %v1645_v58, %v1184_v8  ;;  %v1513_v55 = vadd.f32 %v10912_v7, %v17317_v5  ;;  %v1507_v0 = vpop.f32.mrb[47].mxu1  ;;  %v1187_v8 = vmax.f32 %v1057_v48, 0.0  ;;  %v1067_v47 = vadd.f32 %v17317_v5, %v17246_v32 }
 0x1e3   :  { %v1680_v63 = vadd.f32 %v1644_v49, %v1183_v62  ;;  %v1508_v50 = vadd.f32 %v17317_v5, %v1507_v0  ;;  %v2110_v58 = vmax.f32 %v1984_v34, 0.0  ;;  %v1994_v30 = vadd.f32 %v17269_v43, %v17317_v5 }
 0x1e4   :  { %v17403_v9 = vadd.f32 %v2106_v1, %v1681_v31  ;;  %v1647_v6 = vmax.f32 %v1513_v55, 0.0  ;;  %v2109_v49 = vmax.f32 %v1979_v11, 0.0  ;;  %v1989_v33 = vadd.f32 %v17317_v5, %v17274_v26 }
 0x1e5   :  { %v17407_v37 = vadd.f32 %v2105_v16, %v1680_v63  ;;  %v1646_v3 = vmax.f32 %v1508_v50, 0.0  ;;  %v10915_v44 = vpop.f32.mrb[48].mxu1  ;;  %v1190_v40 = vmax.f32 %v1072_v59, 0.0  ;;  %v1189_v48 = vmax.f32 %v1067_v47, 0.0 }
 0x1e6   :  { %v1683_v62 = vadd.f32 %v1647_v6, %v1186_v56  ;;  %v1523_v10 = vadd.f32 %v10915_v44, %v17317_v5  ;;  %v1517_v57 = vpop.f32.mrb[49].mxu1  ;;  %v1082_v43 = vadd.f32 %v17260_v29, %v17317_v5  ;;  %v1077_v63 = vadd.f32 %v17317_v5, %v17262_v28 }
 0x1e7   :  { %v1682_v54 = vadd.f32 %v1646_v3, %v1185_v51  ;;  %v1518_v60 = vadd.f32 %v17317_v5, %v1517_v57  ;;  %v2112_v51 = vmax.f32 %v1994_v30, 0.0  ;;  %v2111_v6 = vmax.f32 %v1989_v33, 0.0 }
 0x1e8   :  { %v17417_v12 = vadd.f32 %v2108_v42, %v1683_v62  ;;  %v1649_v2 = vmax.f32 %v1523_v10, 0.0  ;;  %v1192_v29 = vmax.f32 %v1082_v43, 0.0  ;;  %v1191_v28 = vmax.f32 %v1077_v63, 0.0 }
 0x1e9   :  { %v17421_v1 = vadd.f32 %v2107_v36, %v1682_v54  ;;  %v1648_v38 = vmax.f32 %v1518_v60, 0.0  ;;  %v10918_v16 = vpop.f32.mrb[50].mxu1  ;;  %v1087_v10 = vadd.f32 %v17317_v5, %v17278_v24  ;;  %v1097_v24 = vadd.f32 %v17317_v5, %v17287_v23 }
 0x1ea   :  { %v1685_v7 = vadd.f32 %v1649_v2, %v1188_v4  ;;  %v1533_v32 = vadd.f32 %v10918_v16, %v17317_v5  ;;  %v1527_v41 = vpop.f32.mrb[51].mxu1  ;;  %v1092_v4 = vadd.f32 %v17276_v25, %v17317_v5  ;;  %v1107_v23 = vadd.f32 %v17317_v5, %v17292_v21 }
 0x1eb   :  { %v1684_v31 = vadd.f32 %v1648_v38, %v1187_v8  ;;  %v1528_v55 = vadd.f32 %v17317_v5, %v1527_v41  ;;  %v1102_v38 = vadd.f32 %v17285_v39, %v17317_v5  ;;  %v1193_v16 = vmax.f32 %v1087_v10, 0.0 }
 0x1ec   :  { %v17429_v0 = vadd.f32 %v2110_v58, %v1685_v7  ;;  %v1651_v56 = vmax.f32 %v1533_v32, 0.0  ;;  %v1194_v30 = vmax.f32 %v1092_v4, 0.0  ;;  %v1112_v39 = vadd.f32 %v17290_v22, %v17317_v5 }
 0x1ed   :  { %v17433_v26 = vadd.f32 %v2109_v49, %v1684_v31  ;;  %v1650_v50 = vmax.f32 %v1528_v55, 0.0  ;;  %v10921_v42 = vpop.f32.mrb[52].mxu1  ;;  %v1196_v55 = vmax.f32 %v1102_v38, 0.0  ;;  %v1122_v22 = vadd.f32 %v17294_v20, %v17317_v5 }
 0x1ee   :  { %v1687_v34 = vadd.f32 %v1651_v56, %v1190_v40  ;;  %v1543_v3 = vadd.f32 %v10921_v42, %v17317_v5  ;;  %v1537_v36 = vpop.f32.mrb[53].mxu1  ;;  %v1195_v56 = vmax.f32 %v1097_v24, 0.0  ;;  %v1117_v21 = vadd.f32 %v17317_v5, %v17296_v19 }
 0x1ef   :  { %v1686_v44 = vadd.f32 %v1650_v50, %v1189_v48  ;;  %v1538_v11 = vadd.f32 %v17317_v5, %v1537_v36  ;;  %v1198_v36 = vmax.f32 %v1112_v39, 0.0  ;;  %v1132_v20 = vadd.f32 %v17298_v35, %v17317_v5 }
 0x1f0   :  { %v17439_v8 = vadd.f32 %v2112_v51, %v1687_v34  ;;  %v1653_v62 = vmax.f32 %v1543_v3, 0.0  ;;  %v1127_v19 = vadd.f32 %v17317_v5, %v17300_v27  ;;  %v1142_v35 = vadd.f32 %v17302_v18, %v17317_v5 }
 0x1f1   :  { %v17443_v57 = vadd.f32 %v2111_v6, %v1686_v44  ;;  %v1652_v59 = vmax.f32 %v1538_v11, 0.0  ;;  %v10924_v47 = vpop.f32.mrb[54].mxu1  ;;  %v1197_v11 = vmax.f32 %v1107_v23, 0.0  ;;  %v1137_v27 = vadd.f32 %v17317_v5, %v17304_v17 }
 0x1f2   :  { %v17445_v54 = vadd.f32 %v1653_v62, %v1192_v29  ;;  %v1553_v60 = vadd.f32 %v10924_v47, %v17317_v5  ;;  %v1547_v2 = vpop.f32.mrb[55].mxu1 }
 0x1f3   :  { %v17448_v58 = vadd.f32 %v1652_v59, %v1191_v28  ;;  %v1548_v25 = vadd.f32 %v17317_v5, %v1547_v2 }
 0x1f4   :  { %v1655_v49 = vmax.f32 %v1553_v60, 0.0  ;;  %v1200_v60 = vmax.f32 %v1122_v22, 0.0  ;;  %v19763_v22 = vld [vmem:[#allocation339_spill] sm:$0xff] }
 0x1f5   :  { %v1654_v33 = vmax.f32 %v1548_v25, 0.0  ;;  %v10927_v7 = vpop.f32.mrb[56].mxu1  ;;  %v1199_v25 = vmax.f32 %v1117_v21, 0.0  ;;  %v1147_v17 = vadd.f32 %v17317_v5, %v19763_v22 }
 0x1f6   :  { %v17455_v32 = vadd.f32 %v1655_v49, %v1194_v30  ;;  %v1563_v41 = vadd.f32 %v10927_v7, %v17317_v5  ;;  %v1557_v40 = vpop.f32.mrb[57].mxu1 }
 0x1f7   :  { %v17458_v48 = vadd.f32 %v1654_v33, %v1193_v16  ;;  %v1558_v31 = vadd.f32 %v17317_v5, %v1557_v40 }
 0x1f8   :  { %v1657_v43 = vmax.f32 %v1563_v41, 0.0  ;;  %v1202_v41 = vmax.f32 %v1132_v20, 0.0 }
 0x1f9   :  { %v1656_v51 = vmax.f32 %v1558_v31, 0.0  ;;  %v10930_v63 = vpop.f32.mrb[58].mxu1  ;;  %v1201_v31 = vmax.f32 %v1127_v19, 0.0  ;;  %v19765_v19 = vld [vmem:[#allocation341_spill] sm:$0xff] }
 0x1fa   :  { %v17465_v50 = vadd.f32 %v1657_v43, %v1196_v55  ;;  %v1573_v6 = vadd.f32 %v10930_v63, %v17317_v5  ;;  %v1567_v42 = vpop.f32.mrb[59].mxu1 }
 0x1fb   :  { %v17468_v34 = vadd.f32 %v1656_v51, %v1195_v56  ;;  %v1568_v3 = vadd.f32 %v17317_v5, %v1567_v42  ;;  %v19762_v42 = vld [vmem:[#allocation338_spill] sm:$0xff] }
 0x1fc   :  { %v1659_v44 = vmax.f32 %v1573_v6, 0.0  ;;  %v1204_v6 = vmax.f32 %v1142_v35, 0.0  ;;  %v1152_v18 = vadd.f32 %v19762_v42, %v17317_v5 }
 0x1fd   :  { %v1658_v29 = vmax.f32 %v1568_v3, 0.0  ;;  %v10933_v4 = vpop.f32.mrb[60].mxu1 }
 0x1fe   :  { %v17475_v62 = vadd.f32 %v1659_v44, %v1198_v36  ;;  %v1583_v28 = vadd.f32 %v10933_v4, %v17317_v5  ;;  %v1577_v10 = vpop.f32.mrb[61].mxu1  ;;  %v1203_v36 = vmax.f32 %v1137_v27, 0.0  ;;  %v19766_v27 = vld [vmem:[#allocation342_spill] sm:$0xff] }
 0x1ff   :  { %v17478_v59 = vadd.f32 %v1658_v29, %v1197_v11  ;;  %v1578_v47 = vadd.f32 %v17317_v5, %v1577_v10 }
 0x200   :  { %v1661_v2 = vmax.f32 %v1583_v28, 0.0 }
 0x201   :  { %v1660_v30 = vmax.f32 %v1578_v47, 0.0  ;;  %v10936_v38 = vpop.f32.mrb[62].mxu1  ;;  %v1206_v47 = vmax.f32 %v1152_v18, 0.0 }
 0x202   :  { %v17485_v49 = vadd.f32 %v1661_v2, %v1200_v60  ;;  %v1593_v16 = vadd.f32 %v10936_v38, %v17317_v5  ;;  %v1587_v24 = vpop.f32.mrb[63].mxu1  ;;  %v19764_v60 = vld [vmem:[#allocation340_spill] sm:$0xff] }
 0x203   :  { %v17488_v33 = vadd.f32 %v1660_v30, %v1199_v25  ;;  %v1588_v7 = vadd.f32 %v17317_v5, %v1587_v24  ;;  %v1162_v20 = vadd.f32 %v19764_v60, %v17317_v5  ;;  %v1205_v25 = vmax.f32 %v1147_v17, 0.0 }
 0x204   :  { %v1663_v40 = vmax.f32 %v1593_v16, 0.0  ;;  %v1157_v30 = vadd.f32 %v17317_v5, %v19765_v19 }
 0x205   :  { %v1662_v55 = vmax.f32 %v1588_v7, 0.0  ;;  %v10939_v39 = vpop.f32.mrb[64].mxu1 }
 0x206   :  { %v17495_v43 = vadd.f32 %v1663_v40, %v1202_v41  ;;  %v1603_v56 = vadd.f32 %v10939_v39, %v17317_v5  ;;  %v1597_v23 = vpop.f32.mrb[65].mxu1 }
 0x207   :  { %v17498_v51 = vadd.f32 %v1662_v55, %v1201_v31  ;;  %v1598_v63 = vadd.f32 %v17317_v5, %v1597_v23  ;;  %v1208_v31 = vmax.f32 %v1162_v20, 0.0  ;;  %v1172_v55 = vadd.f32 %v19766_v27, %v17317_v5  ;;  %v19767_v23 = vld [vmem:[#allocation343_spill] sm:$0xff] }
 0x208   :  { %v1665_v3 = vmax.f32 %v1603_v56, 0.0  ;;  %v1207_v56 = vmax.f32 %v1157_v30, 0.0 }
 0x209   :  { %v1664_v44 = vmax.f32 %v1598_v63, 0.0  ;;  %v10942_v11 = vpop.f32.mrb[66].mxu1  ;;  %v1167_v63 = vadd.f32 %v17317_v5, %v19767_v23 }
 0x20a   :  { %v17505_v21 = vadd.f32 %v1665_v3, %v1204_v6  ;;  %v1613_v29 = vadd.f32 %v10942_v11, %v17317_v5  ;;  %v1607_v4 = vpop.f32.mrb[67].mxu1 }
 0x20b   :  { %v17508_v28 = vadd.f32 %v1664_v44, %v1203_v36  ;;  %v1608_v10 = vadd.f32 %v17317_v5, %v1607_v4  ;;  %v1210_v44 = vmax.f32 %v1172_v55, 0.0 }
 0x20c   :  { %v1667_v2 = vmax.f32 %v1613_v29, 0.0  ;;  %v1209_v29 = vmax.f32 %v1167_v63, 0.0 }
 0x20d   :  { %v1666_v38 = vmax.f32 %v1608_v10, 0.0  ;;  %v10945_v16 = vpop.f32.mrb[68].mxu1 }
 0x20e   :  { %v17515_v24 = vadd.f32 %v1667_v2, %v1206_v47  ;;  %v1623_v7 = vadd.f32 %v10945_v16, %v17317_v5  ;;  %v1617_v41 = vpop.f32.mrb[69].mxu1 }
 0x20f   :  { %v17518_v35 = vadd.f32 %v1666_v38, %v1205_v25  ;;  %v1618_v40 = vadd.f32 %v17317_v5, %v1617_v41 }
 0x210   :  { %v1669_v39 = vmax.f32 %v1623_v7, 0.0 }
 0x211   :  { %v1668_v6 = vmax.f32 %v1618_v40, 0.0  ;;  %v10948_v42 = vpop.f32.mrb[70].mxu1 }
 0x212   :  { %v17525_v18 = vadd.f32 %v1669_v39, %v1208_v31  ;;  %v1633_v3 = vadd.f32 %v10948_v42, %v17317_v5  ;;  %v1627_v36 = vpop.f32.mrb[71].mxu1 }
 0x213   :  { %v17528_v22 = vadd.f32 %v1668_v6, %v1207_v56  ;;  %v1628_v17 = vadd.f32 %v17317_v5, %v1627_v36 }
 0x214   :  { %v1671_v11 = vmax.f32 %v1633_v3, 0.0 }
 0x215   :  { %v1670_v4 = vmax.f32 %v1628_v17, 0.0  ;;  %v10983_v10 = vpop.f32.mrb[72].mxu1 }
 0x216   :  { %v17531_v47 = vadd.f32 %v1671_v11, %v1210_v44  ;;  %v2004_v60 = vadd.f32 %v10983_v10, %v17317_v5  ;;  %v1998_v20 = vpop.f32.mrb[73].mxu1 }
 0x217   :  { %v17534_v2 = vadd.f32 %v1670_v4, %v1209_v29  ;;  %v1999_v25 = vadd.f32 %v17317_v5, %v1998_v20 }
 0x218   :  { %v2114_v19 = vmax.f32 %v2004_v60, 0.0 }
 0x219   :  { %v2113_v30 = vmax.f32 %v1999_v25, 0.0  ;;  %v10986_v38 = vpop.f32.mrb[74].mxu1 }
 0x21a   :  { %v17538_v16 = vadd.f32 %v2114_v19, %v17445_v54  ;;  %v2014_v7 = vadd.f32 %v10986_v38, %v17317_v5  ;;  %v2008_v41 = vpop.f32.mrb[75].mxu1 }
 0x21b   :  { %v17542_v40 = vadd.f32 %v2113_v30, %v17448_v58  ;;  %v2009_v31 = vadd.f32 %v17317_v5, %v2008_v41 }
 0x21c   :  { %v2116_v27 = vmax.f32 %v2014_v7, 0.0 }
 0x21d   :  { %v2115_v55 = vmax.f32 %v2009_v31, 0.0  ;;  %v10989_v39 = vpop.f32.mrb[76].mxu1 }
 0x21e   :  { %v17546_v56 = vadd.f32 %v2116_v27, %v17455_v32  ;;  %v2024_v23 = vadd.f32 %v10989_v39, %v17317_v5  ;;  %v2018_v63 = vpop.f32.mrb[77].mxu1 }
 0x21f   :  { %v17550_v54 = vadd.f32 %v2115_v55, %v17458_v48  ;;  %v2019_v6 = vadd.f32 %v17317_v5, %v2018_v63 }
 0x220   :  { %v2118_v42 = vmax.f32 %v2024_v23, 0.0 }
 0x221   :  { %v2117_v3 = vmax.f32 %v2019_v6, 0.0  ;;  %v10992_v58 = vpop.f32.mrb[78].mxu1 }
 0x222   :  { %v17554_v36 = vadd.f32 %v2118_v42, %v17465_v50  ;;  %v2034_v17 = vadd.f32 %v10992_v58, %v17317_v5  ;;  %v2028_v44 = vpop.f32.mrb[79].mxu1 }
 0x223   :  { %v17558_v32 = vadd.f32 %v2117_v3, %v17468_v34  ;;  %v2029_v11 = vadd.f32 %v17317_v5, %v2028_v44 }
 0x224   :  { %v2120_v29 = vmax.f32 %v2034_v17, 0.0 }
 0x225   :  { %v2119_v4 = vmax.f32 %v2029_v11, 0.0  ;;  %v10995_v48 = vpop.f32.mrb[80].mxu1 }
 0x226   :  { %v17562_v10 = vadd.f32 %v2120_v29, %v17475_v62  ;;  %v2044_v60 = vadd.f32 %v10995_v48, %v17317_v5  ;;  %v2038_v20 = vpop.f32.mrb[81].mxu1 }
 0x227   :  { %v17566_v50 = vadd.f32 %v2119_v4, %v17478_v59  ;;  %v2039_v25 = vadd.f32 %v17317_v5, %v2038_v20 }
 0x228   :  { %v2122_v19 = vmax.f32 %v2044_v60, 0.0 }
 0x229   :  { %v2121_v30 = vmax.f32 %v2039_v25, 0.0  ;;  %v10998_v34 = vpop.f32.mrb[82].mxu1 }
 0x22a   :  { %v17570_v38 = vadd.f32 %v2122_v19, %v17485_v49  ;;  %v2054_v7 = vadd.f32 %v10998_v34, %v17317_v5  ;;  %v2048_v41 = vpop.f32.mrb[83].mxu1 }
 0x22b   :  { %v17574_v62 = vadd.f32 %v2121_v30, %v17488_v33  ;;  %v2049_v31 = vadd.f32 %v17317_v5, %v2048_v41 }
 0x22c   :  { %v2124_v27 = vmax.f32 %v2054_v7, 0.0 }
 0x22d   :  { %v2123_v55 = vmax.f32 %v2049_v31, 0.0  ;;  %v11001_v59 = vpop.f32.mrb[84].mxu1 }
 0x22e   :  { %v17578_v39 = vadd.f32 %v2124_v27, %v17495_v43  ;;  %v2064_v23 = vadd.f32 %v11001_v59, %v17317_v5  ;;  %v2058_v63 = vpop.f32.mrb[85].mxu1 }
 0x22f   :  { %v17582_v49 = vadd.f32 %v2123_v55, %v17498_v51  ;;  %v2059_v6 = vadd.f32 %v17317_v5, %v2058_v63 }
 0x230   :  { %v2126_v42 = vmax.f32 %v2064_v23, 0.0 }
 0x231   :  { %v2125_v3 = vmax.f32 %v2059_v6, 0.0  ;;  %v11004_v33 = vpop.f32.mrb[86].mxu1 }
 0x232   :  { %v17586_v58 = vadd.f32 %v2126_v42, %v17505_v21  ;;  %v2074_v17 = vadd.f32 %v11004_v33, %v17317_v5  ;;  %v2068_v44 = vpop.f32.mrb[87].mxu1 }
 0x233   :  { %v17590_v43 = vadd.f32 %v2125_v3, %v17508_v28  ;;  %v2069_v11 = vadd.f32 %v17317_v5, %v2068_v44 }
 0x234   :  { %v2128_v29 = vmax.f32 %v2074_v17, 0.0 }
 0x235   :  { %v2127_v4 = vmax.f32 %v2069_v11, 0.0  ;;  %v11007_v51 = vpop.f32.mrb[88].mxu1 }
 0x236   :  { %v17594_v48 = vadd.f32 %v2128_v29, %v17515_v24  ;;  %v2084_v60 = vadd.f32 %v11007_v51, %v17317_v5  ;;  %v2078_v20 = vpop.f32.mrb[89].mxu1 }
 0x237   :  { %v17598_v21 = vadd.f32 %v2127_v4, %v17518_v35  ;;  %v2079_v25 = vadd.f32 %v17317_v5, %v2078_v20 }
 0x238   :  { %v2130_v19 = vmax.f32 %v2084_v60, 0.0 }
 0x239   :  { %v2129_v30 = vmax.f32 %v2079_v25, 0.0  ;;  %v11010_v28 = vpop.f32.mrb[90].mxu1 }
 0x23a   :  { %v17602_v34 = vadd.f32 %v2130_v19, %v17525_v18  ;;  %v2094_v7 = vadd.f32 %v11010_v28, %v17317_v5  ;;  %v2088_v41 = vpop.f32.mrb[91].mxu1 }
 0x23b   :  { %v17606_v24 = vadd.f32 %v2129_v30, %v17528_v22  ;;  %v2089_v31 = vadd.f32 %v17317_v5, %v2088_v41 }
 0x23c   :  { %v2132_v27 = vmax.f32 %v2094_v7, 0.0 }
 0x23d   :  { %v2131_v55 = vmax.f32 %v2089_v31, 0.0  ;;  %v11021_v35 = vpop.f32.mrb[92].mxu1 }
 0x23e   :  { %v17610_v59 = vadd.f32 %v2132_v27, %v17531_v47  ;;  %v2385_v23 = vadd.f32 %v11021_v35, %v17317_v5  ;;  %v2379_v63 = vpop.f32.mrb[93].mxu1 }
 0x23f   :  { %v17614_v18 = vadd.f32 %v2131_v55, %v17534_v2  ;;  %v2380_v6 = vadd.f32 %v17317_v5, %v2379_v63 }
 0x240   :  { %v2559_v42 = vmax.f32 %v2385_v23, 0.0 }
 0x241   :  { %v2558_v3 = vmax.f32 %v2380_v6, 0.0  ;;  %v11024_v22 = vpop.f32.mrb[94].mxu1 }
 0x242   :  { %v2595_v33 = vadd.f32 %v2559_v42, %v17347_v14  ;;  %v2395_v17 = vadd.f32 %v11024_v22, %v17317_v5  ;;  %v2389_v44 = vpop.f32.mrb[95].mxu1 }
 0x243   :  { %v2594_v11 = vadd.f32 %v2558_v3, %v17351_v53  ;;  %v2390_v47 = vadd.f32 %v17317_v5, %v2389_v44 }
 0x244   :  { %2631 = vst [vmem:[#allocation2 + $0x8] sm:$0xff] %v2595_v33  ;;  %v2561_v29 = vmax.f32 %v2395_v17, 0.0 }
 0x245   :  { %2630 = vst [vmem:[#allocation2] sm:$0xff] %v2594_v11  ;;  %v2560_v4 = vmax.f32 %v2390_v47, 0.0  ;;  %v11027_v2 = vpop.f32.mrb[96].mxu1 }
 0x246   :  { %v2597_v51 = vadd.f32 %v2561_v29, %v17361_v15  ;;  %v2405_v60 = vadd.f32 %v11027_v2, %v17317_v5  ;;  %v2399_v20 = vpop.f32.mrb[97].mxu1 }
 0x247   :  { %v2596_v25 = vadd.f32 %v2560_v4, %v17365_v61  ;;  %v2400_v14 = vadd.f32 %v17317_v5, %v2399_v20 }
 0x248   :  { %2633 = vst [vmem:[#allocation2 + $0x18] sm:$0xff] %v2597_v51  ;;  %v2563_v19 = vmax.f32 %v2405_v60, 0.0 }
 0x249   :  { %2632 = vst [vmem:[#allocation2 + $0x10] sm:$0xff] %v2596_v25  ;;  %v2562_v53 = vmax.f32 %v2400_v14, 0.0  ;;  %v11030_v30 = vpop.f32.mrb[98].mxu1 }
 0x24a   :  { %v2599_v28 = vadd.f32 %v2563_v19, %v17375_v52  ;;  %v2415_v7 = vadd.f32 %v11030_v30, %v17317_v5  ;;  %v2409_v41 = vpop.f32.mrb[99].mxu1 }
 0x24b   :  { %v2598_v31 = vadd.f32 %v2562_v53, %v17379_v45  ;;  %v2410_v15 = vadd.f32 %v17317_v5, %v2409_v41 }
 0x24c   :  { %2635 = vst [vmem:[#allocation2 + $0x28] sm:$0xff] %v2599_v28  ;;  %v2565_v27 = vmax.f32 %v2415_v7, 0.0 }
 0x24d   :  { %2634 = vst [vmem:[#allocation2 + $0x20] sm:$0xff] %v2598_v31  ;;  %v2564_v61 = vmax.f32 %v2410_v15, 0.0  ;;  %v11033_v55 = vpop.f32.mrb[100].mxu1 }
 0x24e   :  { %v2601_v35 = vadd.f32 %v2565_v27, %v17389_v46  ;;  %v2425_v23 = vadd.f32 %v11033_v55, %v17317_v5  ;;  %v2419_v63 = vpop.f32.mrb[101].mxu1 }
 0x24f   :  { %v2600_v6 = vadd.f32 %v2564_v61, %v17393_v13  ;;  %v2420_v52 = vadd.f32 %v17317_v5, %v2419_v63 }
 0x250   :  { %2637 = vst [vmem:[#allocation2 + $0x38] sm:$0xff] %v2601_v35  ;;  %v2567_v42 = vmax.f32 %v2425_v23, 0.0 }
 0x251   :  { %2636 = vst [vmem:[#allocation2 + $0x30] sm:$0xff] %v2600_v6  ;;  %v2566_v45 = vmax.f32 %v2420_v52, 0.0  ;;  %v11036_v3 = vpop.f32.mrb[102].mxu1 }
 0x252   :  { %v2603_v22 = vadd.f32 %v2567_v42, %v17403_v9  ;;  %v2435_v33 = vadd.f32 %v11036_v3, %v17317_v5  ;;  %v2429_v17 = vpop.f32.mrb[103].mxu1 }
 0x253   :  { %v2602_v44 = vadd.f32 %v2566_v45, %v17407_v37  ;;  %v2430_v46 = vadd.f32 %v17317_v5, %v2429_v17 }
 0x254   :  { %2639 = vst [vmem:[#allocation2 + $0x48] sm:$0xff] %v2603_v22  ;;  %v2569_v11 = vmax.f32 %v2435_v33, 0.0 }
 0x255   :  { %2638 = vst [vmem:[#allocation2 + $0x40] sm:$0xff] %v2602_v44  ;;  %v2568_v13 = vmax.f32 %v2430_v46, 0.0  ;;  %v11039_v47 = vpop.f32.mrb[104].mxu1 }
 0x256   :  { %v2605_v29 = vadd.f32 %v2569_v11, %v17417_v12  ;;  %v2445_v4 = vadd.f32 %v11039_v47, %v17317_v5  ;;  %v2439_v2 = vpop.f32.mrb[105].mxu1 }
 0x257   :  { %v2604_v51 = vadd.f32 %v2568_v13, %v17421_v1  ;;  %v2440_v9 = vadd.f32 %v17317_v5, %v2439_v2 }
 0x258   :  { %2641 = vst [vmem:[#allocation2 + $0x58] sm:$0xff] %v2605_v29  ;;  %v2571_v60 = vmax.f32 %v2445_v4, 0.0 }
 0x259   :  { %2640 = vst [vmem:[#allocation2 + $0x50] sm:$0xff] %v2604_v51  ;;  %v2570_v37 = vmax.f32 %v2440_v9, 0.0  ;;  %v11042_v20 = vpop.f32.mrb[106].mxu1 }
 0x25a   :  { %v2607_v25 = vadd.f32 %v2571_v60, %v17429_v0  ;;  %v2455_v14 = vadd.f32 %v11042_v20, %v17317_v5  ;;  %v2449_v19 = vpop.f32.mrb[107].mxu1 }
 0x25b   :  { %v2606_v53 = vadd.f32 %v2570_v37, %v17433_v26  ;;  %v2450_v12 = vadd.f32 %v17317_v5, %v2449_v19 }
 0x25c   :  { %2643 = vst [vmem:[#allocation2 + $0x68] sm:$0xff] %v2607_v25  ;;  %v2573_v30 = vmax.f32 %v2455_v14, 0.0 }
 0x25d   :  { %2642 = vst [vmem:[#allocation2 + $0x60] sm:$0xff] %v2606_v53  ;;  %v2572_v1 = vmax.f32 %v2450_v12, 0.0  ;;  %v11045_v28 = vpop.f32.mrb[108].mxu1 }
 0x25e   :  { %v2609_v7 = vadd.f32 %v2573_v30, %v17439_v8  ;;  %v2465_v41 = vadd.f32 %v11045_v28, %v17317_v5  ;;  %v2459_v31 = vpop.f32.mrb[109].mxu1 }
 0x25f   :  { %v2608_v15 = vadd.f32 %v2572_v1, %v17443_v57  ;;  %v2460_v0 = vadd.f32 %v17317_v5, %v2459_v31 }
 0x260   :  { %2645 = vst [vmem:[#allocation2 + $0x78] sm:$0xff] %v2609_v7  ;;  %v2575_v27 = vmax.f32 %v2465_v41, 0.0 }
 0x261   :  { %2644 = vst [vmem:[#allocation2 + $0x70] sm:$0xff] %v2608_v15  ;;  %v2574_v26 = vmax.f32 %v2460_v0, 0.0  ;;  %v11048_v61 = vpop.f32.mrb[110].mxu1 }
 0x262   :  { %v2611_v55 = vadd.f32 %v2575_v27, %v17538_v16  ;;  %v2475_v35 = vadd.f32 %v11048_v61, %v17317_v5  ;;  %v2469_v23 = vpop.f32.mrb[111].mxu1 }
 0x263   :  { %v2610_v63 = vadd.f32 %v2574_v26, %v17542_v40  ;;  %v2470_v8 = vadd.f32 %v17317_v5, %v2469_v23 }
 0x264   :  { %2647 = vst [vmem:[#allocation2 + $0x88] sm:$0xff] %v2611_v55  ;;  %v2577_v6 = vmax.f32 %v2475_v35, 0.0 }
 0x265   :  { %2646 = vst [vmem:[#allocation2 + $0x80] sm:$0xff] %v2610_v63  ;;  %v2576_v57 = vmax.f32 %v2470_v8, 0.0  ;;  %v11051_v52 = vpop.f32.mrb[112].mxu1 }
 0x266   :  { %v2613_v42 = vadd.f32 %v2577_v6, %v17546_v56  ;;  %v2485_v45 = vadd.f32 %v11051_v52, %v17317_v5  ;;  %v2479_v3 = vpop.f32.mrb[113].mxu1 }
 0x267   :  { %v2612_v22 = vadd.f32 %v2576_v57, %v17550_v54  ;;  %v2480_v16 = vadd.f32 %v17317_v5, %v2479_v3 }
 0x268   :  { %2649 = vst [vmem:[#allocation2 + $0x98] sm:$0xff] %v2613_v42  ;;  %v2579_v33 = vmax.f32 %v2485_v45, 0.0  ;;  %v14846_v42 = vld [vmem:[%s19202_s2] ss:$0 sm:$0xff] }
 0x269   :  { %2648 = vst [vmem:[#allocation2 + $0x90] sm:$0xff] %v2612_v22  ;;  %v2578_v40 = vmax.f32 %v2480_v16, 0.0  ;;  %v11054_v17 = vpop.f32.mrb[114].mxu1 }
 0x26a   :  { %v2615_v44 = vadd.f32 %v2579_v33, %v17554_v36  ;;  %v2495_v46 = vadd.f32 %v11054_v17, %v17317_v5  ;;  %v2489_v11 = vpop.f32.mrb[115].mxu1 }
 0x26b   :  { %v2614_v13 = vadd.f32 %v2578_v40, %v17558_v32  ;;  %v2490_v56 = vadd.f32 %v17317_v5, %v2489_v11 }
 0x26c   :  { %2651 = vst [vmem:[#allocation2 + $0xa8] sm:$0xff] %v2615_v44  ;;  %v2581_v47 = vmax.f32 %v2495_v46, 0.0 }
 0x26d   :  { %2650 = vst [vmem:[#allocation2 + $0xa0] sm:$0xff] %v2614_v13  ;;  %v2580_v54 = vmax.f32 %v2490_v56, 0.0  ;;  %v11057_v29 = vpop.f32.mrb[116].mxu1 }
 0x26e   :  { %v2617_v4 = vadd.f32 %v2581_v47, %v17562_v10  ;;  %v2505_v2 = vadd.f32 %v11057_v29, %v17317_v5  ;;  %v2499_v51 = vpop.f32.mrb[117].mxu1 }
 0x26f   :  { %v2616_v9 = vadd.f32 %v2580_v54, %v17566_v50  ;;  %v2500_v36 = vadd.f32 %v17317_v5, %v2499_v51 }
 0x270   :  { %2653 = vst [vmem:[#allocation2 + $0xb8] sm:$0xff] %v2617_v4  ;;  %v2583_v60 = vmax.f32 %v2505_v2, 0.0 }
 0x271   :  { %2652 = vst [vmem:[#allocation2 + $0xb0] sm:$0xff] %v2616_v9  ;;  %v2582_v32 = vmax.f32 %v2500_v36, 0.0  ;;  %v11060_v37 = vpop.f32.mrb[118].mxu1 }
 0x272   :  { %v2619_v20 = vadd.f32 %v2583_v60, %v17570_v38  ;;  %v2515_v25 = vadd.f32 %v11060_v37, %v17317_v5  ;;  %v2509_v14 = vpop.f32.mrb[119].mxu1 }
 0x273   :  { %v2618_v19 = vadd.f32 %v2582_v32, %v17574_v62  ;;  %v2510_v10 = vadd.f32 %v17317_v5, %v2509_v14 }
 0x274   :  { %2655 = vst [vmem:[#allocation2 + $0xc8] sm:$0xff] %v2619_v20  ;;  %v2585_v53 = vmax.f32 %v2515_v25, 0.0 }
 0x275   :  { %2654 = vst [vmem:[#allocation2 + $0xc0] sm:$0xff] %v2618_v19  ;;  %v2584_v50 = vmax.f32 %v2510_v10, 0.0  ;;  %v11063_v12 = vpop.f32.mrb[120].mxu1 }
 0x276   :  { %v2621_v30 = vadd.f32 %v2585_v53, %v17578_v39  ;;  %v2525_v1 = vadd.f32 %v11063_v12, %v17317_v5  ;;  %v2519_v28 = vpop.f32.mrb[121].mxu1 }
 0x277   :  { %v2620_v7 = vadd.f32 %v2584_v50, %v17582_v49  ;;  %v2520_v38 = vadd.f32 %v17317_v5, %v2519_v28 }
 0x278   :  { %2657 = vst [vmem:[#allocation2 + $0xd8] sm:$0xff] %v2621_v30  ;;  %v2587_v41 = vmax.f32 %v2525_v1, 0.0 }
 0x279   :  { %2656 = vst [vmem:[#allocation2 + $0xd0] sm:$0xff] %v2620_v7  ;;  %v2586_v62 = vmax.f32 %v2520_v38, 0.0  ;;  %v11066_v31 = vpop.f32.mrb[122].mxu1 }
 0x27a   :  { %v2623_v15 = vadd.f32 %v2587_v41, %v17586_v58  ;;  %v2535_v0 = vadd.f32 %v11066_v31, %v17317_v5  ;;  %v2529_v27 = vpop.f32.mrb[123].mxu1 }
 0x27b   :  { %v2622_v26 = vadd.f32 %v2586_v62, %v17590_v43  ;;  %v2530_v39 = vadd.f32 %v17317_v5, %v2529_v27 }
 0x27c   :  { %2659 = vst [vmem:[#allocation2 + $0xe8] sm:$0xff] %v2623_v15  ;;  %v2589_v61 = vmax.f32 %v2535_v0, 0.0 }
 0x27d   :  { %2658 = vst [vmem:[#allocation2 + $0xe0] sm:$0xff] %v2622_v26  ;;  %v2588_v49 = vmax.f32 %v2530_v39, 0.0  ;;  %v11069_v55 = vpop.f32.mrb[124].mxu1 }
 0x27e   :  { %v2625_v35 = vadd.f32 %v2589_v61, %v17594_v48  ;;  %v2545_v23 = vadd.f32 %v11069_v55, %v17317_v5  ;;  %v2539_v63 = vpop.f32.mrb[125].mxu1 }
 0x27f   :  { %v2624_v8 = vadd.f32 %v2588_v49, %v17598_v21  ;;  %v2540_v58 = vadd.f32 %v17317_v5, %v2539_v63 }
 0x280   :  { %2661 = vst [vmem:[#allocation2 + $0xf8] sm:$0xff] %v2625_v35  ;;  %v2591_v6 = vmax.f32 %v2545_v23, 0.0 }
 0x281   :  { %2660 = vst [vmem:[#allocation2 + $0xf0] sm:$0xff] %v2624_v8  ;;  %v2590_v43 = vmax.f32 %v2540_v58, 0.0  ;;  %v11072_v57 = vpop.f32.mrb[126].mxu1 }
 0x282   :  { %v2627_v52 = vadd.f32 %v2591_v6, %v17602_v34  ;;  %v2555_v45 = vadd.f32 %v14846_v42, %v11072_v57  ;;  %v2549_v48 = vpop.f32.mrb[127].mxu1  ;;  %v19768_v34 = vld [vmem:[#allocation18_spill] sm:$0xff] }
 0x283   :  { %v2626_v3 = vadd.f32 %v2590_v43, %v17606_v24  ;;  %v2550_v22 = vadd.f32 %v14846_v42, %v2549_v48  ;;  %13192 = vmatprep.subr.bf16.mxu0 %v19768_v34 }
 0x284   :  { %2663 = vst [vmem:[#allocation2 + $0x108] sm:$0xff] %v2627_v52  ;;  %v2593_v21 = vmax.f32 %v2555_v45, 0.0 }
 0x285   :  { %2662 = vst [vmem:[#allocation2 + $0x100] sm:$0xff] %v2626_v3  ;;  %v2592_v5 = vmax.f32 %v2550_v22, 0.0 }
 0x286   :  { %v2629_v16 = vadd.f32 %v2593_v21, %v17610_v59 }
 0x287   :  { %v2628_v33 = vadd.f32 %v2592_v5, %v17614_v18 }
 0x288   :  { %2665 = vst [vmem:[#allocation2 + $0x118] sm:$0xff] %v2629_v16 }
 0x289   :  { %2664 = vst [vmem:[#allocation2 + $0x110] sm:$0xff] %v2628_v33 }
 0x28a   :  { %14890 = dma.done.wait [#allocation5], 25600 }
 0x28b   :  { %14891 = vsyncadd [#allocation5], 4294941696  ;;  %13194 = vmatpush3.bf16.msra.mxu0 %v19768_v34  ;;  %v19769_v40 = vld [vmem:[#allocation19_spill] sm:$0xff]  ;;  %v19770_v24 = vld [vmem:[#allocation20_spill] sm:$0xff] }
 0x28c   :  { %13196 = vmatprep.subr.bf16.mxu0 %v19769_v40  ;;  %v2711_v17 = vld [vmem:[#allocation2 + $0x2] sm:$0xff]  ;;  %v19771_v59 = vld [vmem:[#allocation21_spill] sm:$0xff]  ;;  %v19774_v46 = vld [vmem:[#allocation24_spill] sm:$0xff] }
 0x28d   :  { %11105 = vmatprep.mubr.f32.mxu0 %v2711_v17  ;;  %v19772_v18 = vld [vmem:[#allocation22_spill] sm:$0xff]  ;;  %v19773_v44 = vld [vmem:[#allocation23_spill] sm:$0xff]  ;;  %v19775_v11 = vld [vmem:[#allocation25_spill] sm:$0xff] }
 0x28e   :  { %v2712_v13 = vld [vmem:[#allocation2 + $0xa] sm:$0xff]  ;;  %v19776_v56 = vld [vmem:[#allocation10_spill] sm:$0xff]  ;;  %v17712_v4 = vld [vmem:[#allocation2 + $0x32] sm:$0xff] }
 0x28f   :  { %13198 = vmatpush3.bf16.msra.mxu0 %v19769_v40  ;;  %v17705_v47 = vld [vmem:[#allocation2 + $0x1a] sm:$0xff]  ;;  %v17709_v54 = vld [vmem:[#allocation2 + $0x22] sm:$0xff]  ;;  %v19778_v51 = vld [vmem:[#allocation12_spill] sm:$0xff] }
 0x290   :  { %13200 = vmatprep.subr.bf16.mxu0 %v19770_v24  ;;  %v19777_v29 = vld [vmem:[#allocation11_spill] sm:$0xff]  ;;  %v17717_v2 = vld [vmem:[#allocation2 + $0x3a] sm:$0xff]  ;;  %v17725_v36 = vld [vmem:[#allocation2 + $0x52] sm:$0xff] }
 0x291   :  { %v17720_v9 = vld [vmem:[#allocation2 + $0x4a] sm:$0xff]  ;;  %v19779_v60 = vld [vmem:[#allocation13_spill] sm:$0xff]  ;;  %v17728_v32 = vld [vmem:[#allocation2 + $0x62] sm:$0xff] }
 0x292   :  { %v17733_v37 = vld [vmem:[#allocation2 + $0x6a] sm:$0xff]  ;;  %v19780_v20 = vld [vmem:[#allocation14_spill] sm:$0xff]  ;;  %v17744_v10 = vld [vmem:[#allocation2 + $0x92] sm:$0xff] }
 0x293   :  { %13202 = vmatpush3.bf16.msra.mxu0 %v19770_v24  ;;  %v17736_v25 = vld [vmem:[#allocation2 + $0x7a] sm:$0xff]  ;;  %v17741_v14 = vld [vmem:[#allocation2 + $0x82] sm:$0xff]  ;;  %v19782_v50 = vld [vmem:[#allocation16_spill] sm:$0xff] }
 0x294   :  { %13204 = vmatprep.subr.bf16.mxu0 %v19771_v59  ;;  %v19781_v19 = vld [vmem:[#allocation15_spill] sm:$0xff]  ;;  %v17749_v53 = vld [vmem:[#allocation2 + $0x9a] sm:$0xff]  ;;  %v17757_v30 = vld [vmem:[#allocation2 + $0xb2] sm:$0xff] }
 0x295   :  { %v17752_v12 = vld [vmem:[#allocation2 + $0xaa] sm:$0xff]  ;;  %v19783_v1 = vld [vmem:[#allocation17_spill] sm:$0xff]  ;;  %v2671_v28 = vld [vmem:[#allocation2] sm:$0xff] }
 0x296   :  { %v17762_v7 = vld [vmem:[#allocation2 + $0x8] sm:$0xff]  ;;  %v19784_v38 = vld [vmem:[#allocation26_spill] sm:$0xff]  ;;  %v17765_v41 = vld [vmem:[#allocation2 + $0x18] sm:$0xff] }
 0x297   :  { %13206 = vmatpush3.bf16.msra.mxu0 %v19771_v59  ;;  %v17770_v62 = vld [vmem:[#allocation2 + $0x20] sm:$0xff]  ;;  %v19785_v31 = vld [vmem:[#allocation27_spill] sm:$0xff]  ;;  %v17773_v15 = vld [vmem:[#allocation2 + $0x30] sm:$0xff] }
 0x298   :  { %13208 = vmatprep.subr.bf16.mxu0 %v19772_v18  ;;  %v17778_v0 = vld [vmem:[#allocation2 + $0x38] sm:$0xff]  ;;  %v19786_v27 = vld [vmem:[#allocation28_spill] sm:$0xff]  ;;  %v17781_v26 = vld [vmem:[#allocation2 + $0x48] sm:$0xff] }
 0x299   :  { %v17786_v39 = vld [vmem:[#allocation2 + $0x50] sm:$0xff]  ;;  %v19787_v61 = vld [vmem:[#allocation29_spill] sm:$0xff]  ;;  %v17789_v49 = vld [vmem:[#allocation2 + $0x60] sm:$0xff] }
 0x29a   :  { %v17794_v55 = vld [vmem:[#allocation2 + $0x68] sm:$0xff]  ;;  %v19788_v35 = vld [vmem:[#allocation30_spill] sm:$0xff]  ;;  %v17797_v23 = vld [vmem:[#allocation2 + $0x78] sm:$0xff] }
 0x29b   :  { %13210 = vmatpush3.bf16.msra.mxu0 %v19772_v18  ;;  %v17802_v63 = vld [vmem:[#allocation2 + $0x80] sm:$0xff]  ;;  %v19789_v8 = vld [vmem:[#allocation31_spill] sm:$0xff]  ;;  %v17805_v58 = vld [vmem:[#allocation2 + $0x90] sm:$0xff] }
 0x29c   :  { %13212 = vmatprep.subr.bf16.mxu0 %v19773_v44  ;;  %v17810_v6 = vld [vmem:[#allocation2 + $0x98] sm:$0xff]  ;;  %v19790_v43 = vld [vmem:[#allocation32_spill] sm:$0xff]  ;;  %v17813_v57 = vld [vmem:[#allocation2 + $0xa8] sm:$0xff] }
 0x29d   :  { %19791 = vst [vmem:[#allocation338_spill] sm:$0xff] %v17813_v57  ;;  %v17818_v52 = vld [vmem:[#allocation2 + $0xb0] sm:$0xff]  ;;  %v19792_v42 = vld [vmem:[#allocation33_spill] sm:$0xff]  ;;  %v3042_v45 = vld [vmem:[#allocation2 + $0x4] sm:$0xff] }
 0x29e   :  { %v3043_v48 = vld [vmem:[#allocation2 + $0xc] sm:$0xff]  ;;  %v19793_v3 = vld [vmem:[#allocation34_spill] sm:$0xff]  ;;  %v17831_v16 = vld [vmem:[#allocation2 + $0x34] sm:$0xff] }
 0x29f   :  { %13214 = vmatpush3.bf16.msra.mxu0 %v19773_v44  ;;  %v17824_v22 = vld [vmem:[#allocation2 + $0x1c] sm:$0xff]  ;;  %v17828_v21 = vld [vmem:[#allocation2 + $0x24] sm:$0xff]  ;;  %v19795_v34 = vld [vmem:[#allocation36_spill] sm:$0xff] }
 0x2a0   :  { %13216 = vmatprep.subr.bf16.mxu0 %v19774_v46  ;;  %v19794_v5 = vld [vmem:[#allocation35_spill] sm:$0xff]  ;;  %v17836_v33 = vld [vmem:[#allocation2 + $0x3c] sm:$0xff]  ;;  %v17844_v24 = vld [vmem:[#allocation2 + $0x54] sm:$0xff] }
 0x2a1   :  { %v17839_v40 = vld [vmem:[#allocation2 + $0x4c] sm:$0xff]  ;;  %v19796_v17 = vld [vmem:[#allocation37_spill] sm:$0xff]  ;;  %v17847_v59 = vld [vmem:[#allocation2 + $0x64] sm:$0xff] }
 0x2a2   :  { %v17852_v18 = vld [vmem:[#allocation2 + $0x6c] sm:$0xff]  ;;  %v19797_v44 = vld [vmem:[#allocation38_spill] sm:$0xff] }
 0x2a3   :  { %13218 = vmatpush3.bf16.msra.mxu0 %v19774_v46  ;;  %v17855_v46 = vld [vmem:[#allocation2 + $0x7c] sm:$0xff] }
 0x2a4   :  { %13220 = vmatprep.subr.bf16.mxu0 %v19775_v11 }
 0x2a7   :  { %13222 = vmatpush3.bf16.msra.mxu0 %v19775_v11  ;;  %v17860_v11 = vld [vmem:[#allocation2 + $0x84] sm:$0xff] }
 0x2a8   :  { %13224 = vmatprep.subr.bf16.mxu0 %v19776_v56 }
 0x2aa   :  { %11106 = vmatmul.mubr.f32.vlgmr.msra.gmra.mrb[16].mxu0 %v2712_v13  ;;  %v19798_v13 = vld [vmem:[#allocation39_spill] sm:$0xff] }
 0x2ab   :  { %13226 = vmatpush3.bf16.msra.mxu0 %v19776_v56  ;;  %11108 = vmatprep.mubr.f32.mxu0 %v17705_v47  ;;  %v17863_v56 = vld [vmem:[#allocation2 + $0x94] sm:$0xff] }
 0x2ac   :  { %13228 = vmatprep.subr.bf16.mxu0 %v19777_v29 }
 0x2ae   :  { %11109 = vmatmul.mubr.f32.gmra.mrb[18].mxu0 %v17709_v54 }
 0x2af   :  { %13230 = vmatpush3.bf16.msra.mxu0 %v19777_v29  ;;  %11111 = vmatprep.mubr.f32.mxu0 %v17712_v4  ;;  %v17868_v29 = vld [vmem:[#allocation2 + $0x9c] sm:$0xff] }
 0x2b0   :  { %13232 = vmatprep.subr.bf16.mxu0 %v19778_v51 }
 0x2b2   :  { %11112 = vmatmul.mubr.f32.gmra.mrb[20].mxu0 %v17717_v2 }
 0x2b3   :  { %13234 = vmatpush3.bf16.msra.mxu0 %v19778_v51  ;;  %11114 = vmatprep.mubr.f32.mxu0 %v17720_v9  ;;  %v19799_v51 = vld [vmem:[#allocation40_spill] sm:$0xff] }
 0x2b4   :  { %13236 = vmatprep.subr.bf16.mxu0 %v19779_v60 }
 0x2b6   :  { %11115 = vmatmul.mubr.f32.gmra.mrb[22].mxu0 %v17725_v36 }
 0x2b7   :  { %13238 = vmatpush3.bf16.msra.mxu0 %v19779_v60  ;;  %11117 = vmatprep.mubr.f32.mxu0 %v17728_v32  ;;  %v17871_v60 = vld [vmem:[#allocation2 + $0xac] sm:$0xff] }
 0x2b8   :  { %13240 = vmatprep.subr.bf16.mxu0 %v19780_v20 }
 0x2ba   :  { %11118 = vmatmul.mubr.f32.gmra.mrb[24].mxu0 %v17733_v37 }
 0x2bb   :  { %13242 = vmatpush3.bf16.msra.mxu0 %v19780_v20  ;;  %11120 = vmatprep.mubr.f32.mxu0 %v17736_v25  ;;  %v17876_v20 = vld [vmem:[#allocation2 + $0xb4] sm:$0xff] }
 0x2bc   :  { %13244 = vmatprep.subr.bf16.mxu0 %v19781_v19 }
 0x2be   :  { %11121 = vmatmul.mubr.f32.gmra.mrb[26].mxu0 %v17741_v14 }
 0x2bf   :  { %13246 = vmatpush3.bf16.msra.mxu0 %v19781_v19  ;;  %11123 = vmatprep.mubr.f32.mxu0 %v17744_v10  ;;  %v19800_v19 = vld [vmem:[#allocation41_spill] sm:$0xff] }
 0x2c0   :  { %13248 = vmatprep.subr.bf16.mxu0 %v19782_v50 }
 0x2c2   :  { %11124 = vmatmul.mubr.f32.gmra.mrb[28].mxu0 %v17749_v53 }
 0x2c3   :  { %13250 = vmatpush3.bf16.msra.mxu0 %v19782_v50  ;;  %11126 = vmatprep.mubr.f32.mxu0 %v17752_v12  ;;  %v3244_v50 = vld [vmem:[#allocation2 + $0x6] sm:$0xff] }
 0x2c4   :  { %13252 = vmatprep.subr.bf16.mxu0 %v19783_v1 }
 0x2c6   :  { %11127 = vmatmul.mubr.f32.gmra.mrb[30].mxu0 %v17757_v30 }
 0x2c7   :  { %13254 = vmatpush3.bf16.msra.mxu0 %v19783_v1  ;;  %11161 = vmatprep.mubr.f32.mxu0 %v2671_v28  ;;  %v3245_v1 = vld [vmem:[#allocation2 + $0xe] sm:$0xff]  ;;  %v19801_v28 = vld [vmem:[#allocation42_spill] sm:$0xff] }
 0x2c8   :  { %13256 = vmatprep.subr.bf16.mxu0 %v19784_v38 }
 0x2ca   :  { %11162 = vmatmul.mubr.f32.vlgmr.msra.gmra.mrb[16].mxu0 %v17762_v7 }
 0x2cb   :  { %13258 = vmatpush3.bf16.msra.mxu0 %v19784_v38  ;;  %11164 = vmatprep.mubr.f32.mxu0 %v17765_v41  ;;  %v17882_v38 = vld [vmem:[#allocation2 + $0x1e] sm:$0xff] }
 0x2cc   :  { %13260 = vmatprep.subr.bf16.mxu0 %v19785_v31 }
 0x2ce   :  { %11165 = vmatmul.mubr.f32.gmra.mrb[18].mxu0 %v17770_v62 }
 0x2cf   :  { %13262 = vmatpush3.bf16.msra.mxu0 %v19785_v31  ;;  %11167 = vmatprep.mubr.f32.mxu0 %v17773_v15  ;;  %v17886_v31 = vld [vmem:[#allocation2 + $0x26] sm:$0xff] }
 0x2d0   :  { %13264 = vmatprep.subr.bf16.mxu0 %v19786_v27 }
 0x2d2   :  { %11168 = vmatmul.mubr.f32.gmra.mrb[20].mxu0 %v17778_v0 }
 0x2d3   :  { %13266 = vmatpush3.bf16.msra.mxu0 %v19786_v27  ;;  %11170 = vmatprep.mubr.f32.mxu0 %v17781_v26  ;;  %v19802_v27 = vld [vmem:[#allocation43_spill] sm:$0xff] }
 0x2d4   :  { %13268 = vmatprep.subr.bf16.mxu0 %v19787_v61 }
 0x2d6   :  { %11171 = vmatmul.mubr.f32.gmra.mrb[22].mxu0 %v17786_v39 }
 0x2d7   :  { %13270 = vmatpush3.bf16.msra.mxu0 %v19787_v61  ;;  %11173 = vmatprep.mubr.f32.mxu0 %v17789_v49  ;;  %v17889_v61 = vld [vmem:[#allocation2 + $0x36] sm:$0xff] }
 0x2d8   :  { %13272 = vmatprep.subr.bf16.mxu0 %v19788_v35 }
 0x2da   :  { %11174 = vmatmul.mubr.f32.gmra.mrb[24].mxu0 %v17794_v55 }
 0x2db   :  { %13274 = vmatpush3.bf16.msra.mxu0 %v19788_v35  ;;  %11176 = vmatprep.mubr.f32.mxu0 %v17797_v23  ;;  %v17894_v35 = vld [vmem:[#allocation2 + $0x3e] sm:$0xff] }
 0x2dc   :  { %13276 = vmatprep.subr.bf16.mxu0 %v19789_v8 }
 0x2de   :  { %11177 = vmatmul.mubr.f32.gmra.mrb[26].mxu0 %v17802_v63 }
 0x2df   :  { %13278 = vmatpush3.bf16.msra.mxu0 %v19789_v8  ;;  %11179 = vmatprep.mubr.f32.mxu0 %v17805_v58  ;;  %v19803_v8 = vld [vmem:[#allocation44_spill] sm:$0xff] }
 0x2e0   :  { %13280 = vmatprep.subr.bf16.mxu0 %v19790_v43 }
 0x2e2   :  { %11180 = vmatmul.mubr.f32.gmra.mrb[28].mxu0 %v17810_v6 }
 0x2e3   :  { %13282 = vmatpush3.bf16.msra.mxu0 %v19790_v43  ;;  %11182 = vmatprep.mubr.f32.mxu0 %v17813_v57  ;;  %v17897_v43 = vld [vmem:[#allocation2 + $0x4e] sm:$0xff] }
 0x2e4   :  { %13284 = vmatprep.subr.bf16.mxu0 %v19792_v42 }
 0x2e6   :  { %11183 = vmatmul.mubr.f32.gmra.mrb[30].mxu0 %v17818_v52 }
 0x2e7   :  { %13286 = vmatpush3.bf16.msra.mxu0 %v19792_v42  ;;  %11217 = vmatprep.mubr.f32.mxu0 %v3042_v45  ;;  %v17902_v42 = vld [vmem:[#allocation2 + $0x56] sm:$0xff] }
 0x2e8   :  { %13288 = vmatprep.subr.bf16.mxu0 %v19793_v3  ;;  %v19804_v45 = vld [vmem:[#allocation45_spill] sm:$0xff] }
 0x2ea   :  { %11218 = vmatmul.mubr.f32.vlgmr.msra.gmra.mrb[16].mxu0 %v3043_v48  ;;  %v17905_v48 = vld [vmem:[#allocation2 + $0x66] sm:$0xff] }
 0x2eb   :  { %13290 = vmatpush3.bf16.msra.mxu0 %v19793_v3  ;;  %11220 = vmatprep.mubr.f32.mxu0 %v17824_v22  ;;  %v17910_v3 = vld [vmem:[#allocation2 + $0x6e] sm:$0xff] }
 0x2ec   :  { %13292 = vmatprep.subr.bf16.mxu0 %v19794_v5 }
 0x2ee   :  { %11221 = vmatmul.mubr.f32.gmra.mrb[18].mxu0 %v17828_v21 }
 0x2ef   :  { %13294 = vmatpush3.bf16.msra.mxu0 %v19794_v5  ;;  %11223 = vmatprep.mubr.f32.mxu0 %v17831_v16  ;;  %v19805_v5 = vld [vmem:[#allocation46_spill] sm:$0xff] }
 0x2f0   :  { %13296 = vmatprep.subr.bf16.mxu0 %v19795_v34 }
 0x2f2   :  { %11224 = vmatmul.mubr.f32.gmra.mrb[20].mxu0 %v17836_v33 }
 0x2f3   :  { %13298 = vmatpush3.bf16.msra.mxu0 %v19795_v34  ;;  %11226 = vmatprep.mubr.f32.mxu0 %v17839_v40  ;;  %v17913_v34 = vld [vmem:[#allocation2 + $0x7e] sm:$0xff] }
 0x2f4   :  { %13300 = vmatprep.subr.bf16.mxu0 %v19796_v17 }
 0x2f6   :  { %11227 = vmatmul.mubr.f32.gmra.mrb[22].mxu0 %v17844_v24 }
 0x2f7   :  { %13302 = vmatpush3.bf16.msra.mxu0 %v19796_v17  ;;  %11229 = vmatprep.mubr.f32.mxu0 %v17847_v59  ;;  %v17918_v17 = vld [vmem:[#allocation2 + $0x86] sm:$0xff] }
 0x2f8   :  { %13304 = vmatprep.subr.bf16.mxu0 %v19797_v44 }
 0x2fa   :  { %11230 = vmatmul.mubr.f32.gmra.mrb[24].mxu0 %v17852_v18 }
 0x2fb   :  { %13306 = vmatpush3.bf16.msra.mxu0 %v19797_v44  ;;  %11232 = vmatprep.mubr.f32.mxu0 %v17855_v46  ;;  %v19806_v44 = vld [vmem:[#allocation47_spill] sm:$0xff] }
 0x2fc   :  { %13308 = vmatprep.subr.bf16.mxu0 %v19798_v13 }
 0x2fe   :  { %11233 = vmatmul.mubr.f32.gmra.mrb[26].mxu0 %v17860_v11 }
 0x2ff   :  { %13310 = vmatpush3.bf16.msra.mxu0 %v19798_v13  ;;  %11235 = vmatprep.mubr.f32.mxu0 %v17863_v56  ;;  %v17921_v13 = vld [vmem:[#allocation2 + $0x96] sm:$0xff] }
 0x300   :  { %13312 = vmatprep.subr.bf16.mxu0 %v19799_v51 }
 0x302   :  { %11236 = vmatmul.mubr.f32.gmra.mrb[28].mxu0 %v17868_v29 }
 0x303   :  { %13314 = vmatpush3.bf16.msra.mxu0 %v19799_v51  ;;  %11238 = vmatprep.mubr.f32.mxu0 %v17871_v60  ;;  %v17926_v51 = vld [vmem:[#allocation2 + $0x9e] sm:$0xff] }
 0x304   :  { %13316 = vmatprep.subr.bf16.mxu0 %v19800_v19 }
 0x306   :  { %11239 = vmatmul.mubr.f32.gmra.mrb[30].mxu0 %v17876_v20 }
 0x307   :  { %13318 = vmatpush3.bf16.msra.mxu0 %v19800_v19  ;;  %11273 = vmatprep.mubr.f32.mxu0 %v3244_v50  ;;  %v19807_v19 = vld [vmem:[#allocation48_spill] sm:$0xff] }
 0x308   :  { %13320 = vmatprep.subr.bf16.mxu0 %v19801_v28  ;;  %v17929_v50 = vld [vmem:[#allocation2 + $0xae] sm:$0xff] }
 0x30a   :  { %11274 = vmatmul.mubr.f32.vlgmr.msra.gmra.mrb[16].mxu0 %v3245_v1  ;;  %v17934_v1 = vld [vmem:[#allocation2 + $0xb6] sm:$0xff] }
 0x30b   :  { %13322 = vmatpush3.bf16.msra.mxu0 %v19801_v28  ;;  %11276 = vmatprep.mubr.f32.mxu0 %v17882_v38  ;;  %v19808_v28 = vld [vmem:[#allocation49_spill] sm:$0xff] }
 0x30c   :  { %13324 = vmatprep.subr.bf16.mxu0 %v19802_v27 }
 0x30e   :  { %11277 = vmatmul.mubr.f32.gmra.mrb[18].mxu0 %v17886_v31 }
 0x30f   :  { %13326 = vmatpush3.bf16.msra.mxu0 %v19802_v27  ;;  %11279 = vmatprep.mubr.f32.mxu0 %v17889_v61  ;;  %v3447_v27 = vld [vmem:[#allocation2 + $0x10] sm:$0xff] }
 0x310   :  { %13328 = vmatprep.subr.bf16.mxu0 %v19803_v8 }
 0x312   :  { %11280 = vmatmul.mubr.f32.gmra.mrb[20].mxu0 %v17894_v35 }
 0x313   :  { %13330 = vmatpush3.bf16.msra.mxu0 %v19803_v8  ;;  %11282 = vmatprep.mubr.f32.mxu0 %v17897_v43  ;;  %v19809_v8 = vld [vmem:[#allocation50_spill] sm:$0xff] }
 0x314   :  { %13332 = vmatprep.subr.bf16.mxu0 %v19804_v45 }
 0x316   :  { %11283 = vmatmul.mubr.f32.gmra.mrb[22].mxu0 %v17902_v42 }
 0x317   :  { %13334 = vmatpush3.bf16.msra.mxu0 %v19804_v45  ;;  %11285 = vmatprep.mubr.f32.mxu0 %v17905_v48  ;;  %v17943_v45 = vld [vmem:[#allocation2 + $0x28] sm:$0xff] }
 0x318   :  { %13336 = vmatprep.subr.bf16.mxu0 %v19805_v5 }
 0x31a   :  { %11286 = vmatmul.mubr.f32.gmra.mrb[24].mxu0 %v17910_v3 }
 0x31b   :  { %13338 = vmatpush3.bf16.msra.mxu0 %v19805_v5  ;;  %11288 = vmatprep.mubr.f32.mxu0 %v17913_v34  ;;  %v19810_v5 = vld [vmem:[#allocation51_spill] sm:$0xff] }
 0x31c   :  { %13340 = vmatprep.subr.bf16.mxu0 %v19806_v44 }
 0x31e   :  { %11289 = vmatmul.mubr.f32.gmra.mrb[26].mxu0 %v17918_v17 }
 0x31f   :  { %13342 = vmatpush3.bf16.msra.mxu0 %v19806_v44  ;;  %11291 = vmatprep.mubr.f32.mxu0 %v17921_v13  ;;  %v17949_v44 = vld [vmem:[#allocation2 + $0x40] sm:$0xff] }
 0x320   :  { %13344 = vmatprep.subr.bf16.mxu0 %v19807_v19 }
 0x322   :  { %11292 = vmatmul.mubr.f32.gmra.mrb[28].mxu0 %v17926_v51 }
 0x323   :  { %13346 = vmatpush3.bf16.msra.mxu0 %v19807_v19  ;;  %11294 = vmatprep.mubr.f32.mxu0 %v17929_v50  ;;  %v17955_v19 = vld [vmem:[#allocation2 + $0x58] sm:$0xff] }
 0x324   :  { %13348 = vmatprep.subr.bf16.mxu0 %v19808_v28  ;;  %19812 = vst [vmem:[#allocation339_spill] sm:$0xff] %v17955_v19 }
 0x326   :  { %11295 = vmatmul.mubr.f32.gmra.mrb[30].mxu0 %v17934_v1 }
 0x327   :  { %13350 = vmatpush3.bf16.msra.mxu0 %v19808_v28  ;;  %11329 = vmatprep.mubr.f32.mxu0 %v17762_v7  ;;  %v19811_v7 = vld [vmem:[#allocation52_spill] sm:$0xff]  ;;  %v19813_v28 = vld [vmem:[#allocation53_spill] sm:$0xff] }
 0x328   :  { %13352 = vmatprep.subr.bf16.mxu0 %v19809_v8 }
 0x32a   :  { %11330 = vmatmul.mubr.f32.vlgmr.msra.gmra.mrb[16].mxu0 %v3447_v27  ;;  %v17961_v27 = vld [vmem:[#allocation2 + $0x70] sm:$0xff] }
 0x32b   :  { %13354 = vmatpush3.bf16.msra.mxu0 %v19809_v8  ;;  %11332 = vmatprep.mubr.f32.mxu0 %v17770_v62  ;;  %19814 = vst [vmem:[#allocation340_spill] sm:$0xff] %v17961_v27  ;;  %v19815_v8 = vld [vmem:[#allocation54_spill] sm:$0xff] }
 0x32c   :  { %13356 = vmatprep.subr.bf16.mxu0 %v19810_v5 }
 0x32e   :  { %11333 = vmatmul.mubr.f32.gmra.mrb[18].mxu0 %v17943_v45 }
 0x32f   :  { %13358 = vmatpush3.bf16.msra.mxu0 %v19810_v5  ;;  %11335 = vmatprep.mubr.f32.mxu0 %v17778_v0  ;;  %v17967_v5 = vld [vmem:[#allocation2 + $0x88] sm:$0xff] }
 0x330   :  { %13360 = vmatprep.subr.bf16.mxu0 %v19811_v7  ;;  %19816 = vst [vmem:[#allocation341_spill] sm:$0xff] %v17967_v5 }
 0x332   :  { %11336 = vmatmul.mubr.f32.gmra.mrb[20].mxu0 %v17949_v44 }
 0x333   :  { %13362 = vmatpush3.bf16.msra.mxu0 %v19811_v7  ;;  %11338 = vmatprep.mubr.f32.mxu0 %v17786_v39  ;;  %v19817_v7 = vld [vmem:[#allocation55_spill] sm:$0xff] }
 0x334   :  { %13364 = vmatprep.subr.bf16.mxu0 %v19813_v28 }
 0x336   :  { %11339 = vmatmul.mubr.f32.gmra.mrb[22].mxu0 %v17955_v19  ;;  %v19818_v19 = vld [vmem:[#allocation56_spill] sm:$0xff] }
 0x337   :  { %13366 = vmatpush3.bf16.msra.mxu0 %v19813_v28  ;;  %11341 = vmatprep.mubr.f32.mxu0 %v17794_v55  ;;  %v17973_v28 = vld [vmem:[#allocation2 + $0xa0] sm:$0xff] }
 0x338   :  { %13368 = vmatprep.subr.bf16.mxu0 %v19815_v8 }
 0x33a   :  { %11342 = vmatmul.mubr.f32.gmra.mrb[24].mxu0 %v17961_v27  ;;  %v19820_v27 = vld [vmem:[#allocation57_spill] sm:$0xff] }
 0x33b   :  { %13370 = vmatpush3.bf16.msra.mxu0 %v19815_v8  ;;  %11344 = vmatprep.mubr.f32.mxu0 %v17802_v63  ;;  %v17979_v8 = vld [vmem:[#allocation2 + $0xb8] sm:$0xff] }
 0x33c   :  { %13372 = vmatprep.subr.bf16.mxu0 %v19817_v7  ;;  %19819 = vst [vmem:[#allocation342_spill] sm:$0xff] %v17979_v8 }
 0x33e   :  { %11345 = vmatmul.mubr.f32.gmra.mrb[26].mxu0 %v17967_v5 }
 0x33f   :  { %13374 = vmatpush3.bf16.msra.mxu0 %v19817_v7  ;;  %11347 = vmatprep.mubr.f32.mxu0 %v17810_v6  ;;  %v19821_v7 = vld [vmem:[#allocation58_spill] sm:$0xff] }
 0x340   :  { %13376 = vmatprep.subr.bf16.mxu0 %v19818_v19 }
 0x342   :  { %11348 = vmatmul.mubr.f32.gmra.mrb[28].mxu0 %v17973_v28 }
 0x343   :  { %13378 = vmatpush3.bf16.msra.mxu0 %v19818_v19  ;;  %11350 = vmatprep.mubr.f32.mxu0 %v17818_v52  ;;  %v19822_v19 = vld [vmem:[#allocation59_spill] sm:$0xff] }
 0x344   :  { %13380 = vmatprep.subr.bf16.mxu0 %v19820_v27 }
 0x346   :  { %11351 = vmatmul.mubr.f32.gmra.mrb[30].mxu0 %v17979_v8  ;;  %v19823_v8 = vld [vmem:[#allocation60_spill] sm:$0xff] }
 0x347   :  { %13382 = vmatpush3.bf16.msra.mxu0 %v19820_v27  ;;  %11385 = vmatprep.mubr.f32.mxu0 %v17765_v41  ;;  %v19824_v41 = vld [vmem:[#allocation61_spill] sm:$0xff]  ;;  %v19825_v27 = vld [vmem:[#allocation62_spill] sm:$0xff] }
 0x348   :  { %13384 = vmatprep.subr.bf16.mxu0 %v19821_v7 }
 0x34a   :  { %11386 = vmatmul.mubr.f32.vlgmr.msra.gmra.mrb[16].mxu0 %v17770_v62 }
 0x34b   :  { %13386 = vmatpush3.bf16.msra.mxu0 %v19821_v7  ;;  %11388 = vmatprep.mubr.f32.mxu0 %v17773_v15  ;;  %v19826_v7 = vld [vmem:[#allocation63_spill] sm:$0xff] }
 0x34c   :  { %13388 = vmatprep.subr.bf16.mxu0 %v19822_v19 }
 0x34e   :  { %11389 = vmatmul.mubr.f32.gmra.mrb[18].mxu0 %v17778_v0 }
 0x34f   :  { %13390 = vmatpush3.bf16.msra.mxu0 %v19822_v19  ;;  %11391 = vmatprep.mubr.f32.mxu0 %v17781_v26  ;;  %v18010_v19 = vld [vmem:[#allocation2 + $0xc0] sm:$0xff] }
 0x350   :  { %13392 = vmatprep.subr.bf16.mxu0 %v19823_v8  ;;  %19828 = vst [vmem:[#allocation343_spill] sm:$0xff] %v18010_v19 }
 0x352   :  { %11392 = vmatmul.mubr.f32.gmra.mrb[20].mxu0 %v17786_v39 }
 0x353   :  { %13394 = vmatpush3.bf16.msra.mxu0 %v19823_v8  ;;  %11394 = vmatprep.mubr.f32.mxu0 %v17789_v49  ;;  %v19827_v8 = vld [vmem:[#allocation64_spill] sm:$0xff] }
 0x354   :  { %13396 = vmatprep.subr.bf16.mxu0 %v19824_v41 }
 0x356   :  { %11395 = vmatmul.mubr.f32.gmra.mrb[22].mxu0 %v17794_v55 }
 0x357   :  { %13398 = vmatpush3.bf16.msra.mxu0 %v19824_v41  ;;  %11397 = vmatprep.mubr.f32.mxu0 %v17797_v23  ;;  %v18015_v41 = vld [vmem:[#allocation2 + $0xc8] sm:$0xff] }
 0x358   :  { %13400 = vmatprep.subr.bf16.mxu0 %v19825_v27 }
 0x35a   :  { %11398 = vmatmul.mubr.f32.gmra.mrb[24].mxu0 %v17802_v63 }
 0x35b   :  { %13402 = vmatpush3.bf16.msra.mxu0 %v19825_v27  ;;  %11400 = vmatprep.mubr.f32.mxu0 %v17805_v58  ;;  %v19829_v27 = vld [vmem:[#allocation65_spill] sm:$0xff] }
 0x35c   :  { %13404 = vmatprep.subr.bf16.mxu0 %v19826_v7 }
 0x35e   :  { %11401 = vmatmul.mubr.f32.gmra.mrb[26].mxu0 %v17810_v6 }
 0x35f   :  { %13406 = vmatpush3.bf16.msra.mxu0 %v19826_v7  ;;  %11403 = vmatprep.mubr.f32.mxu0 %v17813_v57  ;;  %v19830_v7 = vld [vmem:[#allocation66_spill] sm:$0xff] }
 0x360   :  { %13408 = vmatprep.subr.bf16.mxu0 %v19827_v8 }
 0x362   :  { %11404 = vmatmul.mubr.f32.gmra.mrb[28].mxu0 %v17818_v52 }
 0x363   :  { %13410 = vmatpush3.bf16.msra.mxu0 %v19827_v8  ;;  %11406 = vmatprep.mubr.f32.mxu0 %v18010_v19  ;;  %v19831_v8 = vld [vmem:[#allocation67_spill] sm:$0xff]  ;;  %v19832_v19 = vld [vmem:[#allocation68_spill] sm:$0xff] }
 0x364   :  { %13412 = vmatprep.subr.bf16.mxu0 %v19829_v27 }
 0x366   :  { %11407 = vmatmul.mubr.f32.gmra.mrb[30].mxu0 %v18015_v41 }
 0x367   :  { %13414 = vmatpush3.bf16.msra.mxu0 %v19829_v27  ;;  %11441 = vmatprep.mubr.f32.mxu0 %v17705_v47  ;;  %v19833_v47 = vld [vmem:[#allocation69_spill] sm:$0xff]  ;;  %v19835_v27 = vld [vmem:[#allocation71_spill] sm:$0xff] }
 0x368   :  { %13416 = vmatprep.subr.bf16.mxu0 %v19830_v7 }
 0x36a   :  { %11442 = vmatmul.mubr.f32.vlgmr.msra.gmra.mrb[16].mxu0 %v17709_v54  ;;  %v19834_v54 = vld [vmem:[#allocation70_spill] sm:$0xff] }
 0x36b   :  { %13418 = vmatpush3.bf16.msra.mxu0 %v19830_v7  ;;  %11444 = vmatprep.mubr.f32.mxu0 %v17712_v4  ;;  %v18046_v7 = vld [vmem:[#allocation2 + $0xc2] sm:$0xff] }
 0x36c   :  { %13420 = vmatprep.subr.bf16.mxu0 %v19831_v8 }
 0x36e   :  { %11445 = vmatmul.mubr.f32.gmra.mrb[18].mxu0 %v17717_v2 }
 0x36f   :  { %13422 = vmatpush3.bf16.msra.mxu0 %v19831_v8  ;;  %11447 = vmatprep.mubr.f32.mxu0 %v17720_v9  ;;  %v18051_v8 = vld [vmem:[#allocation2 + $0xca] sm:$0xff] }
 0x370   :  { %13424 = vmatprep.subr.bf16.mxu0 %v19832_v19 }
 0x372   :  { %11448 = vmatmul.mubr.f32.gmra.mrb[20].mxu0 %v17725_v36 }
 0x373   :  { %13426 = vmatpush3.bf16.msra.mxu0 %v19832_v19  ;;  %11450 = vmatprep.mubr.f32.mxu0 %v17728_v32  ;;  %v19836_v19 = vld [vmem:[#allocation72_spill] sm:$0xff] }
 0x374   :  { %13428 = vmatprep.subr.bf16.mxu0 %v19833_v47 }
 0x376   :  { %11451 = vmatmul.mubr.f32.gmra.mrb[22].mxu0 %v17733_v37 }
 0x377   :  { %13430 = vmatpush3.bf16.msra.mxu0 %v19833_v47  ;;  %11453 = vmatprep.mubr.f32.mxu0 %v17736_v25  ;;  %v19837_v47 = vld [vmem:[#allocation73_spill] sm:$0xff] }
 0x378   :  { %13432 = vmatprep.subr.bf16.mxu0 %v19834_v54 }
 0x37a   :  { %11454 = vmatmul.mubr.f32.gmra.mrb[24].mxu0 %v17741_v14 }
 0x37b   :  { %13434 = vmatpush3.bf16.msra.mxu0 %v19834_v54  ;;  %11456 = vmatprep.mubr.f32.mxu0 %v17744_v10  ;;  %v19838_v54 = vld [vmem:[#allocation74_spill] sm:$0xff] }
 0x37c   :  { %13436 = vmatprep.subr.bf16.mxu0 %v19835_v27 }
 0x37e   :  { %11457 = vmatmul.mubr.f32.gmra.mrb[26].mxu0 %v17749_v53 }
 0x37f   :  { %13438 = vmatpush3.bf16.msra.mxu0 %v19835_v27  ;;  %11459 = vmatprep.mubr.f32.mxu0 %v17752_v12  ;;  %v19839_v27 = vld [vmem:[#allocation75_spill] sm:$0xff] }
 0x380   :  { %13440 = vmatprep.subr.bf16.mxu0 %v19836_v19 }
 0x382   :  { %11460 = vmatmul.mubr.f32.gmra.mrb[28].mxu0 %v17757_v30 }
 0x383   :  { %13442 = vmatpush3.bf16.msra.mxu0 %v19836_v19  ;;  %11462 = vmatprep.mubr.f32.mxu0 %v18046_v7  ;;  %v19840_v19 = vld [vmem:[#allocation76_spill] sm:$0xff] }
 0x384   :  { %13444 = vmatprep.subr.bf16.mxu0 %v19837_v47 }
 0x386   :  { %11463 = vmatmul.mubr.f32.gmra.mrb[30].mxu0 %v18051_v8 }
 0x387   :  { %13446 = vmatpush3.bf16.msra.mxu0 %v19837_v47  ;;  %11497 = vmatprep.mubr.f32.mxu0 %v17824_v22  ;;  %v19841_v22 = vld [vmem:[#allocation77_spill] sm:$0xff]  ;;  %v19843_v47 = vld [vmem:[#allocation79_spill] sm:$0xff] }
 0x388   :  { %13448 = vmatprep.subr.bf16.mxu0 %v19838_v54 }
 0x38a   :  { %11498 = vmatmul.mubr.f32.vlgmr.msra.gmra.mrb[16].mxu0 %v17828_v21  ;;  %v19842_v21 = vld [vmem:[#allocation78_spill] sm:$0xff] }
 0x38b   :  { %13450 = vmatpush3.bf16.msra.mxu0 %v19838_v54  ;;  %11500 = vmatprep.mubr.f32.mxu0 %v17831_v16  ;;  %v19844_v54 = vld [vmem:[#allocation80_spill] sm:$0xff] }
 0x38c   :  { %13452 = vmatprep.subr.bf16.mxu0 %v19839_v27 }
 0x38e   :  { %11501 = vmatmul.mubr.f32.gmra.mrb[18].mxu0 %v17836_v33 }
 0x38f   :  { %13454 = vmatpush3.bf16.msra.mxu0 %v19839_v27  ;;  %11503 = vmatprep.mubr.f32.mxu0 %v17839_v40  ;;  %v18082_v27 = vld [vmem:[#allocation2 + $0xc4] sm:$0xff] }
 0x390   :  { %13456 = vmatprep.subr.bf16.mxu0 %v19840_v19 }
 0x392   :  { %11504 = vmatmul.mubr.f32.gmra.mrb[20].mxu0 %v17844_v24 }
 0x393   :  { %13458 = vmatpush3.bf16.msra.mxu0 %v19840_v19  ;;  %11506 = vmatprep.mubr.f32.mxu0 %v17847_v59  ;;  %v18087_v19 = vld [vmem:[#allocation2 + $0xcc] sm:$0xff] }
 0x394   :  { %13460 = vmatprep.subr.bf16.mxu0 %v19841_v22 }
 0x396   :  { %11507 = vmatmul.mubr.f32.gmra.mrb[22].mxu0 %v17852_v18 }
 0x397   :  { %13462 = vmatpush3.bf16.msra.mxu0 %v19841_v22  ;;  %11509 = vmatprep.mubr.f32.mxu0 %v17855_v46  ;;  %v19845_v22 = vld [vmem:[#allocation81_spill] sm:$0xff] }
 0x398   :  { %13464 = vmatprep.subr.bf16.mxu0 %v19842_v21 }
 0x39a   :  { %11510 = vmatmul.mubr.f32.gmra.mrb[24].mxu0 %v17860_v11 }
 0x39b   :  { %13466 = vmatpush3.bf16.msra.mxu0 %v19842_v21  ;;  %11512 = vmatprep.mubr.f32.mxu0 %v17863_v56  ;;  %v19846_v21 = vld [vmem:[#allocation82_spill] sm:$0xff] }
 0x39c   :  { %13468 = vmatprep.subr.bf16.mxu0 %v19843_v47 }
 0x39e   :  { %11513 = vmatmul.mubr.f32.gmra.mrb[26].mxu0 %v17868_v29 }
 0x39f   :  { %13470 = vmatpush3.bf16.msra.mxu0 %v19843_v47  ;;  %11515 = vmatprep.mubr.f32.mxu0 %v17871_v60  ;;  %v19847_v47 = vld [vmem:[#allocation83_spill] sm:$0xff] }
 0x3a0   :  { %13472 = vmatprep.subr.bf16.mxu0 %v19844_v54 }
 0x3a2   :  { %11516 = vmatmul.mubr.f32.gmra.mrb[28].mxu0 %v17876_v20 }
 0x3a3   :  { %13474 = vmatpush3.bf16.msra.mxu0 %v19844_v54  ;;  %11518 = vmatprep.mubr.f32.mxu0 %v18082_v27  ;;  %v19848_v54 = vld [vmem:[#allocation84_spill] sm:$0xff] }
 0x3a4   :  { %13476 = vmatprep.subr.bf16.mxu0 %v19845_v22 }
 0x3a6   :  { %11519 = vmatmul.mubr.f32.gmra.mrb[30].mxu0 %v18087_v19 }
 0x3a7   :  { %13478 = vmatpush3.bf16.msra.mxu0 %v19845_v22  ;;  %11553 = vmatprep.mubr.f32.mxu0 %v17882_v38  ;;  %v19849_v38 = vld [vmem:[#allocation85_spill] sm:$0xff]  ;;  %v19851_v22 = vld [vmem:[#allocation87_spill] sm:$0xff] }
 0x3a8   :  { %13480 = vmatprep.subr.bf16.mxu0 %v19846_v21 }
 0x3aa   :  { %11554 = vmatmul.mubr.f32.vlgmr.msra.gmra.mrb[16].mxu0 %v17886_v31  ;;  %v19850_v31 = vld [vmem:[#allocation86_spill] sm:$0xff] }
 0x3ab   :  { %13482 = vmatpush3.bf16.msra.mxu0 %v19846_v21  ;;  %11556 = vmatprep.mubr.f32.mxu0 %v17889_v61  ;;  %v19852_v21 = vld [vmem:[#allocation88_spill] sm:$0xff] }
 0x3ac   :  { %13484 = vmatprep.subr.bf16.mxu0 %v19847_v47 }
 0x3ae   :  { %11557 = vmatmul.mubr.f32.gmra.mrb[18].mxu0 %v17894_v35 }
 0x3af   :  { %13486 = vmatpush3.bf16.msra.mxu0 %v19847_v47  ;;  %11559 = vmatprep.mubr.f32.mxu0 %v17897_v43  ;;  %v18118_v47 = vld [vmem:[#allocation2 + $0xc6] sm:$0xff] }
 0x3b0   :  { %13488 = vmatprep.subr.bf16.mxu0 %v19848_v54 }
 0x3b2   :  { %11560 = vmatmul.mubr.f32.gmra.mrb[20].mxu0 %v17902_v42 }
 0x3b3   :  { %13490 = vmatpush3.bf16.msra.mxu0 %v19848_v54  ;;  %11562 = vmatprep.mubr.f32.mxu0 %v17905_v48  ;;  %v18123_v54 = vld [vmem:[#allocation2 + $0xce] sm:$0xff] }
 0x3b4   :  { %13492 = vmatprep.subr.bf16.mxu0 %v19849_v38 }
 0x3b6   :  { %11563 = vmatmul.mubr.f32.gmra.mrb[22].mxu0 %v17910_v3 }
 0x3b7   :  { %13494 = vmatpush3.bf16.msra.mxu0 %v19849_v38  ;;  %11565 = vmatprep.mubr.f32.mxu0 %v17913_v34  ;;  %v19853_v38 = vld [vmem:[#allocation89_spill] sm:$0xff] }
 0x3b8   :  { %13496 = vmatprep.subr.bf16.mxu0 %v19850_v31 }
 0x3ba   :  { %11566 = vmatmul.mubr.f32.gmra.mrb[24].mxu0 %v17918_v17 }
 0x3bb   :  { %13498 = vmatpush3.bf16.msra.mxu0 %v19850_v31  ;;  %11568 = vmatprep.mubr.f32.mxu0 %v17921_v13  ;;  %v19854_v31 = vld [vmem:[#allocation90_spill] sm:$0xff] }
 0x3bc   :  { %13500 = vmatprep.subr.bf16.mxu0 %v19851_v22 }
 0x3be   :  { %11569 = vmatmul.mubr.f32.gmra.mrb[26].mxu0 %v17926_v51 }
 0x3bf   :  { %13502 = vmatpush3.bf16.msra.mxu0 %v19851_v22  ;;  %11571 = vmatprep.mubr.f32.mxu0 %v17929_v50  ;;  %v19855_v22 = vld [vmem:[#allocation91_spill] sm:$0xff] }
 0x3c0   :  { %13504 = vmatprep.subr.bf16.mxu0 %v19852_v21 }
 0x3c2   :  { %11572 = vmatmul.mubr.f32.gmra.mrb[28].mxu0 %v17934_v1 }
 0x3c3   :  { %13506 = vmatpush3.bf16.msra.mxu0 %v19852_v21  ;;  %11574 = vmatprep.mubr.f32.mxu0 %v18118_v47  ;;  %v19856_v21 = vld [vmem:[#allocation92_spill] sm:$0xff] }
 0x3c4   :  { %13508 = vmatprep.subr.bf16.mxu0 %v19853_v38 }
 0x3c6   :  { %11575 = vmatmul.mubr.f32.gmra.mrb[30].mxu0 %v18123_v54 }
 0x3c7   :  { %13510 = vmatpush3.bf16.msra.mxu0 %v19853_v38  ;;  %11609 = vmatprep.mubr.f32.mxu0 %v17770_v62  ;;  %v19857_v38 = vld [vmem:[#allocation339_spill] sm:$0xff]  ;;  %v19858_v62 = vld [vmem:[#allocation93_spill] sm:$0xff] }
 0x3c8   :  { %13512 = vmatprep.subr.bf16.mxu0 %v19854_v31 }
 0x3ca   :  { %11610 = vmatmul.mubr.f32.vlgmr.msra.gmra.mrb[16].mxu0 %v17943_v45  ;;  %v19859_v45 = vld [vmem:[#allocation340_spill] sm:$0xff] }
 0x3cb   :  { %13514 = vmatpush3.bf16.msra.mxu0 %v19854_v31  ;;  %11612 = vmatprep.mubr.f32.mxu0 %v17778_v0  ;;  %v19860_v31 = vld [vmem:[#allocation94_spill] sm:$0xff] }
 0x3cc   :  { %13516 = vmatprep.subr.bf16.mxu0 %v19855_v22 }
 0x3ce   :  { %11613 = vmatmul.mubr.f32.gmra.mrb[18].mxu0 %v17949_v44 }
 0x3cf   :  { %13518 = vmatpush3.bf16.msra.mxu0 %v19855_v22  ;;  %11615 = vmatprep.mubr.f32.mxu0 %v17786_v39  ;;  %v19861_v22 = vld [vmem:[#allocation95_spill] sm:$0xff] }
 0x3d0   :  { %13520 = vmatprep.subr.bf16.mxu0 %v19856_v21 }
 0x3d2   :  { %11616 = vmatmul.mubr.f32.gmra.mrb[20].mxu0 %v19857_v38 }
 0x3d3   :  { %13522 = vmatpush3.bf16.msra.mxu0 %v19856_v21  ;;  %11618 = vmatprep.mubr.f32.mxu0 %v17794_v55  ;;  %v19862_v21 = vld [vmem:[#allocation96_spill] sm:$0xff] }
 0x3d4   :  { %13524 = vmatprep.subr.bf16.mxu0 %v19858_v62 }
 0x3d6   :  { %11619 = vmatmul.mubr.f32.gmra.mrb[22].mxu0 %v19859_v45 }
 0x3d7   :  { %13526 = vmatpush3.bf16.msra.mxu0 %v19858_v62  ;;  %11621 = vmatprep.mubr.f32.mxu0 %v17802_v63  ;;  %v19863_v62 = vld [vmem:[#allocation342_spill] sm:$0xff] }
 0x3d8   :  { %13528 = vmatprep.subr.bf16.mxu0 %v19860_v31 }
 0x3da   :  { %11622 = vmatmul.mubr.f32.gmra.mrb[24].mxu0 %v17967_v5  ;;  %v18157_v5 = vld [vmem:[#allocation2 + $0xd0] sm:$0xff] }
 0x3db   :  { %13530 = vmatpush3.bf16.msra.mxu0 %v19860_v31  ;;  %11624 = vmatprep.mubr.f32.mxu0 %v17810_v6  ;;  %19864 = vst [vmem:[#allocation18_spill] sm:$0xff] %v18157_v5  ;;  %v19865_v31 = vld [vmem:[#allocation97_spill] sm:$0xff] }
 0x3dc   :  { %13532 = vmatprep.subr.bf16.mxu0 %v19861_v22 }
 0x3de   :  { %11625 = vmatmul.mubr.f32.gmra.mrb[26].mxu0 %v17973_v28 }
 0x3df   :  { %13534 = vmatpush3.bf16.msra.mxu0 %v19861_v22  ;;  %11627 = vmatprep.mubr.f32.mxu0 %v17818_v52  ;;  %v19866_v22 = vld [vmem:[#allocation98_spill] sm:$0xff] }
 0x3e0   :  { %13536 = vmatprep.subr.bf16.mxu0 %v19862_v21 }
 0x3e2   :  { %11628 = vmatmul.mubr.f32.gmra.mrb[28].mxu0 %v19863_v62 }
 0x3e3   :  { %13538 = vmatpush3.bf16.msra.mxu0 %v19862_v21  ;;  %11630 = vmatprep.mubr.f32.mxu0 %v18015_v41  ;;  %v19867_v21 = vld [vmem:[#allocation99_spill] sm:$0xff] }
 0x3e4   :  { %13540 = vmatprep.subr.bf16.mxu0 %v19865_v31 }
 0x3e6   :  { %11631 = vmatmul.mubr.f32.gmra.mrb[30].mxu0 %v18157_v5  ;;  %v19868_v5 = vld [vmem:[#allocation100_spill] sm:$0xff] }
 0x3e7   :  { %13542 = vmatpush3.bf16.msra.mxu0 %v19865_v31  ;;  %11665 = vmatprep.mubr.f32.mxu0 %v17773_v15  ;;  %v19869_v15 = vld [vmem:[#allocation101_spill] sm:$0xff]  ;;  %v19870_v31 = vld [vmem:[#allocation102_spill] sm:$0xff] }
 0x3e8   :  { %13544 = vmatprep.subr.bf16.mxu0 %v19866_v22 }
 0x3ea   :  { %11666 = vmatmul.mubr.f32.vlgmr.msra.gmra.mrb[16].mxu0 %v17778_v0 }
 0x3eb   :  { %13546 = vmatpush3.bf16.msra.mxu0 %v19866_v22  ;;  %11668 = vmatprep.mubr.f32.mxu0 %v17781_v26  ;;  %v19871_v22 = vld [vmem:[#allocation103_spill] sm:$0xff] }
 0x3ec   :  { %13548 = vmatprep.subr.bf16.mxu0 %v19867_v21 }
 0x3ee   :  { %11669 = vmatmul.mubr.f32.gmra.mrb[18].mxu0 %v17786_v39 }
 0x3ef   :  { %13550 = vmatpush3.bf16.msra.mxu0 %v19867_v21  ;;  %11671 = vmatprep.mubr.f32.mxu0 %v17789_v49  ;;  %v19873_v21 = vld [vmem:[#allocation104_spill] sm:$0xff] }
 0x3f0   :  { %13552 = vmatprep.subr.bf16.mxu0 %v19868_v5 }
 0x3f2   :  { %11672 = vmatmul.mubr.f32.gmra.mrb[20].mxu0 %v17794_v55 }
 0x3f3   :  { %13554 = vmatpush3.bf16.msra.mxu0 %v19868_v5  ;;  %11674 = vmatprep.mubr.f32.mxu0 %v17797_v23  ;;  %v19872_v5 = vld [vmem:[#allocation343_spill] sm:$0xff] }
 0x3f4   :  { %13556 = vmatprep.subr.bf16.mxu0 %v19869_v15 }
 0x3f6   :  { %11675 = vmatmul.mubr.f32.gmra.mrb[22].mxu0 %v17802_v63 }
 0x3f7   :  { %13558 = vmatpush3.bf16.msra.mxu0 %v19869_v15  ;;  %11677 = vmatprep.mubr.f32.mxu0 %v17805_v58  ;;  %v18188_v15 = vld [vmem:[#allocation2 + $0xd8] sm:$0xff] }
 0x3f8   :  { %13560 = vmatprep.subr.bf16.mxu0 %v19870_v31  ;;  %19874 = vst [vmem:[#allocation19_spill] sm:$0xff] %v18188_v15 }
 0x3fa   :  { %11678 = vmatmul.mubr.f32.gmra.mrb[24].mxu0 %v17810_v6 }
 0x3fb   :  { %13562 = vmatpush3.bf16.msra.mxu0 %v19870_v31  ;;  %11680 = vmatprep.mubr.f32.mxu0 %v17813_v57  ;;  %v18193_v31 = vld [vmem:[#allocation2 + $0xe0] sm:$0xff]  ;;  %v19875_v57 = vld [vmem:[#allocation105_spill] sm:$0xff] }
 0x3fc   :  { %13564 = vmatprep.subr.bf16.mxu0 %v19871_v22 }
 0x3fe   :  { %11681 = vmatmul.mubr.f32.gmra.mrb[26].mxu0 %v17818_v52 }
 0x3ff   :  { %13566 = vmatpush3.bf16.msra.mxu0 %v19871_v22  ;;  %11683 = vmatprep.mubr.f32.mxu0 %v19872_v5  ;;  %v19876_v22 = vld [vmem:[#allocation106_spill] sm:$0xff] }
 0x400   :  { %13568 = vmatprep.subr.bf16.mxu0 %v19873_v21 }
 0x402   :  { %11684 = vmatmul.mubr.f32.gmra.mrb[28].mxu0 %v18015_v41 }
 0x403   :  { %13570 = vmatpush3.bf16.msra.mxu0 %v19873_v21  ;;  %11686 = vmatprep.mubr.f32.mxu0 %v18188_v15  ;;  %v19877_v21 = vld [vmem:[#allocation107_spill] sm:$0xff]  ;;  %v19878_v15 = vld [vmem:[#allocation108_spill] sm:$0xff] }
 0x404   :  { %13572 = vmatprep.subr.bf16.mxu0 %v19875_v57 }
 0x406   :  { %11687 = vmatmul.mubr.f32.gmra.mrb[30].mxu0 %v18193_v31 }
 0x407   :  { %13574 = vmatpush3.bf16.msra.mxu0 %v19875_v57  ;;  %11721 = vmatprep.mubr.f32.mxu0 %v17712_v4  ;;  %v19879_v4 = vld [vmem:[#allocation109_spill] sm:$0xff]  ;;  %v19889_v57 = vld [vmem:[#allocation119_spill] sm:$0xff] }
 0x408   :  { %13576 = vmatprep.subr.bf16.mxu0 %v19876_v22 }
 0x40a   :  { %11722 = vmatmul.mubr.f32.vlgmr.msra.gmra.mrb[16].mxu0 %v17717_v2  ;;  %v19880_v2 = vld [vmem:[#allocation110_spill] sm:$0xff] }
 0x40b   :  { %13578 = vmatpush3.bf16.msra.mxu0 %v19876_v22  ;;  %11724 = vmatprep.mubr.f32.mxu0 %v17720_v9  ;;  %v19881_v9 = vld [vmem:[#allocation111_spill] sm:$0xff]  ;;  %v19902_v22 = vld [vmem:[#allocation132_spill] sm:$0xff] }
 0x40c   :  { %13580 = vmatprep.subr.bf16.mxu0 %v19877_v21 }
 0x40e   :  { %11725 = vmatmul.mubr.f32.gmra.mrb[18].mxu0 %v17725_v36  ;;  %v19882_v36 = vld [vmem:[#allocation112_spill] sm:$0xff] }
 0x40f   :  { %13582 = vmatpush3.bf16.msra.mxu0 %v19877_v21  ;;  %11727 = vmatprep.mubr.f32.mxu0 %v17728_v32  ;;  %v18224_v32 = vld [vmem:[#allocation2 + $0xda] sm:$0xff] }
 0x410   :  { %13584 = vmatprep.subr.bf16.mxu0 %v19878_v15  ;;  %v19905_v21 = vld [vmem:[#allocation134_spill] sm:$0xff] }
 0x412   :  { %11728 = vmatmul.mubr.f32.gmra.mrb[20].mxu0 %v17733_v37  ;;  %v18229_v37 = vld [vmem:[#allocation2 + $0xe2] sm:$0xff] }
 0x413   :  { %13586 = vmatpush3.bf16.msra.mxu0 %v19878_v15  ;;  %11730 = vmatprep.mubr.f32.mxu0 %v17736_v25  ;;  %v19883_v25 = vld [vmem:[#allocation113_spill] sm:$0xff]  ;;  %v19901_v15 = vld [vmem:[#allocation131_spill] sm:$0xff] }
 0x414   :  { %13588 = vmatprep.subr.bf16.mxu0 %v19879_v4 }
 0x416   :  { %11731 = vmatmul.mubr.f32.gmra.mrb[22].mxu0 %v17741_v14  ;;  %v19884_v14 = vld [vmem:[#allocation114_spill] sm:$0xff] }
 0x417   :  { %13590 = vmatpush3.bf16.msra.mxu0 %v19879_v4  ;;  %11733 = vmatprep.mubr.f32.mxu0 %v17744_v10  ;;  %v19885_v10 = vld [vmem:[#allocation115_spill] sm:$0xff] }
 0x418   :  { %13592 = vmatprep.subr.bf16.mxu0 %v19880_v2  ;;  %v19906_v4 = vld [vmem:[#allocation135_spill] sm:$0xff] }
 0x41a   :  { %11734 = vmatmul.mubr.f32.gmra.mrb[24].mxu0 %v17749_v53  ;;  %v19886_v53 = vld [vmem:[#allocation116_spill] sm:$0xff] }
 0x41b   :  { %13594 = vmatpush3.bf16.msra.mxu0 %v19880_v2  ;;  %11736 = vmatprep.mubr.f32.mxu0 %v17752_v12  ;;  %v19887_v12 = vld [vmem:[#allocation117_spill] sm:$0xff]  ;;  %v19907_v2 = vld [vmem:[#allocation136_spill] sm:$0xff] }
 0x41c   :  { %13596 = vmatprep.subr.bf16.mxu0 %v19881_v9 }
 0x41e   :  { %11737 = vmatmul.mubr.f32.gmra.mrb[26].mxu0 %v17757_v30  ;;  %v19888_v30 = vld [vmem:[#allocation118_spill] sm:$0xff] }
 0x41f   :  { %13598 = vmatpush3.bf16.msra.mxu0 %v19881_v9  ;;  %11739 = vmatprep.mubr.f32.mxu0 %v18046_v7  ;;  %v19908_v9 = vld [vmem:[#allocation18_spill] sm:$0xff] }
 0x420   :  { %13600 = vmatprep.subr.bf16.mxu0 %v19882_v36 }
 0x422   :  { %11740 = vmatmul.mubr.f32.gmra.mrb[28].mxu0 %v18051_v8 }
 0x423   :  { %13602 = vmatpush3.bf16.msra.mxu0 %v19882_v36  ;;  %11742 = vmatprep.mubr.f32.mxu0 %v18224_v32  ;;  %v18335_v36 = vld [vmem:[#allocation2 + $0xe8] sm:$0xff] }
 0x424   :  { %13604 = vmatprep.subr.bf16.mxu0 %v19883_v25 }
 0x426   :  { %11743 = vmatmul.mubr.f32.gmra.mrb[30].mxu0 %v18229_v37 }
 0x427   :  { %13606 = vmatpush3.bf16.msra.mxu0 %v19883_v25  ;;  %11777 = vmatprep.mubr.f32.mxu0 %v17831_v16  ;;  %v19890_v16 = vld [vmem:[#allocation120_spill] sm:$0xff]  ;;  %v19909_v25 = vld [vmem:[#allocation137_spill] sm:$0xff] }
 0x428   :  { %13608 = vmatprep.subr.bf16.mxu0 %v19884_v14 }
 0x42a   :  { %11778 = vmatmul.mubr.f32.vlgmr.msra.gmra.mrb[16].mxu0 %v17836_v33  ;;  %v18260_v33 = vld [vmem:[#allocation2 + $0xdc] sm:$0xff] }
 0x42b   :  { %13610 = vmatpush3.bf16.msra.mxu0 %v19884_v14  ;;  %11780 = vmatprep.mubr.f32.mxu0 %v17839_v40  ;;  %v18265_v40 = vld [vmem:[#allocation2 + $0xe4] sm:$0xff] }
 0x42c   :  { %13612 = vmatprep.subr.bf16.mxu0 %v19885_v10  ;;  %v19910_v14 = vld [vmem:[#allocation138_spill] sm:$0xff] }
 0x42e   :  { %11781 = vmatmul.mubr.f32.gmra.mrb[18].mxu0 %v17844_v24  ;;  %v19891_v24 = vld [vmem:[#allocation121_spill] sm:$0xff] }
 0x42f   :  { %13614 = vmatpush3.bf16.msra.mxu0 %v19885_v10  ;;  %11783 = vmatprep.mubr.f32.mxu0 %v17847_v59  ;;  %v19892_v59 = vld [vmem:[#allocation122_spill] sm:$0xff]  ;;  %v19911_v10 = vld [vmem:[#allocation139_spill] sm:$0xff] }
 0x430   :  { %13616 = vmatprep.subr.bf16.mxu0 %v19886_v53 }
 0x432   :  { %11784 = vmatmul.mubr.f32.gmra.mrb[20].mxu0 %v17852_v18  ;;  %v19893_v18 = vld [vmem:[#allocation123_spill] sm:$0xff] }
 0x433   :  { %13618 = vmatpush3.bf16.msra.mxu0 %v19886_v53  ;;  %11786 = vmatprep.mubr.f32.mxu0 %v17855_v46  ;;  %v19894_v46 = vld [vmem:[#allocation124_spill] sm:$0xff] }
 0x434   :  { %13620 = vmatprep.subr.bf16.mxu0 %v19887_v12  ;;  %v19912_v53 = vld [vmem:[#allocation140_spill] sm:$0xff] }
 0x436   :  { %11787 = vmatmul.mubr.f32.gmra.mrb[22].mxu0 %v17860_v11  ;;  %v19895_v11 = vld [vmem:[#allocation125_spill] sm:$0xff] }
 0x437   :  { %13622 = vmatpush3.bf16.msra.mxu0 %v19887_v12  ;;  %11789 = vmatprep.mubr.f32.mxu0 %v17863_v56  ;;  %v19896_v56 = vld [vmem:[#allocation126_spill] sm:$0xff]  ;;  %v14847_v12 = vld [vmem:[#allocation2 + $0x4a] sm:$0xff] }
 0x438   :  { %13624 = vmatprep.subr.bf16.mxu0 %v19888_v30 }
 0x43a   :  { %11790 = vmatmul.mubr.f32.gmra.mrb[24].mxu0 %v17868_v29  ;;  %v19897_v29 = vld [vmem:[#allocation127_spill] sm:$0xff] }
 0x43b   :  { %13626 = vmatpush3.bf16.msra.mxu0 %v19888_v30  ;;  %11792 = vmatprep.mubr.f32.mxu0 %v17871_v60  ;;  %v19898_v60 = vld [vmem:[#allocation128_spill] sm:$0xff]  ;;  %v19920_v30 = vld [vmem:[#allocation146_spill] sm:$0xff] }
 0x43c   :  { %13628 = vmatprep.subr.bf16.mxu0 %v19889_v57 }
 0x43e   :  { %11793 = vmatmul.mubr.f32.gmra.mrb[26].mxu0 %v17876_v20  ;;  %v18296_v20 = vld [vmem:[#allocation2 + $0xde] sm:$0xff] }
 0x43f   :  { %13630 = vmatpush3.bf16.msra.mxu0 %v19889_v57  ;;  %11795 = vmatprep.mubr.f32.mxu0 %v18082_v27  ;;  %v14848_v57 = vld [vmem:[#allocation2 + $0x52] sm:$0xff] }
 0x440   :  { %13632 = vmatprep.subr.bf16.mxu0 %v19890_v16 }
 0x442   :  { %11796 = vmatmul.mubr.f32.gmra.mrb[28].mxu0 %v18087_v19 }
 0x443   :  { %13634 = vmatpush3.bf16.msra.mxu0 %v19890_v16  ;;  %11798 = vmatprep.mubr.f32.mxu0 %v18260_v33  ;;  %v18378_v16 = vld [vmem:[#allocation2 + $0x62] sm:$0xff] }
 0x444   :  { %13636 = vmatprep.subr.bf16.mxu0 %v19891_v24 }
 0x446   :  { %11799 = vmatmul.mubr.f32.gmra.mrb[30].mxu0 %v18265_v40 }
 0x447   :  { %13638 = vmatpush3.bf16.msra.mxu0 %v19891_v24  ;;  %11833 = vmatprep.mubr.f32.mxu0 %v17889_v61  ;;  %v18301_v61 = vld [vmem:[#allocation2 + $0xe6] sm:$0xff] }
 0x448   :  { %13640 = vmatprep.subr.bf16.mxu0 %v19892_v59  ;;  %v19921_v24 = vld [vmem:[#allocation147_spill] sm:$0xff] }
 0x44a   :  { %11834 = vmatmul.mubr.f32.vlgmr.msra.gmra.mrb[16].mxu0 %v17894_v35  ;;  %v19899_v35 = vld [vmem:[#allocation129_spill] sm:$0xff] }
 0x44b   :  { %13642 = vmatpush3.bf16.msra.mxu0 %v19892_v59  ;;  %11836 = vmatprep.mubr.f32.mxu0 %v17897_v43  ;;  %v19900_v43 = vld [vmem:[#allocation130_spill] sm:$0xff]  ;;  %v18382_v59 = vld [vmem:[#allocation2 + $0x6a] sm:$0xff] }
 0x44c   :  { %13644 = vmatprep.subr.bf16.mxu0 %v19893_v18 }
 0x44e   :  { %11837 = vmatmul.mubr.f32.gmra.mrb[18].mxu0 %v17902_v42 }
 0x44f   :  { %13646 = vmatpush3.bf16.msra.mxu0 %v19893_v18  ;;  %11839 = vmatprep.mubr.f32.mxu0 %v17905_v48  ;;  %v18386_v18 = vld [vmem:[#allocation2 + $0x7a] sm:$0xff] }
 0x450   :  { %13648 = vmatprep.subr.bf16.mxu0 %v19894_v46 }
 0x452   :  { %11840 = vmatmul.mubr.f32.gmra.mrb[20].mxu0 %v17910_v3 }
 0x453   :  { %13650 = vmatpush3.bf16.msra.mxu0 %v19894_v46  ;;  %11842 = vmatprep.mubr.f32.mxu0 %v17913_v34  ;;  %v19922_v46 = vld [vmem:[#allocation148_spill] sm:$0xff] }
 0x454   :  { %13652 = vmatprep.subr.bf16.mxu0 %v19895_v11 }
 0x456   :  { %11843 = vmatmul.mubr.f32.gmra.mrb[22].mxu0 %v17918_v17 }
 0x457   :  { %13654 = vmatpush3.bf16.msra.mxu0 %v19895_v11  ;;  %11845 = vmatprep.mubr.f32.mxu0 %v17921_v13  ;;  %v18390_v11 = vld [vmem:[#allocation2 + $0x82] sm:$0xff] }
 0x458   :  { %13656 = vmatprep.subr.bf16.mxu0 %v19896_v56 }
 0x45a   :  { %11846 = vmatmul.mubr.f32.gmra.mrb[24].mxu0 %v17926_v51 }
 0x45b   :  { %13658 = vmatpush3.bf16.msra.mxu0 %v19896_v56  ;;  %11848 = vmatprep.mubr.f32.mxu0 %v17929_v50  ;;  %v18394_v56 = vld [vmem:[#allocation2 + $0x92] sm:$0xff] }
 0x45c   :  { %13660 = vmatprep.subr.bf16.mxu0 %v19897_v29 }
 0x45e   :  { %11849 = vmatmul.mubr.f32.gmra.mrb[26].mxu0 %v17934_v1 }
 0x45f   :  { %13662 = vmatpush3.bf16.msra.mxu0 %v19897_v29  ;;  %11851 = vmatprep.mubr.f32.mxu0 %v18118_v47  ;;  %v19923_v29 = vld [vmem:[#allocation149_spill] sm:$0xff] }
 0x460   :  { %13664 = vmatprep.subr.bf16.mxu0 %v19898_v60 }
 0x462   :  { %11852 = vmatmul.mubr.f32.gmra.mrb[28].mxu0 %v18123_v54 }
 0x463   :  { %13666 = vmatpush3.bf16.msra.mxu0 %v19898_v60  ;;  %11854 = vmatprep.mubr.f32.mxu0 %v18296_v20  ;;  %v18398_v60 = vld [vmem:[#allocation2 + $0x9a] sm:$0xff] }
 0x464   :  { %13668 = vmatprep.subr.bf16.mxu0 %v19899_v35 }
 0x466   :  { %11855 = vmatmul.mubr.f32.gmra.mrb[30].mxu0 %v18301_v61 }
 0x467   :  { %13670 = vmatpush3.bf16.msra.mxu0 %v19899_v35  ;;  %11889 = vmatprep.mubr.f32.mxu0 %v17778_v0  ;;  %v19903_v0 = vld [vmem:[#allocation133_spill] sm:$0xff]  ;;  %v18402_v35 = vld [vmem:[#allocation2 + $0xaa] sm:$0xff] }
 0x468   :  { %13672 = vmatprep.subr.bf16.mxu0 %v19900_v43 }
 0x46a   :  { %11890 = vmatmul.mubr.f32.vlgmr.msra.gmra.mrb[16].mxu0 %v17949_v44  ;;  %v19904_v44 = vld [vmem:[#allocation341_spill] sm:$0xff] }
 0x46b   :  { %13674 = vmatpush3.bf16.msra.mxu0 %v19900_v43  ;;  %11892 = vmatprep.mubr.f32.mxu0 %v17786_v39  ;;  %v19924_v43 = vld [vmem:[#allocation150_spill] sm:$0xff] }
 0x46c   :  { %13676 = vmatprep.subr.bf16.mxu0 %v19901_v15 }
 0x46e   :  { %11893 = vmatmul.mubr.f32.gmra.mrb[18].mxu0 %v19857_v38 }
 0x46f   :  { %13678 = vmatpush3.bf16.msra.mxu0 %v19901_v15  ;;  %11895 = vmatprep.mubr.f32.mxu0 %v17794_v55  ;;  %v18406_v15 = vld [vmem:[#allocation2 + $0xb2] sm:$0xff] }
 0x470   :  { %13680 = vmatprep.subr.bf16.mxu0 %v19902_v22 }
 0x472   :  { %11896 = vmatmul.mubr.f32.gmra.mrb[20].mxu0 %v19859_v45 }
 0x473   :  { %13682 = vmatpush3.bf16.msra.mxu0 %v19902_v22  ;;  %11898 = vmatprep.mubr.f32.mxu0 %v17802_v63  ;;  %v19925_v22 = vld [vmem:[#allocation151_spill] sm:$0xff] }
 0x474   :  { %13684 = vmatprep.subr.bf16.mxu0 %v19903_v0 }
 0x476   :  { %11899 = vmatmul.mubr.f32.gmra.mrb[22].mxu0 %v19904_v44 }
 0x477   :  { %13686 = vmatpush3.bf16.msra.mxu0 %v19903_v0  ;;  %11901 = vmatprep.mubr.f32.mxu0 %v17810_v6  ;;  %v19926_v0 = vld [vmem:[#allocation152_spill] sm:$0xff] }
 0x478   :  { %13688 = vmatprep.subr.bf16.mxu0 %v19905_v21 }
 0x47a   :  { %11902 = vmatmul.mubr.f32.gmra.mrb[24].mxu0 %v17973_v28 }
 0x47b   :  { %13690 = vmatpush3.bf16.msra.mxu0 %v19905_v21  ;;  %11904 = vmatprep.mubr.f32.mxu0 %v17818_v52  ;;  %v18416_v21 = vld [vmem:[#allocation2 + $0xf2] sm:$0xff] }
 0x47c   :  { %13692 = vmatprep.subr.bf16.mxu0 %v19906_v4 }
 0x47e   :  { %11905 = vmatmul.mubr.f32.gmra.mrb[26].mxu0 %v19863_v62 }
 0x47f   :  { %13694 = vmatpush3.bf16.msra.mxu0 %v19906_v4  ;;  %11907 = vmatprep.mubr.f32.mxu0 %v18015_v41  ;;  %v18421_v4 = vld [vmem:[#allocation2 + $0xfa] sm:$0xff] }
 0x480   :  { %13696 = vmatprep.subr.bf16.mxu0 %v19907_v2 }
 0x482   :  { %11908 = vmatmul.mubr.f32.gmra.mrb[28].mxu0 %v19908_v9 }
 0x483   :  { %13698 = vmatpush3.bf16.msra.mxu0 %v19907_v2  ;;  %11910 = vmatprep.mubr.f32.mxu0 %v18193_v31  ;;  %v19927_v2 = vld [vmem:[#allocation153_spill] sm:$0xff] }
 0x484   :  { %13700 = vmatprep.subr.bf16.mxu0 %v19909_v25 }
 0x486   :  { %11911 = vmatmul.mubr.f32.gmra.mrb[30].mxu0 %v18335_v36 }
 0x487   :  { %13702 = vmatpush3.bf16.msra.mxu0 %v19909_v25  ;;  %11945 = vmatprep.mubr.f32.mxu0 %v17781_v26  ;;  %v19913_v26 = vld [vmem:[#allocation141_spill] sm:$0xff]  ;;  %v14857_v25 = vld [vmem:[#allocation2 + $0x4c] sm:$0xff] }
 0x488   :  { %13704 = vmatprep.subr.bf16.mxu0 %v19910_v14 }
 0x48a   :  { %11946 = vmatmul.mubr.f32.vlgmr.msra.gmra.mrb[16].mxu0 %v17786_v39  ;;  %v19914_v39 = vld [vmem:[#allocation338_spill] sm:$0xff] }
 0x48b   :  { %13706 = vmatpush3.bf16.msra.mxu0 %v19910_v14  ;;  %11948 = vmatprep.mubr.f32.mxu0 %v17789_v49  ;;  %v19915_v49 = vld [vmem:[#allocation142_spill] sm:$0xff] }
 0x48c   :  { %13708 = vmatprep.subr.bf16.mxu0 %v19911_v10  ;;  %v19928_v14 = vld [vmem:[#allocation154_spill] sm:$0xff] }
 0x48e   :  { %11949 = vmatmul.mubr.f32.gmra.mrb[18].mxu0 %v17794_v55  ;;  %v19916_v55 = vld [vmem:[#allocation143_spill] sm:$0xff] }
 0x48f   :  { %13710 = vmatpush3.bf16.msra.mxu0 %v19911_v10  ;;  %11951 = vmatprep.mubr.f32.mxu0 %v17797_v23  ;;  %v19917_v23 = vld [vmem:[#allocation19_spill] sm:$0xff]  ;;  %v14858_v10 = vld [vmem:[#allocation2 + $0x54] sm:$0xff] }
 0x490   :  { %13712 = vmatprep.subr.bf16.mxu0 %v19912_v53 }
 0x492   :  { %11952 = vmatmul.mubr.f32.gmra.mrb[20].mxu0 %v17802_v63  ;;  %v19918_v63 = vld [vmem:[#allocation144_spill] sm:$0xff] }
 0x493   :  { %13714 = vmatpush3.bf16.msra.mxu0 %v19912_v53  ;;  %11954 = vmatprep.mubr.f32.mxu0 %v17805_v58  ;;  %v18366_v58 = vld [vmem:[#allocation2 + $0xf0] sm:$0xff]  ;;  %v18428_v53 = vld [vmem:[#allocation2 + $0x64] sm:$0xff] }
 0x494   :  { %13716 = vmatprep.subr.bf16.mxu0 %v19913_v26 }
 0x496   :  { %11955 = vmatmul.mubr.f32.gmra.mrb[22].mxu0 %v17810_v6  ;;  %v18371_v6 = vld [vmem:[#allocation2 + $0xf8] sm:$0xff] }
 0x497   :  { %13718 = vmatpush3.bf16.msra.mxu0 %v19913_v26  ;;  %11957 = vmatprep.mubr.f32.mxu0 %v19914_v39  ;;  %v19929_v26 = vld [vmem:[#allocation155_spill] sm:$0xff] }
 0x498   :  { %13720 = vmatprep.subr.bf16.mxu0 %v19915_v49  ;;  %v18432_v39 = vld [vmem:[#allocation2 + $0x6c] sm:$0xff] }
 0x49a   :  { %11958 = vmatmul.mubr.f32.gmra.mrb[24].mxu0 %v17818_v52  ;;  %v19919_v52 = vld [vmem:[#allocation145_spill] sm:$0xff] }
 0x49b   :  { %13722 = vmatpush3.bf16.msra.mxu0 %v19915_v49  ;;  %11960 = vmatprep.mubr.f32.mxu0 %v19872_v5  ;;  %v18436_v49 = vld [vmem:[#allocation2 + $0x7c] sm:$0xff] }
 0x49c   :  { %13724 = vmatprep.subr.bf16.mxu0 %v19916_v55 }
 0x49e   :  { %11961 = vmatmul.mubr.f32.gmra.mrb[26].mxu0 %v18015_v41 }
 0x49f   :  { %13726 = vmatpush3.bf16.msra.mxu0 %v19916_v55  ;;  %11963 = vmatprep.mubr.f32.mxu0 %v19917_v23  ;;  %v19930_v55 = vld [vmem:[#allocation156_spill] sm:$0xff] }
 0x4a0   :  { %13728 = vmatprep.subr.bf16.mxu0 %v19918_v63 }
 0x4a2   :  { %11964 = vmatmul.mubr.f32.gmra.mrb[28].mxu0 %v18193_v31 }
 0x4a3   :  { %13730 = vmatpush3.bf16.msra.mxu0 %v19918_v63  ;;  %11966 = vmatprep.mubr.f32.mxu0 %v18366_v58  ;;  %v18440_v63 = vld [vmem:[#allocation2 + $0x84] sm:$0xff] }
 0x4a4   :  { %13732 = vmatprep.subr.bf16.mxu0 %v19919_v52 }
 0x4a6   :  { %11967 = vmatmul.mubr.f32.gmra.mrb[30].mxu0 %v18371_v6 }
 0x4a7   :  { %13734 = vmatpush3.bf16.msra.mxu0 %v19919_v52  ;;  %12001 = vmatprep.mubr.f32.mxu0 %v14847_v12  ;;  %v18444_v52 = vld [vmem:[#allocation2 + $0x94] sm:$0xff] }
 0x4a8   :  { %13736 = vmatprep.subr.bf16.mxu0 %v19920_v30  ;;  %v19931_v12 = vld [vmem:[#allocation157_spill] sm:$0xff] }
 0x4aa   :  { %12002 = vmatmul.mubr.f32.vlgmr.msra.gmra.mrb[16].mxu0 %v14848_v57  ;;  %v18452_v57 = vld [vmem:[#allocation2 + $0xac] sm:$0xff] }
 0x4ab   :  { %13738 = vmatpush3.bf16.msra.mxu0 %v19920_v30  ;;  %12004 = vmatprep.mubr.f32.mxu0 %v18378_v16  ;;  %v18448_v30 = vld [vmem:[#allocation2 + $0x9c] sm:$0xff] }
 0x4ac   :  { %13740 = vmatprep.subr.bf16.mxu0 %v19921_v24 }
 0x4ae   :  { %12005 = vmatmul.mubr.f32.gmra.mrb[18].mxu0 %v18382_v59 }
 0x4af   :  { %13742 = vmatpush3.bf16.msra.mxu0 %v19921_v24  ;;  %12007 = vmatprep.mubr.f32.mxu0 %v18386_v18  ;;  %v19932_v24 = vld [vmem:[#allocation158_spill] sm:$0xff] }
 0x4b0   :  { %13744 = vmatprep.subr.bf16.mxu0 %v19922_v46 }
 0x4b2   :  { %12008 = vmatmul.mubr.f32.gmra.mrb[20].mxu0 %v18390_v11 }
 0x4b3   :  { %13746 = vmatpush3.bf16.msra.mxu0 %v19922_v46  ;;  %12010 = vmatprep.mubr.f32.mxu0 %v18394_v56  ;;  %v18456_v46 = vld [vmem:[#allocation2 + $0xb4] sm:$0xff] }
 0x4b4   :  { %13748 = vmatprep.subr.bf16.mxu0 %v19923_v29 }
 0x4b6   :  { %12011 = vmatmul.mubr.f32.gmra.mrb[22].mxu0 %v18398_v60 }
 0x4b7   :  { %13750 = vmatpush3.bf16.msra.mxu0 %v19923_v29  ;;  %12013 = vmatprep.mubr.f32.mxu0 %v18402_v35  ;;  %v19933_v29 = vld [vmem:[#allocation159_spill] sm:$0xff] }
 0x4b8   :  { %13752 = vmatprep.subr.bf16.mxu0 %v19924_v43 }
 0x4ba   :  { %12014 = vmatmul.mubr.f32.gmra.mrb[24].mxu0 %v18406_v15 }
 0x4bb   :  { %13754 = vmatpush3.bf16.msra.mxu0 %v19924_v43  ;;  %12016 = vmatprep.mubr.f32.mxu0 %v18046_v7  ;;  %v19934_v43 = vld [vmem:[#allocation160_spill] sm:$0xff] }
 0x4bc   :  { %13756 = vmatprep.subr.bf16.mxu0 %v19925_v22 }
 0x4be   :  { %12017 = vmatmul.mubr.f32.gmra.mrb[26].mxu0 %v18051_v8 }
 0x4bf   :  { %13758 = vmatpush3.bf16.msra.mxu0 %v19925_v22  ;;  %12019 = vmatprep.mubr.f32.mxu0 %v18224_v32  ;;  %v18466_v22 = vld [vmem:[#allocation2 + $0xf4] sm:$0xff] }
 0x4c0   :  { %13760 = vmatprep.subr.bf16.mxu0 %v19926_v0 }
 0x4c2   :  { %12020 = vmatmul.mubr.f32.gmra.mrb[28].mxu0 %v18229_v37 }
 0x4c3   :  { %13762 = vmatpush3.bf16.msra.mxu0 %v19926_v0  ;;  %12022 = vmatprep.mubr.f32.mxu0 %v18416_v21  ;;  %v18471_v0 = vld [vmem:[#allocation2 + $0xfc] sm:$0xff] }
 0x4c4   :  { %13764 = vmatprep.subr.bf16.mxu0 %v19927_v2 }
 0x4c6   :  { %12023 = vmatmul.mubr.f32.gmra.mrb[30].mxu0 %v18421_v4 }
 0x4c7   :  { %13766 = vmatpush3.bf16.msra.mxu0 %v19927_v2  ;;  %12057 = vmatprep.mubr.f32.mxu0 %v14857_v25  ;;  %v19935_v2 = vld [vmem:[#allocation161_spill] sm:$0xff]  ;;  %v14867_v25 = vld [vmem:[#allocation2 + $0x4e] sm:$0xff] }
 0x4c8   :  { %13768 = vmatprep.subr.bf16.mxu0 %v19928_v14 }
 0x4ca   :  { %12058 = vmatmul.mubr.f32.vlgmr.msra.gmra.mrb[16].mxu0 %v14858_v10  ;;  %v19937_v10 = vld [vmem:[#allocation163_spill] sm:$0xff] }
 0x4cb   :  { %13770 = vmatpush3.bf16.msra.mxu0 %v19928_v14  ;;  %12060 = vmatprep.mubr.f32.mxu0 %v18428_v53  ;;  %v19936_v14 = vld [vmem:[#allocation162_spill] sm:$0xff] }
 0x4cc   :  { %13772 = vmatprep.subr.bf16.mxu0 %v19929_v26 }
 0x4ce   :  { %12061 = vmatmul.mubr.f32.gmra.mrb[18].mxu0 %v18432_v39 }
 0x4cf   :  { %13774 = vmatpush3.bf16.msra.mxu0 %v19929_v26  ;;  %12063 = vmatprep.mubr.f32.mxu0 %v18436_v49  ;;  %v19938_v26 = vld [vmem:[#allocation164_spill] sm:$0xff] }
 0x4d0   :  { %13776 = vmatprep.subr.bf16.mxu0 %v19930_v55 }
 0x4d2   :  { %12064 = vmatmul.mubr.f32.gmra.mrb[20].mxu0 %v18440_v63 }
 0x4d3   :  { %13778 = vmatpush3.bf16.msra.mxu0 %v19930_v55  ;;  %12066 = vmatprep.mubr.f32.mxu0 %v18444_v52  ;;  %v18514_v55 = vld [vmem:[#allocation2 + $0x68] sm:$0xff] }
 0x4d4   :  { %13780 = vmatprep.subr.bf16.mxu0 %v19931_v12 }
 0x4d6   :  { %12067 = vmatmul.mubr.f32.gmra.mrb[22].mxu0 %v18448_v30 }
 0x4d7   :  { %13782 = vmatpush3.bf16.msra.mxu0 %v19931_v12  ;;  %12069 = vmatprep.mubr.f32.mxu0 %v18452_v57  ;;  %v19945_v12 = vld [vmem:[#allocation171_spill] sm:$0xff] }
 0x4d8   :  { %13784 = vmatprep.subr.bf16.mxu0 %v19932_v24 }
 0x4da   :  { %12070 = vmatmul.mubr.f32.gmra.mrb[24].mxu0 %v18456_v46 }
 0x4db   :  { %13786 = vmatpush3.bf16.msra.mxu0 %v19932_v24  ;;  %12072 = vmatprep.mubr.f32.mxu0 %v18082_v27  ;;  %v18520_v24 = vld [vmem:[#allocation2 + $0x80] sm:$0xff] }
 0x4dc   :  { %13788 = vmatprep.subr.bf16.mxu0 %v19933_v29 }
 0x4de   :  { %12073 = vmatmul.mubr.f32.gmra.mrb[26].mxu0 %v18087_v19 }
 0x4df   :  { %13790 = vmatpush3.bf16.msra.mxu0 %v19933_v29  ;;  %12075 = vmatprep.mubr.f32.mxu0 %v18260_v33  ;;  %v19946_v29 = vld [vmem:[#allocation172_spill] sm:$0xff] }
 0x4e0   :  { %13792 = vmatprep.subr.bf16.mxu0 %v19934_v43 }
 0x4e2   :  { %12076 = vmatmul.mubr.f32.gmra.mrb[28].mxu0 %v18265_v40 }
 0x4e3   :  { %13794 = vmatpush3.bf16.msra.mxu0 %v19934_v43  ;;  %12078 = vmatprep.mubr.f32.mxu0 %v18466_v22  ;;  %v19947_v43 = vld [vmem:[#allocation173_spill] sm:$0xff] }
 0x4e4   :  { %13796 = vmatprep.subr.bf16.mxu0 %v19935_v2 }
 0x4e6   :  { %12079 = vmatmul.mubr.f32.gmra.mrb[30].mxu0 %v18471_v0 }
 0x4e7   :  { %13798 = vmatpush3.bf16.msra.mxu0 %v19935_v2  ;;  %12113 = vmatprep.mubr.f32.mxu0 %v14867_v25  ;;  %v19948_v2 = vld [vmem:[#allocation174_spill] sm:$0xff]  ;;  %v19951_v25 = vld [vmem:[#allocation177_spill] sm:$0xff] }
 0x4e8   :  { %13800 = vmatprep.subr.bf16.mxu0 %v19936_v14 }
 0x4ea   :  { %12114 = vmatmul.mubr.f32.vlgmr.msra.gmra.mrb[16].mxu0 %v17902_v42  ;;  %v19939_v42 = vld [vmem:[#allocation165_spill] sm:$0xff] }
 0x4eb   :  { %13802 = vmatpush3.bf16.msra.mxu0 %v19936_v14  ;;  %12116 = vmatprep.mubr.f32.mxu0 %v17905_v48  ;;  %v19940_v48 = vld [vmem:[#allocation166_spill] sm:$0xff] }
 0x4ec   :  { %13804 = vmatprep.subr.bf16.mxu0 %v19937_v10  ;;  %v14873_v14 = vld [vmem:[#allocation2 + $0x60] sm:$0xff] }
 0x4ee   :  { %12117 = vmatmul.mubr.f32.gmra.mrb[18].mxu0 %v17910_v3  ;;  %v19941_v3 = vld [vmem:[#allocation167_spill] sm:$0xff] }
 0x4ef   :  { %13806 = vmatpush3.bf16.msra.mxu0 %v19937_v10  ;;  %12119 = vmatprep.mubr.f32.mxu0 %v17913_v34  ;;  %v19942_v34 = vld [vmem:[#allocation168_spill] sm:$0xff]  ;;  %v19952_v10 = vld [vmem:[#allocation178_spill] sm:$0xff] }
 0x4f0   :  { %13808 = vmatprep.subr.bf16.mxu0 %v19938_v26 }
 0x4f2   :  { %12120 = vmatmul.mubr.f32.gmra.mrb[20].mxu0 %v17918_v17  ;;  %v18501_v17 = vld [vmem:[#allocation2 + $0xf6] sm:$0xff] }
 0x4f3   :  { %13810 = vmatpush3.bf16.msra.mxu0 %v19938_v26  ;;  %12122 = vmatprep.mubr.f32.mxu0 %v17921_v13  ;;  %v18506_v13 = vld [vmem:[#allocation2 + $0xfe] sm:$0xff] }
 0x4f4   :  { %13812 = vmatprep.subr.bf16.mxu0 %v19939_v42  ;;  %v14874_v26 = vld [vmem:[#allocation2 + $0x78] sm:$0xff] }
 0x4f6   :  { %12123 = vmatmul.mubr.f32.gmra.mrb[22].mxu0 %v17926_v51  ;;  %v19943_v51 = vld [vmem:[#allocation169_spill] sm:$0xff] }
 0x4f7   :  { %13814 = vmatpush3.bf16.msra.mxu0 %v19939_v42  ;;  %12125 = vmatprep.mubr.f32.mxu0 %v17929_v50  ;;  %v14868_v50 = vld [vmem:[#allocation2 + $0x50] sm:$0xff]  ;;  %v19953_v42 = vld [vmem:[#allocation179_spill] sm:$0xff] }
 0x4f8   :  { %13816 = vmatprep.subr.bf16.mxu0 %v19940_v48 }
 0x4fa   :  { %12126 = vmatmul.mubr.f32.gmra.mrb[24].mxu0 %v17934_v1  ;;  %v19944_v1 = vld [vmem:[#allocation170_spill] sm:$0xff] }
 0x4fb   :  { %13818 = vmatpush3.bf16.msra.mxu0 %v19940_v48  ;;  %12128 = vmatprep.mubr.f32.mxu0 %v18118_v47  ;;  %v14875_v48 = vld [vmem:[#allocation2 + $0x90] sm:$0xff] }
 0x4fc   :  { %13820 = vmatprep.subr.bf16.mxu0 %v19941_v3 }
 0x4fe   :  { %12129 = vmatmul.mubr.f32.gmra.mrb[26].mxu0 %v18123_v54 }
 0x4ff   :  { %13822 = vmatpush3.bf16.msra.mxu0 %v19941_v3  ;;  %12131 = vmatprep.mubr.f32.mxu0 %v18296_v20  ;;  %v19954_v3 = vld [vmem:[#allocation180_spill] sm:$0xff] }
 0x500   :  { %13824 = vmatprep.subr.bf16.mxu0 %v19942_v34 }
 0x502   :  { %12132 = vmatmul.mubr.f32.gmra.mrb[28].mxu0 %v18301_v61 }
 0x503   :  { %13826 = vmatpush3.bf16.msra.mxu0 %v19942_v34  ;;  %12134 = vmatprep.mubr.f32.mxu0 %v18501_v17  ;;  %v14876_v34 = vld [vmem:[#allocation2 + $0xa8] sm:$0xff] }
 0x504   :  { %13828 = vmatprep.subr.bf16.mxu0 %v19943_v51 }
 0x506   :  { %12135 = vmatmul.mubr.f32.gmra.mrb[30].mxu0 %v18506_v13 }
 0x507   :  { %13830 = vmatpush3.bf16.msra.mxu0 %v19943_v51  ;;  %12169 = vmatprep.mubr.f32.mxu0 %v14868_v50  ;;  %v19955_v51 = vld [vmem:[#allocation181_spill] sm:$0xff]  ;;  %v19956_v50 = vld [vmem:[#allocation182_spill] sm:$0xff] }
 0x508   :  { %13832 = vmatprep.subr.bf16.mxu0 %v19944_v1 }
 0x50a   :  { %12170 = vmatmul.mubr.f32.vlgmr.msra.gmra.mrb[16].mxu0 %v19857_v38  ;;  %v18526_v38 = vld [vmem:[#allocation2 + $0x98] sm:$0xff] }
 0x50b   :  { %13834 = vmatpush3.bf16.msra.mxu0 %v19944_v1  ;;  %12172 = vmatprep.mubr.f32.mxu0 %v18514_v55  ;;  %v19957_v1 = vld [vmem:[#allocation183_spill] sm:$0xff] }
 0x50c   :  { %13836 = vmatprep.subr.bf16.mxu0 %v19945_v12 }
 0x50e   :  { %12173 = vmatmul.mubr.f32.gmra.mrb[18].mxu0 %v19859_v45  ;;  %v18532_v45 = vld [vmem:[#allocation2 + $0xb0] sm:$0xff] }
 0x50f   :  { %13838 = vmatpush3.bf16.msra.mxu0 %v19945_v12  ;;  %12175 = vmatprep.mubr.f32.mxu0 %v18520_v24  ;;  %v19958_v12 = vld [vmem:[#allocation184_spill] sm:$0xff] }
 0x510   :  { %13840 = vmatprep.subr.bf16.mxu0 %v19946_v29 }
 0x512   :  { %12176 = vmatmul.mubr.f32.gmra.mrb[20].mxu0 %v19904_v44  ;;  %v19949_v44 = vld [vmem:[#allocation175_spill] sm:$0xff] }
 0x513   :  { %13842 = vmatpush3.bf16.msra.mxu0 %v19946_v29  ;;  %12178 = vmatprep.mubr.f32.mxu0 %v18526_v38  ;;  %v6468_v29 = vld [vmem:[#allocation2 + $0x108] sm:$0xff] }
 0x514   :  { %13844 = vmatprep.subr.bf16.mxu0 %v19947_v43 }
 0x516   :  { %12179 = vmatmul.mubr.f32.gmra.mrb[22].mxu0 %v17973_v28  ;;  %v19950_v28 = vld [vmem:[#allocation176_spill] sm:$0xff] }
 0x517   :  { %13846 = vmatpush3.bf16.msra.mxu0 %v19947_v43  ;;  %12181 = vmatprep.mubr.f32.mxu0 %v18532_v45  ;;  %v19962_v43 = vld [vmem:[#allocation188_spill] sm:$0xff] }
 0x518   :  { %13848 = vmatprep.subr.bf16.mxu0 %v19948_v2 }
 0x51a   :  { %12182 = vmatmul.mubr.f32.gmra.mrb[24].mxu0 %v19863_v62  ;;  %v18547_v62 = vld [vmem:[#allocation2 + $0x100] sm:$0xff] }
 0x51b   :  { %13850 = vmatpush3.bf16.msra.mxu0 %v19948_v2  ;;  %12184 = vmatprep.mubr.f32.mxu0 %v18015_v41  ;;  %v14884_v2 = vld [vmem:[#allocation2 + $0xb6] sm:$0xff] }
 0x51c   :  { %13852 = vmatprep.subr.bf16.mxu0 %v19949_v44 }
 0x51e   :  { %12185 = vmatmul.mubr.f32.gmra.mrb[26].mxu0 %v19908_v9 }
 0x51f   :  { %13854 = vmatpush3.bf16.msra.mxu0 %v19949_v44  ;;  %12187 = vmatprep.mubr.f32.mxu0 %v18193_v31  ;;  %v19980_v44 = vld [vmem:[#allocation206_spill] sm:$0xff] }
 0x520   :  { %13856 = vmatprep.subr.bf16.mxu0 %v19950_v28 }
 0x522   :  { %12188 = vmatmul.mubr.f32.gmra.mrb[28].mxu0 %v18335_v36 }
 0x523   :  { %13858 = vmatpush3.bf16.msra.mxu0 %v19950_v28  ;;  %12190 = vmatprep.mubr.f32.mxu0 %v18371_v6  ;;  %v19981_v28 = vld [vmem:[#allocation207_spill] sm:$0xff] }
 0x524   :  { %13860 = vmatprep.subr.bf16.mxu0 %v19951_v25 }
 0x526   :  { %12191 = vmatmul.mubr.f32.gmra.mrb[30].mxu0 %v18547_v62 }
 0x527   :  { %13862 = vmatpush3.bf16.msra.mxu0 %v19951_v25  ;;  %12225 = vmatprep.mubr.f32.mxu0 %v14873_v14  ;;  %v19982_v25 = vld [vmem:[#allocation208_spill] sm:$0xff] }
 0x528   :  { %13864 = vmatprep.subr.bf16.mxu0 %v19952_v10  ;;  %v7032_v14 = vld [vmem:[#allocation2 + $0x10e] sm:$0xff] }
 0x52a   :  { %12226 = vmatmul.mubr.f32.vlgmr.msra.gmra.mrb[16].mxu0 %v18514_v55 }
 0x52b   :  { %13866 = vmatpush3.bf16.msra.mxu0 %v19952_v10  ;;  %12228 = vmatprep.mubr.f32.mxu0 %v14874_v26  ;;  %v14889_v10 = vld [vmem:[#allocation2 + $0xc8] sm:$0xff] }
 0x52c   :  { %13868 = vmatprep.subr.bf16.mxu0 %v19953_v42 }
 0x52e   :  { %12229 = vmatmul.mubr.f32.gmra.mrb[18].mxu0 %v18520_v24 }
 0x52f   :  { %13870 = vmatpush3.bf16.msra.mxu0 %v19953_v42  ;;  %12231 = vmatprep.mubr.f32.mxu0 %v14875_v48 }
 0x530   :  { %13872 = vmatprep.subr.bf16.mxu0 %v19954_v3 }
 0x532   :  { %12232 = vmatmul.mubr.f32.gmra.mrb[20].mxu0 %v18526_v38 }
 0x533   :  { %13874 = vmatpush3.bf16.msra.mxu0 %v19954_v3  ;;  %12234 = vmatprep.mubr.f32.mxu0 %v14876_v34 }
 0x534   :  { %13876 = vmatprep.subr.bf16.mxu0 %v19955_v51 }
 0x536   :  { %12235 = vmatmul.mubr.f32.gmra.mrb[22].mxu0 %v18532_v45 }
 0x537   :  { %13878 = vmatpush3.bf16.msra.mxu0 %v19955_v51  ;;  %12237 = vmatprep.mubr.f32.mxu0 %v19872_v5  ;;  %v19959_v5 = vld [vmem:[#allocation185_spill] sm:$0xff] }
 0x538   :  { %13880 = vmatprep.subr.bf16.mxu0 %v19956_v50 }
 0x53a   :  { %12238 = vmatmul.mubr.f32.gmra.mrb[24].mxu0 %v18015_v41  ;;  %v18576_v41 = vld [vmem:[#allocation2 + $0x110] sm:$0xff] }
 0x53b   :  { %13882 = vmatpush3.bf16.msra.mxu0 %v19956_v50  ;;  %12240 = vmatprep.mubr.f32.mxu0 %v19917_v23  ;;  %v19960_v23 = vld [vmem:[#allocation186_spill] sm:$0xff] }
 0x53c   :  { %13884 = vmatprep.subr.bf16.mxu0 %v19957_v1 }
 0x53e   :  { %12241 = vmatmul.mubr.f32.gmra.mrb[26].mxu0 %v18193_v31 }
 0x53f   :  { %13886 = vmatpush3.bf16.msra.mxu0 %v19957_v1  ;;  %12243 = vmatprep.mubr.f32.mxu0 %v18366_v58  ;;  %v19961_v58 = vld [vmem:[#allocation187_spill] sm:$0xff] }
 0x540   :  { %13888 = vmatprep.subr.bf16.mxu0 %v19958_v12 }
 0x542   :  { %12244 = vmatmul.mubr.f32.gmra.mrb[28].mxu0 %v18371_v6 }
 0x543   :  { %13890 = vmatpush3.bf16.msra.mxu0 %v19958_v12  ;;  %12246 = vmatprep.mubr.f32.mxu0 %v6468_v29 }
 0x544   :  { %13892 = vmatprep.subr.bf16.mxu0 %v19959_v5 }
 0x546   :  { %12247 = vmatmul.mubr.f32.gmra.mrb[30].mxu0 %v18576_v41 }
 0x547   :  { %13894 = vmatpush3.bf16.msra.mxu0 %v19959_v5  ;;  %12281 = vmatprep.mubr.f32.mxu0 %v18378_v16  ;;  %v19963_v16 = vld [vmem:[#allocation189_spill] sm:$0xff] }
 0x548   :  { %13896 = vmatprep.subr.bf16.mxu0 %v19960_v23 }
 0x54a   :  { %12282 = vmatmul.mubr.f32.vlgmr.msra.gmra.mrb[16].mxu0 %v18382_v59  ;;  %v19964_v59 = vld [vmem:[#allocation190_spill] sm:$0xff] }
 0x54b   :  { %13898 = vmatpush3.bf16.msra.mxu0 %v19960_v23  ;;  %12284 = vmatprep.mubr.f32.mxu0 %v18386_v18  ;;  %v19965_v18 = vld [vmem:[#allocation191_spill] sm:$0xff] }
 0x54c   :  { %13900 = vmatprep.subr.bf16.mxu0 %v19961_v58 }
 0x54e   :  { %12285 = vmatmul.mubr.f32.gmra.mrb[18].mxu0 %v18390_v11  ;;  %v19966_v11 = vld [vmem:[#allocation192_spill] sm:$0xff] }
 0x54f   :  { %13902 = vmatpush3.bf16.msra.mxu0 %v19961_v58  ;;  %12287 = vmatprep.mubr.f32.mxu0 %v18394_v56  ;;  %v6656_v56 = vld [vmem:[#allocation2 + $0x10a] sm:$0xff] }
 0x550   :  { %13904 = vmatprep.subr.bf16.mxu0 %v19962_v43 }
 0x552   :  { %12288 = vmatmul.mubr.f32.gmra.mrb[20].mxu0 %v18398_v60  ;;  %v19970_v60 = vld [vmem:[#allocation196_spill] sm:$0xff] }
 0x553   :  { %13906 = vmatpush3.bf16.msra.mxu0 %v19962_v43  ;;  %12290 = vmatprep.mubr.f32.mxu0 %v18402_v35  ;;  %v19971_v35 = vld [vmem:[#allocation197_spill] sm:$0xff] }
 0x554   :  { %13908 = vmatprep.subr.bf16.mxu0 %v19963_v16 }
 0x556   :  { %12291 = vmatmul.mubr.f32.gmra.mrb[22].mxu0 %v18406_v15  ;;  %v19972_v15 = vld [vmem:[#allocation198_spill] sm:$0xff] }
 0x557   :  { %13910 = vmatpush3.bf16.msra.mxu0 %v19963_v16  ;;  %12293 = vmatprep.mubr.f32.mxu0 %v18046_v7  ;;  %v6657_v7 = vld [vmem:[#allocation2 + $0x112] sm:$0xff] }
 0x558   :  { %13912 = vmatprep.subr.bf16.mxu0 %v19964_v59 }
 0x55a   :  { %12294 = vmatmul.mubr.f32.gmra.mrb[24].mxu0 %v18051_v8  ;;  %v19967_v8 = vld [vmem:[#allocation193_spill] sm:$0xff] }
 0x55b   :  { %13914 = vmatpush3.bf16.msra.mxu0 %v19964_v59  ;;  %12296 = vmatprep.mubr.f32.mxu0 %v18224_v32  ;;  %v19968_v32 = vld [vmem:[#allocation194_spill] sm:$0xff] }
 0x55c   :  { %13916 = vmatprep.subr.bf16.mxu0 %v19965_v18 }
 0x55e   :  { %12297 = vmatmul.mubr.f32.gmra.mrb[26].mxu0 %v18229_v37  ;;  %v19969_v37 = vld [vmem:[#allocation195_spill] sm:$0xff] }
 0x55f   :  { %13918 = vmatpush3.bf16.msra.mxu0 %v19965_v18  ;;  %12299 = vmatprep.mubr.f32.mxu0 %v18416_v21  ;;  %v19973_v21 = vld [vmem:[#allocation199_spill] sm:$0xff] }
 0x560   :  { %13920 = vmatprep.subr.bf16.mxu0 %v19966_v11 }
 0x562   :  { %12300 = vmatmul.mubr.f32.gmra.mrb[28].mxu0 %v18421_v4  ;;  %v19974_v4 = vld [vmem:[#allocation200_spill] sm:$0xff] }
 0x563   :  { %13922 = vmatpush3.bf16.msra.mxu0 %v19966_v11  ;;  %12302 = vmatprep.mubr.f32.mxu0 %v6656_v56 }
 0x564   :  { %13924 = vmatprep.subr.bf16.mxu0 %v19967_v8 }
 0x566   :  { %12303 = vmatmul.mubr.f32.gmra.mrb[30].mxu0 %v6657_v7 }
 0x567   :  { %13926 = vmatpush3.bf16.msra.mxu0 %v19967_v8  ;;  %12337 = vmatprep.mubr.f32.mxu0 %v18428_v53  ;;  %v6844_v53 = vld [vmem:[#allocation2 + $0x10c] sm:$0xff] }
 0x568   :  { %13928 = vmatprep.subr.bf16.mxu0 %v19968_v32 }
 0x56a   :  { %12338 = vmatmul.mubr.f32.vlgmr.msra.gmra.mrb[16].mxu0 %v18432_v39  ;;  %v14878_v39 = vld [vmem:[#allocation2 + $0x6e] sm:$0xff] }
 0x56b   :  { %13930 = vmatpush3.bf16.msra.mxu0 %v19968_v32  ;;  %12340 = vmatprep.mubr.f32.mxu0 %v18436_v49  ;;  %v14879_v49 = vld [vmem:[#allocation2 + $0x7e] sm:$0xff] }
 0x56c   :  { %13932 = vmatprep.subr.bf16.mxu0 %v19969_v37 }
 0x56e   :  { %12341 = vmatmul.mubr.f32.gmra.mrb[18].mxu0 %v18440_v63  ;;  %v19977_v63 = vld [vmem:[#allocation203_spill] sm:$0xff] }
 0x56f   :  { %13934 = vmatpush3.bf16.msra.mxu0 %v19969_v37  ;;  %12343 = vmatprep.mubr.f32.mxu0 %v18444_v52  ;;  %v14880_v52 = vld [vmem:[#allocation2 + $0x86] sm:$0xff] }
 0x570   :  { %13936 = vmatprep.subr.bf16.mxu0 %v19970_v60 }
 0x572   :  { %12344 = vmatmul.mubr.f32.gmra.mrb[20].mxu0 %v18448_v30  ;;  %v14881_v30 = vld [vmem:[#allocation2 + $0x96] sm:$0xff] }
 0x573   :  { %13938 = vmatpush3.bf16.msra.mxu0 %v19970_v60  ;;  %12346 = vmatprep.mubr.f32.mxu0 %v18452_v57  ;;  %v19978_v57 = vld [vmem:[#allocation204_spill] sm:$0xff] }
 0x574   :  { %13940 = vmatprep.subr.bf16.mxu0 %v19971_v35 }
 0x576   :  { %12347 = vmatmul.mubr.f32.gmra.mrb[22].mxu0 %v18456_v46  ;;  %v14882_v46 = vld [vmem:[#allocation2 + $0x9e] sm:$0xff] }
 0x577   :  { %13942 = vmatpush3.bf16.msra.mxu0 %v19971_v35  ;;  %12349 = vmatprep.mubr.f32.mxu0 %v18082_v27  ;;  %v6845_v27 = vld [vmem:[#allocation2 + $0x114] sm:$0xff] }
 0x578   :  { %13944 = vmatprep.subr.bf16.mxu0 %v19972_v15 }
 0x57a   :  { %12350 = vmatmul.mubr.f32.gmra.mrb[24].mxu0 %v18087_v19  ;;  %v19975_v19 = vld [vmem:[#allocation201_spill] sm:$0xff] }
 0x57b   :  { %13946 = vmatpush3.bf16.msra.mxu0 %v19972_v15  ;;  %12352 = vmatprep.mubr.f32.mxu0 %v18260_v33  ;;  %v14877_v33 = vld [vmem:[#allocation2 + $0x66] sm:$0xff] }
 0x57c   :  { %13948 = vmatprep.subr.bf16.mxu0 %v19973_v21 }
 0x57e   :  { %12353 = vmatmul.mubr.f32.gmra.mrb[26].mxu0 %v18265_v40  ;;  %v19976_v40 = vld [vmem:[#allocation202_spill] sm:$0xff] }
 0x57f   :  { %13950 = vmatpush3.bf16.msra.mxu0 %v19973_v21  ;;  %12355 = vmatprep.mubr.f32.mxu0 %v18466_v22  ;;  %v14883_v22 = vld [vmem:[#allocation2 + $0xae] sm:$0xff] }
 0x580   :  { %13952 = vmatprep.subr.bf16.mxu0 %v19974_v4 }
 0x582   :  { %12356 = vmatmul.mubr.f32.gmra.mrb[28].mxu0 %v18471_v0  ;;  %v19979_v0 = vld [vmem:[#allocation205_spill] sm:$0xff] }
 0x583   :  { %13954 = vmatpush3.bf16.msra.mxu0 %v19974_v4  ;;  %12358 = vmatprep.mubr.f32.mxu0 %v6844_v53 }
 0x584   :  { %13956 = vmatprep.subr.bf16.mxu0 %v19975_v19 }
 0x586   :  { %12359 = vmatmul.mubr.f32.gmra.mrb[30].mxu0 %v6845_v27 }
 0x587   :  { %13958 = vmatpush3.bf16.msra.mxu0 %v19975_v19  ;;  %12393 = vmatprep.mubr.f32.mxu0 %v14877_v33 }
 0x588   :  { %13960 = vmatprep.subr.bf16.mxu0 %v19976_v40 }
 0x58a   :  { %12394 = vmatmul.mubr.f32.vlgmr.msra.gmra.mrb[16].mxu0 %v14878_v39 }
 0x58b   :  { %13962 = vmatpush3.bf16.msra.mxu0 %v19976_v40  ;;  %12396 = vmatprep.mubr.f32.mxu0 %v14879_v49 }
 0x58c   :  { %13964 = vmatprep.subr.bf16.mxu0 %v19977_v63 }
 0x58e   :  { %12397 = vmatmul.mubr.f32.gmra.mrb[18].mxu0 %v14880_v52 }
 0x58f   :  { %13966 = vmatpush3.bf16.msra.mxu0 %v19977_v63  ;;  %12399 = vmatprep.mubr.f32.mxu0 %v14881_v30 }
 0x590   :  { %13968 = vmatprep.subr.bf16.mxu0 %v19978_v57 }
 0x592   :  { %12400 = vmatmul.mubr.f32.gmra.mrb[20].mxu0 %v14882_v46 }
 0x593   :  { %13970 = vmatpush3.bf16.msra.mxu0 %v19978_v57  ;;  %12402 = vmatprep.mubr.f32.mxu0 %v14883_v22 }
 0x594   :  { %13972 = vmatprep.subr.bf16.mxu0 %v19979_v0 }
 0x596   :  { %12403 = vmatmul.mubr.f32.gmra.mrb[22].mxu0 %v14884_v2 }
 0x597   :  { %13974 = vmatpush3.bf16.msra.mxu0 %v19979_v0  ;;  %12405 = vmatprep.mubr.f32.mxu0 %v18118_v47  ;;  %v7033_v47 = vld [vmem:[#allocation2 + $0x116] sm:$0xff] }
 0x598   :  { %13976 = vmatprep.subr.bf16.mxu0 %v19980_v44 }
 0x59a   :  { %12406 = vmatmul.mubr.f32.gmra.mrb[24].mxu0 %v18123_v54  ;;  %v19983_v54 = vld [vmem:[#allocation209_spill] sm:$0xff] }
 0x59b   :  { %13978 = vmatpush3.bf16.msra.mxu0 %v19980_v44  ;;  %12408 = vmatprep.mubr.f32.mxu0 %v18296_v20  ;;  %v14885_v20 = vld [vmem:[#allocation2 + $0x70] sm:$0xff] }
 0x59c   :  { %13980 = vmatprep.subr.bf16.mxu0 %v19981_v28 }
 0x59e   :  { %12409 = vmatmul.mubr.f32.gmra.mrb[26].mxu0 %v18301_v61  ;;  %v14886_v61 = vld [vmem:[#allocation2 + $0x88] sm:$0xff] }
 0x59f   :  { %13982 = vmatpush3.bf16.msra.mxu0 %v19981_v28  ;;  %12411 = vmatprep.mubr.f32.mxu0 %v18501_v17  ;;  %v14887_v17 = vld [vmem:[#allocation2 + $0xa0] sm:$0xff] }
 0x5a0   :  { %13984 = vmatprep.subr.bf16.mxu0 %v19982_v25 }
 0x5a2   :  { %12412 = vmatmul.mubr.f32.gmra.mrb[28].mxu0 %v18506_v13  ;;  %v14888_v13 = vld [vmem:[#allocation2 + $0xb8] sm:$0xff] }
 0x5a3   :  { %13986 = vmatpush3.bf16.msra.mxu0 %v19982_v25  ;;  %12414 = vmatprep.mubr.f32.mxu0 %v7032_v14 }
 0x5a4   :  { %13988 = vmatprep.subr.bf16.mxu0 %v19983_v54 }
 0x5a6   :  { %12415 = vmatmul.mubr.f32.gmra.mrb[30].mxu0 %v7033_v47 }
 0x5a7   :  { %13990 = vmatpush3.bf16.msra.mxu0 %v19983_v54  ;;  %12449 = vmatprep.mubr.f32.mxu0 %v18514_v55  ;;  %v7221_v55 = vld [vmem:[#allocation2 + $0x118] sm:$0xff] }
 0x5aa   :  { %12450 = vmatmul.mubr.f32.vlgmr.msra.gmra.mrb[16].mxu0 %v14885_v20  ;;  %v7448_v20 = vld [vmem:[%s19205_s5 + $0x8] sm:$0xff] }
 0x5ab   :  { %12452 = vmatprep.mubr.f32.mxu0 %v18520_v24  ;;  %v7447_v24 = vld [vmem:[%s19205_s5] sm:$0xff] }
 0x5ac   :  { %12505 = vmatprep.mubr.f32.mxu1 %v7447_v24  ;;  %v7454_v24 = vld [vmem:[%s19205_s5 + $0x38] sm:$0xff] }
 0x5ae   :  { %12453 = vmatmul.mubr.f32.gmra.mrb[18].mxu0 %v14886_v61  ;;  %v7449_v61 = vld [vmem:[%s19205_s5 + $0x10] sm:$0xff] }
 0x5af   :  { %12455 = vmatprep.mubr.f32.mxu0 %v18526_v38 }
 0x5b2   :  { %12456 = vmatmul.mubr.f32.gmra.mrb[20].mxu0 %v14887_v17  ;;  %v7450_v17 = vld [vmem:[%s19205_s5 + $0x18] sm:$0xff] }
 0x5b3   :  { %12458 = vmatprep.mubr.f32.mxu0 %v18532_v45 }
 0x5b6   :  { %12459 = vmatmul.mubr.f32.gmra.mrb[22].mxu0 %v14888_v13  ;;  %v7451_v13 = vld [vmem:[%s19205_s5 + $0x20] sm:$0xff] }
 0x5b7   :  { %12461 = vmatprep.mubr.f32.mxu0 %v14889_v10  ;;  %v7452_v10 = vld [vmem:[%s19205_s5 + $0x28] sm:$0xff] }
 0x5ba   :  { %12462 = vmatmul.mubr.f32.gmra.mrb[24].mxu0 %v19908_v9  ;;  %v18679_v9 = vld [vmem:[%s19204_s4] ss:$0 sm:$0xff] }
 0x5bb   :  { %12464 = vmatprep.mubr.f32.mxu0 %v18193_v31 }
 0x5be   :  { %12465 = vmatmul.mubr.f32.gmra.mrb[26].mxu0 %v18335_v36 }
 0x5bf   :  { %12467 = vmatprep.mubr.f32.mxu0 %v18371_v6 }
 0x5c2   :  { %12468 = vmatmul.mubr.f32.gmra.mrb[28].mxu0 %v18547_v62 }
 0x5c3   :  { %12470 = vmatprep.mubr.f32.mxu0 %v18576_v41 }
 0x5c6   :  { %12471 = vmatmul.mubr.f32.gmra.mrb[30].mxu0 %v7221_v55  ;;  %v7453_v55 = vld [vmem:[%s19205_s5 + $0x30] sm:$0xff] }
 0x67d   :  { %v12451_v31 = vpop.f32.mrb[16].mxu0 }
 0x67e   :  { %v7416_v36 = vadd.f32 %v12451_v31, %v18679_v9  ;;  %v7313_v6 = vpop.f32.mrb[17].mxu0  ;;  %v7456_v31 = vld [vmem:[%s19205_s5 + $0x48] sm:$0xff] }
 0x67f   :  { %v7415_v38 = vadd.f32 %v18679_v9, %v7313_v6  ;;  %v7458_v6 = vld [vmem:[%s19205_s5 + $0x58] sm:$0xff] }
 0x680   :  { %v7432_v45 = vmax.f32 %v7416_v36, 0.0  ;;  %v7457_v36 = vld [vmem:[%s19205_s5 + $0x50] sm:$0xff] }
 0x681   :  { %v7431_v62 = vmax.f32 %v7415_v38, 0.0  ;;  %v12454_v26 = vpop.f32.mrb[18].mxu0  ;;  %v7459_v38 = vld [vmem:[%s19205_s5 + $0x60] sm:$0xff] }
 0x682   :  { %v7418_v42 = vadd.f32 %v12454_v26, %v18679_v9  ;;  %v7323_v48 = vpop.f32.mrb[19].mxu0  ;;  %v7462_v26 = vld [vmem:[%s19205_s5 + $0x78] sm:$0xff] }
 0x683   :  { %v7417_v3 = vadd.f32 %v18679_v9, %v7323_v48  ;;  %v13991_v34 = vpack.c.bf16 %v7432_v45, %v7431_v62  ;;  %v7460_v45 = vld [vmem:[%s19205_s5 + $0x68] sm:$0xff]  ;;  %v7461_v62 = vld [vmem:[%s19205_s5 + $0x70] sm:$0xff] }
 0x684   :  { %v7434_v51 = vmax.f32 %v7418_v42, 0.0 }
 0x685   :  { %v7433_v50 = vmax.f32 %v7417_v3, 0.0  ;;  %v12457_v1 = vpop.f32.mrb[20].mxu0  ;;  %13992 = vmatprep.subr.bf16.mxu1 %v13991_v34 }
 0x686   :  { %v7420_v12 = vadd.f32 %v12457_v1, %v18679_v9  ;;  %v7333_v29 = vpop.f32.mrb[21].mxu0  ;;  %13994 = vmatpush3.bf16.msra.mxu1 %v13991_v34 }
 0x687   :  { %v13995_v41 = vpack.c.bf16 %v7434_v51, %v7433_v50  ;;  %v7419_v5 = vadd.f32 %v18679_v9, %v7333_v29 }
 0x688   :  { %v7436_v23 = vmax.f32 %v7420_v12, 0.0 }
 0x689   :  { %v7435_v58 = vmax.f32 %v7419_v5, 0.0  ;;  %v12460_v43 = vpop.f32.mrb[22].mxu0  ;;  %13996 = vmatprep.subr.bf16.mxu1 %v13995_v41 }
 0x68a   :  { %v7422_v16 = vadd.f32 %v12460_v43, %v18679_v9  ;;  %v7343_v59 = vpop.f32.mrb[23].mxu0  ;;  %13998 = vmatpush3.bf16.msra.mxu1 %v13995_v41 }
 0x68b   :  { %v13999_v18 = vpack.c.bf16 %v7436_v23, %v7435_v58  ;;  %v7421_v11 = vadd.f32 %v18679_v9, %v7343_v59 }
 0x68c   :  { %v7438_v56 = vmax.f32 %v7422_v16, 0.0 }
 0x68d   :  { %v7437_v7 = vmax.f32 %v7421_v11, 0.0  ;;  %v12463_v8 = vpop.f32.mrb[24].mxu0  ;;  %14000 = vmatprep.subr.bf16.mxu1 %v13999_v18 }
 0x68e   :  { %v7424_v32 = vadd.f32 %v12463_v8, %v18679_v9  ;;  %v7353_v37 = vpop.f32.mrb[25].mxu0  ;;  %14002 = vmatpush3.bf16.msra.mxu1 %v13999_v18 }
 0x68f   :  { %v14003_v60 = vpack.c.bf16 %v7438_v56, %v7437_v7  ;;  %v7423_v35 = vadd.f32 %v18679_v9, %v7353_v37 }
 0x690   :  { %v7440_v15 = vmax.f32 %v7424_v32, 0.0 }
 0x691   :  { %v7439_v21 = vmax.f32 %v7423_v35, 0.0  ;;  %v12466_v4 = vpop.f32.mrb[26].mxu0  ;;  %14004 = vmatprep.subr.bf16.mxu1 %v14003_v60 }
 0x692   :  { %v7426_v53 = vadd.f32 %v12466_v4, %v18679_v9  ;;  %v7363_v27 = vpop.f32.mrb[27].mxu0  ;;  %14006 = vmatpush3.bf16.msra.mxu1 %v14003_v60 }
 0x693   :  { %v14007_v19 = vpack.c.bf16 %v7440_v15, %v7439_v21  ;;  %v7425_v33 = vadd.f32 %v18679_v9, %v7363_v27 }
 0x694   :  { %v7442_v40 = vmax.f32 %v7426_v53, 0.0 }
 0x695   :  { %v7441_v39 = vmax.f32 %v7425_v33, 0.0  ;;  %v12469_v49 = vpop.f32.mrb[28].mxu0  ;;  %14008 = vmatprep.subr.bf16.mxu1 %v14007_v19 }
 0x696   :  { %v7428_v63 = vadd.f32 %v12469_v49, %v18679_v9  ;;  %v7373_v52 = vpop.f32.mrb[29].mxu0  ;;  %14010 = vmatpush3.bf16.msra.mxu1 %v14007_v19 }
 0x697   :  { %v14011_v30 = vpack.c.bf16 %v7442_v40, %v7441_v39  ;;  %v7427_v57 = vadd.f32 %v18679_v9, %v7373_v52 }
 0x698   :  { %v7444_v46 = vmax.f32 %v7428_v63, 0.0 }
 0x699   :  { %v7443_v22 = vmax.f32 %v7427_v57, 0.0  ;;  %v12472_v0 = vpop.f32.mrb[30].mxu0  ;;  %14012 = vmatprep.subr.bf16.mxu1 %v14011_v30 }
 0x69a   :  { %v7430_v2 = vadd.f32 %v12472_v0, %v18679_v9  ;;  %v7383_v44 = vpop.f32.mrb[31].mxu0  ;;  %14014 = vmatpush3.bf16.msra.mxu1 %v14011_v30 }
 0x69b   :  { %v14015_v28 = vpack.c.bf16 %v7444_v46, %v7443_v22  ;;  %v7429_v25 = vadd.f32 %v18679_v9, %v7383_v44  ;;  %v7455_v9 = vld [vmem:[%s19205_s5 + $0x40] sm:$0xff] }
 0x69c   :  { %v7446_v14 = vmax.f32 %v7430_v2, 0.0 }
 0x69d   :  { %v7445_v47 = vmax.f32 %v7429_v25, 0.0  ;;  %14016 = vmatprep.subr.bf16.mxu1 %v14015_v28 }
 0x69e   :  { %14018 = vmatpush3.bf16.msra.mxu1 %v14015_v28 }
 0x69f   :  { %v14019_v54 = vpack.c.bf16 %v7446_v14, %v7445_v47 }
 0x6a1   :  { %14020 = vmatprep.subr.bf16.mxu1 %v14019_v54 }
 0x6a2   :  { %14022 = vmatpush3.bf16.msra.mxu1 %v14019_v54 }
 0x6a5   :  { %12506 = vmatmul.mubr.f32.vlgmr.msra.gmra.mrb[128].mxu1 %v7448_v20 }
 0x6a6   :  { %12508 = vmatprep.mubr.f32.mxu1 %v7449_v61 }
 0x6a9   :  { %12509 = vmatmul.mubr.f32.gmra.mrb[130].mxu1 %v7450_v17 }
 0x6aa   :  { %12511 = vmatprep.mubr.f32.mxu1 %v7451_v13 }
 0x6ad   :  { %12512 = vmatmul.mubr.f32.gmra.mrb[132].mxu1 %v7452_v10 }
 0x6ae   :  { %12514 = vmatprep.mubr.f32.mxu1 %v7453_v55 }
 0x6b1   :  { %12515 = vmatmul.mubr.f32.gmra.mrb[134].mxu1 %v7454_v24 }
 0x6b2   :  { %12517 = vmatprep.mubr.f32.mxu1 %v7455_v9 }
 0x6b5   :  { %12518 = vmatmul.mubr.f32.gmra.mrb[136].mxu1 %v7456_v31 }
 0x6b6   :  { %12520 = vmatprep.mubr.f32.mxu1 %v7457_v36 }
 0x6b9   :  { %12521 = vmatmul.mubr.f32.gmra.mrb[138].mxu1 %v7458_v6 }
 0x6ba   :  { %12523 = vmatprep.mubr.f32.mxu1 %v7459_v38 }
 0x6bd   :  { %12524 = vmatmul.mubr.f32.gmra.mrb[140].mxu1 %v7460_v45 }
 0x6be   :  { %12526 = vmatprep.mubr.f32.mxu1 %v7461_v62 }
 0x6c1   :  { %12527 = vmatmul.mubr.f32.gmra.mrb[142].mxu1 %v7462_v26 }
 0x778   :  { %v12507_v42 = vpop.f32.mrb[128].mxu1 }
 0x779   :  { %v7529_v48 = vpop.f32.mrb[129].mxu1 }
 0x77c   :  { %v18742_v3 = vpop.f32.mrb[130].mxu1 }
 0x77d   :  { %v18744_v34 = vpop.f32.mrb[131].mxu1 }
 0x780   :  { %v18746_v51 = vpop.f32.mrb[132].mxu1 }
 0x781   :  { %v18748_v50 = vpop.f32.mrb[133].mxu1 }
 0x784   :  { %v18750_v1 = vpop.f32.mrb[134].mxu1 }
 0x785   :  { %v18752_v12 = vpop.f32.mrb[135].mxu1 }
 0x788   :  { %v18754_v29 = vpop.f32.mrb[136].mxu1 }
 0x789   :  { %v18756_v41 = vpop.f32.mrb[137].mxu1 }
 0x78c   :  { %v18758_v5 = vpop.f32.mrb[138].mxu1 }
 0x78d   :  { %v18760_v23 = vpop.f32.mrb[139].mxu1 }
 0x790   :  { %v18762_v58 = vpop.f32.mrb[140].mxu1 }
 0x791   :  { %v18764_v43 = vpop.f32.mrb[141].mxu1 }
 0x794   :  { %v18766_v16 = vpop.f32.mrb[142].mxu1 }
 0x795   :  { %v18768_v59 = vpop.f32.mrb[143].mxu1 }
 0x796   :  { %14892 = dma.done.wait [#allocation5 + $0x1], 16384 }
 0x797   :  { %14893 = vsyncadd [#allocation5 + $0x1], 4294950912  ;;  %v14894_v18 = vmov 0.0|0.0   ;;  %vm14895_vm1 = vmmov 0   ;;  %v14896_v11 = vmov 0.0   ;;  %v19984_v56 = vld [vmem:[#allocation218_spill] sm:$0xff] }
 0x798   :  { %14023 = vmatprep.subr.bf16.mxu1 %v14894_v18  ;;  %12561 = vmatprep.mubr.msk.f32.mxu1 %vm14895_vm1, %v14896_v11  ;;  %v19985_v7 = vld [vmem:[#allocation219_spill] sm:$0xff]  ;;  %v19986_v8 = vld [vmem:[#allocation220_spill] sm:$0xff]  ;;  %v19987_v32 = vld [vmem:[#allocation221_spill] sm:$0xff] }
 0x799   :  { %14025 = vmatpush3.bf16.msra.mxu1 %v19984_v56  ;;  %v19988_v37 = vld [vmem:[#allocation222_spill] sm:$0xff]  ;;  %v19989_v60 = vld [vmem:[#allocation223_spill] sm:$0xff]  ;;  %v19990_v35 = vld [vmem:[#allocation224_spill] sm:$0xff] }
 0x79a   :  { %14026 = vmatprep.subr.bf16.mxu1 %v14894_v18  ;;  %v19991_v15 = vld [vmem:[#allocation225_spill] sm:$0xff]  ;;  %v19992_v21 = vld [vmem:[#allocation210_spill] sm:$0xff]  ;;  %v19993_v4 = vld [vmem:[#allocation211_spill] sm:$0xff] }
 0x79b   :  { %v19994_v53 = vld [vmem:[#allocation212_spill] sm:$0xff]  ;;  %v19995_v27 = vld [vmem:[#allocation213_spill] sm:$0xff]  ;;  %v19996_v19 = vld [vmem:[#allocation214_spill] sm:$0xff] }
 0x79c   :  { %v19997_v33 = vld [vmem:[#allocation215_spill] sm:$0xff]  ;;  %v19998_v40 = vld [vmem:[#allocation216_spill] sm:$0xff]  ;;  %v19999_v39 = vld [vmem:[#allocation217_spill] sm:$0xff] }
 0x79d   :  { %14028 = vmatpush3.bf16.msra.mxu1 %v19985_v7  ;;  %v20000_v49 = vld [vmem:[#allocation226_spill] sm:$0xff]  ;;  %v20001_v63 = vld [vmem:[#allocation227_spill] sm:$0xff]  ;;  %v20002_v52 = vld [vmem:[#allocation228_spill] sm:$0xff] }
 0x79e   :  { %14029 = vmatprep.subr.bf16.mxu1 %v14894_v18  ;;  %v20003_v30 = vld [vmem:[#allocation229_spill] sm:$0xff]  ;;  %v20004_v57 = vld [vmem:[#allocation230_spill] sm:$0xff]  ;;  %v20005_v46 = vld [vmem:[#allocation231_spill] sm:$0xff] }
 0x79f   :  { %v20006_v22 = vld [vmem:[#allocation232_spill] sm:$0xff]  ;;  %v20007_v0 = vld [vmem:[#allocation233_spill] sm:$0xff]  ;;  %v20008_v2 = vld [vmem:[#allocation234_spill] sm:$0xff] }
 0x7a0   :  { %v20009_v44 = vld [vmem:[#allocation235_spill] sm:$0xff]  ;;  %v20010_v28 = vld [vmem:[#allocation236_spill] sm:$0xff]  ;;  %v20011_v25 = vld [vmem:[#allocation237_spill] sm:$0xff] }
 0x7a1   :  { %14031 = vmatpush3.bf16.msra.mxu1 %v19986_v8  ;;  %v20012_v14 = vld [vmem:[#allocation238_spill] sm:$0xff]  ;;  %v20013_v47 = vld [vmem:[#allocation239_spill] sm:$0xff]  ;;  %v20014_v54 = vld [vmem:[#allocation240_spill] sm:$0xff] }
 0x7a2   :  { %14032 = vmatprep.subr.bf16.mxu1 %v14894_v18  ;;  %v20015_v20 = vld [vmem:[#allocation241_spill] sm:$0xff]  ;;  %v20016_v61 = vld [vmem:[#allocation242_spill] sm:$0xff]  ;;  %v20017_v17 = vld [vmem:[#allocation243_spill] sm:$0xff] }
 0x7a3   :  { %v20018_v13 = vld [vmem:[#allocation244_spill] sm:$0xff]  ;;  %v20019_v10 = vld [vmem:[#allocation245_spill] sm:$0xff]  ;;  %v20020_v55 = vld [vmem:[#allocation246_spill] sm:$0xff] }
 0x7a4   :  { %v20021_v24 = vld [vmem:[#allocation247_spill] sm:$0xff]  ;;  %v20022_v9 = vld [vmem:[#allocation248_spill] sm:$0xff]  ;;  %v20023_v31 = vld [vmem:[#allocation249_spill] sm:$0xff] }
 0x7a5   :  { %14034 = vmatpush3.bf16.msra.mxu1 %v19987_v32  ;;  %v20024_v36 = vld [vmem:[#allocation250_spill] sm:$0xff]  ;;  %v20025_v6 = vld [vmem:[#allocation251_spill] sm:$0xff]  ;;  %v20026_v38 = vld [vmem:[#allocation252_spill] sm:$0xff] }
 0x7a6   :  { %14035 = vmatprep.subr.bf16.mxu1 %v14894_v18  ;;  %v20027_v45 = vld [vmem:[#allocation253_spill] sm:$0xff]  ;;  %v20028_v62 = vld [vmem:[#allocation254_spill] sm:$0xff]  ;;  %v20029_v26 = vld [vmem:[#allocation255_spill] sm:$0xff] }
 0x7a7   :  { %v20035_v56 = vld [vmem:[#allocation261_spill] sm:$0xff]  ;;  %v20037_v7 = vld [vmem:[#allocation263_spill] sm:$0xff]  ;;  %v20038_v8 = vld [vmem:[#allocation264_spill] sm:$0xff] }
 0x7a8   :  { %v20039_v32 = vld [vmem:[#allocation265_spill] sm:$0xff] }
 0x7a9   :  { %14037 = vmatpush3.bf16.msra.mxu1 %v19988_v37  ;;  %v20040_v37 = vld [vmem:[#allocation266_spill] sm:$0xff] }
 0x7aa   :  { %14038 = vmatprep.subr.bf16.mxu1 %v14894_v18 }
 0x7ad   :  { %14040 = vmatpush3.bf16.msra.mxu1 %v19989_v60  ;;  %v20041_v60 = vld [vmem:[#allocation267_spill] sm:$0xff] }
 0x7ae   :  { %14041 = vmatprep.subr.bf16.mxu1 %v14894_v18 }
 0x7b1   :  { %14043 = vmatpush3.bf16.msra.mxu1 %v19990_v35  ;;  %v20042_v35 = vld [vmem:[#allocation268_spill] sm:$0xff] }
 0x7b2   :  { %14044 = vmatprep.subr.bf16.mxu1 %v14894_v18 }
 0x7b5   :  { %14046 = vmatpush3.bf16.msra.mxu1 %v19991_v15  ;;  %v20043_v15 = vld [vmem:[#allocation269_spill] sm:$0xff] }
 0x7b6   :  { %14047 = vmatprep.subr.bf16.mxu1 %v14894_v18 }
 0x7b8   :  { %12562 = vmatmul.mubr.f32.vlgmr.msra.gmra.mrb[144].mxu1 %v12507_v42  ;;  %v20030_v42 = vld [vmem:[#allocation256_spill] sm:$0xff] }
 0x7b9   :  { %14049 = vmatpush3.bf16.msra.mxu1 %v19992_v21  ;;  %12596 = vmatprep.mubr.msk.f32.mxu1 %vm14895_vm1, %v14896_v11 }
 0x7ba   :  { %14050 = vmatprep.subr.bf16.mxu1 %v14894_v18 }
 0x7bd   :  { %14052 = vmatpush3.bf16.msra.mxu1 %v19993_v4 }
 0x7be   :  { %14053 = vmatprep.subr.bf16.mxu1 %v14894_v18 }
 0x7c1   :  { %14055 = vmatpush3.bf16.msra.mxu1 %v19994_v53  ;;  %v20045_v53 = vld [vmem:[#allocation271_spill] sm:$0xff] }
 0x7c2   :  { %14056 = vmatprep.subr.bf16.mxu1 %v14894_v18 }
 0x7c5   :  { %14058 = vmatpush3.bf16.msra.mxu1 %v19995_v27  ;;  %v20046_v27 = vld [vmem:[#allocation272_spill] sm:$0xff] }
 0x7c6   :  { %14059 = vmatprep.subr.bf16.mxu1 %v14894_v18 }
 0x7c9   :  { %14061 = vmatpush3.bf16.msra.mxu1 %v19996_v19  ;;  %v20047_v19 = vld [vmem:[#allocation273_spill] sm:$0xff] }
 0x7ca   :  { %14062 = vmatprep.subr.bf16.mxu1 %v14894_v18 }
 0x7cd   :  { %14064 = vmatpush3.bf16.msra.mxu1 %v19997_v33  ;;  %v20048_v33 = vld [vmem:[#allocation274_spill] sm:$0xff] }
 0x7ce   :  { %14065 = vmatprep.subr.bf16.mxu1 %v14894_v18 }
 0x7d1   :  { %14067 = vmatpush3.bf16.msra.mxu1 %v19998_v40  ;;  %v20049_v40 = vld [vmem:[#allocation275_spill] sm:$0xff] }
 0x7d2   :  { %14068 = vmatprep.subr.bf16.mxu1 %v14894_v18 }
 0x7d5   :  { %14070 = vmatpush3.bf16.msra.mxu1 %v19999_v39  ;;  %v20050_v39 = vld [vmem:[#allocation276_spill] sm:$0xff] }
 0x7d6   :  { %14071 = vmatprep.subr.bf16.mxu1 %v14894_v18 }
 0x7d8   :  { %12597 = vmatmul.mubr.f32.vlgmr.msra.gmra.mrb[146].mxu1 %v7529_v48  ;;  %v20031_v48 = vld [vmem:[#allocation257_spill] sm:$0xff] }
 0x7d9   :  { %14073 = vmatpush3.bf16.msra.mxu1 %v20000_v49  ;;  %12631 = vmatprep.mubr.msk.f32.mxu1 %vm14895_vm1, %v14896_v11  ;;  %v20051_v49 = vld [vmem:[#allocation277_spill] sm:$0xff] }
 0x7da   :  { %14074 = vmatprep.subr.bf16.mxu1 %v14894_v18 }
 0x7dd   :  { %14076 = vmatpush3.bf16.msra.mxu1 %v20001_v63 }
 0x7de   :  { %14077 = vmatprep.subr.bf16.mxu1 %v14894_v18 }
 0x7e1   :  { %14079 = vmatpush3.bf16.msra.mxu1 %v20002_v52 }
 0x7e2   :  { %14080 = vmatprep.subr.bf16.mxu1 %v14894_v18 }
 0x7e5   :  { %14082 = vmatpush3.bf16.msra.mxu1 %v20003_v30 }
 0x7e6   :  { %14083 = vmatprep.subr.bf16.mxu1 %v14894_v18 }
 0x7e9   :  { %14085 = vmatpush3.bf16.msra.mxu1 %v20004_v57  ;;  %v20053_v57 = vld [vmem:[#allocation279_spill] sm:$0xff] }
 0x7ea   :  { %14086 = vmatprep.subr.bf16.mxu1 %v14894_v18 }
 0x7ed   :  { %14088 = vmatpush3.bf16.msra.mxu1 %v20005_v46  ;;  %v20054_v46 = vld [vmem:[#allocation280_spill] sm:$0xff] }
 0x7ee   :  { %14089 = vmatprep.subr.bf16.mxu1 %v14894_v18 }
 0x7f1   :  { %14091 = vmatpush3.bf16.msra.mxu1 %v20006_v22  ;;  %v20055_v22 = vld [vmem:[#allocation281_spill] sm:$0xff] }
 0x7f2   :  { %14092 = vmatprep.subr.bf16.mxu1 %v14894_v18 }
 0x7f5   :  { %14094 = vmatpush3.bf16.msra.mxu1 %v20007_v0  ;;  %v20056_v0 = vld [vmem:[#allocation282_spill] sm:$0xff] }
 0x7f6   :  { %14095 = vmatprep.subr.bf16.mxu1 %v14894_v18 }
 0x7f8   :  { %12632 = vmatmul.mubr.f32.vlgmr.msra.gmra.mrb[148].mxu1 %v18744_v34  ;;  %v20033_v34 = vld [vmem:[#allocation259_spill] sm:$0xff] }
 0x7f9   :  { %14097 = vmatpush3.bf16.msra.mxu1 %v20008_v2  ;;  %12666 = vmatprep.mubr.msk.f32.mxu1 %vm14895_vm1, %v14896_v11  ;;  %v20057_v2 = vld [vmem:[#allocation283_spill] sm:$0xff] }
 0x7fa   :  { %14098 = vmatprep.subr.bf16.mxu1 %v14894_v18 }
 0x7fd   :  { %14100 = vmatpush3.bf16.msra.mxu1 %v20009_v44  ;;  %v20058_v44 = vld [vmem:[#allocation284_spill] sm:$0xff] }
 0x7fe   :  { %14101 = vmatprep.subr.bf16.mxu1 %v14894_v18 }
 0x801   :  { %14103 = vmatpush3.bf16.msra.mxu1 %v20010_v28  ;;  %v20059_v28 = vld [vmem:[#allocation285_spill] sm:$0xff] }
 0x802   :  { %14104 = vmatprep.subr.bf16.mxu1 %v14894_v18 }
 0x805   :  { %14106 = vmatpush3.bf16.msra.mxu1 %v20011_v25 }
 0x806   :  { %14107 = vmatprep.subr.bf16.mxu1 %v14894_v18 }
 0x809   :  { %14109 = vmatpush3.bf16.msra.mxu1 %v20012_v14 }
 0x80a   :  { %14110 = vmatprep.subr.bf16.mxu1 %v14894_v18 }
 0x80d   :  { %14112 = vmatpush3.bf16.msra.mxu1 %v20013_v47 }
 0x80e   :  { %14113 = vmatprep.subr.bf16.mxu1 %v14894_v18 }
 0x811   :  { %14115 = vmatpush3.bf16.msra.mxu1 %v20014_v54  ;;  %v20061_v54 = vld [vmem:[#allocation287_spill] sm:$0xff] }
 0x812   :  { %14116 = vmatprep.subr.bf16.mxu1 %v14894_v18 }
 0x815   :  { %14118 = vmatpush3.bf16.msra.mxu1 %v20015_v20  ;;  %v20062_v20 = vld [vmem:[#allocation288_spill] sm:$0xff] }
 0x816   :  { %14119 = vmatprep.subr.bf16.mxu1 %v14894_v18 }
 0x818   :  { %12667 = vmatmul.mubr.f32.vlgmr.msra.gmra.mrb[150].mxu1 %v18742_v3  ;;  %v20032_v3 = vld [vmem:[#allocation258_spill] sm:$0xff] }
 0x819   :  { %14121 = vmatpush3.bf16.msra.mxu1 %v20016_v61  ;;  %12701 = vmatprep.mubr.msk.f32.mxu1 %vm14895_vm1, %v14896_v11  ;;  %v20063_v61 = vld [vmem:[#allocation289_spill] sm:$0xff] }
 0x81a   :  { %14122 = vmatprep.subr.bf16.mxu1 %v14894_v18 }
 0x81d   :  { %14124 = vmatpush3.bf16.msra.mxu1 %v20017_v17  ;;  %v20064_v17 = vld [vmem:[#allocation290_spill] sm:$0xff] }
 0x81e   :  { %14125 = vmatprep.subr.bf16.mxu1 %v14894_v18 }
 0x821   :  { %14127 = vmatpush3.bf16.msra.mxu1 %v20018_v13  ;;  %v20065_v13 = vld [vmem:[#allocation291_spill] sm:$0xff] }
 0x822   :  { %14128 = vmatprep.subr.bf16.mxu1 %v14894_v18 }
 0x825   :  { %14130 = vmatpush3.bf16.msra.mxu1 %v20019_v10  ;;  %v20066_v10 = vld [vmem:[#allocation292_spill] sm:$0xff] }
 0x826   :  { %14131 = vmatprep.subr.bf16.mxu1 %v14894_v18 }
 0x829   :  { %14133 = vmatpush3.bf16.msra.mxu1 %v20020_v55  ;;  %v20067_v55 = vld [vmem:[#allocation293_spill] sm:$0xff] }
 0x82a   :  { %14134 = vmatprep.subr.bf16.mxu1 %v14894_v18 }
 0x82d   :  { %14136 = vmatpush3.bf16.msra.mxu1 %v20021_v24 }
 0x82e   :  { %14137 = vmatprep.subr.bf16.mxu1 %v14894_v18 }
 0x831   :  { %14139 = vmatpush3.bf16.msra.mxu1 %v20022_v9 }
 0x832   :  { %14140 = vmatprep.subr.bf16.mxu1 %v14894_v18 }
 0x835   :  { %14142 = vmatpush3.bf16.msra.mxu1 %v20023_v31 }
 0x836   :  { %14143 = vmatprep.subr.bf16.mxu1 %v14894_v18 }
 0x838   :  { %12702 = vmatmul.mubr.f32.vlgmr.msra.gmra.mrb[152].mxu1 %v18748_v50  ;;  %v20034_v50 = vld [vmem:[#allocation260_spill] sm:$0xff] }
 0x839   :  { %14145 = vmatpush3.bf16.msra.mxu1 %v20024_v36  ;;  %12736 = vmatprep.mubr.msk.f32.mxu1 %vm14895_vm1, %v14896_v11  ;;  %v20069_v36 = vld [vmem:[#allocation295_spill] sm:$0xff] }
 0x83a   :  { %14146 = vmatprep.subr.bf16.mxu1 %v14894_v18 }
 0x83d   :  { %14148 = vmatpush3.bf16.msra.mxu1 %v20025_v6  ;;  %v20070_v6 = vld [vmem:[#allocation296_spill] sm:$0xff] }
 0x83e   :  { %14149 = vmatprep.subr.bf16.mxu1 %v14894_v18 }
 0x841   :  { %14151 = vmatpush3.bf16.msra.mxu1 %v20026_v38  ;;  %v20071_v38 = vld [vmem:[#allocation297_spill] sm:$0xff] }
 0x842   :  { %14152 = vmatprep.subr.bf16.mxu1 %v14894_v18 }
 0x845   :  { %14154 = vmatpush3.bf16.msra.mxu1 %v20027_v45  ;;  %v20072_v45 = vld [vmem:[#allocation298_spill] sm:$0xff] }
 0x846   :  { %14155 = vmatprep.subr.bf16.mxu1 %v14894_v18 }
 0x849   :  { %14157 = vmatpush3.bf16.msra.mxu1 %v20028_v62  ;;  %v20073_v62 = vld [vmem:[#allocation299_spill] sm:$0xff] }
 0x84a   :  { %14158 = vmatprep.subr.bf16.mxu1 %v14894_v18 }
 0x84d   :  { %14160 = vmatpush3.bf16.msra.mxu1 %v20029_v26  ;;  %v20074_v26 = vld [vmem:[#allocation300_spill] sm:$0xff] }
 0x84e   :  { %14161 = vmatprep.subr.bf16.mxu1 %v14894_v18 }
 0x851   :  { %14163 = vmatpush3.bf16.msra.mxu1 %v20030_v42  ;;  %v20075_v42 = vld [vmem:[#allocation301_spill] sm:$0xff] }
 0x852   :  { %14164 = vmatprep.subr.bf16.mxu1 %v14894_v18 }
 0x855   :  { %14166 = vmatpush3.bf16.msra.mxu1 %v20031_v48 }
 0x856   :  { %14167 = vmatprep.subr.bf16.mxu1 %v14894_v18 }
 0x858   :  { %12737 = vmatmul.mubr.f32.vlgmr.msra.gmra.mrb[154].mxu1 %v18746_v51  ;;  %v20036_v51 = vld [vmem:[#allocation262_spill] sm:$0xff] }
 0x859   :  { %14169 = vmatpush3.bf16.msra.mxu1 %v20032_v3  ;;  %12771 = vmatprep.mubr.msk.f32.mxu1 %vm14895_vm1, %v14896_v11 }
 0x85a   :  { %14170 = vmatprep.subr.bf16.mxu1 %v14894_v18 }
 0x85d   :  { %14172 = vmatpush3.bf16.msra.mxu1 %v20033_v34 }
 0x85e   :  { %14173 = vmatprep.subr.bf16.mxu1 %v14894_v18 }
 0x861   :  { %14175 = vmatpush3.bf16.msra.mxu1 %v20034_v50  ;;  %v20077_v50 = vld [vmem:[#allocation303_spill] sm:$0xff] }
 0x862   :  { %14176 = vmatprep.subr.bf16.mxu1 %v14894_v18 }
 0x865   :  { %14178 = vmatpush3.bf16.msra.mxu1 %v20035_v56  ;;  %v20078_v56 = vld [vmem:[#allocation304_spill] sm:$0xff] }
 0x866   :  { %14179 = vmatprep.subr.bf16.mxu1 %v14894_v18 }
 0x869   :  { %14181 = vmatpush3.bf16.msra.mxu1 %v20036_v51  ;;  %v20079_v51 = vld [vmem:[#allocation305_spill] sm:$0xff] }
 0x86a   :  { %14182 = vmatprep.subr.bf16.mxu1 %v14894_v18 }
 0x86d   :  { %14184 = vmatpush3.bf16.msra.mxu1 %v20037_v7  ;;  %v20080_v7 = vld [vmem:[#allocation306_spill] sm:$0xff] }
 0x86e   :  { %14185 = vmatprep.subr.bf16.mxu1 %v14894_v18 }
 0x871   :  { %14187 = vmatpush3.bf16.msra.mxu1 %v20038_v8  ;;  %v20081_v8 = vld [vmem:[#allocation307_spill] sm:$0xff] }
 0x872   :  { %14188 = vmatprep.subr.bf16.mxu1 %v14894_v18 }
 0x875   :  { %14190 = vmatpush3.bf16.msra.mxu1 %v20039_v32  ;;  %v20082_v32 = vld [vmem:[#allocation308_spill] sm:$0xff] }
 0x876   :  { %14191 = vmatprep.subr.bf16.mxu1 %v14894_v18 }
 0x878   :  { %12772 = vmatmul.mubr.f32.vlgmr.msra.gmra.mrb[156].mxu1 %v18752_v12  ;;  %v20044_v12 = vld [vmem:[#allocation270_spill] sm:$0xff] }
 0x879   :  { %14193 = vmatpush3.bf16.msra.mxu1 %v20040_v37  ;;  %12806 = vmatprep.mubr.msk.f32.mxu1 %vm14895_vm1, %v14896_v11  ;;  %v20083_v37 = vld [vmem:[#allocation309_spill] sm:$0xff] }
 0x87a   :  { %14194 = vmatprep.subr.bf16.mxu1 %v14894_v18 }
 0x87d   :  { %14196 = vmatpush3.bf16.msra.mxu1 %v20041_v60 }
 0x87e   :  { %14197 = vmatprep.subr.bf16.mxu1 %v14894_v18 }
 0x881   :  { %14199 = vmatpush3.bf16.msra.mxu1 %v20042_v35 }
 0x882   :  { %14200 = vmatprep.subr.bf16.mxu1 %v14894_v18 }
 0x885   :  { %14202 = vmatpush3.bf16.msra.mxu1 %v20043_v15 }
 0x886   :  { %14203 = vmatprep.subr.bf16.mxu1 %v14894_v18 }
 0x889   :  { %14205 = vmatpush3.bf16.msra.mxu1 %v20044_v12  ;;  %v20085_v12 = vld [vmem:[#allocation311_spill] sm:$0xff] }
 0x88a   :  { %14206 = vmatprep.subr.bf16.mxu1 %v14894_v18 }
 0x88b   :  { %v7728_v21 = vpop.f32.mrb[144].mxu1 }
 0x88c   :  { %v12563_v4 = vpop.f32.mrb[145].mxu1 }
 0x88d   :  { %14208 = vmatpush3.bf16.msra.mxu1 %v20045_v53  ;;  %v20087_v4 = vld [vmem:[#allocation313_spill] sm:$0xff]  ;;  %v20088_v53 = vld [vmem:[#allocation314_spill] sm:$0xff] }
 0x88e   :  { %14209 = vmatprep.subr.bf16.mxu1 %v14894_v18 }
 0x891   :  { %14211 = vmatpush3.bf16.msra.mxu1 %v20046_v27  ;;  %v20089_v27 = vld [vmem:[#allocation315_spill] sm:$0xff] }
 0x892   :  { %14212 = vmatprep.subr.bf16.mxu1 %v14894_v18 }
 0x895   :  { %14214 = vmatpush3.bf16.msra.mxu1 %v20047_v19  ;;  %v20090_v19 = vld [vmem:[#allocation316_spill] sm:$0xff] }
 0x896   :  { %14215 = vmatprep.subr.bf16.mxu1 %v14894_v18 }
 0x898   :  { %12807 = vmatmul.mubr.f32.vlgmr.msra.gmra.mrb[158].mxu1 %v18750_v1  ;;  %v20052_v1 = vld [vmem:[#allocation278_spill] sm:$0xff] }
 0x899   :  { %14217 = vmatpush3.bf16.msra.mxu1 %v20048_v33  ;;  %12841 = vmatprep.mubr.msk.f32.mxu1 %vm14895_vm1, %v14896_v11  ;;  %v20091_v33 = vld [vmem:[#allocation317_spill] sm:$0xff] }
 0x89a   :  { %14218 = vmatprep.subr.bf16.mxu1 %v14894_v18 }
 0x89d   :  { %14220 = vmatpush3.bf16.msra.mxu1 %v20049_v40 }
 0x89e   :  { %14221 = vmatprep.subr.bf16.mxu1 %v14894_v18 }
 0x8a1   :  { %14223 = vmatpush3.bf16.msra.mxu1 %v20050_v39 }
 0x8a2   :  { %14224 = vmatprep.subr.bf16.mxu1 %v14894_v18 }
 0x8a5   :  { %14226 = vmatpush3.bf16.msra.mxu1 %v20051_v49 }
 0x8a6   :  { %14227 = vmatprep.subr.bf16.mxu1 %v14894_v18 }
 0x8a9   :  { %14229 = vmatpush3.bf16.msra.mxu1 %v20052_v1  ;;  %v20093_v1 = vld [vmem:[#allocation319_spill] sm:$0xff] }
 0x8aa   :  { %14230 = vmatprep.subr.bf16.mxu1 %v14894_v18 }
 0x8ab   :  { %v7798_v63 = vpop.f32.mrb[146].mxu1 }
 0x8ac   :  { %v7799_v52 = vadd.f32 %v7798_v63, %v7728_v21  ;;  %v12598_v30 = vpop.f32.mrb[147].mxu1  ;;  %v20086_v21 = vld [vmem:[#allocation312_spill] sm:$0xff] }
 0x8ad   :  { %14232 = vmatpush3.bf16.msra.mxu1 %v20053_v57  ;;  %v20094_v63 = vld [vmem:[#allocation320_spill] sm:$0xff]  ;;  %v20096_v30 = vld [vmem:[#allocation322_spill] sm:$0xff]  ;;  %v20097_v57 = vld [vmem:[#allocation323_spill] sm:$0xff] }
 0x8ae   :  { %14233 = vmatprep.subr.bf16.mxu1 %v14894_v18 }
 0x8b1   :  { %14235 = vmatpush3.bf16.msra.mxu1 %v20054_v46  ;;  %v20098_v46 = vld [vmem:[#allocation324_spill] sm:$0xff] }
 0x8b2   :  { %14236 = vmatprep.subr.bf16.mxu1 %v14894_v18 }
 0x8b5   :  { %14238 = vmatpush3.bf16.msra.mxu1 %v20055_v22  ;;  %v20099_v22 = vld [vmem:[#allocation325_spill] sm:$0xff] }
 0x8b6   :  { %14239 = vmatprep.subr.bf16.mxu1 %v14894_v18 }
 0x8b8   :  { %12842 = vmatmul.mubr.f32.vlgmr.msra.gmra.mrb[160].mxu1 %v18756_v41  ;;  %v20060_v41 = vld [vmem:[#allocation286_spill] sm:$0xff] }
 0x8b9   :  { %14241 = vmatpush3.bf16.msra.mxu1 %v20056_v0  ;;  %12876 = vmatprep.mubr.msk.f32.mxu1 %vm14895_vm1, %v14896_v11 }
 0x8ba   :  { %14242 = vmatprep.subr.bf16.mxu1 %v14894_v18 }
 0x8bd   :  { %14244 = vmatpush3.bf16.msra.mxu1 %v20057_v2 }
 0x8be   :  { %14245 = vmatprep.subr.bf16.mxu1 %v14894_v18 }
 0x8c1   :  { %14247 = vmatpush3.bf16.msra.mxu1 %v20058_v44 }
 0x8c2   :  { %14248 = vmatprep.subr.bf16.mxu1 %v14894_v18 }
 0x8c5   :  { %14250 = vmatpush3.bf16.msra.mxu1 %v20059_v28  ;;  %v20101_v28 = vld [vmem:[#allocation327_spill] sm:$0xff] }
 0x8c6   :  { %14251 = vmatprep.subr.bf16.mxu1 %v14894_v18 }
 0x8c9   :  { %14253 = vmatpush3.bf16.msra.mxu1 %v20060_v41  ;;  %v20102_v41 = vld [vmem:[#allocation328_spill] sm:$0xff] }
 0x8ca   :  { %14254 = vmatprep.subr.bf16.mxu1 %v14894_v18 }
 0x8cb   :  { %v7893_v25 = vpop.f32.mrb[148].mxu1 }
 0x8cc   :  { %v7897_v14 = vadd.f32 %v7893_v25, %v7799_v52  ;;  %v12633_v47 = vpop.f32.mrb[149].mxu1  ;;  %v20095_v52 = vld [vmem:[#allocation321_spill] sm:$0xff] }
 0x8cd   :  { %14256 = vmatpush3.bf16.msra.mxu1 %v20061_v54  ;;  %v20103_v25 = vld [vmem:[#allocation329_spill] sm:$0xff]  ;;  %v20105_v47 = vld [vmem:[#allocation331_spill] sm:$0xff]  ;;  %v20106_v54 = vld [vmem:[#allocation332_spill] sm:$0xff] }
 0x8ce   :  { %14257 = vmatprep.subr.bf16.mxu1 %v14894_v18 }
 0x8d1   :  { %14259 = vmatpush3.bf16.msra.mxu1 %v20062_v20  ;;  %v20107_v20 = vld [vmem:[#allocation333_spill] sm:$0xff] }
 0x8d2   :  { %14260 = vmatprep.subr.bf16.mxu1 %v14894_v18 }
 0x8d5   :  { %14262 = vmatpush3.bf16.msra.mxu1 %v20063_v61 }
 0x8d6   :  { %14263 = vmatprep.subr.bf16.mxu1 %v14894_v18 }
 0x8d8   :  { %12877 = vmatmul.mubr.f32.vlgmr.msra.gmra.mrb[162].mxu1 %v18754_v29  ;;  %v20068_v29 = vld [vmem:[#allocation294_spill] sm:$0xff] }
 0x8d9   :  { %14265 = vmatpush3.bf16.msra.mxu1 %v20064_v17  ;;  %12911 = vmatprep.mubr.msk.f32.mxu1 %vm14895_vm1, %v14896_v11 }
 0x8da   :  { %14266 = vmatprep.subr.bf16.mxu1 %v14894_v18 }
 0x8dd   :  { %14268 = vmatpush3.bf16.msra.mxu1 %v20065_v13 }
 0x8de   :  { %14269 = vmatprep.subr.bf16.mxu1 %v14894_v18 }
 0x8e1   :  { %14271 = vmatpush3.bf16.msra.mxu1 %v20066_v10  ;;  %v20109_v10 = vld [vmem:[#allocation335_spill] sm:$0xff] }
 0x8e2   :  { %14272 = vmatprep.subr.bf16.mxu1 %v14894_v18 }
 0x8e5   :  { %14274 = vmatpush3.bf16.msra.mxu1 %v20067_v55  ;;  %v20110_v55 = vld [vmem:[#allocation336_spill] sm:$0xff] }
 0x8e6   :  { %14275 = vmatprep.subr.bf16.mxu1 %v14894_v18 }
 0x8e9   :  { %14277 = vmatpush3.bf16.msra.mxu1 %v20068_v29  ;;  %v20111_v29 = vld [vmem:[#allocation337_spill] sm:$0xff] }
 0x8ea   :  { %14278 = vmatprep.subr.bf16.mxu1 %v14894_v18 }
 0x8eb   :  { %v7989_v24 = vpop.f32.mrb[150].mxu1 }
 0x8ec   :  { %v7993_v9 = vadd.f32 %v7989_v24, %v7897_v14  ;;  %v12668_v31 = vpop.f32.mrb[151].mxu1  ;;  %v20104_v14 = vld [vmem:[#allocation330_spill] sm:$0xff] }
 0x8ed   :  { %14280 = vmatpush3.bf16.msra.mxu1 %v20069_v36 }
 0x8ee   :  { %14281 = vmatprep.subr.bf16.mxu1 %v14894_v18 }
 0x8f1   :  { %14283 = vmatpush3.bf16.msra.mxu1 %v20070_v6 }
 0x8f2   :  { %14284 = vmatprep.subr.bf16.mxu1 %v14894_v18 }
 0x8f5   :  { %14286 = vmatpush3.bf16.msra.mxu1 %v20071_v38 }
 0x8f6   :  { %14287 = vmatprep.subr.bf16.mxu1 %v14894_v18 }
 0x8f8   :  { %12912 = vmatmul.mubr.f32.vlgmr.msra.gmra.mrb[164].mxu1 %v18760_v23  ;;  %v20076_v23 = vld [vmem:[#allocation302_spill] sm:$0xff] }
 0x8f9   :  { %14289 = vmatpush3.bf16.msra.mxu1 %v20072_v45  ;;  %12946 = vmatprep.mubr.msk.f32.mxu1 %vm14895_vm1, %v14896_v11  ;;  %v9155_v45 = vld [vmem:[%s19208_s8] sm:$0xff] }
 0x8fa   :  { %14290 = vmatprep.subr.bf16.mxu1 %v14894_v18 }
 0x8fd   :  { %14292 = vmatpush3.bf16.msra.mxu1 %v20073_v62  ;;  %v9156_v62 = vld [vmem:[%s19208_s8 + $0x8] sm:$0xff] }
 0x8fe   :  { %14293 = vmatprep.subr.bf16.mxu1 %v14894_v18 }
 0x901   :  { %14295 = vmatpush3.bf16.msra.mxu1 %v20074_v26  ;;  %v14408_v26 = vpack.c.bf16 %v9156_v62, %v9155_v45  ;;  %v9263_v45 = vld [vmem:[%s19210_s10 + $0x70] sm:$0xff]  ;;  %v9264_v62 = vld [vmem:[%s19210_s10 + $0x78] sm:$0xff] }
 0x902   :  { %14296 = vmatprep.subr.bf16.mxu1 %v14894_v18 }
 0x905   :  { %14298 = vmatpush3.bf16.msra.mxu1 %v20075_v42  ;;  %v9158_v42 = vld [vmem:[%s19208_s8 + $0x18] sm:$0xff] }
 0x906   :  { %14299 = vmatprep.subr.bf16.mxu1 %v14894_v18 }
 0x909   :  { %14301 = vmatpush3.bf16.msra.mxu1 %v20076_v23 }
 0x90a   :  { %14302 = vmatprep.subr.bf16.mxu1 %v14894_v18 }
 0x90b   :  { %v8085_v48 = vpop.f32.mrb[152].mxu1 }
 0x90c   :  { %v8089_v3 = vadd.f32 %v8085_v48, %v7993_v9  ;;  %v12703_v34 = vpop.f32.mrb[153].mxu1  ;;  %v9159_v48 = vld [vmem:[%s19208_s8 + $0x20] sm:$0xff] }
 0x90d   :  { %14304 = vmatpush3.bf16.msra.mxu1 %v20077_v50  ;;  %v9161_v50 = vld [vmem:[%s19208_s8 + $0x30] sm:$0xff] }
 0x90e   :  { %14305 = vmatprep.subr.bf16.mxu1 %v14894_v18 }
 0x911   :  { %14307 = vmatpush3.bf16.msra.mxu1 %v20078_v56  ;;  %v9162_v56 = vld [vmem:[%s19208_s8 + $0x38] sm:$0xff] }
 0x912   :  { %14308 = vmatprep.subr.bf16.mxu1 %v14894_v18 }
 0x915   :  { %14310 = vmatpush3.bf16.msra.mxu1 %v20079_v51  ;;  %v14417_v51 = vpack.c.bf16 %v9162_v56, %v9161_v50 }
 0x916   :  { %14311 = vmatprep.subr.bf16.mxu1 %v14894_v18 }
 0x918   :  { %12947 = vmatmul.mubr.f32.vlgmr.msra.gmra.mrb[166].mxu1 %v18758_v5  ;;  %v20084_v5 = vld [vmem:[#allocation310_spill] sm:$0xff] }
 0x919   :  { %14313 = vmatpush3.bf16.msra.mxu1 %v20080_v7  ;;  %12981 = vmatprep.mubr.msk.f32.mxu1 %vm14895_vm1, %v14896_v11  ;;  %v9163_v7 = vld [vmem:[%s19208_s8 + $0x40] sm:$0xff] }
 0x91a   :  { %14314 = vmatprep.subr.bf16.mxu1 %v14894_v18 }
 0x91d   :  { %14316 = vmatpush3.bf16.msra.mxu1 %v20081_v8  ;;  %v9164_v8 = vld [vmem:[%s19208_s8 + $0x48] sm:$0xff] }
 0x91e   :  { %14317 = vmatprep.subr.bf16.mxu1 %v14894_v18 }
 0x921   :  { %14319 = vmatpush3.bf16.msra.mxu1 %v20082_v32  ;;  %v14420_v32 = vpack.c.bf16 %v9164_v8, %v9163_v7 }
 0x922   :  { %14320 = vmatprep.subr.bf16.mxu1 %v14894_v18 }
 0x925   :  { %14322 = vmatpush3.bf16.msra.mxu1 %v20083_v37  ;;  %v9165_v37 = vld [vmem:[%s19208_s8 + $0x50] sm:$0xff] }
 0x926   :  { %14323 = vmatprep.subr.bf16.mxu1 %v14894_v18 }
 0x929   :  { %14325 = vmatpush3.bf16.msra.mxu1 %v20084_v5  ;;  %v9166_v5 = vld [vmem:[%s19208_s8 + $0x58] sm:$0xff] }
 0x92a   :  { %14326 = vmatprep.subr.bf16.mxu1 %v14894_v18 }
 0x92b   :  { %v8181_v60 = vpop.f32.mrb[154].mxu1 }
 0x92c   :  { %v8185_v35 = vadd.f32 %v8181_v60, %v8089_v3  ;;  %v12738_v15 = vpop.f32.mrb[155].mxu1  ;;  %v9160_v3 = vld [vmem:[%s19208_s8 + $0x28] sm:$0xff]  ;;  %v14423_v60 = vpack.c.bf16 %v9166_v5, %v9165_v37 }
 0x92d   :  { %14328 = vmatpush3.bf16.msra.mxu1 %v20085_v12  ;;  %v14414_v34 = vpack.c.bf16 %v9160_v3, %v9159_v48  ;;  %v9168_v15 = vld [vmem:[%s19208_s8 + $0x68] sm:$0xff] }
 0x92e   :  { %14329 = vmatprep.subr.bf16.mxu1 %v14894_v18 }
 0x931   :  { %14331 = vmatpush3.bf16.msra.mxu1 %v20086_v21 }
 0x932   :  { %14332 = vmatprep.subr.bf16.mxu1 %v14894_v18 }
 0x935   :  { %14334 = vmatpush3.bf16.msra.mxu1 %v20087_v4 }
 0x936   :  { %14335 = vmatprep.subr.bf16.mxu1 %v14894_v18 }
 0x938   :  { %12982 = vmatmul.mubr.f32.vlgmr.msra.gmra.mrb[168].mxu1 %v18764_v43  ;;  %v20092_v43 = vld [vmem:[#allocation318_spill] sm:$0xff] }
 0x939   :  { %14337 = vmatpush3.bf16.msra.mxu1 %v20088_v53  ;;  %13016 = vmatprep.mubr.msk.f32.mxu1 %vm14895_vm1, %v14896_v11 }
 0x93a   :  { %14338 = vmatprep.subr.bf16.mxu1 %v14894_v18 }
 0x93d   :  { %14340 = vmatpush3.bf16.msra.mxu1 %v20089_v27  ;;  %v9169_v27 = vld [vmem:[%s19208_s8 + $0x70] sm:$0xff] }
 0x93e   :  { %14341 = vmatprep.subr.bf16.mxu1 %v14894_v18 }
 0x941   :  { %14343 = vmatpush3.bf16.msra.mxu1 %v20090_v19  ;;  %v9170_v19 = vld [vmem:[%s19208_s8 + $0x78] sm:$0xff] }
 0x942   :  { %14344 = vmatprep.subr.bf16.mxu1 %v14894_v18 }
 0x945   :  { %14346 = vmatpush3.bf16.msra.mxu1 %v20091_v33  ;;  %v14429_v33 = vpack.c.bf16 %v9170_v19, %v9169_v27 }
 0x946   :  { %14347 = vmatprep.subr.bf16.mxu1 %v14894_v18 }
 0x949   :  { %14349 = vmatpush3.bf16.msra.mxu1 %v20092_v43 }
 0x94a   :  { %14350 = vmatprep.subr.bf16.mxu1 %v14894_v18 }
 0x94b   :  { %v8277_v40 = vpop.f32.mrb[156].mxu1 }
 0x94c   :  { %v8281_v39 = vadd.f32 %v8277_v40, %v8185_v35  ;;  %v12773_v49 = vpop.f32.mrb[157].mxu1  ;;  %v9167_v35 = vld [vmem:[%s19208_s8 + $0x60] sm:$0xff] }
 0x94d   :  { %14352 = vmatpush3.bf16.msra.mxu1 %v20093_v1  ;;  %v14426_v12 = vpack.c.bf16 %v9168_v15, %v9167_v35 }
 0x94e   :  { %14353 = vmatprep.subr.bf16.mxu1 %v14894_v18 }
 0x951   :  { %14355 = vmatpush3.bf16.msra.mxu1 %v20094_v63 }
 0x952   :  { %14356 = vmatprep.subr.bf16.mxu1 %v14894_v18 }
 0x955   :  { %14358 = vmatpush3.bf16.msra.mxu1 %v20095_v52 }
 0x956   :  { %14359 = vmatprep.subr.bf16.mxu1 %v14894_v18 }
 0x958   :  { %13017 = vmatmul.mubr.f32.vlgmr.msra.gmra.mrb[170].mxu1 %v18762_v58  ;;  %v20100_v58 = vld [vmem:[#allocation326_spill] sm:$0xff] }
 0x959   :  { %14361 = vmatpush3.bf16.msra.mxu1 %v20096_v30  ;;  %13051 = vmatprep.mubr.msk.f32.mxu1 %vm14895_vm1, %v14896_v11 }
 0x95a   :  { %14362 = vmatprep.subr.bf16.mxu1 %v14894_v18 }
 0x95d   :  { %14364 = vmatpush3.bf16.msra.mxu1 %v20097_v57 }
 0x95e   :  { %14365 = vmatprep.subr.bf16.mxu1 %v14894_v18 }
 0x961   :  { %14367 = vmatpush3.bf16.msra.mxu1 %v20098_v46 }
 0x962   :  { %14368 = vmatprep.subr.bf16.mxu1 %v14894_v18 }
 0x965   :  { %14370 = vmatpush3.bf16.msra.mxu1 %v20099_v22  ;;  %v9522_v22 = vld [vmem:[%s19207_s7] ss:$0 sm:$0xff] }
 0x966   :  { %14371 = vmatprep.subr.bf16.mxu1 %v14894_v18 }
 0x969   :  { %14373 = vmatpush3.bf16.msra.mxu1 %v20100_v58 }
 0x96a   :  { %14374 = vmatprep.subr.bf16.mxu1 %v14894_v18 }
 0x96b   :  { %v8373_v0 = vpop.f32.mrb[158].mxu1 }
 0x96c   :  { %v8377_v2 = vadd.f32 %v8373_v0, %v8281_v39  ;;  %v12808_v44 = vpop.f32.mrb[159].mxu1 }
 0x96d   :  { %14376 = vmatpush3.bf16.msra.mxu1 %v20101_v28  ;;  %v9250_v44 = vld [vmem:[%s19210_s10 + $0x8] sm:$0xff] }
 0x96e   :  { %14377 = vmatprep.subr.bf16.mxu1 %v14894_v18 }
 0x971   :  { %14379 = vmatpush3.bf16.msra.mxu1 %v20102_v41 }
 0x972   :  { %14380 = vmatprep.subr.bf16.mxu1 %v14894_v18 }
 0x975   :  { %14382 = vmatpush3.bf16.msra.mxu1 %v20103_v25 }
 0x976   :  { %14383 = vmatprep.subr.bf16.mxu1 %v14894_v18 }
 0x978   :  { %13052 = vmatmul.mubr.f32.vlgmr.msra.gmra.mrb[172].mxu1 %v18768_v59  ;;  %v20108_v59 = vld [vmem:[#allocation334_spill] sm:$0xff] }
 0x979   :  { %14385 = vmatpush3.bf16.msra.mxu1 %v20104_v14  ;;  %13086 = vmatprep.mubr.msk.f32.mxu1 %vm14895_vm1, %v14896_v11  ;;  %v9251_v14 = vld [vmem:[%s19210_s10 + $0x10] sm:$0xff] }
 0x97a   :  { %14386 = vmatprep.subr.bf16.mxu1 %v14894_v18 }
 0x97d   :  { %14388 = vmatpush3.bf16.msra.mxu1 %v20105_v47  ;;  %v9252_v47 = vld [vmem:[%s19210_s10 + $0x18] sm:$0xff] }
 0x97e   :  { %14389 = vmatprep.subr.bf16.mxu1 %v14894_v18 }
 0x981   :  { %14391 = vmatpush3.bf16.msra.mxu1 %v20106_v54  ;;  %v14435_v54 = vpack.c.bf16 %v9252_v47, %v9251_v14 }
 0x982   :  { %14392 = vmatprep.subr.bf16.mxu1 %v14894_v18 }
 0x985   :  { %14394 = vmatpush3.bf16.msra.mxu1 %v20107_v20  ;;  %v9253_v20 = vld [vmem:[%s19210_s10 + $0x20] sm:$0xff] }
 0x986   :  { %14395 = vmatprep.subr.bf16.mxu1 %v14894_v18 }
 0x989   :  { %14397 = vmatpush3.bf16.msra.mxu1 %v20108_v59  ;;  %v9254_v59 = vld [vmem:[%s19210_s10 + $0x28] sm:$0xff] }
 0x98a   :  { %14398 = vmatprep.subr.bf16.mxu1 %v14894_v18 }
 0x98b   :  { %v8469_v61 = vpop.f32.mrb[160].mxu1 }
 0x98c   :  { %v8473_v17 = vadd.f32 %v8469_v61, %v8377_v2  ;;  %v12843_v13 = vpop.f32.mrb[161].mxu1  ;;  %v9249_v2 = vld [vmem:[%s19210_s10] sm:$0xff]  ;;  %v14438_v61 = vpack.c.bf16 %v9254_v59, %v9253_v20 }
 0x98d   :  { %14400 = vmatpush3.bf16.msra.mxu1 %v20109_v10  ;;  %v14432_v41 = vpack.c.bf16 %v9250_v44, %v9249_v2  ;;  %v9257_v10 = vld [vmem:[%s19210_s10 + $0x40] sm:$0xff] }
 0x98e   :  { %14401 = vmatprep.subr.bf16.mxu1 %v14894_v18 }
 0x991   :  { %14403 = vmatpush3.bf16.msra.mxu1 %v20110_v55  ;;  %v9258_v55 = vld [vmem:[%s19210_s10 + $0x48] sm:$0xff] }
 0x992   :  { %14404 = vmatprep.subr.bf16.mxu1 %v14894_v18 }
 0x995   :  { %14406 = vmatpush3.bf16.msra.mxu1 %v20111_v29  ;;  %v14444_v29 = vpack.c.bf16 %v9258_v55, %v9257_v10 }
 0x996   :  { %14407 = vmatprep.subr.bf16.mxu1 %v14894_v18 }
 0x998   :  { %13087 = vmatmul.mubr.f32.vlgmr.msra.gmra.mrb[174].mxu1 %v18766_v16  ;;  %v9157_v16 = vld [vmem:[%s19208_s8 + $0x10] sm:$0xff] }
 0x999   :  { %13121 = vmatprep.mubr.msk.f32.mxu1 %vm14895_vm1, %v14896_v11  ;;  %14409 = vmatpush3.bf16.msra.mxu1 %v14408_v26  ;;  %v14411_v23 = vpack.c.bf16 %v9158_v42, %v9157_v16  ;;  %v14453_v16 = vpack.c.bf16 %v9264_v62, %v9263_v45  ;;  %v9523_v26 = vld [vmem:[%s19209_s9] ss:$0 sm:$0xff] }
 0x99a   :  { %14410 = vmatprep.subr.bf16.mxu1 %v14894_v18 }
 0x99d   :  { %14412 = vmatpush3.bf16.msra.mxu1 %v14411_v23 }
 0x99e   :  { %14413 = vmatprep.subr.bf16.mxu1 %v14894_v18 }
 0x9a1   :  { %14415 = vmatpush3.bf16.msra.mxu1 %v14414_v34 }
 0x9a2   :  { %14416 = vmatprep.subr.bf16.mxu1 %v14894_v18 }
 0x9a5   :  { %14418 = vmatpush3.bf16.msra.mxu1 %v14417_v51 }
 0x9a6   :  { %14419 = vmatprep.subr.bf16.mxu1 %v14894_v18 }
 0x9a9   :  { %14421 = vmatpush3.bf16.msra.mxu1 %v14420_v32 }
 0x9aa   :  { %14422 = vmatprep.subr.bf16.mxu1 %v14894_v18 }
 0x9ab   :  { %v8565_v24 = vpop.f32.mrb[162].mxu1 }
 0x9ac   :  { %v8569_v9 = vadd.f32 %v8565_v24, %v8473_v17  ;;  %v12878_v31 = vpop.f32.mrb[163].mxu1  ;;  %v9255_v17 = vld [vmem:[%s19210_s10 + $0x30] sm:$0xff] }
 0x9ad   :  { %14424 = vmatpush3.bf16.msra.mxu1 %v14423_v60  ;;  %v9259_v24 = vld [vmem:[%s19210_s10 + $0x50] sm:$0xff] }
 0x9ae   :  { %14425 = vmatprep.subr.bf16.mxu1 %v14894_v18 }
 0x9b1   :  { %14427 = vmatpush3.bf16.msra.mxu1 %v14426_v12 }
 0x9b2   :  { %14428 = vmatprep.subr.bf16.mxu1 %v14894_v18 }
 0x9b5   :  { %14430 = vmatpush3.bf16.msra.mxu1 %v14429_v33 }
 0x9b6   :  { %14431 = vmatprep.subr.bf16.mxu1 %v14894_v18 }
 0x9cb   :  { %v8661_v36 = vpop.f32.mrb[164].mxu1 }
 0x9cc   :  { %v8665_v6 = vadd.f32 %v8661_v36, %v8569_v9  ;;  %v12913_v38 = vpop.f32.mrb[165].mxu1  ;;  %v9260_v9 = vld [vmem:[%s19210_s10 + $0x58] sm:$0xff]  ;;  %v9261_v36 = vld [vmem:[%s19210_s10 + $0x60] sm:$0xff] }
 0x9cd   :  { %v14447_v31 = vpack.c.bf16 %v9260_v9, %v9259_v24 }
 0x9eb   :  { %v8757_v21 = vpop.f32.mrb[166].mxu1 }
 0x9ec   :  { %v8761_v4 = vadd.f32 %v8757_v21, %v8665_v6  ;;  %v12948_v53 = vpop.f32.mrb[167].mxu1  ;;  %v9262_v6 = vld [vmem:[%s19210_s10 + $0x68] sm:$0xff] }
 0x9ed   :  { %v14450_v38 = vpack.c.bf16 %v9262_v6, %v9261_v36 }
 0xa0b   :  { %v8853_v43 = vpop.f32.mrb[168].mxu1 }
 0xa0c   :  { %v8857_v40 = vadd.f32 %v8853_v43, %v8761_v4  ;;  %v12983_v39 = vpop.f32.mrb[169].mxu1 }
 0xa2b   :  { %v8949_v49 = vpop.f32.mrb[170].mxu1 }
 0xa2c   :  { %v8953_v1 = vadd.f32 %v8949_v49, %v8857_v40  ;;  %v13018_v63 = vpop.f32.mrb[171].mxu1 }
 0xa4b   :  { %v9045_v52 = vpop.f32.mrb[172].mxu1 }
 0xa4c   :  { %v9049_v30 = vadd.f32 %v9045_v52, %v8953_v1  ;;  %v13053_v57 = vpop.f32.mrb[173].mxu1 }
 0xa6b   :  { %v9141_v46 = vpop.f32.mrb[174].mxu1 }
 0xa6c   :  { %v9145_v58 = vadd.f32 %v9141_v46, %v9049_v30  ;;  %v13088_v0 = vpop.f32.mrb[175].mxu1 }
 0xa6e   :  { %v9153_v28 = vadd.f32 %v9522_v22, %v9145_v58 }
 0xa70   :  { %v9154_v25 = vmax.f32 %v9153_v28, 0.0 }
 0xa72   :  { %13122 = vmatmul.mubr.f32.vlgmr.msra.gmra.mrb[176].mxu1 %v9154_v25 }
 0xa73   :  { %14433 = vmatpush3.bf16.msra.mxu1 %v14432_v41  ;;  %13156 = vmatprep.mubr.msk.f32.mxu1 %vm14895_vm1, %v14896_v11  ;;  %v9256_v11 = vld [vmem:[%s19210_s10 + $0x38] sm:$0xff] }
 0xa74   :  { %14434 = vmatprep.subr.bf16.mxu1 %v14894_v18  ;;  %v14441_v13 = vpack.c.bf16 %v9256_v11, %v9255_v17 }
 0xa77   :  { %14436 = vmatpush3.bf16.msra.mxu1 %v14435_v54 }
 0xa78   :  { %14437 = vmatprep.subr.bf16.mxu1 %v14894_v18 }
 0xa7b   :  { %14439 = vmatpush3.bf16.msra.mxu1 %v14438_v61 }
 0xa7c   :  { %14440 = vmatprep.subr.bf16.mxu1 %v14894_v18 }
 0xa7f   :  { %14442 = vmatpush3.bf16.msra.mxu1 %v14441_v13 }
 0xa80   :  { %14443 = vmatprep.subr.bf16.mxu1 %v14894_v18 }
 0xa83   :  { %14445 = vmatpush3.bf16.msra.mxu1 %v14444_v29 }
 0xa84   :  { %14446 = vmatprep.subr.bf16.mxu1 %v14894_v18 }
 0xa87   :  { %14448 = vmatpush3.bf16.msra.mxu1 %v14447_v31 }
 0xa88   :  { %14449 = vmatprep.subr.bf16.mxu1 %v14894_v18 }
 0xa8b   :  { %14451 = vmatpush3.bf16.msra.mxu1 %v14450_v38 }
 0xa8c   :  { %14452 = vmatprep.subr.bf16.mxu1 %v14894_v18  ;;  %v9524_v18 = vld [vmem:[%s19211_s11] ss:$0 sm:$0xff] }
 0xa8f   :  { %14454 = vmatpush3.bf16.msra.mxu1 %v14453_v16 }
 0xb45   :  { %v9244_v42 = vpop.f32.mrb[176].mxu1 }
 0xb46   :  { %v9245_v23 = vadd.f32 %v9523_v26, %v9244_v42  ;;  %v13123_v48 = vpop.f32.mrb[177].mxu1 }
 0xb48   :  { %v9248_v3 = vmax.f32 %v9245_v23, 0.0 }
 0xb4a   :  { %13157 = vmatmul.mubr.f32.vlgmr.msra.gmra.mrb[178].mxu1 %v9248_v3 }
 0xc1d   :  { %v9338_v34 = vpop.f32.mrb[178].mxu1 }
 0xc1e   :  { %v9339_v50 = vadd.f32 %v9524_v18, %v9338_v34  ;;  %v13158_v56 = vpop.f32.mrb[179].mxu1 }
 0xc20   :  { %9342 = vst [vmem:[%s19212_s12] sm:$0xff] %v9339_v50 }
 0xc21   :  { %9347 = vsyncmov [#allocation5] }
 0xc24   :  { %s9348_s21 = vpop.sfrf %9347 }
 0xc25   :  { %p9525_p0 = scmp.ne.s32.totalorder %s9348_s21, 0 }
 0xc27   :  { %9352 = shalt.err (%p9525_p0)  }
 0xc28   :  { %9354 = vsyncmov [#allocation5 + $0x1] }
 0xc2b   :  { %s9355_s9 = vpop.sfrf %9354 }
 0xc2c   :  { %p9526_p1 = scmp.ne.s32.totalorder %s9355_s9, 0 }
 0xc2e   :  { %9359 = shalt.err (%p9526_p1)  }

</bundles_post_ra>
